<compile_context>
chip_gen: v7x
topology: tpu7x:2x2x1
jax: 0.10.0
libtpu: 0.0.40
codegen_flags: <defaults>
</compile_context>

<pallas_src>
import jax
import jax.numpy as jnp
from jax.experimental import pallas as pl
from jax.experimental.pallas import tpu as pltpu


# ---------------------------------------------------------------------------
# Fused forward (wrapper builds one pallas_call)
# ---------------------------------------------------------------------------
def cnn_forward(x_nchw, params):
    (cw1, cb1, s1, p1), (cw2, cb2, s2, p2), (lw1, lb1), (lw2, lb2) = params
    # TODO(synk): kernel specializes to stride=1 (the configuration this module uses).
    assert s1 == 1 and s2 == 1, "Pallas CNN kernel implements the stride=1 instantiation"

    N, C0, H1in, W1in = x_nchw.shape
    C1, _, K1, _ = cw1.shape
    C2, _, K2, _ = cw2.shape
    HID, F = lw1.shape
    OUT = lw2.shape[0]

    # Static shape plumbing (stride 1, 2x2/stride-2 pooling).
    H1 = H1in + 2 * p1 - K1 + 1
    W1 = W1in + 2 * p1 - K1 + 1
    Ho1, Wo1 = H1 // 2, W1 // 2
    H2 = Ho1 + 2 * p2 - K2 + 1
    W2 = Wo1 + 2 * p2 - K2 + 1
    Ho2, Wo2 = H2 // 2, W2 // 2
    assert H1 % 2 == 0 and W1 % 2 == 0 and H2 % 2 == 0 and W2 % 2 == 0
    assert F == Ho2 * Wo2 * C2

    # ---- trace-time (one-off) layout prep: input layout + weights only ----
    x_nhwc = jnp.transpose(x_nchw, (0, 2, 3, 1))                         # NCHW -> NHWC
    w1col = jnp.transpose(cw1, (2, 3, 1, 0)).reshape(K1 * K1 * C0, C1)    # im2col weights
    w2col = jnp.transpose(cw2, (2, 3, 1, 0)).reshape(K2 * K2 * C1, C2)
    # Fold PyTorch's NCHW flatten order (C,H,W) into lw1's rows so the kernel can
    # flatten the NHWC conv output directly.
    lw1p = jnp.transpose(
        jnp.transpose(lw1.reshape(HID, C2, Ho2, Wo2), (0, 2, 3, 1)).reshape(HID, F))
    lw2p = jnp.transpose(lw2)

    def conv_relu_pool(pad_ref, w_ref, b_ref, H, W, Cin, K, Cout):
        # im2col: build (N*H*W, K*K*Cin) patch matrix -> ONE MXU matmul.
        cols = []
        for kh in range(K):
            for kw in range(K):
                cols.append(
                    pad_ref[:, kh:kh + H, kw:kw + W, :].reshape(N * H * W, Cin))
        patches = jnp.concatenate(cols, axis=-1)              # (N*H*W, K*K*Cin)
        act = jnp.dot(patches, w_ref[...],
                      preferred_element_type=jnp.float32) + b_ref[...]
        act = jnp.maximum(act, 0.0)                            # bias + ReLU
        # Vectorized 2x2 / stride-2 max pool (rows ordered (n, h, w)).
        a5 = act.reshape(N * (H // 2), 2, W // 2, 2, Cout)
        a4 = jnp.maximum(a5[:, 0], a5[:, 1])                   # pool over H
        a3 = jnp.max(a4, axis=2)                               # pool over W
        return a3.reshape(N, H // 2, W // 2, Cout)             # (N, Ho, Wo, Cout)

    def kernel(x_ref, w1_ref, b1_ref, w2_ref, b2_ref,
               lw1_ref, lb1_ref, lw2_ref, lb2_ref,
               o_ref, pad1_ref, pad2_ref):
        # ---- conv block 1: in-kernel zero pad -> conv -> ReLU -> pool ----
        pad1_ref[...] = jnp.zeros(pad1_ref.shape, jnp.float32)
        pad1_ref[:, p1:p1 + H1in, p1:p1 + W1in, :] = x_ref[...]
        pooled1 = conv_relu_pool(pad1_ref, w1_ref, b1_ref, H1, W1, C0, K1, C1)

        # ---- conv block 2 ----
        pad2_ref[...] = jnp.zeros(pad2_ref.shape, jnp.float32)
        pad2_ref[:, p2:p2 + Ho1, p2:p2 + Wo1, :] = pooled1
        pooled2 = conv_relu_pool(pad2_ref, w2_ref, b2_ref, H2, W2, C1, K2, C2)

        # ---- flatten in NHWC order (lw1 rows pre-permuted to match) ----
        feats = jnp.concatenate(
            [pooled2[:, ho, wo, :] for ho in range(Ho2) for wo in range(Wo2)],
            axis=-1)                                           # (N, Ho2*Wo2*C2)

        # ---- Linear -> Linear -> softmax(dim=1) ----
        h = jnp.dot(feats, lw1_ref[...],
                    preferred_element_type=jnp.float32) + lb1_ref[...]
        logits = jnp.dot(h, lw2_ref[...],
                         preferred_element_type=jnp.float32) + lb2_ref[...]
        m = jnp.max(logits, axis=-1, keepdims=True)
        e = jnp.exp(logits - m)
        o_ref[...] = e / jnp.sum(e, axis=-1, keepdims=True)

    vmem = pl.BlockSpec(memory_space=pltpu.MemorySpace.VMEM)
    # Single invocation (no grid): the whole problem is ~40 KB, far below VMEM
    # limits on v5e/v6e/v7x; a grid would only add per-step overhead.
    # TODO(synk): for large batches, add a "parallel" batch grid axis so both
    # v7x TensorCores get work.
    return pl.pallas_call(
        kernel,
        out_shape=jax.ShapeDtypeStruct((N, OUT), jnp.float32),
        in_specs=[vmem] * 9,
        out_specs=vmem,
        scratch_shapes=[
            pltpu.VMEM((N, H1in + 2 * p1, W1in + 2 * p1, C0), jnp.float32),  # padded in1
            pltpu.VMEM((N, Ho1 + 2 * p2, Wo1 + 2 * p2, C1), jnp.float32),    # padded in2
        ],
    )(x_nhwc, w1col, cb1.reshape(1, C1), w2col, cb2.reshape(1, C2),
      lw1p, lb1.reshape(1, HID), lw2p, lb2.reshape(1, OUT))


# ---------------------------------------------------------------------------
# Deterministic parameter init (PyTorch-shaped tensors)
# ---------------------------------------------------------------------------
def init_params(key, conv1, conv2, linear):
    ks = jax.random.split(key, 8)
    cw1 = 0.10 * jax.random.normal(ks[0], (conv1[1], conv1[0], conv1[2], conv1[2]), jnp.float32)
    cb1 = 0.10 * jax.random.normal(ks[1], (conv1[1],), jnp.float32)
    cw2 = 0.10 * jax.random.normal(ks[2], (conv2[1], conv2[0], conv2[2], conv2[2]), jnp.float32)
    cb2 = 0.10 * jax.random.normal(ks[3], (conv2[1],), jnp.float32)
    lw1 = 0.05 * jax.random.normal(ks[4], (linear[1], linear[0]), jnp.float32)  # (out, in)
    lb1 = 0.05 * jax.random.normal(ks[5], (linear[1],), jnp.float32)
    lw2 = 0.05 * jax.random.normal(ks[6], (linear[2], linear[1]), jnp.float32)
    lb2 = 0.05 * jax.random.normal(ks[7], (linear[2],), jnp.float32)
    return ((cw1, cb1, conv1[3], conv1[4]),
            (cw2, cb2, conv2[3], conv2[4]),
            (lw1, lb1), (lw2, lb2))


# ---------------------------------------------------------------------------
# Pure-JAX reference (mirrors the PyTorch forward)
# ---------------------------------------------------------------------------
def reference_forward(x, params):
    (cw1, cb1, s1, p1), (cw2, cb2, s2, p2), (lw1, lb1), (lw2, lb2) = params
    hi = jax.lax.Precision.HIGHEST

    def conv(x, w, b, s, p):
        y = jax.lax.conv_general_dilated(
            x, w, (s, s), [(p, p), (p, p)],
            dimension_numbers=("NCHW", "OIHW", "NCHW"), precision=hi)
        return y + b[None, :, None, None]

    def pool(x):
        return jax.lax.reduce_window(x, -jnp.inf, jax.lax.max,
                                     (1, 1, 2, 2), (1, 1, 2, 2), "VALID")

    y = pool(jax.nn.relu(conv(x, cw1, cb1, s1, p1)))
    y = pool(jax.nn.relu(conv(y, cw2, cb2, s2, p2)))
    y = y.reshape(y.shape[0], -1)
    y = jnp.dot(y, lw1.T, precision=hi) + lb1
    y = jnp.dot(y, lw2.T, precision=hi) + lb2
    return jax.nn.softmax(y, axis=1)


if __name__ == "__main__":
    # CNN(conv1=(4,8,3,1,1), conv2=(8,16,3,1,1), linear=(256,32,10)), input 2x4x16x16.
    conv1 = (4, 8, 3, 1, 1)
    conv2 = (8, 16, 3, 1, 1)
    linear = (16 * 4 * 4, 32, 10)

    key = jax.random.PRNGKey(0)
    kx, kp = jax.random.split(key)
    x = jax.random.normal(kx, (2, 4, 16, 16), jnp.float32)   # NCHW
    params = init_params(kp, conv1, conv2, linear)

    out = cnn_forward(x, params)
    out = jax.block_until_ready(out)
    assert out.shape == (2, 10) and out.dtype == jnp.float32

    ref = reference_forward(x, params)
    if not bool(jnp.allclose(out, ref, atol=2e-3, rtol=0)):
        raise SystemExit("Pallas CNN output does not match JAX reference")

    print("KERNEL_OK")
</pallas_src>

<mosaic_0001>
module attributes {stable_mosaic.version = 11 : i64} {
  func.func @kernel(%arg0: memref<2x16x16x4xf32, #tpu.memory_space<vmem>>, %arg1: memref<36x8xf32, #tpu.memory_space<vmem>>, %arg2: memref<1x8xf32, #tpu.memory_space<vmem>>, %arg3: memref<72x16xf32, #tpu.memory_space<vmem>>, %arg4: memref<1x16xf32, #tpu.memory_space<vmem>>, %arg5: memref<256x32xf32, #tpu.memory_space<vmem>>, %arg6: memref<1x32xf32, #tpu.memory_space<vmem>>, %arg7: memref<32x10xf32, #tpu.memory_space<vmem>>, %arg8: memref<1x10xf32, #tpu.memory_space<vmem>>, %arg9: memref<2x10xf32, #tpu.memory_space<vmem>>, %arg10: memref<2x18x18x4xf32, #tpu.memory_space<vmem>>, %arg11: memref<2x10x10x8xf32, #tpu.memory_space<vmem>>) attributes {dimension_semantics = [], scalar_prefetch = 0 : i64, scratch_operands = 2 : i64, tpu.core_type = #tpu.core_type<tc>} {
    %cst = arith.constant 0.000000e+00 : f32
    %0 = vector.broadcast %cst : f32 to vector<2x18x18x4xf32>
    %c0 = arith.constant 0 : index
    %c0_0 = arith.constant 0 : index
    %c0_1 = arith.constant 0 : index
    %c0_2 = arith.constant 0 : index
    %1 = vector.load %arg10[%c0, %c0_0, %c0_1, %c0_2] : memref<2x18x18x4xf32, #tpu.memory_space<vmem>>, vector<2x18x18x4xf32>
    tpu.vector_store %arg10[%c0, %c0_0, %c0_1, %c0_2], %0 {strides = array<i32>} : memref<2x18x18x4xf32, #tpu.memory_space<vmem>>, vector<2x18x18x4xf32>,
    %c0_3 = arith.constant 0 : index
    %c0_4 = arith.constant 0 : index
    %c0_5 = arith.constant 0 : index
    %c0_6 = arith.constant 0 : index
    %2 = vector.load %arg0[%c0_3, %c0_4, %c0_5, %c0_6] : memref<2x16x16x4xf32, #tpu.memory_space<vmem>>, vector<2x16x16x4xf32>
    %c0_7 = arith.constant 0 : index
    %c1 = arith.constant 1 : index
    %c1_8 = arith.constant 1 : index
    %c0_9 = arith.constant 0 : index
    %3 = vector.load %arg10[%c0_7, %c1, %c1_8, %c0_9] : memref<2x18x18x4xf32, #tpu.memory_space<vmem>>, vector<2x16x16x4xf32>
    tpu.vector_store %arg10[%c0_7, %c1, %c1_8, %c0_9], %2 {strides = array<i32>} : memref<2x18x18x4xf32, #tpu.memory_space<vmem>>, vector<2x16x16x4xf32>,
    %c0_10 = arith.constant 0 : index
    %c0_11 = arith.constant 0 : index
    %c0_12 = arith.constant 0 : index
    %c0_13 = arith.constant 0 : index
    %4 = vector.load %arg10[%c0_10, %c0_11, %c0_12, %c0_13] : memref<2x18x18x4xf32, #tpu.memory_space<vmem>>, vector<2x16x16x4xf32>
    %5 = vector.shape_cast %4 : vector<2x16x16x4xf32> to vector<512x4xf32>
    %c0_14 = arith.constant 0 : index
    %c0_15 = arith.constant 0 : index
    %c1_16 = arith.constant 1 : index
    %c0_17 = arith.constant 0 : index
    %6 = vector.load %arg10[%c0_14, %c0_15, %c1_16, %c0_17] : memref<2x18x18x4xf32, #tpu.memory_space<vmem>>, vector<2x16x16x4xf32>
    %7 = vector.shape_cast %6 : vector<2x16x16x4xf32> to vector<512x4xf32>
    %c0_18 = arith.constant 0 : index
    %c0_19 = arith.constant 0 : index
    %c2 = arith.constant 2 : index
    %c0_20 = arith.constant 0 : index
    %8 = vector.load %arg10[%c0_18, %c0_19, %c2, %c0_20] : memref<2x18x18x4xf32, #tpu.memory_space<vmem>>, vector<2x16x16x4xf32>
    %9 = vector.shape_cast %8 : vector<2x16x16x4xf32> to vector<512x4xf32>
    %c0_21 = arith.constant 0 : index
    %c1_22 = arith.constant 1 : index
    %c0_23 = arith.constant 0 : index
    %c0_24 = arith.constant 0 : index
    %10 = vector.load %arg10[%c0_21, %c1_22, %c0_23, %c0_24] : memref<2x18x18x4xf32, #tpu.memory_space<vmem>>, vector<2x16x16x4xf32>
    %11 = vector.shape_cast %10 : vector<2x16x16x4xf32> to vector<512x4xf32>
    %c0_25 = arith.constant 0 : index
    %c1_26 = arith.constant 1 : index
    %c1_27 = arith.constant 1 : index
    %c0_28 = arith.constant 0 : index
    %12 = vector.load %arg10[%c0_25, %c1_26, %c1_27, %c0_28] : memref<2x18x18x4xf32, #tpu.memory_space<vmem>>, vector<2x16x16x4xf32>
    %13 = vector.shape_cast %12 : vector<2x16x16x4xf32> to vector<512x4xf32>
    %c0_29 = arith.constant 0 : index
    %c1_30 = arith.constant 1 : index
    %c2_31 = arith.constant 2 : index
    %c0_32 = arith.constant 0 : index
    %14 = vector.load %arg10[%c0_29, %c1_30, %c2_31, %c0_32] : memref<2x18x18x4xf32, #tpu.memory_space<vmem>>, vector<2x16x16x4xf32>
    %15 = vector.shape_cast %14 : vector<2x16x16x4xf32> to vector<512x4xf32>
    %c0_33 = arith.constant 0 : index
    %c2_34 = arith.constant 2 : index
    %c0_35 = arith.constant 0 : index
    %c0_36 = arith.constant 0 : index
    %16 = vector.load %arg10[%c0_33, %c2_34, %c0_35, %c0_36] : memref<2x18x18x4xf32, #tpu.memory_space<vmem>>, vector<2x16x16x4xf32>
    %17 = vector.shape_cast %16 : vector<2x16x16x4xf32> to vector<512x4xf32>
    %c0_37 = arith.constant 0 : index
    %c2_38 = arith.constant 2 : index
    %c1_39 = arith.constant 1 : index
    %c0_40 = arith.constant 0 : index
    %18 = vector.load %arg10[%c0_37, %c2_38, %c1_39, %c0_40] : memref<2x18x18x4xf32, #tpu.memory_space<vmem>>, vector<2x16x16x4xf32>
    %19 = vector.shape_cast %18 : vector<2x16x16x4xf32> to vector<512x4xf32>
    %c0_41 = arith.constant 0 : index
    %c2_42 = arith.constant 2 : index
    %c2_43 = arith.constant 2 : index
    %c0_44 = arith.constant 0 : index
    %20 = vector.load %arg10[%c0_41, %c2_42, %c2_43, %c0_44] : memref<2x18x18x4xf32, #tpu.memory_space<vmem>>, vector<2x16x16x4xf32>
    %21 = vector.shape_cast %20 : vector<2x16x16x4xf32> to vector<512x4xf32>
    %22 = tpu.concatenate %5, %7, %9, %11, %13, %15, %17, %19, %21 in 1 : vector<512x4xf32>, vector<512x4xf32>, vector<512x4xf32>, vector<512x4xf32>, vector<512x4xf32>, vector<512x4xf32>, vector<512x4xf32>, vector<512x4xf32>, vector<512x4xf32> -> vector<512x36xf32>
    %c0_45 = arith.constant 0 : index
    %c0_46 = arith.constant 0 : index
    %23 = vector.load %arg1[%c0_45, %c0_46] : memref<36x8xf32, #tpu.memory_space<vmem>>, vector<36x8xf32>
    %cst_47 = arith.constant dense<0.000000e+00> : vector<512x8xf32>
    %24 = tpu.matmul %22, %23, %cst_47 {dimension_numbers = #tpu.dot_dimension_numbers<[1], [0], [0], [1], [0, 0, 1, 1], [], []>} : vector<512x36xf32>, vector<36x8xf32>, vector<512x8xf32> -> vector<512x8xf32>
    %c0_48 = arith.constant 0 : index
    %c0_49 = arith.constant 0 : index
    %25 = vector.load %arg2[%c0_48, %c0_49] : memref<1x8xf32, #tpu.memory_space<vmem>>, vector<1x8xf32>
    %26 = vector.broadcast %25 : vector<1x8xf32> to vector<512x8xf32>
    %27 = arith.addf %24, %26 : vector<512x8xf32>
    %cst_50 = arith.constant 0.000000e+00 : f32
    %28 = vector.broadcast %cst_50 : f32 to vector<512x8xf32>
    %29 = arith.maximumf %27, %28 : vector<512x8xf32>
    %30 = vector.shape_cast %29 : vector<512x8xf32> to vector<16x2x8x2x8xf32>
    %31 = vector.extract_strided_slice %30 {offsets = [0, 0, 0, 0, 0], sizes = [16, 1, 8, 2, 8], strides = [1, 1, 1, 1, 1]} : vector<16x2x8x2x8xf32> to vector<16x1x8x2x8xf32>
    %32 = vector.shape_cast %31 : vector<16x1x8x2x8xf32> to vector<16x8x2x8xf32>
    %33 = vector.extract_strided_slice %30 {offsets = [0, 1, 0, 0, 0], sizes = [16, 1, 8, 2, 8], strides = [1, 1, 1, 1, 1]} : vector<16x2x8x2x8xf32> to vector<16x1x8x2x8xf32>
    %34 = vector.shape_cast %33 : vector<16x1x8x2x8xf32> to vector<16x8x2x8xf32>
    %35 = arith.maximumf %32, %34 : vector<16x8x2x8xf32>
    %cst_51 = arith.constant dense<0xFF800000> : vector<16x8x8xf32>
    %36 = vector.multi_reduction <maximumf>, %35, %cst_51 [2] : vector<16x8x2x8xf32> to vector<16x8x8xf32>
    %37 = vector.shape_cast %36 : vector<16x8x8xf32> to vector<2x8x8x8xf32>
    %cst_52 = arith.constant 0.000000e+00 : f32
    %38 = vector.broadcast %cst_52 : f32 to vector<2x10x10x8xf32>
    %c0_53 = arith.constant 0 : index
    %c0_54 = arith.constant 0 : index
    %c0_55 = arith.constant 0 : index
    %c0_56 = arith.constant 0 : index
    %39 = vector.load %arg11[%c0_53, %c0_54, %c0_55, %c0_56] : memref<2x10x10x8xf32, #tpu.memory_space<vmem>>, vector<2x10x10x8xf32>
    tpu.vector_store %arg11[%c0_53, %c0_54, %c0_55, %c0_56], %38 {strides = array<i32>} : memref<2x10x10x8xf32, #tpu.memory_space<vmem>>, vector<2x10x10x8xf32>,
    %c0_57 = arith.constant 0 : index
    %c1_58 = arith.constant 1 : index
    %c1_59 = arith.constant 1 : index
    %c0_60 = arith.constant 0 : index
    %40 = vector.load %arg11[%c0_57, %c1_58, %c1_59, %c0_60] : memref<2x10x10x8xf32, #tpu.memory_space<vmem>>, vector<2x8x8x8xf32>
    tpu.vector_store %arg11[%c0_57, %c1_58, %c1_59, %c0_60], %37 {strides = array<i32>} : memref<2x10x10x8xf32, #tpu.memory_space<vmem>>, vector<2x8x8x8xf32>,
    %c0_61 = arith.constant 0 : index
    %c0_62 = arith.constant 0 : index
    %c0_63 = arith.constant 0 : index
    %c0_64 = arith.constant 0 : index
    %41 = vector.load %arg11[%c0_61, %c0_62, %c0_63, %c0_64] : memref<2x10x10x8xf32, #tpu.memory_space<vmem>>, vector<2x8x8x8xf32>
    %42 = vector.shape_cast %41 : vector<2x8x8x8xf32> to vector<128x8xf32>
    %c0_65 = arith.constant 0 : index
    %c0_66 = arith.constant 0 : index
    %c1_67 = arith.constant 1 : index
    %c0_68 = arith.constant 0 : index
    %43 = vector.load %arg11[%c0_65, %c0_66, %c1_67, %c0_68] : memref<2x10x10x8xf32, #tpu.memory_space<vmem>>, vector<2x8x8x8xf32>
    %44 = vector.shape_cast %43 : vector<2x8x8x8xf32> to vector<128x8xf32>
    %c0_69 = arith.constant 0 : index
    %c0_70 = arith.constant 0 : index
    %c2_71 = arith.constant 2 : index
    %c0_72 = arith.constant 0 : index
    %45 = vector.load %arg11[%c0_69, %c0_70, %c2_71, %c0_72] : memref<2x10x10x8xf32, #tpu.memory_space<vmem>>, vector<2x8x8x8xf32>
    %46 = vector.shape_cast %45 : vector<2x8x8x8xf32> to vector<128x8xf32>
    %c0_73 = arith.constant 0 : index
    %c1_74 = arith.constant 1 : index
    %c0_75 = arith.constant 0 : index
    %c0_76 = arith.constant 0 : index
    %47 = vector.load %arg11[%c0_73, %c1_74, %c0_75, %c0_76] : memref<2x10x10x8xf32, #tpu.memory_space<vmem>>, vector<2x8x8x8xf32>
    %48 = vector.shape_cast %47 : vector<2x8x8x8xf32> to vector<128x8xf32>
    %c0_77 = arith.constant 0 : index
    %c1_78 = arith.constant 1 : index
    %c1_79 = arith.constant 1 : index
    %c0_80 = arith.constant 0 : index
    %49 = vector.load %arg11[%c0_77, %c1_78, %c1_79, %c0_80] : memref<2x10x10x8xf32, #tpu.memory_space<vmem>>, vector<2x8x8x8xf32>
    %50 = vector.shape_cast %49 : vector<2x8x8x8xf32> to vector<128x8xf32>
    %c0_81 = arith.constant 0 : index
    %c1_82 = arith.constant 1 : index
    %c2_83 = arith.constant 2 : index
    %c0_84 = arith.constant 0 : index
    %51 = vector.load %arg11[%c0_81, %c1_82, %c2_83, %c0_84] : memref<2x10x10x8xf32, #tpu.memory_space<vmem>>, vector<2x8x8x8xf32>
    %52 = vector.shape_cast %51 : vector<2x8x8x8xf32> to vector<128x8xf32>
    %c0_85 = arith.constant 0 : index
    %c2_86 = arith.constant 2 : index
    %c0_87 = arith.constant 0 : index
    %c0_88 = arith.constant 0 : index
    %53 = vector.load %arg11[%c0_85, %c2_86, %c0_87, %c0_88] : memref<2x10x10x8xf32, #tpu.memory_space<vmem>>, vector<2x8x8x8xf32>
    %54 = vector.shape_cast %53 : vector<2x8x8x8xf32> to vector<128x8xf32>
    %c0_89 = arith.constant 0 : index
    %c2_90 = arith.constant 2 : index
    %c1_91 = arith.constant 1 : index
    %c0_92 = arith.constant 0 : index
    %55 = vector.load %arg11[%c0_89, %c2_90, %c1_91, %c0_92] : memref<2x10x10x8xf32, #tpu.memory_space<vmem>>, vector<2x8x8x8xf32>
    %56 = vector.shape_cast %55 : vector<2x8x8x8xf32> to vector<128x8xf32>
    %c0_93 = arith.constant 0 : index
    %c2_94 = arith.constant 2 : index
    %c2_95 = arith.constant 2 : index
    %c0_96 = arith.constant 0 : index
    %57 = vector.load %arg11[%c0_93, %c2_94, %c2_95, %c0_96] : memref<2x10x10x8xf32, #tpu.memory_space<vmem>>, vector<2x8x8x8xf32>
    %58 = vector.shape_cast %57 : vector<2x8x8x8xf32> to vector<128x8xf32>
    %59 = tpu.concatenate %42, %44, %46, %48, %50, %52, %54, %56, %58 in 1 : vector<128x8xf32>, vector<128x8xf32>, vector<128x8xf32>, vector<128x8xf32>, vector<128x8xf32>, vector<128x8xf32>, vector<128x8xf32>, vector<128x8xf32>, vector<128x8xf32> -> vector<128x72xf32>
    %c0_97 = arith.constant 0 : index
    %c0_98 = arith.constant 0 : index
    %60 = vector.load %arg3[%c0_97, %c0_98] : memref<72x16xf32, #tpu.memory_space<vmem>>, vector<72x16xf32>
    %cst_99 = arith.constant dense<0.000000e+00> : vector<128x16xf32>
    %61 = tpu.matmul %59, %60, %cst_99 {dimension_numbers = #tpu.dot_dimension_numbers<[1], [0], [0], [1], [0, 0, 1, 1], [], []>} : vector<128x72xf32>, vector<72x16xf32>, vector<128x16xf32> -> vector<128x16xf32>
    %c0_100 = arith.constant 0 : index
    %c0_101 = arith.constant 0 : index
    %62 = vector.load %arg4[%c0_100, %c0_101] : memref<1x16xf32, #tpu.memory_space<vmem>>, vector<1x16xf32>
    %63 = vector.broadcast %62 : vector<1x16xf32> to vector<128x16xf32>
    %64 = arith.addf %61, %63 : vector<128x16xf32>
    %cst_102 = arith.constant 0.000000e+00 : f32
    %65 = vector.broadcast %cst_102 : f32 to vector<128x16xf32>
    %66 = arith.maximumf %64, %65 : vector<128x16xf32>
    %67 = vector.shape_cast %66 : vector<128x16xf32> to vector<8x2x4x2x16xf32>
    %68 = vector.extract_strided_slice %67 {offsets = [0, 0, 0, 0, 0], sizes = [8, 1, 4, 2, 16], strides = [1, 1, 1, 1, 1]} : vector<8x2x4x2x16xf32> to vector<8x1x4x2x16xf32>
    %69 = vector.shape_cast %68 : vector<8x1x4x2x16xf32> to vector<8x4x2x16xf32>
    %70 = vector.extract_strided_slice %67 {offsets = [0, 1, 0, 0, 0], sizes = [8, 1, 4, 2, 16], strides = [1, 1, 1, 1, 1]} : vector<8x2x4x2x16xf32> to vector<8x1x4x2x16xf32>
    %71 = vector.shape_cast %70 : vector<8x1x4x2x16xf32> to vector<8x4x2x16xf32>
    %72 = arith.maximumf %69, %71 : vector<8x4x2x16xf32>
    %cst_103 = arith.constant dense<0xFF800000> : vector<8x4x16xf32>
    %73 = vector.multi_reduction <maximumf>, %72, %cst_103 [2] : vector<8x4x2x16xf32> to vector<8x4x16xf32>
    %74 = vector.shape_cast %73 : vector<8x4x16xf32> to vector<2x4x4x16xf32>
    %75 = vector.extract_strided_slice %74 {offsets = [0, 0, 0, 0], sizes = [2, 1, 1, 16], strides = [1, 1, 1, 1]} : vector<2x4x4x16xf32> to vector<2x1x1x16xf32>
    %76 = vector.shape_cast %75 : vector<2x1x1x16xf32> to vector<2x16xf32>
    %77 = vector.extract_strided_slice %74 {offsets = [0, 0, 1, 0], sizes = [2, 1, 1, 16], strides = [1, 1, 1, 1]} : vector<2x4x4x16xf32> to vector<2x1x1x16xf32>
    %78 = vector.shape_cast %77 : vector<2x1x1x16xf32> to vector<2x16xf32>
    %79 = vector.extract_strided_slice %74 {offsets = [0, 0, 2, 0], sizes = [2, 1, 1, 16], strides = [1, 1, 1, 1]} : vector<2x4x4x16xf32> to vector<2x1x1x16xf32>
    %80 = vector.shape_cast %79 : vector<2x1x1x16xf32> to vector<2x16xf32>
    %81 = vector.extract_strided_slice %74 {offsets = [0, 0, 3, 0], sizes = [2, 1, 1, 16], strides = [1, 1, 1, 1]} : vector<2x4x4x16xf32> to vector<2x1x1x16xf32>
    %82 = vector.shape_cast %81 : vector<2x1x1x16xf32> to vector<2x16xf32>
    %83 = vector.extract_strided_slice %74 {offsets = [0, 1, 0, 0], sizes = [2, 1, 1, 16], strides = [1, 1, 1, 1]} : vector<2x4x4x16xf32> to vector<2x1x1x16xf32>
    %84 = vector.shape_cast %83 : vector<2x1x1x16xf32> to vector<2x16xf32>
    %85 = vector.extract_strided_slice %74 {offsets = [0, 1, 1, 0], sizes = [2, 1, 1, 16], strides = [1, 1, 1, 1]} : vector<2x4x4x16xf32> to vector<2x1x1x16xf32>
    %86 = vector.shape_cast %85 : vector<2x1x1x16xf32> to vector<2x16xf32>
    %87 = vector.extract_strided_slice %74 {offsets = [0, 1, 2, 0], sizes = [2, 1, 1, 16], strides = [1, 1, 1, 1]} : vector<2x4x4x16xf32> to vector<2x1x1x16xf32>
    %88 = vector.shape_cast %87 : vector<2x1x1x16xf32> to vector<2x16xf32>
    %89 = vector.extract_strided_slice %74 {offsets = [0, 1, 3, 0], sizes = [2, 1, 1, 16], strides = [1, 1, 1, 1]} : vector<2x4x4x16xf32> to vector<2x1x1x16xf32>
    %90 = vector.shape_cast %89 : vector<2x1x1x16xf32> to vector<2x16xf32>
    %91 = vector.extract_strided_slice %74 {offsets = [0, 2, 0, 0], sizes = [2, 1, 1, 16], strides = [1, 1, 1, 1]} : vector<2x4x4x16xf32> to vector<2x1x1x16xf32>
    %92 = vector.shape_cast %91 : vector<2x1x1x16xf32> to vector<2x16xf32>
    %93 = vector.extract_strided_slice %74 {offsets = [0, 2, 1, 0], sizes = [2, 1, 1, 16], strides = [1, 1, 1, 1]} : vector<2x4x4x16xf32> to vector<2x1x1x16xf32>
    %94 = vector.shape_cast %93 : vector<2x1x1x16xf32> to vector<2x16xf32>
    %95 = vector.extract_strided_slice %74 {offsets = [0, 2, 2, 0], sizes = [2, 1, 1, 16], strides = [1, 1, 1, 1]} : vector<2x4x4x16xf32> to vector<2x1x1x16xf32>
    %96 = vector.shape_cast %95 : vector<2x1x1x16xf32> to vector<2x16xf32>
    %97 = vector.extract_strided_slice %74 {offsets = [0, 2, 3, 0], sizes = [2, 1, 1, 16], strides = [1, 1, 1, 1]} : vector<2x4x4x16xf32> to vector<2x1x1x16xf32>
    %98 = vector.shape_cast %97 : vector<2x1x1x16xf32> to vector<2x16xf32>
    %99 = vector.extract_strided_slice %74 {offsets = [0, 3, 0, 0], sizes = [2, 1, 1, 16], strides = [1, 1, 1, 1]} : vector<2x4x4x16xf32> to vector<2x1x1x16xf32>
    %100 = vector.shape_cast %99 : vector<2x1x1x16xf32> to vector<2x16xf32>
    %101 = vector.extract_strided_slice %74 {offsets = [0, 3, 1, 0], sizes = [2, 1, 1, 16], strides = [1, 1, 1, 1]} : vector<2x4x4x16xf32> to vector<2x1x1x16xf32>
    %102 = vector.shape_cast %101 : vector<2x1x1x16xf32> to vector<2x16xf32>
    %103 = vector.extract_strided_slice %74 {offsets = [0, 3, 2, 0], sizes = [2, 1, 1, 16], strides = [1, 1, 1, 1]} : vector<2x4x4x16xf32> to vector<2x1x1x16xf32>
    %104 = vector.shape_cast %103 : vector<2x1x1x16xf32> to vector<2x16xf32>
    %105 = vector.extract_strided_slice %74 {offsets = [0, 3, 3, 0], sizes = [2, 1, 1, 16], strides = [1, 1, 1, 1]} : vector<2x4x4x16xf32> to vector<2x1x1x16xf32>
    %106 = vector.shape_cast %105 : vector<2x1x1x16xf32> to vector<2x16xf32>
    %107 = tpu.concatenate %76, %78, %80, %82, %84, %86, %88, %90, %92, %94, %96, %98, %100, %102, %104, %106 in 1 : vector<2x16xf32>, vector<2x16xf32>, vector<2x16xf32>, vector<2x16xf32>, vector<2x16xf32>, vector<2x16xf32>, vector<2x16xf32>, vector<2x16xf32>, vector<2x16xf32>, vector<2x16xf32>, vector<2x16xf32>, vector<2x16xf32>, vector<2x16xf32>, vector<2x16xf32>, vector<2x16xf32>, vector<2x16xf32> -> vector<2x256xf32>
    %c0_104 = arith.constant 0 : index
    %c0_105 = arith.constant 0 : index
    %108 = vector.load %arg5[%c0_104, %c0_105] : memref<256x32xf32, #tpu.memory_space<vmem>>, vector<256x32xf32>
    %cst_106 = arith.constant dense<0.000000e+00> : vector<2x32xf32>
    %109 = tpu.matmul %107, %108, %cst_106 {dimension_numbers = #tpu.dot_dimension_numbers<[1], [0], [0], [1], [0, 0, 1, 1], [], []>} : vector<2x256xf32>, vector<256x32xf32>, vector<2x32xf32> -> vector<2x32xf32>
    %c0_107 = arith.constant 0 : index
    %c0_108 = arith.constant 0 : index
    %110 = vector.load %arg6[%c0_107, %c0_108] : memref<1x32xf32, #tpu.memory_space<vmem>>, vector<1x32xf32>
    %111 = vector.broadcast %110 : vector<1x32xf32> to vector<2x32xf32>
    %112 = arith.addf %109, %111 : vector<2x32xf32>
    %c0_109 = arith.constant 0 : index
    %c0_110 = arith.constant 0 : index
    %113 = vector.load %arg7[%c0_109, %c0_110] : memref<32x10xf32, #tpu.memory_space<vmem>>, vector<32x10xf32>
    %cst_111 = arith.constant dense<0.000000e+00> : vector<2x10xf32>
    %114 = tpu.matmul %112, %113, %cst_111 {dimension_numbers = #tpu.dot_dimension_numbers<[1], [0], [0], [1], [0, 0, 1, 1], [], []>} : vector<2x32xf32>, vector<32x10xf32>, vector<2x10xf32> -> vector<2x10xf32>
    %c0_112 = arith.constant 0 : index
    %c0_113 = arith.constant 0 : index
    %115 = vector.load %arg8[%c0_112, %c0_113] : memref<1x10xf32, #tpu.memory_space<vmem>>, vector<1x10xf32>
    %116 = vector.broadcast %115 : vector<1x10xf32> to vector<2x10xf32>
    %117 = arith.addf %114, %116 : vector<2x10xf32>
    %cst_114 = arith.constant dense<0xFF800000> : vector<2xf32>
    %118 = vector.multi_reduction <maximumf>, %117, %cst_114 [1] : vector<2x10xf32> to vector<2xf32>
    %119 = vector.shape_cast %118 : vector<2xf32> to vector<2x1xf32>
    %120 = vector.broadcast %119 : vector<2x1xf32> to vector<2x10xf32>
    %121 = arith.subf %117, %120 : vector<2x10xf32>
    %122 = math.exp %121 : vector<2x10xf32>
    %cst_115 = arith.constant dense<0.000000e+00> : vector<2xf32>
    %123 = vector.multi_reduction <add>, %122, %cst_115 [1] : vector<2x10xf32> to vector<2xf32>
    %124 = vector.shape_cast %123 : vector<2xf32> to vector<2x1xf32>
    %125 = vector.broadcast %124 : vector<2x1xf32> to vector<2x10xf32>
    %126 = arith.divf %122, %125 : vector<2x10xf32>
    %c0_116 = arith.constant 0 : index
    %c0_117 = arith.constant 0 : index
    %127 = vector.load %arg9[%c0_116, %c0_117] : memref<2x10xf32, #tpu.memory_space<vmem>>, vector<2x10xf32>
    tpu.vector_store %arg9[%c0_116, %c0_117], %126 {strides = array<i32>} : memref<2x10xf32, #tpu.memory_space<vmem>>, vector<2x10xf32>,
    return
  }
}

</mosaic_0001>

<bundles_post_ra>
// kernel: tpu_custom_call.1
= control target key start
LH: loop header
LB: loop body
LE: loop exit
PB: predicated region body
PF: predicated region fallthrough
CT: control target
= control target key end

     0   :  { %vm33_vm0 = vcmask 31744   ;;  %vm36_vm1 = vcmask 25600   ;;  %v13928_v1 = vmov 0.0   ;;  %vm13924_vm2 = vcmask 64512   ;;  %s13911_s0 = inlined_call_operand.vmem [shape: f32[2,16,16,4], index: 0, kind: input, shape index: {}]   ;;  %s13912_s1 = inlined_call_operand.vmem [shape: f32[36,8], index: 1, kind: input, shape index: {}]   ;;  %s13913_s2 = inlined_call_operand.vmem [shape: f32[1,8], index: 2, kind: input, shape index: {}]   ;;  %s13914_s3 = inlined_call_operand.vmem [shape: f32[72,16], index: 3, kind: input, shape index: {}]   ;;  %s13915_s4 = inlined_call_operand.vmem [shape: f32[1,16], index: 4, kind: input, shape index: {}]   ;;  %s13916_s5 = inlined_call_operand.vmem [shape: f32[256,32], index: 5, kind: input, shape index: {}]   ;;  %s13917_s6 = inlined_call_operand.vmem [shape: f32[1,32], index: 6, kind: input, shape index: {}]   ;;  %s13918_s7 = inlined_call_operand.vmem [shape: f32[32,10], index: 7, kind: input, shape index: {}]   ;;  %s13919_s8 = inlined_call_operand.vmem [shape: f32[1,10], index: 8, kind: input, shape index: {}]   ;;  %s13920_s9 = inlined_call_operand.hbm [shape: f32[2,10], index: 9, kind: output, shape index: {}]  }
   0x1   :  { %v9400_v0 = vld [vmem:[%s13911_s0] sm:$0xff]  ;;  %34 = vst.msk [vmem:[#allocation2] sm:$0xff] %vm33_vm0, %v13928_v1  ;;  %35 = vst.msk [vmem:[#allocation2 + $0x8] sm:$0xff] %vm33_vm0, %v13928_v1  ;;  %v144_v2 = vld [vmem:[%s13911_s0 + $0x8] sm:$0xff] }
   0x2   :  { %38 = vst.msk [vmem:[#allocation2 + $0x18] sm:$0xff] %vm33_vm0, %v13928_v1  ;;  %39 = vst.msk [vmem:[#allocation2 + $0x20] sm:$0xff] %vm33_vm0, %v13928_v1  ;;  %v145_v3 = vld [vmem:[%s13911_s0 + $0x10] sm:$0xff]  ;;  %v146_v4 = vld [vmem:[%s13911_s0 + $0x18] sm:$0xff] }
   0x3   :  { %41 = vst.msk [vmem:[#allocation2 + $0x30] sm:$0xff] %vm33_vm0, %v13928_v1  ;;  %42 = vst.msk [vmem:[#allocation2 + $0x38] sm:$0xff] %vm33_vm0, %v13928_v1  ;;  %v147_v5 = vld [vmem:[%s13911_s0 + $0x20] sm:$0xff]  ;;  %v148_v6 = vld [vmem:[%s13911_s0 + $0x28] sm:$0xff] }
   0x4   :  { %44 = vst.msk [vmem:[#allocation2 + $0x48] sm:$0xff] %vm33_vm0, %v13928_v1  ;;  %45 = vst.msk [vmem:[#allocation2 + $0x50] sm:$0xff] %vm33_vm0, %v13928_v1  ;;  %v149_v7 = vld [vmem:[%s13911_s0 + $0x30] sm:$0xff]  ;;  %v150_v8 = vld [vmem:[%s13911_s0 + $0x38] sm:$0xff] }
   0x5   :  { %47 = vst.msk [vmem:[#allocation2 + $0x60] sm:$0xff] %vm33_vm0, %v13928_v1  ;;  %48 = vst.msk [vmem:[#allocation2 + $0x68] sm:$0xff] %vm33_vm0, %v13928_v1  ;;  %v151_v9 = vld [vmem:[%s13911_s0 + $0x40] sm:$0xff]  ;;  %v152_v10 = vld [vmem:[%s13911_s0 + $0x48] sm:$0xff] }
   0x6   :  { %50 = vst.msk [vmem:[#allocation2 + $0x78] sm:$0xff] %vm33_vm0, %v13928_v1  ;;  %51 = vst.msk [vmem:[#allocation2 + $0x80] sm:$0xff] %vm33_vm0, %v13928_v1 }
   0x7   :  { %53 = vst.msk [vmem:[#allocation2 + $0x90] sm:$0xff] %vm33_vm0, %v13928_v1  ;;  %54 = vst.msk [vmem:[#allocation2 + $0x98] sm:$0xff] %vm33_vm0, %v13928_v1 }
   0x8   :  { %56 = vst.msk [vmem:[#allocation2 + $0xa8] sm:$0xff] %vm33_vm0, %v13928_v1  ;;  %57 = vst.msk [vmem:[#allocation2 + $0xb0] sm:$0xff] %vm33_vm0, %v13928_v1 }
   0x9   :  { %59 = vst.msk [vmem:[#allocation2 + $0xc0] sm:$0xff] %vm33_vm0, %v13928_v1  ;;  %60 = vst.msk [vmem:[#allocation2 + $0xc8] sm:$0xff] %vm33_vm0, %v13928_v1 }
   0xa   :  { %62 = vst.msk [vmem:[#allocation2 + $0xd8] sm:$0xff] %vm33_vm0, %v13928_v1  ;;  %63 = vst.msk [vmem:[#allocation2 + $0xe0] sm:$0xff] %vm33_vm0, %v13928_v1 }
   0xb   :  { %65 = vst.msk [vmem:[#allocation2 + $0xf0] sm:$0xff] %vm33_vm0, %v13928_v1  ;;  %66 = vst.msk [vmem:[#allocation2 + $0xf8] sm:$0xff] %vm33_vm0, %v13928_v1 }
   0xc   :  { %68 = vst.msk [vmem:[#allocation2 + $0x108] sm:$0xff] %vm33_vm0, %v13928_v1  ;;  %69 = vst.msk [vmem:[#allocation2 + $0x110] sm:$0xff] %vm33_vm0, %v13928_v1 }
   0xd   :  { %71 = vst.msk [vmem:[#allocation2 + $0x120] sm:$0xff] %vm33_vm0, %v13928_v1  ;;  %72 = vst.msk [vmem:[#allocation2 + $0x128] sm:$0xff] %vm33_vm0, %v13928_v1 }
   0xe   :  { %74 = vst.msk [vmem:[#allocation2 + $0x138] sm:$0xff] %vm33_vm0, %v13928_v1  ;;  %75 = vst.msk [vmem:[#allocation2 + $0x140] sm:$0xff] %vm33_vm0, %v13928_v1 }
   0xf   :  { %77 = vst.msk [vmem:[#allocation2 + $0x150] sm:$0xff] %vm33_vm0, %v13928_v1  ;;  %78 = vst.msk [vmem:[#allocation2 + $0x158] sm:$0xff] %vm33_vm0, %v13928_v1 }
  0x10   :  { %80 = vst.msk [vmem:[#allocation2 + $0x168] sm:$0xff] %vm33_vm0, %v13928_v1  ;;  %81 = vst.msk [vmem:[#allocation2 + $0x170] sm:$0xff] %vm33_vm0, %v13928_v1 }
  0x11   :  { %83 = vst.msk [vmem:[#allocation2 + $0x180] sm:$0xff] %vm33_vm0, %v13928_v1  ;;  %84 = vst.msk [vmem:[#allocation2 + $0x188] sm:$0xff] %vm33_vm0, %v13928_v1 }
  0x12   :  { %86 = vst.msk [vmem:[#allocation2 + $0x198] sm:$0xff] %vm33_vm0, %v13928_v1  ;;  %87 = vst.msk [vmem:[#allocation2 + $0x1a0] sm:$0xff] %vm33_vm0, %v13928_v1 }
  0x13   :  { %89 = vst.msk [vmem:[#allocation2 + $0x1b0] sm:$0xff] %vm33_vm0, %v13928_v1  ;;  %90 = vst.msk [vmem:[#allocation2 + $0x1b8] sm:$0xff] %vm33_vm0, %v13928_v1 }
  0x14   :  { %92 = vst.msk [vmem:[#allocation2 + $0x1c8] sm:$0xff] %vm33_vm0, %v13928_v1  ;;  %93 = vst.msk [vmem:[#allocation2 + $0x1d0] sm:$0xff] %vm33_vm0, %v13928_v1 }
  0x15   :  { %95 = vst.msk [vmem:[#allocation2 + $0x1e0] sm:$0xff] %vm33_vm0, %v13928_v1  ;;  %96 = vst.msk [vmem:[#allocation2 + $0x1e8] sm:$0xff] %vm33_vm0, %v13928_v1 }
  0x16   :  { %98 = vst.msk [vmem:[#allocation2 + $0x1f8] sm:$0xff] %vm33_vm0, %v13928_v1  ;;  %99 = vst.msk [vmem:[#allocation2 + $0x200] sm:$0xff] %vm33_vm0, %v13928_v1 }
  0x17   :  { %101 = vst.msk [vmem:[#allocation2 + $0x210] sm:$0xff] %vm33_vm0, %v13928_v1  ;;  %102 = vst.msk [vmem:[#allocation2 + $0x218] sm:$0xff] %vm33_vm0, %v13928_v1 }
  0x18   :  { %104 = vst.msk [vmem:[#allocation2 + $0x228] sm:$0xff] %vm33_vm0, %v13928_v1  ;;  %105 = vst.msk [vmem:[#allocation2 + $0x230] sm:$0xff] %vm33_vm0, %v13928_v1 }
  0x19   :  { %107 = vst.msk [vmem:[#allocation2 + $0x240] sm:$0xff] %vm33_vm0, %v13928_v1  ;;  %108 = vst.msk [vmem:[#allocation2 + $0x248] sm:$0xff] %vm33_vm0, %v13928_v1 }
  0x1a   :  { %110 = vst.msk [vmem:[#allocation2 + $0x258] sm:$0xff] %vm33_vm0, %v13928_v1  ;;  %111 = vst.msk [vmem:[#allocation2 + $0x260] sm:$0xff] %vm33_vm0, %v13928_v1 }
  0x1b   :  { %113 = vst.msk [vmem:[#allocation2 + $0x270] sm:$0xff] %vm33_vm0, %v13928_v1  ;;  %114 = vst.msk [vmem:[#allocation2 + $0x278] sm:$0xff] %vm33_vm0, %v13928_v1 }
  0x1c   :  { %116 = vst.msk [vmem:[#allocation2 + $0x288] sm:$0xff] %vm33_vm0, %v13928_v1  ;;  %117 = vst.msk [vmem:[#allocation2 + $0x290] sm:$0xff] %vm33_vm0, %v13928_v1 }
  0x1d   :  { %119 = vst.msk [vmem:[#allocation2 + $0x2a0] sm:$0xff] %vm33_vm0, %v13928_v1  ;;  %120 = vst.msk [vmem:[#allocation2 + $0x2a8] sm:$0xff] %vm33_vm0, %v13928_v1 }
  0x1e   :  { %122 = vst.msk [vmem:[#allocation2 + $0x2b8] sm:$0xff] %vm33_vm0, %v13928_v1  ;;  %123 = vst.msk [vmem:[#allocation2 + $0x2c0] sm:$0xff] %vm33_vm0, %v13928_v1 }
  0x1f   :  { %125 = vst.msk [vmem:[#allocation2 + $0x2d0] sm:$0xff] %vm33_vm0, %v13928_v1  ;;  %126 = vst.msk [vmem:[#allocation2 + $0x2d8] sm:$0xff] %vm33_vm0, %v13928_v1 }
  0x20   :  { %128 = vst.msk [vmem:[#allocation2 + $0x2e8] sm:$0xff] %vm33_vm0, %v13928_v1  ;;  %129 = vst.msk [vmem:[#allocation2 + $0x2f0] sm:$0xff] %vm33_vm0, %v13928_v1 }
  0x21   :  { %131 = vst.msk [vmem:[#allocation2 + $0x300] sm:$0xff] %vm33_vm0, %v13928_v1  ;;  %132 = vst.msk [vmem:[#allocation2 + $0x308] sm:$0xff] %vm33_vm0, %v13928_v1 }
  0x22   :  { %134 = vst.msk [vmem:[#allocation2 + $0x318] sm:$0xff] %vm33_vm0, %v13928_v1  ;;  %135 = vst.msk [vmem:[#allocation2 + $0x320] sm:$0xff] %vm33_vm0, %v13928_v1 }
  0x23   :  { %137 = vst.msk [vmem:[#allocation2 + $0x330] sm:$0xff] %vm33_vm0, %v13928_v1  ;;  %138 = vst.msk [vmem:[#allocation2 + $0x338] sm:$0xff] %vm33_vm0, %v13928_v1 }
  0x24   :  { %140 = vst.msk [vmem:[#allocation2 + $0x348] sm:$0xff] %vm33_vm0, %v13928_v1  ;;  %141 = vst.msk [vmem:[#allocation2 + $0x350] sm:$0xff] %vm33_vm0, %v13928_v1 }
  0x25   :  { %37 = vst.msk [vmem:[#allocation2 + $0x10] sm:$0x3] %vm36_vm1, %v13928_v1  ;;  %40 = vst.msk [vmem:[#allocation2 + $0x28] sm:$0x3] %vm36_vm1, %v13928_v1 }
  0x26   :  { %43 = vst.msk [vmem:[#allocation2 + $0x40] sm:$0x3] %vm36_vm1, %v13928_v1  ;;  %46 = vst.msk [vmem:[#allocation2 + $0x58] sm:$0x3] %vm36_vm1, %v13928_v1 }
  0x27   :  { %49 = vst.msk [vmem:[#allocation2 + $0x70] sm:$0x3] %vm36_vm1, %v13928_v1  ;;  %52 = vst.msk [vmem:[#allocation2 + $0x88] sm:$0x3] %vm36_vm1, %v13928_v1 }
  0x28   :  { %55 = vst.msk [vmem:[#allocation2 + $0xa0] sm:$0x3] %vm36_vm1, %v13928_v1  ;;  %58 = vst.msk [vmem:[#allocation2 + $0xb8] sm:$0x3] %vm36_vm1, %v13928_v1 }
  0x29   :  { %61 = vst.msk [vmem:[#allocation2 + $0xd0] sm:$0x3] %vm36_vm1, %v13928_v1  ;;  %64 = vst.msk [vmem:[#allocation2 + $0xe8] sm:$0x3] %vm36_vm1, %v13928_v1 }
  0x2a   :  { %67 = vst.msk [vmem:[#allocation2 + $0x100] sm:$0x3] %vm36_vm1, %v13928_v1  ;;  %70 = vst.msk [vmem:[#allocation2 + $0x118] sm:$0x3] %vm36_vm1, %v13928_v1 }
  0x2b   :  { %73 = vst.msk [vmem:[#allocation2 + $0x130] sm:$0x3] %vm36_vm1, %v13928_v1  ;;  %76 = vst.msk [vmem:[#allocation2 + $0x148] sm:$0x3] %vm36_vm1, %v13928_v1 }
  0x2c   :  { %79 = vst.msk [vmem:[#allocation2 + $0x160] sm:$0x3] %vm36_vm1, %v13928_v1  ;;  %82 = vst.msk [vmem:[#allocation2 + $0x178] sm:$0x3] %vm36_vm1, %v13928_v1 }
  0x2d   :  { %85 = vst.msk [vmem:[#allocation2 + $0x190] sm:$0x3] %vm36_vm1, %v13928_v1  ;;  %88 = vst.msk [vmem:[#allocation2 + $0x1a8] sm:$0x3] %vm36_vm1, %v13928_v1 }
  0x2e   :  { %91 = vst.msk [vmem:[#allocation2 + $0x1c0] sm:$0x3] %vm36_vm1, %v13928_v1  ;;  %94 = vst.msk [vmem:[#allocation2 + $0x1d8] sm:$0x3] %vm36_vm1, %v13928_v1 }
  0x2f   :  { %97 = vst.msk [vmem:[#allocation2 + $0x1f0] sm:$0x3] %vm36_vm1, %v13928_v1  ;;  %100 = vst.msk [vmem:[#allocation2 + $0x208] sm:$0x3] %vm36_vm1, %v13928_v1 }
  0x30   :  { %103 = vst.msk [vmem:[#allocation2 + $0x220] sm:$0x3] %vm36_vm1, %v13928_v1  ;;  %106 = vst.msk [vmem:[#allocation2 + $0x238] sm:$0x3] %vm36_vm1, %v13928_v1 }
  0x31   :  { %109 = vst.msk [vmem:[#allocation2 + $0x250] sm:$0x3] %vm36_vm1, %v13928_v1  ;;  %112 = vst.msk [vmem:[#allocation2 + $0x268] sm:$0x3] %vm36_vm1, %v13928_v1 }
  0x32   :  { %115 = vst.msk [vmem:[#allocation2 + $0x280] sm:$0x3] %vm36_vm1, %v13928_v1  ;;  %118 = vst.msk [vmem:[#allocation2 + $0x298] sm:$0x3] %vm36_vm1, %v13928_v1 }
  0x33   :  { %121 = vst.msk [vmem:[#allocation2 + $0x2b0] sm:$0x3] %vm36_vm1, %v13928_v1  ;;  %124 = vst.msk [vmem:[#allocation2 + $0x2c8] sm:$0x3] %vm36_vm1, %v13928_v1 }
  0x34   :  { %127 = vst.msk [vmem:[#allocation2 + $0x2e0] sm:$0x3] %vm36_vm1, %v13928_v1  ;;  %130 = vst.msk [vmem:[#allocation2 + $0x2f8] sm:$0x3] %vm36_vm1, %v13928_v1 }
  0x35   :  { %133 = vst.msk [vmem:[#allocation2 + $0x310] sm:$0x3] %vm36_vm1, %v13928_v1  ;;  %136 = vst.msk [vmem:[#allocation2 + $0x328] sm:$0x3] %vm36_vm1, %v13928_v1 }
  0x36   :  { %139 = vst.msk [vmem:[#allocation2 + $0x340] sm:$0x3] %vm36_vm1, %v13928_v1  ;;  %142 = vst.msk [vmem:[#allocation2 + $0x358] sm:$0x3] %vm36_vm1, %v13928_v1 }
  0x37   :  { %208 = vst.msk [vmem:[#allocation2 + $0x19] sm:$0xff] %vm33_vm0, %v9400_v0  ;;  %209 = vst.msk [vmem:[#allocation2 + $0x21] sm:$0xff] %vm33_vm0, %v144_v2 }
  0x38   :  { %210 = vst.msk [vmem:[#allocation2 + $0x31] sm:$0xff] %vm33_vm0, %v145_v3  ;;  %211 = vst.msk [vmem:[#allocation2 + $0x39] sm:$0xff] %vm33_vm0, %v146_v4 }
  0x39   :  { %6507 = vst.msk [vmem:[#allocation3] sm:$0xff] %vm13924_vm2, %v13928_v1  ;;  %6509 = vst.msk [vmem:[#allocation3 + $0x10] sm:$0xff] %vm13924_vm2, %v13928_v1 }
  0x3a   :  { %6511 = vst.msk [vmem:[#allocation3 + $0x20] sm:$0xff] %vm13924_vm2, %v13928_v1  ;;  %6513 = vst.msk [vmem:[#allocation3 + $0x30] sm:$0xff] %vm13924_vm2, %v13928_v1 }
  0x3b   :  { %6515 = vst.msk [vmem:[#allocation3 + $0x40] sm:$0xff] %vm13924_vm2, %v13928_v1  ;;  %6517 = vst.msk [vmem:[#allocation3 + $0x50] sm:$0xff] %vm13924_vm2, %v13928_v1 }
  0x3c   :  { %6519 = vst.msk [vmem:[#allocation3 + $0x60] sm:$0xff] %vm13924_vm2, %v13928_v1  ;;  %6521 = vst.msk [vmem:[#allocation3 + $0x70] sm:$0xff] %vm13924_vm2, %v13928_v1 }
  0x3d   :  { %6523 = vst.msk [vmem:[#allocation3 + $0x80] sm:$0xff] %vm13924_vm2, %v13928_v1  ;;  %6525 = vst.msk [vmem:[#allocation3 + $0x90] sm:$0xff] %vm13924_vm2, %v13928_v1 }
  0x3e   :  { %6527 = vst.msk [vmem:[#allocation3 + $0xa0] sm:$0xff] %vm13924_vm2, %v13928_v1  ;;  %6529 = vst.msk [vmem:[#allocation3 + $0xb0] sm:$0xff] %vm13924_vm2, %v13928_v1 }
  0x3f   :  { %6531 = vst.msk [vmem:[#allocation3 + $0xc0] sm:$0xff] %vm13924_vm2, %v13928_v1  ;;  %6533 = vst.msk [vmem:[#allocation3 + $0xd0] sm:$0xff] %vm13924_vm2, %v13928_v1 }
  0x40   :  { %6535 = vst.msk [vmem:[#allocation3 + $0xe0] sm:$0xff] %vm13924_vm2, %v13928_v1  ;;  %6537 = vst.msk [vmem:[#allocation3 + $0xf0] sm:$0xff] %vm13924_vm2, %v13928_v1 }
  0x41   :  { %6539 = vst.msk [vmem:[#allocation3 + $0x100] sm:$0xff] %vm13924_vm2, %v13928_v1  ;;  %6541 = vst.msk [vmem:[#allocation3 + $0x110] sm:$0xff] %vm13924_vm2, %v13928_v1 }
  0x42   :  { %6543 = vst.msk [vmem:[#allocation3 + $0x120] sm:$0xff] %vm13924_vm2, %v13928_v1  ;;  %6545 = vst.msk [vmem:[#allocation3 + $0x130] sm:$0xff] %vm13924_vm2, %v13928_v1 }
  0x43   :  { %212 = vst.msk [vmem:[#allocation2 + $0x49] sm:$0xff] %vm33_vm0, %v147_v5  ;;  %213 = vst.msk [vmem:[#allocation2 + $0x51] sm:$0xff] %vm33_vm0, %v148_v6 }
  0x44   :  { %214 = vst.msk [vmem:[#allocation2 + $0x61] sm:$0xff] %vm33_vm0, %v149_v7  ;;  %215 = vst.msk [vmem:[#allocation2 + $0x69] sm:$0xff] %vm33_vm0, %v150_v8 }
  0x45   :  { %216 = vst.msk [vmem:[#allocation2 + $0x79] sm:$0xff] %vm33_vm0, %v151_v9  ;;  %217 = vst.msk [vmem:[#allocation2 + $0x81] sm:$0xff] %vm33_vm0, %v152_v10 }
  0x46   :  { %14 = vsyncpa [#allocation5], 0  ;;  %v400_v11 = vld [vmem:[#allocation2 + $0x2] sm:$0xff]  ;;  %s9328_s29 = smov 8   ;;  %s9329_s30 = smov 4   ;;  %v401_v13 = vld [vmem:[#allocation2 + $0xa] sm:$0xff] }
  0x47   :  { %v336_v12 = vld [vmem:[#allocation2 + $0x1] sm:$0xff]  ;;  %1169 = vrot.lane.b32.xlu1 %v400_v11, %s9328_s29  ;;  %v337_v14 = vld [vmem:[#allocation2 + $0x9] sm:$0xff]  ;;  %v9702_v16 = vld [vmem:[#allocation2 + $0x18] sm:$0xff]  ;;  %s9330_s10 = smov 12   ;;  %s9331_s11 = smov 16   ;;  %vm3621_vm3 = vcmask 1043456  }
  0x48   :  { %913 = vrot.lane.b32.xlu0 %v336_v12, %s9329_s30  ;;  %v9700_v15 = vld [vmem:[#allocation2 + $0x20] sm:$0xff]  ;;  %v153_v20 = vld [vmem:[%s13911_s0 + $0x50] sm:$0xff]  ;;  %s9332_s14 = smov 20   ;;  %v3417_v24 = vld [vmem:[%s13912_s1 + $0x8] sm:$0xff]  ;;  %s9333_s19 = smov 24   ;;  %vm13923_vm4 = vcmask 97280  }
  0x49   :  { %v338_v17 = vld [vmem:[#allocation2 + $0x19] sm:$0xff]  ;;  %v529_v19 = vld [vmem:[#allocation2 + $0x21] sm:$0xff]  ;;  %218 = vst.msk [vmem:[#allocation2 + $0x91] sm:$0xff] %vm33_vm0, %v153_v20  ;;  %v9718_v21 = vld [vmem:[#allocation2 + $0x30] sm:$0xff]  ;;  %s9334_s26 = smov 28   ;;  %s9335_s12 = smov 32  }
  0x4a   :  { %v592_v18 = vld [vmem:[#allocation2 + $0x1a] sm:$0xff]  ;;  %v593_v22 = vld [vmem:[#allocation2 + $0x22] sm:$0xff]  ;;  %v3418_v27 = vld [vmem:[%s13912_s1 + $0x10] sm:$0xff]  ;;  %vm3091_vm5 = vcmask 130048   ;;  %vm3156_vm6 = vcmask 162816   ;;  %vm3221_vm7 = vcmask 195584  }
  0x4b   :  { %1171 = vrot.lane.b32.xlu1 %v401_v13, %s9328_s29  ;;  %v3416_v23 = vld [vmem:[%s13912_s1] sm:$0xff]  ;;  %v154_v26 = vld [vmem:[%s13911_s0 + $0x58] sm:$0xff]  ;;  %v9765_v37 = vld [vmem:[#allocation2 + $0x48] sm:$0xff]  ;;  %vm3286_vm8 = vcmask 228352   ;;  %vm3351_vm9 = vcmask 261120   ;;  %vm3428_vm10 = vcmask 293888  }
  0x4c   :  { %915 = vrot.lane.b32.xlu0 %v337_v14, %s9329_s30  ;;  %v9159_v25 = vpack.c.bf16 %v3417_v24, %v3416_v23  ;;  %219 = vst.msk [vmem:[#allocation2 + $0x99] sm:$0xff] %vm33_vm0, %v154_v26  ;;  %v3419_v28 = vld [vmem:[%s13912_s1 + $0x18] sm:$0xff]  ;;  %v3420_v32 = vld [vmem:[%s13912_s1 + $0x20] sm:$0xf]  ;;  %v156_v38 = vld [vmem:[%s13911_s0 + $0x68] sm:$0xff]  ;;  %vm13922_vm11 = vcmask 58368  }
  0x4d   :  { %v721_v29 = vld [vmem:[#allocation2 + $0x31] sm:$0xff]  ;;  %v9163_v31 = vpack.c.bf16 %v3419_v28, %v3418_v27  ;;  %v722_v34 = vld [vmem:[#allocation2 + $0x39] sm:$0xff]  ;;  %221 = vst.msk [vmem:[#allocation2 + $0xb1] sm:$0xff] %vm33_vm0, %v156_v38  ;;  %v723_v39 = vld [vmem:[#allocation2 + $0x49] sm:$0xff]  ;;  %vm6675_vm12 = vcmask 1041409   ;;  %vm13921_vm13 = vcmask 1042434  }
  0x4e   :  { %9160 = vmatprep.subr.bf16.mxu0 %v9159_v25  ;;  %9221 = vmatprep.subr.bf16.mxu1 %v9159_v25  ;;  %v9742_v30 = vld [vmem:[#allocation2 + $0x38] sm:$0xff]  ;;  %v155_v36 = vld [vmem:[%s13911_s0 + $0x60] sm:$0xff]  ;;  %v9777_v40 = vld [vmem:[#allocation2 + $0x50] sm:$0xff]  ;;  %6508 = vst.msk [vmem:[#allocation3 + $0x8] sm:$0x3] %vm13922_vm11, %v13928_v1  ;;  %vm6679_vm14 = vcmask 1043459  }
  0x4f   :  { %1427 = vrot.lane.b32.xlu1 %v9700_v15, %s9330_s10  ;;  %9162 = vmatpush3.bf16.msra.mxu0 %v9159_v25  ;;  %v785_v33 = vld [vmem:[#allocation2 + $0x32] sm:$0xff]  ;;  %v786_v35 = vld [vmem:[#allocation2 + $0x3a] sm:$0xff]  ;;  %220 = vst.msk [vmem:[#allocation2 + $0xa9] sm:$0xff] %vm33_vm0, %v155_v36  ;;  %v787_v41 = vld [vmem:[#allocation2 + $0x4a] sm:$0xff]  ;;  %vm6681_vm15 = vcmask 1044484   ;;  %vm13927_vm1 = vcmask 1045509  }
  0x50   :  { %1425 = vrot.lane.b32.xlu0 %v9702_v16, %s9330_s10  ;;  %9224 = vmatpush3.bf16.msra.mxu1 %v9159_v25  ;;  %v724_v42 = vld [vmem:[#allocation2 + $0x51] sm:$0xff]  ;;  %v9797_v45 = vld [vmem:[#allocation2 + $0x60] sm:$0xff]  ;;  %v9809_v48 = vld [vmem:[#allocation2 + $0x68] sm:$0xff]  ;;  %6510 = vst.msk [vmem:[#allocation3 + $0x18] sm:$0x3] %vm13922_vm11, %v13928_v1  ;;  %s9338_s17 = smov 48  }
  0x51   :  { %9164 = vmatprep.subr.bf16.mxu0 %v9163_v31  ;;  %9222 = vmatprep.subr.bf16.mxu1 %v9163_v31  ;;  %v788_v43 = vld [vmem:[#allocation2 + $0x52] sm:$0xff]  ;;  %v725_v47 = vld [vmem:[#allocation2 + $0x61] sm:$0xff]  ;;  %v726_v50 = vld [vmem:[#allocation2 + $0x69] sm:$0xff]  ;;  %6512 = vst.msk [vmem:[#allocation3 + $0x28] sm:$0x3] %vm13922_vm11, %v13928_v1  ;;  %s9339_s23 = smov 56  }
  0x52   :  { %v157_v44 = vld [vmem:[%s13911_s0 + $0x70] sm:$0xff]  ;;  %v158_v46 = vld [vmem:[%s13911_s0 + $0x78] sm:$0xff]  ;;  %v789_v49 = vld [vmem:[#allocation2 + $0x62] sm:$0xff]  ;;  %6514 = vst.msk [vmem:[#allocation3 + $0x38] sm:$0x3] %vm13922_vm11, %v13928_v1  ;;  %s9340_s24 = smov 64  }
  0x53   :  { %917 = vrot.lane.b32.xlu1 %v338_v17, %s9329_s30  ;;  %9166 = vmatpush3.bf16.msra.mxu0 %v9163_v31  ;;  %222 = vst.msk [vmem:[#allocation2 + $0xc1] sm:$0xff] %vm33_vm0, %v157_v44  ;;  %223 = vst.msk [vmem:[#allocation2 + $0xc9] sm:$0xff] %vm33_vm0, %v158_v46  ;;  %v790_v51 = vld [vmem:[#allocation2 + $0x6a] sm:$0xff]  ;;  %v159_v52 = vld [vmem:[%s13911_s0 + $0x80] sm:$0xff]  ;;  %s9341_s28 = smov 80   ;;  %s9343_s1 = smov 112  }
  0x54   :  { %1681 = vrot.lane.b32.xlu0 %v338_v17, %s9331_s11  ;;  %9225 = vmatpush3.bf16.msra.mxu1 %v9163_v31  ;;  %224 = vst.msk [vmem:[#allocation2 + $0xd9] sm:$0xff] %vm33_vm0, %v159_v52  ;;  %v9829_v55 = vld [vmem:[#allocation2 + $0x78] sm:$0xff]  ;;  %v160_v58 = vld [vmem:[%s13911_s0 + $0x88] sm:$0xff]  ;;  %v9845_v62 = vld [vmem:[#allocation2 + $0x80] sm:$0xff] }
  0x55   :  { %9008 = vmatprep.subr.msk.mxu0 %vm3621_vm3, %v3420_v32  ;;  %9223 = vmatprep.subr.msk.mxu1 %vm3621_vm3, %v3420_v32  ;;  %225 = vst.msk [vmem:[#allocation2 + $0xe1] sm:$0xff] %vm33_vm0, %v160_v58  ;;  %v727_v61 = vld [vmem:[#allocation2 + $0x79] sm:$0xff]  ;;  %v728_v5 = vld [vmem:[#allocation2 + $0x81] sm:$0xff]  ;;  %v161_v14 = vld [vmem:[%s13911_s0 + $0x90] sm:$0xff] }
  0x56   :  { %v791_v4 = vld [vmem:[#allocation2 + $0x7a] sm:$0xff]  ;;  %v792_v10 = vld [vmem:[#allocation2 + $0x82] sm:$0xff]  ;;  %226 = vst.msk [vmem:[#allocation2 + $0xf1] sm:$0xff] %vm33_vm0, %v161_v14 }
  0x57   :  { %1937 = vrot.lane.b32.xlu1 %v592_v18, %s9332_s14  ;;  %9009 = vmatpush3.msk.msra.mxu0 %vm3621_vm3, %v3420_v32  ;;  %v272_v13 = vld [vmem:[#allocation2] sm:$0xff]  ;;  %v273_v26 = vld [vmem:[#allocation2 + $0x8] sm:$0xff]  ;;  %6516 = vst.msk [vmem:[#allocation3 + $0x48] sm:$0x3] %vm13922_vm11, %v13928_v1  ;;  %6518 = vst.msk [vmem:[#allocation3 + $0x58] sm:$0x3] %vm13922_vm11, %v13928_v1 }
  0x58   :  { %1683 = vrot.lane.b32.xlu0 %v529_v19, %s9331_s11  ;;  %9226 = vmatpush3.msk.msra.mxu1 %vm3621_vm3, %v3420_v32  ;;  %6520 = vst.msk [vmem:[#allocation3 + $0x68] sm:$0x3] %vm13922_vm11, %v13928_v1  ;;  %6522 = vst.msk [vmem:[#allocation3 + $0x78] sm:$0x3] %vm13922_vm11, %v13928_v1  ;;  %vm13926_vm3 = vcmask 1046534  }
  0x59   :  { %6524 = vst.msk [vmem:[#allocation3 + $0x88] sm:$0x3] %vm13922_vm11, %v13928_v1  ;;  %6526 = vst.msk [vmem:[#allocation3 + $0x98] sm:$0x3] %vm13922_vm11, %v13928_v1 }
  0x5a   :  { %6528 = vst.msk [vmem:[#allocation3 + $0xa8] sm:$0x3] %vm13922_vm11, %v13928_v1  ;;  %6530 = vst.msk [vmem:[#allocation3 + $0xb8] sm:$0x3] %vm13922_vm11, %v13928_v1 }
  0x5b   :  { %1173 = vrot.lane.b32.xlu1 %v592_v18, %s9328_s29  ;;  %6532 = vst.msk [vmem:[#allocation3 + $0xc8] sm:$0x3] %vm13922_vm11, %v13928_v1  ;;  %6534 = vst.msk [vmem:[#allocation3 + $0xd8] sm:$0x3] %vm13922_vm11, %v13928_v1 }
  0x5c   :  { %919 = vrot.lane.b32.xlu0 %v529_v19, %s9329_s30  ;;  %6536 = vst.msk [vmem:[#allocation3 + $0xe8] sm:$0x3] %vm13922_vm11, %v13928_v1  ;;  %6538 = vst.msk [vmem:[#allocation3 + $0xf8] sm:$0x3] %vm13922_vm11, %v13928_v1 }
  0x5d   :  { %6540 = vst.msk [vmem:[#allocation3 + $0x108] sm:$0x3] %vm13922_vm11, %v13928_v1  ;;  %6542 = vst.msk [vmem:[#allocation3 + $0x118] sm:$0x3] %vm13922_vm11, %v13928_v1 }
  0x5e   :  { %6544 = vst.msk [vmem:[#allocation3 + $0x128] sm:$0x3] %vm13922_vm11, %v13928_v1  ;;  %6546 = vst.msk [vmem:[#allocation3 + $0x138] sm:$0x3] %vm13922_vm11, %v13928_v1 }
  0x5f   :  { %2193 = vrot.lane.b32.xlu1 %v9718_v21, %s9333_s19 }
  0x60   :  { %1939 = vrot.lane.b32.xlu0 %v593_v22, %s9332_s14 }
  0x63   :  { %1429 = vrot.lane.b32.xlu1 %v9718_v21, %s9330_s10 }
  0x64   :  { %1175 = vrot.lane.b32.xlu0 %v593_v22, %s9328_s29  ;;  %v9877_v22 = vld [vmem:[#allocation2 + $0x90] sm:$0xff] }
  0x67   :  { %2449 = vrot.lane.b32.xlu1 %v721_v29, %s9334_s26 }
  0x68   :  { %2195 = vrot.lane.b32.xlu0 %v9742_v30, %s9333_s19 }
  0x6b   :  { %1685 = vrot.lane.b32.xlu1 %v721_v29, %s9331_s11 }
  0x6c   :  { %1431 = vrot.lane.b32.xlu0 %v9742_v30, %s9330_s10 }
  0x6f   :  { %2705 = vrot.lane.b32.xlu1 %v785_v33, %s9335_s12 }
  0x70   :  { %2451 = vrot.lane.b32.xlu0 %v722_v34, %s9334_s26 }
  0x73   :  { %1687 = vrot.lane.b32.xlu1 %v722_v34, %s9331_s11 }
  0x74   :  { %921 = vrot.lane.b32.xlu0 %v721_v29, %s9329_s30  ;;  %v162_v29 = vld [vmem:[%s13911_s0 + $0x98] sm:$0xff] }
  0x75   :  { %227 = vst.msk [vmem:[#allocation2 + $0xf9] sm:$0xff] %vm33_vm0, %v162_v29 }
  0x77   :  { %2707 = vrot.lane.b32.xlu1 %v786_v35, %s9335_s12 }
  0x78   :  { %1941 = vrot.lane.b32.xlu0 %v785_v33, %s9332_s14 }
  0x7b   :  { %1177 = vrot.lane.b32.xlu1 %v785_v33, %s9328_s29 }
  0x7c   :  { %923 = vrot.lane.b32.xlu0 %v722_v34, %s9329_s30 }
  0x7f   :  { %2197 = vrot.lane.b32.xlu1 %v9765_v37, %s9333_s19 }
  0x80   :  { %1943 = vrot.lane.b32.xlu0 %v786_v35, %s9332_s14 }
  0x83   :  { %1433 = vrot.lane.b32.xlu1 %v9765_v37, %s9330_s10 }
  0x84   :  { %1179 = vrot.lane.b32.xlu0 %v786_v35, %s9328_s29 }
  0x87   :  { %2453 = vrot.lane.b32.xlu1 %v723_v39, %s9334_s26 }
  0x88   :  { %2199 = vrot.lane.b32.xlu0 %v9777_v40, %s9333_s19 }
  0x8b   :  { %1689 = vrot.lane.b32.xlu1 %v723_v39, %s9331_s11 }
  0x8c   :  { %1435 = vrot.lane.b32.xlu0 %v9777_v40, %s9330_s10 }
  0x8f   :  { %2709 = vrot.lane.b32.xlu1 %v787_v41, %s9335_s12 }
  0x90   :  { %2455 = vrot.lane.b32.xlu0 %v724_v42, %s9334_s26 }
  0x93   :  { %1691 = vrot.lane.b32.xlu1 %v724_v42, %s9331_s11 }
  0x94   :  { %925 = vrot.lane.b32.xlu0 %v723_v39, %s9329_s30  ;;  %v729_v39 = vld [vmem:[#allocation2 + $0x91] sm:$0xff] }
  0x97   :  { %2711 = vrot.lane.b32.xlu1 %v788_v43, %s9335_s12 }
  0x98   :  { %1945 = vrot.lane.b32.xlu0 %v787_v41, %s9332_s14 }
  0x9b   :  { %1181 = vrot.lane.b32.xlu1 %v787_v41, %s9328_s29  ;;  %v9903_v41 = vld [vmem:[#allocation2 + $0x98] sm:$0xff] }
  0x9c   :  { %927 = vrot.lane.b32.xlu0 %v724_v42, %s9329_s30 }
  0x9f   :  { %2201 = vrot.lane.b32.xlu1 %v9797_v45, %s9333_s19 }
  0xa0   :  { %1947 = vrot.lane.b32.xlu0 %v788_v43, %s9332_s14 }
  0xa3   :  { %1437 = vrot.lane.b32.xlu1 %v9797_v45, %s9330_s10 }
  0xa4   :  { %1183 = vrot.lane.b32.xlu0 %v788_v43, %s9328_s29 }
  0xa7   :  { %2457 = vrot.lane.b32.xlu1 %v725_v47, %s9334_s26 }
  0xa8   :  { %2203 = vrot.lane.b32.xlu0 %v9809_v48, %s9333_s19 }
  0xab   :  { %1693 = vrot.lane.b32.xlu1 %v725_v47, %s9331_s11 }
  0xac   :  { %1439 = vrot.lane.b32.xlu0 %v9809_v48, %s9330_s10 }
  0xaf   :  { %2713 = vrot.lane.b32.xlu1 %v789_v49, %s9335_s12 }
  0xb0   :  { %2459 = vrot.lane.b32.xlu0 %v726_v50, %s9334_s26 }
  0xb3   :  { %1695 = vrot.lane.b32.xlu1 %v726_v50, %s9331_s11 }
  0xb4   :  { %929 = vrot.lane.b32.xlu0 %v725_v47, %s9329_s30 }
  0xb7   :  { %2715 = vrot.lane.b32.xlu1 %v790_v51, %s9335_s12 }
  0xb8   :  { %1949 = vrot.lane.b32.xlu0 %v789_v49, %s9332_s14 }
  0xb9   :  { %v1170_v53 = vpop.permute.xlu1 %1169 }
  0xba   :  { %v914_v54 = vpop.permute.xlu0 %913 }
  0xbb   :  { %1185 = vrot.lane.b32.xlu1 %v789_v49, %s9328_s29  ;;  %v2897_v17 = vsel %vm33_vm0, %v272_v13, %v914_v54  ;;  %v793_v54 = vld [vmem:[#allocation2 + $0x92] sm:$0xff] }
  0xbc   :  { %931 = vrot.lane.b32.xlu0 %v726_v50, %s9329_s30  ;;  %v2962_v20 = vsel %vm13924_vm2, %v2897_v17, %v1170_v53 }
  0xbd   :  { %v9831_v56 = vpop.permute.xlu1 %1171 }
  0xbe   :  { %v916_v57 = vpop.permute.xlu0 %915 }
  0xbf   :  { %2205 = vrot.lane.b32.xlu1 %v9829_v55, %s9333_s19  ;;  %v2898_v32 = vsel %vm33_vm0, %v273_v26, %v916_v57 }
  0xc0   :  { %1951 = vrot.lane.b32.xlu0 %v790_v51, %s9332_s14  ;;  %v2963_v38 = vsel %vm13924_vm2, %v2898_v32, %v9831_v56  ;;  %v730_v56 = vld [vmem:[#allocation2 + $0x99] sm:$0xff] }
  0xc1   :  { %v9840_v59 = vpop.permute.xlu1 %1427 }
  0xc2   :  { %v1426_v60 = vpop.permute.xlu0 %1425  ;;  %v3028_v42 = vsel %vm13923_vm4, %v2963_v38, %v9840_v59  ;;  %v732_v38 = vld [vmem:[#allocation2 + $0xb1] sm:$0xff] }
  0xc3   :  { %1441 = vrot.lane.b32.xlu1 %v9829_v55, %s9330_s10  ;;  %v3027_v23 = vsel %vm13923_vm4, %v2962_v20, %v1426_v60 }
  0xc4   :  { %1187 = vrot.lane.b32.xlu0 %v790_v51, %s9328_s29 }
  0xc5   :  { %v9847_v63 = vpop.permute.xlu1 %917 }
  0xc6   :  { %v1682_v0 = vpop.permute.xlu0 %1681 }
  0xc7   :  { %2461 = vrot.lane.b32.xlu1 %v727_v61, %s9334_s26  ;;  %v3092_v27 = vsel %vm3091_vm5, %v3027_v23, %v1682_v0 }
  0xc8   :  { %2207 = vrot.lane.b32.xlu0 %v9845_v62, %s9333_s19 }
  0xc9   :  { %v1938_v2 = vpop.permute.xlu1 %1937 }
  0xca   :  { %v1684_v3 = vpop.permute.xlu0 %1683  ;;  %v3157_v28 = vsel %vm3156_vm6, %v3092_v27, %v1938_v2  ;;  %v731_v27 = vld [vmem:[#allocation2 + $0xa9] sm:$0xff] }
  0xcb   :  { %1697 = vrot.lane.b32.xlu1 %v727_v61, %s9331_s11  ;;  %v3093_v46 = vsel %vm3091_vm5, %v3028_v42, %v1684_v3  ;;  %v163_v3 = vld [vmem:[%s13911_s0 + $0xa0] sm:$0xff] }
  0xcc   :  { %1443 = vrot.lane.b32.xlu0 %v9845_v62, %s9330_s10  ;;  %228 = vst.msk [vmem:[#allocation2 + $0x109] sm:$0xff] %vm33_vm0, %v163_v3 }
  0xcd   :  { %v9855_v6 = vpop.permute.xlu1 %1173 }
  0xce   :  { %v9857_v7 = vpop.permute.xlu0 %919 }
  0xcf   :  { %2717 = vrot.lane.b32.xlu1 %v791_v4, %s9335_s12 }
  0xd0   :  { %2463 = vrot.lane.b32.xlu0 %v728_v5, %s9334_s26 }
  0xd1   :  { %v2194_v8 = vpop.permute.xlu1 %2193 }
  0xd2   :  { %v1940_v9 = vpop.permute.xlu0 %1939  ;;  %v3222_v31 = vsel %vm3221_vm7, %v3157_v28, %v2194_v8  ;;  %v2899_v8 = vsel %vm33_vm0, %v9702_v16, %v9847_v63  ;;  %v164_v63 = vld [vmem:[%s13911_s0 + $0xa8] sm:$0xff]  ;;  %v9978_v28 = vld [vmem:[#allocation2 + $0xb0] sm:$0xff] }
  0xd3   :  { %1699 = vrot.lane.b32.xlu1 %v728_v5, %s9331_s11  ;;  %v3158_v47 = vsel %vm3156_vm6, %v3093_v46, %v1940_v9  ;;  %v2964_v9 = vsel %vm13924_vm2, %v2899_v8, %v9855_v6  ;;  %229 = vst.msk [vmem:[#allocation2 + $0x111] sm:$0xff] %vm33_vm0, %v164_v63 }
  0xd4   :  { %933 = vrot.lane.b32.xlu0 %v727_v61, %s9329_s30  ;;  %v794_v61 = vld [vmem:[#allocation2 + $0x9a] sm:$0xff] }
  0xd5   :  { %v9863_v11 = vpop.permute.xlu1 %1429 }
  0xd6   :  { %v9865_v12 = vpop.permute.xlu0 %1175  ;;  %v3029_v13 = vsel %vm13923_vm4, %v2964_v9, %v9863_v11  ;;  %v2900_v11 = vsel %vm33_vm0, %v9700_v15, %v9857_v7 }
  0xd7   :  { %2719 = vrot.lane.b32.xlu1 %v792_v10, %s9335_s12  ;;  %v2965_v26 = vsel %vm13924_vm2, %v2900_v11, %v9865_v12 }
  0xd8   :  { %1953 = vrot.lane.b32.xlu0 %v791_v4, %s9332_s14 }
  0xd9   :  { %v2450_v18 = vpop.permute.xlu1 %2449 }
  0xda   :  { %v2196_v19 = vpop.permute.xlu0 %2195  ;;  %v3287_v33 = vsel %vm3286_vm8, %v3222_v31, %v2450_v18 }
  0xdb   :  { %1189 = vrot.lane.b32.xlu1 %v791_v4, %s9328_s29  ;;  %v3223_v49 = vsel %vm3221_vm7, %v3158_v47, %v2196_v19  ;;  %v796_v47 = vld [vmem:[#allocation2 + $0xb2] sm:$0xff] }
  0xdc   :  { %935 = vrot.lane.b32.xlu0 %v728_v5, %s9329_s30 }
  0xdd   :  { %v9880_v24 = vpop.permute.xlu1 %1685 }
  0xde   :  { %v9882_v25 = vpop.permute.xlu0 %1431  ;;  %v3094_v18 = vsel %vm3091_vm5, %v3029_v13, %v9880_v24 }
  0xdf   :  { %2209 = vrot.lane.b32.xlu1 %v9877_v22, %s9333_s19  ;;  %v3030_v15 = vsel %vm13923_vm4, %v2965_v26, %v9882_v25  ;;  %v734_v26 = vld [vmem:[#allocation2 + $0xc9] sm:$0xff] }
  0xe0   :  { %1955 = vrot.lane.b32.xlu0 %v792_v10, %s9332_s14 }
  0xe1   :  { %v2706_v34 = vpop.permute.xlu1 %2705 }
  0xe2   :  { %v2452_v35 = vpop.permute.xlu0 %2451  ;;  %v3352_v36 = vsel %vm3351_vm9, %v3287_v33, %v2706_v34 }
  0xe3   :  { %1445 = vrot.lane.b32.xlu1 %v9877_v22, %s9330_s10  ;;  %9010 = vmatprep.mubr.msk.f32.mxu0 %vm3428_vm10, %v3352_v36  ;;  %v3288_v50 = vsel %vm3286_vm8, %v3223_v49, %v2452_v35  ;;  %v795_v36 = vld [vmem:[#allocation2 + $0xaa] sm:$0xff] }
  0xe4   :  { %1191 = vrot.lane.b32.xlu0 %v792_v10, %s9328_s29  ;;  %v9948_v10 = vld [vmem:[#allocation2 + $0xa8] sm:$0xff] }
  0xe5   :  { %v9907_v43 = vpop.permute.xlu1 %1687 }
  0xe6   :  { %v9909_v44 = vpop.permute.xlu0 %921  ;;  %v3095_v31 = vsel %vm3091_vm5, %v3030_v15, %v9907_v43 }
  0xe7   :  { %2465 = vrot.lane.b32.xlu1 %v729_v39, %s9334_s26 }
  0xe8   :  { %2211 = vrot.lane.b32.xlu0 %v9903_v41, %s9333_s19 }
  0xe9   :  { %v2708_v51 = vpop.permute.xlu1 %2707 }
  0xea   :  { %v1942_v52 = vpop.permute.xlu0 %1941  ;;  %v3353_v53 = vsel %vm3351_vm9, %v3288_v50, %v2708_v51  ;;  %v165_v51 = vld [vmem:[%s13911_s0 + $0xb0] sm:$0xff] }
  0xeb   :  { %1701 = vrot.lane.b32.xlu1 %v729_v39, %s9331_s11  ;;  %9011 = vmatmul.mubr.msk.f32.vlgmr.msra.gmra.mrb[0].mxu0 %vm3428_vm10, %v3353_v53  ;;  %v3159_v16 = vsel %vm3156_vm6, %v3094_v18, %v1942_v52  ;;  %230 = vst.msk [vmem:[#allocation2 + $0x121] sm:$0xff] %vm33_vm0, %v165_v51  ;;  %v2901_v52 = vsel %vm33_vm0, %v9718_v21, %v9909_v44  ;;  %v733_v18 = vld [vmem:[#allocation2 + $0xc1] sm:$0xff] }
  0xec   :  { %1447 = vrot.lane.b32.xlu0 %v9903_v41, %s9330_s10 }
  0xed   :  { %v9923_v57 = vpop.permute.xlu1 %1177 }
  0xee   :  { %v9925_v58 = vpop.permute.xlu0 %923 }
  0xef   :  { %2721 = vrot.lane.b32.xlu1 %v793_v54, %s9335_s12 }
  0xf0   :  { %2467 = vrot.lane.b32.xlu0 %v730_v56, %s9334_s26 }
  0xf1   :  { %v2198_v59 = vpop.permute.xlu1 %2197 }
  0xf2   :  { %v1944_v60 = vpop.permute.xlu0 %1943  ;;  %v3224_v6 = vsel %vm3221_vm7, %v3159_v16, %v2198_v59  ;;  %v10024_v59 = vld [vmem:[#allocation2 + $0xc0] sm:$0xff]  ;;  %v10054_v16 = vld [vmem:[#allocation2 + $0xc8] sm:$0xff] }
  0xf3   :  { %1703 = vrot.lane.b32.xlu1 %v730_v56, %s9331_s11  ;;  %v3160_v32 = vsel %vm3156_vm6, %v3095_v31, %v1944_v60 }
  0xf4   :  { %937 = vrot.lane.b32.xlu0 %v729_v39, %s9329_s30 }
  0xf5   :  { %v9931_v0 = vpop.permute.xlu1 %1433 }
  0xf6   :  { %v9933_v2 = vpop.permute.xlu0 %1179 }
  0xf7   :  { %2723 = vrot.lane.b32.xlu1 %v794_v61, %s9335_s12 }
  0xf8   :  { %1957 = vrot.lane.b32.xlu0 %v793_v54, %s9332_s14 }
  0xf9   :  { %v2454_v4 = vpop.permute.xlu1 %2453 }
  0xfa   :  { %v2200_v5 = vpop.permute.xlu0 %2199  ;;  %v3289_v19 = vsel %vm3286_vm8, %v3224_v6, %v2454_v4  ;;  %v2902_v4 = vsel %vm33_vm0, %v9742_v30, %v9925_v58 }
  0xfb   :  { %1193 = vrot.lane.b32.xlu1 %v793_v54, %s9328_s29  ;;  %v3225_v12 = vsel %vm3221_vm7, %v3160_v32, %v2200_v5  ;;  %v798_v32 = vld [vmem:[#allocation2 + $0xca] sm:$0xff] }
  0xfc   :  { %939 = vrot.lane.b32.xlu0 %v730_v56, %s9329_s30  ;;  %v2966_v56 = vsel %vm13924_vm2, %v2901_v52, %v9923_v57  ;;  %v166_v57 = vld [vmem:[%s13911_s0 + $0xb8] sm:$0xff] }
  0xfd   :  { %v9952_v14 = vpop.permute.xlu1 %1689  ;;  %v3031_v60 = vsel %vm13923_vm4, %v2966_v56, %v9931_v0  ;;  %231 = vst.msk [vmem:[#allocation2 + $0x129] sm:$0xff] %vm33_vm0, %v166_v57 }
  0xfe   :  { %v9954_v17 = vpop.permute.xlu0 %1435  ;;  %v3096_v21 = vsel %vm3091_vm5, %v3031_v60, %v9952_v14  ;;  %v2967_v14 = vsel %vm13924_vm2, %v2902_v4, %v9933_v2 }
  0xff   :  { %2213 = vrot.lane.b32.xlu1 %v9948_v10, %s9333_s19  ;;  %v3032_v30 = vsel %vm13923_vm4, %v2967_v14, %v9954_v17  ;;  %v736_v14 = vld [vmem:[#allocation2 + $0xe1] sm:$0xff] }
 0x100   :  { %1959 = vrot.lane.b32.xlu0 %v794_v61, %s9332_s14 }
 0x101   :  { %v2710_v20 = vpop.permute.xlu1 %2709 }
 0x102   :  { %v2456_v23 = vpop.permute.xlu0 %2455  ;;  %v3354_v24 = vsel %vm3351_vm9, %v3289_v19, %v2710_v20 }
 0x103   :  { %1449 = vrot.lane.b32.xlu1 %v9948_v10, %s9330_s10  ;;  %9013 = vmatprep.mubr.msk.f32.mxu0 %vm3428_vm10, %v3354_v24  ;;  %v3290_v33 = vsel %vm3286_vm8, %v3225_v12, %v2456_v23  ;;  %v797_v24 = vld [vmem:[#allocation2 + $0xc2] sm:$0xff] }
 0x104   :  { %1195 = vrot.lane.b32.xlu0 %v794_v61, %s9328_s29 }
 0x105   :  { %v9982_v7 = vpop.permute.xlu1 %1691 }
 0x106   :  { %v9984_v29 = vpop.permute.xlu0 %925  ;;  %v3097_v6 = vsel %vm3091_vm5, %v3032_v30, %v9982_v7 }
 0x107   :  { %2469 = vrot.lane.b32.xlu1 %v731_v27, %s9334_s26 }
 0x108   :  { %2215 = vrot.lane.b32.xlu0 %v9978_v28, %s9333_s19 }
 0x109   :  { %v2712_v34 = vpop.permute.xlu1 %2711 }
 0x10a   :  { %v1946_v25 = vpop.permute.xlu0 %1945  ;;  %v3355_v35 = vsel %vm3351_vm9, %v3290_v33, %v2712_v34  ;;  %v167_v34 = vld [vmem:[%s13911_s0 + $0xc0] sm:$0xff] }
 0x10b   :  { %1705 = vrot.lane.b32.xlu1 %v731_v27, %s9331_s11  ;;  %9014 = vmatmul.mubr.msk.f32.gmra.mrb[2].mxu0 %vm3428_vm10, %v3355_v35  ;;  %v3161_v44 = vsel %vm3156_vm6, %v3096_v21, %v1946_v25  ;;  %232 = vst.msk [vmem:[#allocation2 + $0x139] sm:$0xff] %vm33_vm0, %v167_v34  ;;  %v2903_v25 = vsel %vm33_vm0, %v9765_v37, %v9984_v29  ;;  %v735_v21 = vld [vmem:[#allocation2 + $0xd9] sm:$0xff] }
 0x10c   :  { %1451 = vrot.lane.b32.xlu0 %v9978_v28, %s9330_s10 }
 0x10d   :  { %v9999_v39 = vpop.permute.xlu1 %1181 }
 0x10e   :  { %v10001_v42 = vpop.permute.xlu0 %927 }
 0x10f   :  { %2725 = vrot.lane.b32.xlu1 %v795_v36, %s9335_s12  ;;  %v2904_v52 = vsel %vm33_vm0, %v9777_v40, %v10001_v42 }
 0x110   :  { %2471 = vrot.lane.b32.xlu0 %v732_v38, %s9334_s26 }
 0x111   :  { %v2202_v43 = vpop.permute.xlu1 %2201 }
 0x112   :  { %v1948_v46 = vpop.permute.xlu0 %1947  ;;  %v3226_v0 = vsel %vm3221_vm7, %v3161_v44, %v2202_v43  ;;  %v10100_v43 = vld [vmem:[#allocation2 + $0xd8] sm:$0xff]  ;;  %v10130_v44 = vld [vmem:[#allocation2 + $0xe0] sm:$0xff] }
 0x113   :  { %1707 = vrot.lane.b32.xlu1 %v732_v38, %s9331_s11  ;;  %v3162_v11 = vsel %vm3156_vm6, %v3097_v6, %v1948_v46 }
 0x114   :  { %941 = vrot.lane.b32.xlu0 %v731_v27, %s9329_s30 }
 0x115   :  { %v10007_v49 = vpop.permute.xlu1 %1437 }
 0x116   :  { %v10009_v50 = vpop.permute.xlu0 %1183 }
 0x117   :  { %2727 = vrot.lane.b32.xlu1 %v796_v47, %s9335_s12 }
 0x118   :  { %1961 = vrot.lane.b32.xlu0 %v795_v36, %s9332_s14 }
 0x119   :  { %v2458_v53 = vpop.permute.xlu1 %2457 }
 0x11a   :  { %v2204_v54 = vpop.permute.xlu0 %2203  ;;  %v3291_v5 = vsel %vm3286_vm8, %v3226_v0, %v2458_v53 }
 0x11b   :  { %1197 = vrot.lane.b32.xlu1 %v795_v36, %s9328_s29  ;;  %v3227_v2 = vsel %vm3221_vm7, %v3162_v11, %v2204_v54  ;;  %v800_v11 = vld [vmem:[#allocation2 + $0xe2] sm:$0xff] }
 0x11c   :  { %943 = vrot.lane.b32.xlu0 %v732_v38, %s9329_s30  ;;  %v2968_v38 = vsel %vm13924_vm2, %v2903_v25, %v9999_v39  ;;  %v168_v39 = vld [vmem:[%s13911_s0 + $0xc8] sm:$0xff] }
 0x11d   :  { %v10028_v61 = vpop.permute.xlu1 %1693  ;;  %v3033_v46 = vsel %vm13923_vm4, %v2968_v38, %v10007_v49  ;;  %233 = vst.msk [vmem:[#allocation2 + $0x141] sm:$0xff] %vm33_vm0, %v168_v39  ;;  %v170_v38 = vld [vmem:[%s13911_s0 + $0xd8] sm:$0xff] }
 0x11e   :  { %v10030_v3 = vpop.permute.xlu0 %1439  ;;  %v3098_v37 = vsel %vm3091_vm5, %v3033_v46, %v10028_v61  ;;  %v2969_v61 = vsel %vm13924_vm2, %v2904_v52, %v10009_v50  ;;  %235 = vst.msk [vmem:[#allocation2 + $0x159] sm:$0xff] %vm33_vm0, %v170_v38  ;;  %v172_v38 = vld [vmem:[%s13911_s0 + $0xe8] sm:$0xff] }
 0x11f   :  { %2217 = vrot.lane.b32.xlu1 %v10024_v59, %s9333_s19  ;;  %v3034_v40 = vsel %vm13923_vm4, %v2969_v61, %v10030_v3  ;;  %v738_v61 = vld [vmem:[#allocation2 + $0xf9] sm:$0xff]  ;;  %237 = vst.msk [vmem:[#allocation2 + $0x171] sm:$0xff] %vm33_vm0, %v172_v38 }
 0x120   :  { %1963 = vrot.lane.b32.xlu0 %v796_v47, %s9332_s14 }
 0x121   :  { %v2714_v8 = vpop.permute.xlu1 %2713 }
 0x122   :  { %v2460_v9 = vpop.permute.xlu0 %2459  ;;  %v3356_v13 = vsel %vm3351_vm9, %v3291_v5, %v2714_v8 }
 0x123   :  { %1453 = vrot.lane.b32.xlu1 %v10024_v59, %s9330_s10  ;;  %9016 = vmatprep.mubr.msk.f32.mxu0 %vm3428_vm10, %v3356_v13  ;;  %v3292_v19 = vsel %vm3286_vm8, %v3227_v2, %v2460_v9  ;;  %v799_v13 = vld [vmem:[#allocation2 + $0xda] sm:$0xff] }
 0x124   :  { %1199 = vrot.lane.b32.xlu0 %v796_v47, %s9328_s29 }
 0x125   :  { %v10058_v58 = vpop.permute.xlu1 %1695 }
 0x126   :  { %v10060_v63 = vpop.permute.xlu0 %929  ;;  %v3099_v0 = vsel %vm3091_vm5, %v3034_v40, %v10058_v58 }
 0x127   :  { %2473 = vrot.lane.b32.xlu1 %v733_v18, %s9334_s26 }
 0x128   :  { %2219 = vrot.lane.b32.xlu0 %v10054_v16, %s9333_s19 }
 0x129   :  { %v2716_v20 = vpop.permute.xlu1 %2715 }
 0x12a   :  { %v1950_v17 = vpop.permute.xlu0 %1949  ;;  %v3357_v23 = vsel %vm3351_vm9, %v3292_v19, %v2716_v20  ;;  %v169_v20 = vld [vmem:[%s13911_s0 + $0xd0] sm:$0xff] }
 0x12b   :  { %1709 = vrot.lane.b32.xlu1 %v733_v18, %s9331_s11  ;;  %9017 = vmatmul.mubr.msk.f32.gmra.mrb[4].mxu0 %vm3428_vm10, %v3357_v23  ;;  %v3163_v29 = vsel %vm3156_vm6, %v3098_v37, %v1950_v17  ;;  %234 = vst.msk [vmem:[#allocation2 + $0x151] sm:$0xff] %vm33_vm0, %v169_v20  ;;  %v2905_v17 = vsel %vm33_vm0, %v9797_v45, %v10060_v63 }
 0x12c   :  { %1455 = vrot.lane.b32.xlu0 %v10054_v16, %s9330_s10 }
 0x12d   :  { %v10075_v27 = vpop.permute.xlu1 %1185 }
 0x12e   :  { %v10077_v15 = vpop.permute.xlu0 %931 }
 0x12f   :  { %2729 = vrot.lane.b32.xlu1 %v797_v24, %s9335_s12 }
 0x130   :  { %2475 = vrot.lane.b32.xlu0 %v734_v26, %s9334_s26 }
 0x131   :  { %v2206_v7 = vpop.permute.xlu1 %2205 }
 0x132   :  { %v1952_v31 = vpop.permute.xlu0 %1951  ;;  %v3228_v49 = vsel %vm3221_vm7, %v3163_v29, %v2206_v7  ;;  %v10176_v7 = vld [vmem:[#allocation2 + $0xf0] sm:$0xff] }
 0x133   :  { %1711 = vrot.lane.b32.xlu1 %v734_v26, %s9331_s11  ;;  %v3164_v4 = vsel %vm3156_vm6, %v3099_v0, %v1952_v31 }
 0x134   :  { %945 = vrot.lane.b32.xlu0 %v733_v18, %s9329_s30 }
 0x135   :  { %v10083_v12 = vpop.permute.xlu1 %1441 }
 0x136   :  { %v10085_v33 = vpop.permute.xlu0 %1187 }
 0x137   :  { %2731 = vrot.lane.b32.xlu1 %v798_v32, %s9335_s12 }
 0x138   :  { %1965 = vrot.lane.b32.xlu0 %v797_v24, %s9332_s14 }
 0x139   :  { %v2462_v35 = vpop.permute.xlu1 %2461 }
 0x13a   :  { %v2208_v36 = vpop.permute.xlu0 %2207  ;;  %v3293_v53 = vsel %vm3286_vm8, %v3228_v49, %v2462_v35 }
 0x13b   :  { %1201 = vrot.lane.b32.xlu1 %v797_v24, %s9328_s29  ;;  %v3229_v50 = vsel %vm3221_vm7, %v3164_v4, %v2208_v36  ;;  %v802_v4 = vld [vmem:[#allocation2 + $0xfa] sm:$0xff] }
 0x13c   :  { %947 = vrot.lane.b32.xlu0 %v734_v26, %s9329_s30  ;;  %v2970_v26 = vsel %vm13924_vm2, %v2905_v17, %v10075_v27 }
 0x13d   :  { %v10104_v47 = vpop.permute.xlu1 %1697  ;;  %v3035_v31 = vsel %vm13923_vm4, %v2970_v26, %v10083_v12  ;;  %v2906_v12 = vsel %vm33_vm0, %v9809_v48, %v10077_v15  ;;  %v737_v15 = vld [vmem:[#allocation2 + $0xf1] sm:$0xff]  ;;  %v171_v26 = vld [vmem:[%s13911_s0 + $0xe0] sm:$0xff] }
 0x13e   :  { %v10106_v51 = vpop.permute.xlu0 %1443  ;;  %v3100_v45 = vsel %vm3091_vm5, %v3035_v31, %v10104_v47  ;;  %v2971_v48 = vsel %vm13924_vm2, %v2906_v12, %v10085_v33  ;;  %v10206_v47 = vld [vmem:[#allocation2 + $0xf8] sm:$0xff]  ;;  %236 = vst.msk [vmem:[#allocation2 + $0x169] sm:$0xff] %vm33_vm0, %v171_v26 }
 0x13f   :  { %2221 = vrot.lane.b32.xlu1 %v10100_v43, %s9333_s19  ;;  %v3036_v37 = vsel %vm13923_vm4, %v2971_v48, %v10106_v51  ;;  %v186_v48 = vld [vmem:[%s13911_s0 + $0x158] sm:$0xff] }
 0x140   :  { %1967 = vrot.lane.b32.xlu0 %v798_v32, %s9332_s14  ;;  %251 = vst.msk [vmem:[#allocation2 + $0x249] sm:$0xff] %vm33_vm0, %v186_v48 }
 0x141   :  { %v2718_v54 = vpop.permute.xlu1 %2717 }
 0x142   :  { %v2464_v56 = vpop.permute.xlu0 %2463  ;;  %v3358_v60 = vsel %vm3351_vm9, %v3293_v53, %v2718_v54 }
 0x143   :  { %1457 = vrot.lane.b32.xlu1 %v10100_v43, %s9330_s10  ;;  %9019 = vmatprep.mubr.msk.f32.mxu0 %vm3428_vm10, %v3358_v60  ;;  %v3294_v5 = vsel %vm3286_vm8, %v3229_v50, %v2464_v56  ;;  %v801_v60 = vld [vmem:[#allocation2 + $0xf2] sm:$0xff] }
 0x144   :  { %1203 = vrot.lane.b32.xlu0 %v798_v32, %s9328_s29 }
 0x145   :  { %v10134_v42 = vpop.permute.xlu1 %1699 }
 0x146   :  { %v10136_v57 = vpop.permute.xlu0 %933  ;;  %v3101_v49 = vsel %vm3091_vm5, %v3036_v37, %v10134_v42  ;;  %v740_v37 = vld [vmem:[#allocation2 + $0x111] sm:$0xff] }
 0x147   :  { %2477 = vrot.lane.b32.xlu1 %v735_v21, %s9334_s26 }
 0x148   :  { %2223 = vrot.lane.b32.xlu0 %v10130_v44, %s9333_s19 }
 0x149   :  { %v2720_v8 = vpop.permute.xlu1 %2719 }
 0x14a   :  { %v1954_v3 = vpop.permute.xlu0 %1953  ;;  %v3359_v9 = vsel %vm3351_vm9, %v3294_v5, %v2720_v8  ;;  %v2907_v8 = vsel %vm33_vm0, %v9829_v55, %v10136_v57 }
 0x14b   :  { %1713 = vrot.lane.b32.xlu1 %v735_v21, %s9331_s11  ;;  %9020 = vmatmul.mubr.msk.f32.gmra.mrb[6].mxu0 %vm3428_vm10, %v3359_v9  ;;  %v3165_v63 = vsel %vm3156_vm6, %v3100_v45, %v1954_v3 }
 0x14c   :  { %1459 = vrot.lane.b32.xlu0 %v10130_v44, %s9330_s10 }
 0x14d   :  { %v10151_v18 = vpop.permute.xlu1 %1189 }
 0x14e   :  { %v10153_v30 = vpop.permute.xlu0 %935 }
 0x14f   :  { %2733 = vrot.lane.b32.xlu1 %v799_v13, %s9335_s12 }
 0x150   :  { %2479 = vrot.lane.b32.xlu0 %v736_v14, %s9334_s26 }
 0x151   :  { %v2210_v58 = vpop.permute.xlu1 %2209 }
 0x152   :  { %v1956_v6 = vpop.permute.xlu0 %1955  ;;  %v3230_v27 = vsel %vm3221_vm7, %v3165_v63, %v2210_v58 }
 0x153   :  { %1715 = vrot.lane.b32.xlu1 %v736_v14, %s9331_s11  ;;  %v3166_v52 = vsel %vm3156_vm6, %v3101_v49, %v1956_v6 }
 0x154   :  { %949 = vrot.lane.b32.xlu0 %v735_v21, %s9329_s30 }
 0x155   :  { %v10159_v2 = vpop.permute.xlu1 %1445 }
 0x156   :  { %v10161_v19 = vpop.permute.xlu0 %1191 }
 0x157   :  { %2735 = vrot.lane.b32.xlu1 %v800_v11, %s9335_s12 }
 0x158   :  { %1969 = vrot.lane.b32.xlu0 %v799_v13, %s9332_s14 }
 0x159   :  { %v2466_v23 = vpop.permute.xlu1 %2465 }
 0x15a   :  { %v2212_v24 = vpop.permute.xlu0 %2211  ;;  %v3295_v25 = vsel %vm3286_vm8, %v3230_v27, %v2466_v23 }
 0x15b   :  { %1205 = vrot.lane.b32.xlu1 %v799_v13, %s9328_s29  ;;  %v3231_v33 = vsel %vm3221_vm7, %v3166_v52, %v2212_v24  ;;  %v2972_v13 = vsel %vm13924_vm2, %v2907_v8, %v10151_v18  ;;  %v2908_v18 = vsel %vm33_vm0, %v9845_v62, %v10153_v30  ;;  %v739_v62 = vld [vmem:[#allocation2 + $0x109] sm:$0xff] }
 0x15c   :  { %951 = vrot.lane.b32.xlu0 %v736_v14, %s9329_s30  ;;  %v675_v14 = vld [vmem:[#allocation2 + $0x108] sm:$0xff]  ;;  %v3037_v58 = vsel %vm13923_vm4, %v2972_v13, %v10159_v2  ;;  %v2973_v31 = vsel %vm13924_vm2, %v2908_v18, %v10161_v19  ;;  %v676_v30 = vld [vmem:[#allocation2 + $0x110] sm:$0xff] }
 0x15d   :  { %v10180_v32 = vpop.permute.xlu1 %1701  ;;  %v185_v19 = vld [vmem:[%s13911_s0 + $0x150] sm:$0xff] }
 0x15e   :  { %v10182_v34 = vpop.permute.xlu0 %1447  ;;  %v3102_v55 = vsel %vm3091_vm5, %v3037_v58, %v10180_v32  ;;  %250 = vst.msk [vmem:[#allocation2 + $0x241] sm:$0xff] %vm33_vm0, %v185_v19  ;;  %v173_v19 = vld [vmem:[%s13911_s0 + $0xf0] sm:$0xff] }
 0x15f   :  { %2225 = vrot.lane.b32.xlu1 %v10176_v7, %s9333_s19  ;;  %v3038_v32 = vsel %vm13923_vm4, %v2973_v31, %v10182_v34  ;;  %v188_v31 = vld [vmem:[%s13911_s0 + $0x168] sm:$0xff]  ;;  %238 = vst.msk [vmem:[#allocation2 + $0x181] sm:$0xff] %vm33_vm0, %v173_v19 }
 0x160   :  { %1971 = vrot.lane.b32.xlu0 %v800_v11, %s9332_s14  ;;  %253 = vst.msk [vmem:[#allocation2 + $0x261] sm:$0xff] %vm33_vm0, %v188_v31 }
 0x161   :  { %v2722_v35 = vpop.permute.xlu1 %2721 }
 0x162   :  { %v2468_v36 = vpop.permute.xlu0 %2467  ;;  %v3360_v46 = vsel %vm3351_vm9, %v3295_v25, %v2722_v35 }
 0x163   :  { %1461 = vrot.lane.b32.xlu1 %v10176_v7, %s9330_s10  ;;  %9022 = vmatprep.mubr.msk.f32.mxu0 %vm3428_vm10, %v3360_v46  ;;  %v3296_v51 = vsel %vm3286_vm8, %v3231_v33, %v2468_v36 }
 0x164   :  { %1207 = vrot.lane.b32.xlu0 %v800_v11, %s9328_s29 }
 0x165   :  { %v10210_v29 = vpop.permute.xlu1 %1703 }
 0x166   :  { %v10212_v39 = vpop.permute.xlu0 %937  ;;  %v3103_v27 = vsel %vm3091_vm5, %v3038_v32, %v10210_v29 }
 0x167   :  { %2481 = vrot.lane.b32.xlu1 %v737_v15, %s9334_s26 }
 0x168   :  { %2227 = vrot.lane.b32.xlu0 %v10206_v47, %s9333_s19 }
 0x169   :  { %v2724_v53 = vpop.permute.xlu1 %2723 }
 0x16a   :  { %v1958_v54 = vpop.permute.xlu0 %1957  ;;  %v3361_v56 = vsel %vm3351_vm9, %v3296_v51, %v2724_v53  ;;  %v804_v51 = vld [vmem:[#allocation2 + $0x112] sm:$0xff] }
 0x16b   :  { %1717 = vrot.lane.b32.xlu1 %v737_v15, %s9331_s11  ;;  %9023 = vmatmul.mubr.msk.f32.gmra.mrb[8].mxu0 %vm3428_vm10, %v3361_v56  ;;  %v3167_v57 = vsel %vm3156_vm6, %v3102_v55, %v1958_v54  ;;  %v2909_v56 = vsel %vm33_vm0, %v9877_v22, %v10212_v39 }
 0x16c   :  { %1463 = vrot.lane.b32.xlu0 %v10206_v47, %s9330_s10 }
 0x16d   :  { %v10267_v21 = vpop.permute.xlu1 %1193 }
 0x16e   :  { %v10269_v40 = vpop.permute.xlu0 %939 }
 0x16f   :  { %2737 = vrot.lane.b32.xlu1 %v801_v60, %s9335_s12 }
 0x170   :  { %2483 = vrot.lane.b32.xlu0 %v738_v61, %s9334_s26 }
 0x171   :  { %v2214_v42 = vpop.permute.xlu1 %2213 }
 0x172   :  { %v1960_v0 = vpop.permute.xlu0 %1959  ;;  %v3232_v20 = vsel %vm3221_vm7, %v3167_v57, %v2214_v42  ;;  %v187_v42 = vld [vmem:[%s13911_s0 + $0x160] sm:$0xff] }
 0x173   :  { %1719 = vrot.lane.b32.xlu1 %v738_v61, %s9331_s11  ;;  %v3168_v12 = vsel %vm3156_vm6, %v3103_v27, %v1960_v0  ;;  %252 = vst.msk [vmem:[#allocation2 + $0x259] sm:$0xff] %vm33_vm0, %v187_v42  ;;  %v2974_v0 = vsel %vm13924_vm2, %v2909_v56, %v10267_v21  ;;  %v2910_v21 = vsel %vm33_vm0, %v9903_v41, %v10269_v40  ;;  %v741_v57 = vld [vmem:[#allocation2 + $0x121] sm:$0xff] }
 0x174   :  { %953 = vrot.lane.b32.xlu0 %v737_v15, %s9329_s30  ;;  %v803_v15 = vld [vmem:[#allocation2 + $0x10a] sm:$0xff] }
 0x175   :  { %v10275_v50 = vpop.permute.xlu1 %1449 }
 0x176   :  { %v10277_v5 = vpop.permute.xlu0 %1195  ;;  %v3039_v8 = vsel %vm13923_vm4, %v2974_v0, %v10275_v50 }
 0x177   :  { %2739 = vrot.lane.b32.xlu1 %v802_v4, %s9335_s12 }
 0x178   :  { %1973 = vrot.lane.b32.xlu0 %v801_v60, %s9332_s14 }
 0x179   :  { %v2470_v3 = vpop.permute.xlu1 %2469 }
 0x17a   :  { %v2216_v9 = vpop.permute.xlu0 %2215  ;;  %v3297_v2 = vsel %vm3286_vm8, %v3232_v20, %v2470_v3  ;;  %v678_v20 = vld [vmem:[#allocation2 + $0x128] sm:$0xff] }
 0x17b   :  { %1209 = vrot.lane.b32.xlu1 %v801_v60, %s9328_s29  ;;  %v3233_v25 = vsel %vm3221_vm7, %v3168_v12, %v2216_v9 }
 0x17c   :  { %955 = vrot.lane.b32.xlu0 %v738_v61, %s9329_s30 }
 0x17d   :  { %v10290_v6 = vpop.permute.xlu1 %1705 }
 0x17e   :  { %v10292_v11 = vpop.permute.xlu0 %1451  ;;  %v3104_v3 = vsel %vm3091_vm5, %v3039_v8, %v10290_v6  ;;  %v2975_v6 = vsel %vm13924_vm2, %v2910_v21, %v10277_v5 }
 0x17f   :  { %2229 = vrot.lane.b32.xlu1 %v675_v14, %s9333_s19  ;;  %v3040_v41 = vsel %vm13923_vm4, %v2975_v6, %v10292_v11  ;;  %v807_v6 = vld [vmem:[#allocation2 + $0x13a] sm:$0xff] }
 0x180   :  { %1975 = vrot.lane.b32.xlu0 %v802_v4, %s9332_s14 }
 0x181   :  { %v2726_v17 = vpop.permute.xlu1 %2725 }
 0x182   :  { %v2472_v23 = vpop.permute.xlu0 %2471  ;;  %v3362_v24 = vsel %vm3351_vm9, %v3297_v2, %v2726_v17 }
 0x183   :  { %1465 = vrot.lane.b32.xlu1 %v675_v14, %s9330_s10  ;;  %9025 = vmatprep.mubr.msk.f32.mxu0 %vm3428_vm10, %v3362_v24  ;;  %v3298_v34 = vsel %vm3286_vm8, %v3233_v25, %v2472_v23  ;;  %v806_v25 = vld [vmem:[#allocation2 + $0x12a] sm:$0xff] }
 0x184   :  { %1211 = vrot.lane.b32.xlu0 %v802_v4, %s9328_s29  ;;  %v677_v4 = vld [vmem:[#allocation2 + $0x120] sm:$0xff] }
 0x185   :  { %v10316_v45 = vpop.permute.xlu1 %1707 }
 0x186   :  { %v10318_v63 = vpop.permute.xlu0 %941  ;;  %v3105_v2 = vsel %vm3091_vm5, %v3040_v41, %v10316_v45 }
 0x187   :  { %2485 = vrot.lane.b32.xlu1 %v739_v62, %s9334_s26 }
 0x188   :  { %2231 = vrot.lane.b32.xlu0 %v676_v30, %s9333_s19 }
 0x189   :  { %v2728_v35 = vpop.permute.xlu1 %2727 }
 0x18a   :  { %v1962_v36 = vpop.permute.xlu0 %1961  ;;  %v3363_v46 = vsel %vm3351_vm9, %v3298_v34, %v2728_v35 }
 0x18b   :  { %1721 = vrot.lane.b32.xlu1 %v739_v62, %s9331_s11  ;;  %9026 = vmatmul.mubr.msk.f32.gmra.mrb[10].mxu0 %vm3428_vm10, %v3363_v46  ;;  %v3169_v9 = vsel %vm3156_vm6, %v3104_v3, %v1962_v36  ;;  %v2911_v36 = vsel %vm33_vm0, %v9948_v10, %v10318_v63  ;;  %v680_v3 = vld [vmem:[#allocation2 + $0x140] sm:$0xff] }
 0x18c   :  { %1467 = vrot.lane.b32.xlu0 %v676_v30, %s9330_s10  ;;  %v742_v30 = vld [vmem:[#allocation2 + $0x129] sm:$0xff] }
 0x18d   :  { %v10343_v29 = vpop.permute.xlu1 %1197 }
 0x18e   :  { %v10345_v49 = vpop.permute.xlu0 %943  ;;  %v2976_v48 = vsel %vm13924_vm2, %v2911_v36, %v10343_v29  ;;  %v174_v29 = vld [vmem:[%s13911_s0 + $0xf8] sm:$0xff] }
 0x18f   :  { %2741 = vrot.lane.b32.xlu1 %v803_v15, %s9335_s12  ;;  %239 = vst.msk [vmem:[#allocation2 + $0x189] sm:$0xff] %vm33_vm0, %v174_v29 }
 0x190   :  { %2487 = vrot.lane.b32.xlu0 %v740_v37, %s9334_s26 }
 0x191   :  { %v2218_v52 = vpop.permute.xlu1 %2217 }
 0x192   :  { %v1964_v33 = vpop.permute.xlu0 %1963  ;;  %v3234_v13 = vsel %vm3221_vm7, %v3169_v9, %v2218_v52 }
 0x193   :  { %1723 = vrot.lane.b32.xlu1 %v740_v37, %s9331_s11  ;;  %v3170_v17 = vsel %vm3156_vm6, %v3105_v2, %v1964_v33 }
 0x194   :  { %957 = vrot.lane.b32.xlu0 %v739_v62, %s9329_s30  ;;  %v805_v62 = vld [vmem:[#allocation2 + $0x122] sm:$0xff] }
 0x195   :  { %v10351_v53 = vpop.permute.xlu1 %1453 }
 0x196   :  { %v10353_v54 = vpop.permute.xlu0 %1199 }
 0x197   :  { %2743 = vrot.lane.b32.xlu1 %v804_v51, %s9335_s12 }
 0x198   :  { %1977 = vrot.lane.b32.xlu0 %v803_v15, %s9332_s14 }
 0x199   :  { %v2474_v60 = vpop.permute.xlu1 %2473 }
 0x19a   :  { %v2220_v61 = vpop.permute.xlu0 %2219  ;;  %v3299_v50 = vsel %vm3286_vm8, %v3234_v13, %v2474_v60  ;;  %v2912_v60 = vsel %vm33_vm0, %v9978_v28, %v10345_v49 }
 0x19b   :  { %1213 = vrot.lane.b32.xlu1 %v803_v15, %s9328_s29  ;;  %v3235_v5 = vsel %vm3221_vm7, %v3170_v17, %v2220_v61  ;;  %v679_v15 = vld [vmem:[#allocation2 + $0x138] sm:$0xff]  ;;  %v2977_v8 = vsel %vm13924_vm2, %v2912_v60, %v10353_v54  ;;  %v10494_v17 = vld [vmem:[%s13913_s2] ss:$0 sm:$0xff] }
 0x19c   :  { %959 = vrot.lane.b32.xlu0 %v740_v37, %s9329_s30  ;;  %v3041_v37 = vsel %vm13923_vm4, %v2976_v48, %v10351_v53 }
 0x19d   :  { %v10370_v22 = vpop.permute.xlu1 %1709 }
 0x19e   :  { %v10372_v39 = vpop.permute.xlu0 %1455  ;;  %v3106_v10 = vsel %vm3091_vm5, %v3041_v37, %v10370_v22  ;;  %v743_v22 = vld [vmem:[#allocation2 + $0x139] sm:$0xff]  ;;  %v681_v37 = vld [vmem:[#allocation2 + $0x150] sm:$0xff] }
 0x19f   :  { %2233 = vrot.lane.b32.xlu1 %v677_v4, %s9333_s19  ;;  %v3042_v28 = vsel %vm13923_vm4, %v2977_v8, %v10372_v39  ;;  %v189_v39 = vld [vmem:[%s13911_s0 + $0x170] sm:$0xff] }
 0x1a0   :  { %1979 = vrot.lane.b32.xlu0 %v804_v51, %s9332_s14  ;;  %254 = vst.msk [vmem:[#allocation2 + $0x271] sm:$0xff] %vm33_vm0, %v189_v39  ;;  %v10554_v39 = vld [vmem:[#allocation2 + $0x151] sm:$0xff] }
 0x1a1   :  { %v2730_v14 = vpop.permute.xlu1 %2729 }
 0x1a2   :  { %v2476_v58 = vpop.permute.xlu0 %2475  ;;  %v3364_v55 = vsel %vm3351_vm9, %v3299_v50, %v2730_v14 }
 0x1a3   :  { %1469 = vrot.lane.b32.xlu1 %v677_v4, %s9330_s10  ;;  %9028 = vmatprep.mubr.msk.f32.mxu0 %vm3428_vm10, %v3364_v55  ;;  %v3300_v23 = vsel %vm3286_vm8, %v3235_v5, %v2476_v58  ;;  %v808_v5 = vld [vmem:[#allocation2 + $0x142] sm:$0xff] }
 0x1a4   :  { %1215 = vrot.lane.b32.xlu0 %v804_v51, %s9328_s29 }
 0x1a5   :  { %v10392_v40 = vpop.permute.xlu1 %1711 }
 0x1a6   :  { %v10394_v18 = vpop.permute.xlu0 %945  ;;  %v3107_v13 = vsel %vm3091_vm5, %v3042_v28, %v10392_v40 }
 0x1a7   :  { %2489 = vrot.lane.b32.xlu1 %v741_v57, %s9334_s26 }
 0x1a8   :  { %2235 = vrot.lane.b32.xlu0 %v678_v20, %s9333_s19 }
 0x1a9   :  { %v2732_v24 = vpop.permute.xlu1 %2731 }
 0x1aa   :  { %v1966_v26 = vpop.permute.xlu0 %1965  ;;  %v3365_v11 = vsel %vm3351_vm9, %v3300_v23, %v2732_v24  ;;  %v9336_v23 = vmov 1983009808  }
 0x1ab   :  { %1725 = vrot.lane.b32.xlu1 %v741_v57, %s9331_s11  ;;  %9029 = vmatmul.mubr.msk.f32.gmra.mrb[12].mxu0 %vm3428_vm10, %v3365_v11  ;;  %v3171_v63 = vsel %vm3156_vm6, %v3106_v10, %v1966_v26  ;;  %v4140_v24 = vunpack.c.l.s4 %v9336_v23  ;;  %v4142_v26 = vlaneseq }
 0x1ac   :  { %1471 = vrot.lane.b32.xlu0 %v678_v20, %s9330_s10 }
 0x1ad   :  { %v10411_v32 = vpop.permute.xlu1 %1201  ;;  %v4141_v19 = vunpack.c.0.s8 %v4140_v24 }
 0x1ae   :  { %v10413_v45 = vpop.permute.xlu0 %947 }
 0x1af   :  { %2745 = vrot.lane.b32.xlu1 %v805_v62, %s9335_s12 }
 0x1b0   :  { %2491 = vrot.lane.b32.xlu0 %v742_v30, %s9334_s26 }
 0x1b1   :  { %v2222_v27 = vpop.permute.xlu1 %2221 }
 0x1b2   :  { %v1968_v12 = vpop.permute.xlu0 %1967  ;;  %v3236_v53 = vsel %vm3221_vm7, %v3171_v63, %v2222_v27 }
 0x1b3   :  { %1727 = vrot.lane.b32.xlu1 %v742_v30, %s9331_s11  ;;  %v3172_v21 = vsel %vm3156_vm6, %v3107_v13, %v1968_v12  ;;  %v2913_v12 = vsel %vm33_vm0, %v10024_v59, %v10394_v18 }
 0x1b4   :  { %961 = vrot.lane.b32.xlu0 %v741_v57, %s9329_s30  ;;  %v744_v57 = vld [vmem:[#allocation2 + $0x141] sm:$0xff] }
 0x1b5   :  { %v10423_v34 = vpop.permute.xlu1 %1457 }
 0x1b6   :  { %v10425_v35 = vpop.permute.xlu0 %1203 }
 0x1b7   :  { %2747 = vrot.lane.b32.xlu1 %v806_v25, %s9335_s12 }
 0x1b8   :  { %1981 = vrot.lane.b32.xlu0 %v805_v62, %s9332_s14 }
 0x1b9   :  { %v2478_v38 = vpop.permute.xlu1 %2477 }
 0x1ba   :  { %v2224_v46 = vpop.permute.xlu0 %2223  ;;  %v3301_v61 = vsel %vm3286_vm8, %v3236_v53, %v2478_v38 }
 0x1bb   :  { %1217 = vrot.lane.b32.xlu1 %v805_v62, %s9328_s29  ;;  %v3237_v54 = vsel %vm3221_vm7, %v3172_v21, %v2224_v46 }
 0x1bc   :  { %963 = vrot.lane.b32.xlu0 %v742_v30, %s9329_s30  ;;  %v190_v30 = vld [vmem:[%s13911_s0 + $0x178] sm:$0xff] }
 0x1bd   :  { %v10438_v52 = vpop.permute.xlu1 %1713  ;;  %255 = vst.msk [vmem:[#allocation2 + $0x279] sm:$0xff] %vm33_vm0, %v190_v30 }
 0x1be   :  { %v10440_v33 = vpop.permute.xlu0 %1459  ;;  %v9012_v51 = vpop.f32.mrb[0].mxu0 }
 0x1bf   :  { %2237 = vrot.lane.b32.xlu1 %v679_v15, %s9333_s19  ;;  %v3691_v56 = vpop.f32.mrb[1].mxu0  ;;  %v3697_v62 = vadd.f32 %v9012_v51, %v10494_v17 }
 0x1c0   :  { %1983 = vrot.lane.b32.xlu0 %v806_v25, %s9332_s14  ;;  %v3692_v27 = vadd.f32 %v10494_v17, %v3691_v56 }
 0x1c1   :  { %v2734_v42 = vpop.permute.xlu1 %2733  ;;  %v4011_v46 = vmax.f32 %v3697_v62, 0.0 }
 0x1c2   :  { %v2480_v0 = vpop.permute.xlu0 %2479  ;;  %v3366_v4 = vsel %vm3351_vm9, %v3301_v61, %v2734_v42  ;;  %v4010_v48 = vmax.f32 %v3692_v27, 0.0 }
 0x1c3   :  { %1473 = vrot.lane.b32.xlu1 %v679_v15, %s9330_s10  ;;  %9031 = vmatprep.mubr.msk.f32.mxu0 %vm3428_vm10, %v3366_v4  ;;  %v3302_v50 = vsel %vm3286_vm8, %v3237_v54, %v2480_v0  ;;  %v2978_v15 = vsel %vm13924_vm2, %v2913_v12, %v10411_v32  ;;  %v4155_v29 = vcombine.high %v4011_v46, %v4011_v46 }
 0x1c4   :  { %1219 = vrot.lane.b32.xlu0 %v806_v25, %s9328_s29  ;;  %v4143_v25 = vshrl.u32 %v4142_v26, 7  ;;  %v3043_v10 = vsel %vm13923_vm4, %v2978_v15, %v10423_v34  ;;  %v4138_v53 = vcombine.high %v4010_v48, %v4010_v48  ;;  %v2914_v32 = vsel %vm33_vm0, %v10054_v16, %v10413_v45 }
 0x1c5   :  { %v10464_v49 = vpop.permute.xlu1 %1715  ;;  %v3108_v51 = vsel %vm3091_vm5, %v3043_v10, %v10438_v52  ;;  %v2979_v45 = vsel %vm13924_vm2, %v2914_v32, %v10425_v35 }
 0x1c6   :  { %v10466_v9 = vpop.permute.xlu0 %949  ;;  %v10521_v63 = vsub.s32 %v4141_v19, %v4143_v25 }
 0x1c7   :  { %2493 = vrot.lane.b32.xlu1 %v743_v22, %s9334_s26 }
 0x1c8   :  { %2239 = vrot.lane.b32.xlu0 %v680_v3, %s9333_s19  ;;  %v4162_v52 = vrot.slane %v4011_v46, %v10521_v63  ;;  %v4145_v0 = vrot.slane %v4010_v48, %v10521_v63  ;;  %v4169_v28 = vrot.slane %v4155_v29, %v10521_v63  ;;  %v4152_v21 = vrot.slane %v4138_v53, %v10521_v63 }
 0x1c9   :  { %v2736_v14 = vpop.permute.xlu1 %2735 }
 0x1ca   :  { %v1970_v58 = vpop.permute.xlu0 %1969  ;;  %v3367_v55 = vsel %vm3351_vm9, %v3302_v50, %v2736_v14  ;;  %v3044_v50 = vsel %vm13923_vm4, %v2979_v45, %v10440_v33  ;;  %v4171_v24 = vcombine.high %v4169_v28, %v4169_v28  ;;  %v4154_v30 = vcombine.high %v4152_v21, %v4152_v21 }
 0x1cb   :  { %1729 = vrot.lane.b32.xlu1 %v743_v22, %s9331_s11  ;;  %9032 = vmatmul.mubr.msk.f32.gmra.mrb[14].mxu0 %vm3428_vm10, %v3367_v55  ;;  %v3173_v56 = vsel %vm3156_vm6, %v3108_v51, %v1970_v58  ;;  %v4170_v55 = vcombine.high %v4162_v52, %v4162_v52 }
 0x1cc   :  { %1475 = vrot.lane.b32.xlu0 %v680_v3, %s9330_s10 }
 0x1cd   :  { %v10483_v20 = vpop.permute.xlu1 %1205 }
 0x1ce   :  { %v10485_v41 = vpop.permute.xlu0 %951 }
 0x1cf   :  { %2749 = vrot.lane.b32.xlu1 %v807_v6, %s9335_s12 }
 0x1d0   :  { %2495 = vrot.lane.b32.xlu0 %v744_v57, %s9334_s26 }
 0x1d1   :  { %v2226_v40 = vpop.permute.xlu1 %2225 }
 0x1d2   :  { %v10489_v2 = vpop.permute.xlu0 %1971  ;;  %v3238_v34 = vsel %vm3221_vm7, %v3173_v56, %v2226_v40 }
 0x1d3   :  { %1731 = vrot.lane.b32.xlu1 %v744_v57, %s9331_s11 }
 0x1d4   :  { %965 = vrot.lane.b32.xlu0 %v743_v22, %s9329_s30 }
 0x1d5   :  { %v10498_v11 = vpop.permute.xlu1 %1461 }
 0x1d6   :  { %v10500_v31 = vpop.permute.xlu0 %1207 }
 0x1d7   :  { %2751 = vrot.lane.b32.xlu1 %v808_v5, %s9335_s12 }
 0x1d8   :  { %1985 = vrot.lane.b32.xlu0 %v807_v6, %s9332_s14 }
 0x1d9   :  { %v2482_v36 = vpop.permute.xlu1 %2481 }
 0x1da   :  { %v10513_v38 = vpop.permute.xlu0 %2227  ;;  %v3303_v4 = vsel %vm3286_vm8, %v3238_v34, %v2482_v36 }
 0x1db   :  { %1221 = vrot.lane.b32.xlu1 %v807_v6, %s9328_s29  ;;  %v4153_v6 = vcombine.high %v4145_v0, %v4145_v0 }
 0x1dc   :  { %967 = vrot.lane.b32.xlu0 %v744_v57, %s9329_s30 }
 0x1dd   :  { %v10523_v59 = vpop.permute.xlu1 %1717 }
 0x1de   :  { %v10525_v18 = vpop.permute.xlu0 %1463  ;;  %v9015_v60 = vpop.f32.mrb[2].mxu0 }
 0x1df   :  { %2241 = vrot.lane.b32.xlu1 %v681_v37, %s9333_s19  ;;  %v3707_v61 = vadd.f32 %v9015_v60, %v10494_v17  ;;  %v3701_v42 = vpop.f32.mrb[3].mxu0 }
 0x1e0   :  { %1987 = vrot.lane.b32.xlu0 %v808_v5, %s9332_s14  ;;  %v3702_v8 = vadd.f32 %v10494_v17, %v3701_v42 }
 0x1e1   :  { %v2738_v22 = vpop.permute.xlu1 %2737  ;;  %v4013_v13 = vmax.f32 %v3707_v61, 0.0 }
 0x1e2   :  { %v10541_v3 = vpop.permute.xlu0 %2483  ;;  %v3368_v16 = vsel %vm3351_vm9, %v3303_v4, %v2738_v22  ;;  %v4012_v54 = vmax.f32 %v3702_v8, 0.0 }
 0x1e3   :  { %1477 = vrot.lane.b32.xlu1 %v681_v37, %s9330_s10  ;;  %v4189_v14 = vcombine.high %v4013_v13, %v4013_v13  ;;  %v4196_v58 = vrot.slane %v4013_v13, %v10521_v63  ;;  %9034 = vmatprep.mubr.msk.f32.mxu0 %vm3428_vm10, %v3368_v16  ;;  %v10578_v13 = vld [vmem:[#allocation2 + $0x152] sm:$0xff]  ;;  %v3109_v16 = vsel %vm3091_vm5, %v3044_v50, %v10464_v49 }
 0x1e4   :  { %1223 = vrot.lane.b32.xlu0 %v808_v5, %s9328_s29  ;;  %v4172_v35 = vcombine.high %v4012_v54, %v4012_v54  ;;  %v4179_v57 = vrot.slane %v4012_v54, %v10521_v63  ;;  %v682_v5 = vld [vmem:[#allocation2 + $0x158] sm:$0xff] }
 0x1e5   :  { %v10557_v40 = vpop.permute.xlu1 %1719  ;;  %v4203_v33 = vrot.slane %v4189_v14, %v10521_v63  ;;  %v4204_v26 = vcombine.high %v4196_v58, %v4196_v58  ;;  %v5486_v62 = vmax.f32 %v4162_v52, %v4196_v58 }
 0x1e6   :  { %v10559_v23 = vpop.permute.xlu0 %953  ;;  %v4186_v27 = vrot.slane %v4172_v35, %v10521_v63  ;;  %v4187_v12 = vcombine.high %v4179_v57, %v4179_v57  ;;  %v5482_v19 = vmax.f32 %v4145_v0, %v4179_v57 }
 0x1e7   :  { %2497 = vrot.lane.b32.xlu1 %v10554_v39, %s9334_s26  ;;  %v4205_v25 = vcombine.high %v4203_v33, %v4203_v33  ;;  %v5487_v36 = vmax.f32 %v4170_v55, %v4204_v26  ;;  %v5488_v46 = vmax.f32 %v4169_v28, %v4203_v33  ;;  %v5639_v48 = vsel %vm13922_vm11, %v5486_v62, -inf  ;;  %v10586_v55 = vld [vmem:[#allocation2 + $0x159] sm:$0xff] }
 0x1e8   :  { %2243 = vrot.lane.b32.xlu0 %v682_v5, %s9333_s19  ;;  %v5640_v15 = vrot.slane %v5639_v48, 4  ;;  %v4188_v37 = vcombine.high %v4186_v27, %v4186_v27  ;;  %v5483_v10 = vmax.f32 %v4153_v6, %v4187_v12  ;;  %v5484_v51 = vmax.f32 %v4152_v21, %v4186_v27 }
 0x1e9   :  { %v2740_v29 = vpop.permute.xlu1 %2739  ;;  %v5489_v56 = vmax.f32 %v4171_v24, %v4205_v25  ;;  %v5646_v60 = vsel %vm13922_vm11, %v5487_v36, -inf  ;;  %v5653_v32 = vsel %vm13922_vm11, %v5488_v46, -inf  ;;  %v5611_v34 = vsel %vm13922_vm11, %v5482_v19, -inf }
 0x1ea   :  { %v10567_v53 = vpop.permute.xlu0 %1973  ;;  %v5641_v61 = vmax.f32 %v5639_v48, %v5640_v15  ;;  %v5647_v42 = vrot.slane %v5646_v60, 4  ;;  %v5654_v52 = vrot.slane %v5653_v32, 4  ;;  %v5485_v0 = vmax.f32 %v4154_v30, %v4188_v37 }
 0x1eb   :  { %1733 = vrot.lane.b32.xlu1 %v10554_v39, %s9331_s11  ;;  %v5660_v4 = vsel %vm13922_vm11, %v5489_v56, -inf  ;;  %v5612_v8 = vrot.slane %v5611_v34, 4  ;;  %v5618_v22 = vsel %vm13922_vm11, %v5483_v10, -inf  ;;  %v5625_v28 = vsel %vm13922_vm11, %v5484_v51, -inf }
 0x1ec   :  { %1479 = vrot.lane.b32.xlu0 %v682_v5, %s9330_s10  ;;  %v5648_v45 = vmax.f32 %v5646_v60, %v5647_v42  ;;  %v5655_v21 = vmax.f32 %v5653_v32, %v5654_v52  ;;  %v5661_v54 = vrot.slane %v5660_v4, 4  ;;  %v5619_v35 = vrot.slane %v5618_v22, 4  ;;  %v10607_v42 = vld [vmem:[#allocation2 + $0x15a] sm:$0xff] }
 0x1ed   :  { %v10582_v14 = vpop.permute.xlu1 %1209  ;;  %v5613_v6 = vmax.f32 %v5611_v34, %v5612_v8  ;;  %v5626_v57 = vrot.slane %v5625_v28, 4  ;;  %v5632_v24 = vsel %vm13922_vm11, %v5485_v0, -inf  ;;  %v3174_v5 = vsel %vm3156_vm6, %v3109_v16, %v10489_v2 }
 0x1ee   :  { %v10584_v58 = vpop.permute.xlu0 %955  ;;  %v5642_v33 = vrot.slane %v5641_v61, 2  ;;  %v5649_v26 = vrot.slane %v5648_v45, 2  ;;  %v5662_v49 = vmax.f32 %v5660_v4, %v5661_v54  ;;  %v5620_v62 = vmax.f32 %v5618_v22, %v5619_v35 }
 0x1ef   :  { %2753 = vrot.lane.b32.xlu1 %v10578_v13, %s9335_s12  ;;  %v5614_v50 = vrot.slane %v5613_v6, 2  ;;  %v5627_v30 = vmax.f32 %v5625_v28, %v5626_v57  ;;  %v5633_v27 = vrot.slane %v5632_v24, 4  ;;  %v3239_v12 = vsel %vm3221_vm7, %v3174_v5, %v10513_v38 }
 0x1f0   :  { %2499 = vrot.lane.b32.xlu0 %v10586_v55, %s9334_s26  ;;  %v5656_v19 = vrot.slane %v5655_v21, 2  ;;  %v5663_v25 = vrot.slane %v5662_v49, 2  ;;  %v5621_v48 = vrot.slane %v5620_v62, 2  ;;  %v5643_v10 = vmax.f32 %v5641_v61, %v5642_v33 }
 0x1f1   :  { %v10597_v36 = vpop.permute.xlu1 %2229  ;;  %v5615_v46 = vmax.f32 %v5613_v6, %v5614_v50  ;;  %v5628_v15 = vrot.slane %v5627_v30, 2  ;;  %v5634_v37 = vmax.f32 %v5632_v24, %v5633_v27  ;;  %v5650_v51 = vmax.f32 %v5648_v45, %v5649_v26  ;;  %v683_v27 = vld [vmem:[#allocation2 + $0x168] sm:$0xff] }
 0x1f2   :  { %v10599_v2 = vpop.permute.xlu0 %1975  ;;  %v3304_v56 = vsel %vm3286_vm8, %v3239_v12, %v10541_v3  ;;  %v5622_v38 = vmax.f32 %v5620_v62, %v5621_v48  ;;  %v5657_v52 = vmax.f32 %v5655_v21, %v5656_v19  ;;  %v5664_v3 = vmax.f32 %v5662_v49, %v5663_v25 }
 0x1f3   :  { %1735 = vrot.lane.b32.xlu1 %v10586_v55, %s9331_s11  ;;  %v5616_v60 = vrot.slane %v5615_v46, 1  ;;  %v5629_v32 = vmax.f32 %v5627_v30, %v5628_v15  ;;  %v5635_v34 = vrot.slane %v5634_v37, 2  ;;  %v3369_v0 = vsel %vm3351_vm9, %v3304_v56, %v2740_v29 }
 0x1f4   :  { %969 = vrot.lane.b32.xlu0 %v10554_v39, %s9329_s30  ;;  %v5623_v8 = vrot.slane %v5622_v38, 1  ;;  %9035 = vmatmul.mubr.msk.f32.gmra.mrb[16].mxu0 %vm3428_vm10, %v3369_v0  ;;  %v5644_v16 = vrot.slane %v5643_v10, 1  ;;  %v5651_v45 = vrot.slane %v5650_v51, 1  ;;  %v175_v39 = vld [vmem:[%s13911_s0 + $0x100] sm:$0xff]  ;;  %v2915_v35 = vsel %vm33_vm0, %v10100_v43, %v10466_v9 }
 0x1f5   :  { %v10610_v61 = vpop.permute.xlu1 %1465  ;;  %v5630_v22 = vrot.slane %v5629_v32, 1  ;;  %v5636_v28 = vmax.f32 %v5634_v37, %v5635_v34  ;;  %v5617_v29 = vmax.f32 %v5615_v46, %v5616_v60  ;;  %240 = vst.msk [vmem:[#allocation2 + $0x1c9] sm:$0xff] %vm33_vm0, %v175_v39  ;;  %v5658_v57 = vrot.slane %v5657_v52, 1 }
 0x1f6   :  { %v10612_v4 = vpop.permute.xlu0 %1211  ;;  %v5624_v21 = vmax.f32 %v5622_v38, %v5623_v8  ;;  %v5665_v33 = vrot.slane %v5664_v3, 1  ;;  %v5645_v50 = vmax.f32 %v5643_v10, %v5644_v16  ;;  %v2980_v30 = vsel %vm13924_vm2, %v2915_v35, %v10483_v20  ;;  %v747_v16 = vld [vmem:[#allocation2 + $0x169] sm:$0xff] }
 0x1f7   :  { %2755 = vrot.lane.b32.xlu1 %v10607_v42, %s9335_s12  ;;  %v5631_v54 = vmax.f32 %v5629_v32, %v5630_v22  ;;  %v5637_v6 = vrot.slane %v5636_v28, 1  ;;  %v5652_v43 = vmax.f32 %v5650_v51, %v5651_v45  ;;  %v3045_v12 = vsel %vm13923_vm4, %v2980_v30, %v10498_v11  ;;  %v380_v32 = vld [vmem:[#allocation2 + $0x241] sm:$0xff] }
 0x1f8   :  { %1989 = vrot.lane.b32.xlu0 %v10578_v13, %s9332_s14  ;;  %v6676_v49 = vsel %vm6675_vm12, %v5624_v21, %v5617_v29  ;;  %v5659_v19 = vmax.f32 %v5657_v52, %v5658_v57  ;;  %v3110_v20 = vsel %vm3091_vm5, %v3045_v12, %v10523_v59  ;;  %v5666_v48 = vmax.f32 %v5664_v3, %v5665_v33  ;;  %v444_v21 = vld [vmem:[#allocation2 + $0x242] sm:$0xff] }
 0x1f9   :  { %v2486_v24 = vpop.permute.xlu1 %2485  ;;  %v5638_v26 = vmax.f32 %v5636_v28, %v5637_v6  ;;  %v6678_v62 = vsel %vm13921_vm13, %v5631_v54, %v6676_v49  ;;  %vm13925_vm13 = vcmask 1047559   ;;  %v3175_v37 = vsel %vm3156_vm6, %v3110_v20, %v10567_v53  ;;  %v748_v54 = vld [vmem:[#allocation2 + $0x171] sm:$0xff]  ;;  %v192_v49 = vld [vmem:[%s13911_s0 + $0x188] sm:$0xff] }
 0x1fa   :  { %v2232_v5 = vpop.permute.xlu0 %2231  ;;  %v3240_v51 = vsel %vm3221_vm7, %v3175_v37, %v10597_v36  ;;  %v2916_v56 = vsel %vm33_vm0, %v10130_v44, %v10485_v41  ;;  %v684_v44 = vld [vmem:[#allocation2 + $0x170] sm:$0xff]  ;;  %257 = vst.msk [vmem:[#allocation2 + $0x291] sm:$0xff] %vm33_vm0, %v192_v49 }
 0x1fb   :  { %1225 = vrot.lane.b32.xlu1 %v10578_v13, %s9328_s29  ;;  %v6680_v9 = vsel %vm6679_vm14, %v5638_v26, %v6678_v62  ;;  %v3305_v53 = vsel %vm3286_vm8, %v3240_v51, %v2486_v24  ;;  %v2981_v36 = vsel %vm13924_vm2, %v2916_v56, %v10500_v31  ;;  %v176_v31 = vld [vmem:[%s13911_s0 + $0x108] sm:$0xff]  ;;  %v2917_v62 = vsel %vm33_vm0, %v10176_v7, %v10559_v23 }
 0x1fc   :  { %971 = vrot.lane.b32.xlu0 %v10586_v55, %s9329_s30  ;;  %v6682_v25 = vsel %vm6681_vm15, %v5645_v50, %v6680_v9  ;;  %v3046_v41 = vsel %vm13923_vm4, %v2981_v36, %v10525_v18  ;;  %v381_v18 = vld [vmem:[#allocation2 + $0x249] sm:$0xff]  ;;  %241 = vst.msk [vmem:[#allocation2 + $0x1d1] sm:$0xff] %vm33_vm0, %v176_v31  ;;  %v508_v50 = vld [vmem:[#allocation2 + $0x258] sm:$0xff]  ;;  %v509_v31 = vld [vmem:[#allocation2 + $0x260] sm:$0xff] }
 0x1fd   :  { %v10638_v46 = vpop.permute.xlu1 %1721  ;;  %v6684_v15 = vsel %vm13927_vm1, %v5652_v43, %v6682_v25  ;;  %v3111_v3 = vsel %vm3091_vm5, %v3046_v41, %v10557_v40  ;;  %v445_v9 = vld [vmem:[#allocation2 + $0x24a] sm:$0xff] }
 0x1fe   :  { %v10640_v13 = vpop.permute.xlu0 %1467  ;;  %v6686_v55 = vsel %vm13926_vm3, %v5659_v19, %v6684_v15  ;;  %v9018_v11 = vpop.f32.mrb[4].mxu0  ;;  %v2982_v19 = vsel %vm13924_vm2, %v2917_v62, %v10582_v14  ;;  %v2918_v14 = vsel %vm33_vm0, %v10206_v47, %v10584_v58 }
 0x1ff   :  { %2245 = vrot.lane.b32.xlu1 %v683_v27, %s9333_s19  ;;  %v6688_v10 = vsel %vm13925_vm13, %v5666_v48, %v6686_v55  ;;  %v3711_v59 = vpop.f32.mrb[5].mxu0  ;;  %v3717_v33 = vadd.f32 %v9018_v11, %v10494_v17  ;;  %v3047_v25 = vsel %vm13923_vm4, %v2982_v19, %v10610_v61 }
 0x200   :  { %1991 = vrot.lane.b32.xlu0 %v10607_v42, %s9332_s14  ;;  %6811 = vst.msk [vmem:[#allocation3 + $0x11] sm:$0xff] %vm13924_vm2, %v6688_v10  ;;  %v3712_v26 = vadd.f32 %v10494_v17, %v3711_v59  ;;  %v3112_v7 = vsel %vm3091_vm5, %v3047_v25, %v10638_v46 }
 0x201   :  { %v2742_v60 = vpop.permute.xlu1 %2741 }
 0x202   :  { %v2488_v38 = vpop.permute.xlu0 %2487  ;;  %v3370_v34 = vsel %vm3351_vm9, %v3305_v53, %v2742_v60  ;;  %v4014_v12 = vmax.f32 %v3712_v26, 0.0 }
 0x203   :  { %1227 = vrot.lane.b32.xlu1 %v10607_v42, %s9328_s29  ;;  %9037 = vmatprep.mubr.msk.f32.mxu0 %vm3428_vm10, %v3370_v34  ;;  %v3176_v42 = vsel %vm3156_vm6, %v3111_v3, %v10599_v2  ;;  %v191_v2 = vld [vmem:[%s13911_s0 + $0x180] sm:$0xff]  ;;  %v2983_v34 = vsel %vm13924_vm2, %v2918_v14, %v10612_v4 }
 0x204   :  { %1001 = vrot.lane.b32.xlu0 %v380_v32, %s9329_s30  ;;  %v3241_v8 = vsel %vm3221_vm7, %v3176_v42, %v2232_v5  ;;  %256 = vst.msk [vmem:[#allocation2 + $0x289] sm:$0xff] %vm33_vm0, %v191_v2  ;;  %v10706_v5 = vld [vmem:[#allocation2 + $0x16a] sm:$0xff]  ;;  %v4206_v15 = vcombine.high %v4014_v12, %v4014_v12  ;;  %v4213_v51 = vrot.slane %v4014_v12, %v10521_v63 }
 0x205   :  { %v10668_v52 = vpop.permute.xlu1 %1723  ;;  %v3306_v22 = vsel %vm3286_vm8, %v3241_v8, %v2488_v38  ;;  %v10749_v38 = vld [vmem:[#allocation2 + $0x172] sm:$0xff]  ;;  %v3048_v41 = vsel %vm13923_vm4, %v2983_v34, %v10640_v13 }
 0x206   :  { %v10670_v0 = vpop.permute.xlu0 %957  ;;  %v4220_v36 = vrot.slane %v4206_v15, %v10521_v63 }
 0x207   :  { %2247 = vrot.lane.b32.xlu1 %v684_v44, %s9333_s19 }
 0x208   :  { %1481 = vrot.lane.b32.xlu0 %v683_v27, %s9330_s10  ;;  %v4015_v27 = vmax.f32 %v3717_v33, 0.0 }
 0x209   :  { %v2744_v28 = vpop.permute.xlu1 %2743 }
 0x20a   :  { %v1978_v40 = vpop.permute.xlu0 %1977  ;;  %v3371_v45 = vsel %vm3351_vm9, %v3306_v22, %v2744_v28  ;;  %v4223_v23 = vcombine.high %v4015_v27, %v4015_v27  ;;  %v4230_v46 = vrot.slane %v4015_v27, %v10521_v63 }
 0x20b   :  { %1003 = vrot.lane.b32.xlu1 %v381_v18, %s9329_s30  ;;  %9038 = vmatmul.mubr.msk.f32.gmra.mrb[18].mxu0 %vm3428_vm10, %v3371_v45  ;;  %v3177_v55 = vsel %vm3156_vm6, %v3112_v7, %v1978_v40  ;;  %v4221_v18 = vcombine.high %v4213_v51, %v4213_v51  ;;  %v572_v7 = vld [vmem:[#allocation2 + $0x259] sm:$0xff] }
 0x20c   :  { %2501 = vrot.lane.b32.xlu0 %v747_v16, %s9334_s26  ;;  %v4237_v47 = vrot.slane %v4223_v23, %v10521_v63  ;;  %v4238_v8 = vcombine.high %v4230_v46, %v4230_v46 }
 0x20d   :  { %v10692_v39 = vpop.permute.xlu1 %1213 }
 0x20e   :  { %v10694_v29 = vpop.permute.xlu0 %959 }
 0x20f   :  { %1483 = vrot.lane.b32.xlu1 %v684_v44, %s9330_s10 }
 0x210   :  { %1257 = vrot.lane.b32.xlu0 %v444_v21, %s9328_s29  ;;  %v4222_v21 = vcombine.high %v4220_v36, %v4220_v36 }
 0x211   :  { %v2234_v6 = vpop.permute.xlu1 %2233 }
 0x212   :  { %v10698_v35 = vpop.permute.xlu0 %1979  ;;  %v3242_v61 = vsel %vm3221_vm7, %v3177_v55, %v2234_v6 }
 0x213   :  { %2503 = vrot.lane.b32.xlu1 %v748_v54, %s9334_s26 }
 0x214   :  { %1737 = vrot.lane.b32.xlu0 %v747_v16, %s9331_s11 }
 0x215   :  { %v10702_v57 = vpop.permute.xlu1 %1469 }
 0x216   :  { %v10704_v24 = vpop.permute.xlu0 %1215 }
 0x217   :  { %973 = vrot.lane.b32.xlu1 %v747_v16, %s9329_s30  ;;  %v4239_v16 = vcombine.high %v4237_v47, %v4237_v47 }
 0x218   :  { %2757 = vrot.lane.b32.xlu0 %v10706_v5, %s9335_s12 }
 0x219   :  { %v2490_v30 = vpop.permute.xlu1 %2489 }
 0x21a   :  { %v10720_v43 = vpop.permute.xlu0 %2235  ;;  %v3307_v59 = vsel %vm3286_vm8, %v3242_v61, %v2490_v30 }
 0x21b   :  { %1513 = vrot.lane.b32.xlu1 %v508_v50, %s9330_s10 }
 0x21c   :  { %1259 = vrot.lane.b32.xlu0 %v445_v9, %s9328_s29 }
 0x21d   :  { %v10728_v20 = vpop.permute.xlu1 %1725 }
 0x21e   :  { %v10730_v48 = vpop.permute.xlu0 %1471  ;;  %v9021_v37 = vpop.f32.mrb[6].mxu0 }
 0x21f   :  { %1993 = vrot.lane.b32.xlu1 %v10706_v5, %s9332_s14  ;;  %v3727_v11 = vadd.f32 %v9021_v37, %v10494_v17  ;;  %v3721_v10 = vpop.f32.mrb[7].mxu0 }
 0x220   :  { %1739 = vrot.lane.b32.xlu0 %v748_v54, %s9331_s11  ;;  %v3722_v56 = vadd.f32 %v10494_v17, %v3721_v10 }
 0x221   :  { %v2746_v53 = vpop.permute.xlu1 %2745  ;;  %v4017_v58 = vmax.f32 %v3727_v11, 0.0 }
 0x222   :  { %v10747_v60 = vpop.permute.xlu0 %2491  ;;  %v3372_v32 = vsel %vm3351_vm9, %v3307_v59, %v2746_v53  ;;  %v4016_v44 = vmax.f32 %v3722_v56, 0.0  ;;  %v3113_v53 = vsel %vm3091_vm5, %v3048_v41, %v10668_v52 }
 0x223   :  { %975 = vrot.lane.b32.xlu1 %v748_v54, %s9329_s30  ;;  %9040 = vmatprep.mubr.msk.f32.mxu0 %vm3428_vm10, %v3372_v32  ;;  %v4257_v3 = vcombine.high %v4017_v58, %v4017_v58  ;;  %v4264_v42 = vrot.slane %v4017_v58, %v10521_v63 }
 0x224   :  { %2759 = vrot.lane.b32.xlu0 %v10749_v38, %s9335_s12  ;;  %v4240_v4 = vcombine.high %v4016_v44, %v4016_v44  ;;  %v4247_v22 = vrot.slane %v4016_v44, %v10521_v63  ;;  %v685_v44 = vld [vmem:[#allocation2 + $0x180] sm:$0xff] }
 0x225   :  { %v10764_v28 = vpop.permute.xlu1 %1727  ;;  %v4271_v2 = vrot.slane %v4257_v3, %v10521_v63  ;;  %v4272_v13 = vcombine.high %v4264_v42, %v4264_v42  ;;  %v5494_v45 = vmax.f32 %v4230_v46, %v4264_v42 }
 0x226   :  { %v10766_v40 = vpop.permute.xlu0 %961  ;;  %v4254_v54 = vrot.slane %v4240_v4, %v10521_v63  ;;  %v4255_v6 = vcombine.high %v4247_v22, %v4247_v22  ;;  %v5490_v33 = vmax.f32 %v4213_v51, %v4247_v22 }
 0x227   :  { %1515 = vrot.lane.b32.xlu1 %v509_v31, %s9330_s10  ;;  %v4273_v26 = vcombine.high %v4271_v2, %v4271_v2  ;;  %v5495_v49 = vmax.f32 %v4238_v8, %v4272_v13  ;;  %v5496_v50 = vmax.f32 %v4237_v47, %v4271_v2  ;;  %v5695_v62 = vsel %vm13922_vm11, %v5494_v45, -inf }
 0x228   :  { %1229 = vrot.lane.b32.xlu0 %v10706_v5, %s9328_s29  ;;  %v5696_v30 = vrot.slane %v5695_v62, 4  ;;  %v4256_v9 = vcombine.high %v4254_v54, %v4254_v54  ;;  %v5491_v27 = vmax.f32 %v4221_v18, %v4255_v6  ;;  %v5492_v12 = vmax.f32 %v4220_v36, %v4254_v54  ;;  %v177_v5 = vld [vmem:[%s13911_s0 + $0x110] sm:$0xff] }
 0x229   :  { %v2748_v19 = vpop.permute.xlu1 %2747  ;;  %v5497_v23 = vmax.f32 %v4239_v16, %v4273_v26  ;;  %v5702_v15 = vsel %vm13922_vm11, %v5495_v49, -inf  ;;  %v5709_v55 = vsel %vm13922_vm11, %v5496_v50, -inf  ;;  %v5667_v37 = vsel %vm13922_vm11, %v5490_v33, -inf  ;;  %242 = vst.msk [vmem:[#allocation2 + $0x1e1] sm:$0xff] %vm33_vm0, %v177_v5 }
 0x22a   :  { %v10774_v25 = vpop.permute.xlu0 %1981  ;;  %v5697_v14 = vmax.f32 %v5695_v62, %v5696_v30  ;;  %v5703_v61 = vrot.slane %v5702_v15, 4  ;;  %v5710_v11 = vrot.slane %v5709_v55, 4  ;;  %v5493_v10 = vmax.f32 %v4222_v21, %v4256_v9 }
 0x22b   :  { %1995 = vrot.lane.b32.xlu1 %v10749_v38, %s9332_s14  ;;  %v5716_v46 = vsel %vm13922_vm11, %v5497_v23, -inf  ;;  %v5668_v51 = vrot.slane %v5667_v37, 4  ;;  %v5674_v59 = vsel %vm13922_vm11, %v5491_v27, -inf  ;;  %v5681_v56 = vsel %vm13922_vm11, %v5492_v12, -inf  ;;  %v636_v23 = vld [vmem:[#allocation2 + $0x25a] sm:$0xff] }
 0x22c   :  { %1769 = vrot.lane.b32.xlu0 %v572_v7, %s9331_s11  ;;  %v5704_v47 = vmax.f32 %v5702_v15, %v5703_v61  ;;  %v5711_v58 = vmax.f32 %v5709_v55, %v5710_v11  ;;  %v5717_v32 = vrot.slane %v5716_v46, 4  ;;  %v5675_v42 = vrot.slane %v5674_v59, 4  ;;  %v573_v61 = vld [vmem:[#allocation2 + $0x261] sm:$0xff] }
 0x22d   :  { %v10791_v34 = vpop.permute.xlu1 %1217  ;;  %v5669_v3 = vmax.f32 %v5667_v37, %v5668_v51  ;;  %v5682_v31 = vrot.slane %v5681_v56, 4  ;;  %v5688_v8 = vsel %vm13922_vm11, %v5493_v10, -inf  ;;  %v3178_v18 = vsel %vm3156_vm6, %v3113_v53, %v10698_v35 }
 0x22e   :  { %v10793_v36 = vpop.permute.xlu0 %963  ;;  %v5698_v4 = vrot.slane %v5697_v14, 2  ;;  %v5705_v22 = vrot.slane %v5704_v47, 2  ;;  %v5718_v16 = vmax.f32 %v5716_v46, %v5717_v32  ;;  %v5676_v41 = vmax.f32 %v5674_v59, %v5675_v42  ;;  %v686_v42 = vld [vmem:[#allocation2 + $0x188] sm:$0xff] }
 0x22f   :  { %1005 = vrot.lane.b32.xlu1 %v572_v7, %s9329_s30  ;;  %v5670_v52 = vrot.slane %v5669_v3, 2  ;;  %v5683_v2 = vmax.f32 %v5681_v56, %v5682_v31  ;;  %v5689_v13 = vrot.slane %v5688_v8, 4  ;;  %v3243_v45 = vsel %vm3221_vm7, %v3178_v18, %v10720_v43 }
 0x230   :  { %2249 = vrot.lane.b32.xlu0 %v685_v44, %s9333_s19  ;;  %v5712_v21 = vrot.slane %v5711_v58, 2  ;;  %v5719_v54 = vrot.slane %v5718_v16, 2  ;;  %v5677_v26 = vrot.slane %v5676_v41, 2  ;;  %v5699_v62 = vmax.f32 %v5697_v14, %v5698_v4 }
 0x231   :  { %v10802_v6 = vpop.permute.xlu1 %2237  ;;  %v5671_v35 = vmax.f32 %v5669_v3, %v5670_v52  ;;  %v5684_v49 = vrot.slane %v5683_v2, 2  ;;  %v5690_v50 = vmax.f32 %v5688_v8, %v5689_v13  ;;  %v5706_v30 = vmax.f32 %v5704_v47, %v5705_v22  ;;  %v9286_v47 = vld [vmem:[#allocation2 + $0x108] sm:$0xff] }
 0x232   :  { %v10804_v33 = vpop.permute.xlu0 %1983  ;;  %v3308_v9 = vsel %vm3286_vm8, %v3243_v45, %v10747_v60  ;;  %v5678_v12 = vmax.f32 %v5676_v41, %v5677_v26  ;;  %v5713_v15 = vmax.f32 %v5711_v58, %v5712_v21  ;;  %v5720_v11 = vmax.f32 %v5718_v16, %v5719_v54  ;;  %v178_v16 = vld [vmem:[%s13911_s0 + $0x118] sm:$0xff] }
 0x233   :  { %1485 = vrot.lane.b32.xlu1 %v685_v44, %s9330_s10  ;;  %v5672_v27 = vrot.slane %v5671_v35, 1  ;;  %v5685_v43 = vmax.f32 %v5683_v2, %v5684_v49  ;;  %v5691_v7 = vrot.slane %v5690_v50, 2  ;;  %v3373_v55 = vsel %vm3351_vm9, %v3308_v9, %v2748_v19  ;;  %v749_v19 = vld [vmem:[#allocation2 + $0x181] sm:$0xff]  ;;  %243 = vst.msk [vmem:[#allocation2 + $0x1e9] sm:$0xff] %vm33_vm0, %v178_v16 }
 0x234   :  { %1231 = vrot.lane.b32.xlu0 %v10749_v38, %s9328_s29  ;;  %v5679_v60 = vrot.slane %v5678_v12, 1  ;;  %9041 = vmatmul.mubr.msk.f32.gmra.mrb[20].mxu0 %vm3428_vm10, %v3373_v55  ;;  %v5700_v46 = vrot.slane %v5699_v62, 1  ;;  %v5707_v51 = vrot.slane %v5706_v30, 1  ;;  %v2919_v58 = vsel %vm33_vm0, %v9286_v47, %v10670_v0  ;;  %v702_v47 = vld [vmem:[#allocation2 + $0x278] sm:$0xff] }
 0x235   :  { %v10812_v37 = vpop.permute.xlu1 %1473  ;;  %v5686_v10 = vrot.slane %v5685_v43, 1  ;;  %v5692_v5 = vmax.f32 %v5690_v50, %v5691_v7  ;;  %v5673_v38 = vmax.f32 %v5671_v35, %v5672_v27  ;;  %v5714_v32 = vrot.slane %v5713_v15, 1 }
 0x236   :  { %v10814_v14 = vpop.permute.xlu0 %1219  ;;  %v5680_v59 = vmax.f32 %v5678_v12, %v5679_v60  ;;  %v5721_v31 = vrot.slane %v5720_v11, 1  ;;  %v5701_v4 = vmax.f32 %v5699_v62, %v5700_v46  ;;  %vm13930_vm11 = vcmask 1042434  }
 0x237   :  { %2025 = vrot.lane.b32.xlu1 %v636_v23, %s9332_s14  ;;  %v5687_v56 = vmax.f32 %v5685_v43, %v5686_v10  ;;  %v5693_v53 = vrot.slane %v5692_v5, 1  ;;  %v2984_v0 = vsel %vm13924_vm2, %v2919_v58, %v10692_v39  ;;  %v5708_v52 = vmax.f32 %v5706_v30, %v5707_v51  ;;  %v813_v10 = vld [vmem:[#allocation2 + $0x182] sm:$0xff] }
 0x238   :  { %1771 = vrot.lane.b32.xlu0 %v573_v61, %s9331_s11  ;;  %v6689_v18 = vsel %vm6675_vm12, %v5680_v59, %v5673_v38  ;;  %v3049_v2 = vsel %vm13923_vm4, %v2984_v0, %v10702_v57  ;;  %v5715_v13 = vmax.f32 %v5713_v15, %v5714_v32  ;;  %v5722_v35 = vmax.f32 %v5720_v11, %v5721_v31  ;;  %v750_v51 = vld [vmem:[#allocation2 + $0x189] sm:$0xff]  ;;  %v194_v31 = vld [vmem:[%s13911_s0 + $0x198] sm:$0xff] }
 0x239   :  { %v2494_v44 = vpop.permute.xlu1 %2493  ;;  %v5694_v8 = vmax.f32 %v5692_v5, %v5693_v53  ;;  %v6690_v22 = vsel %vm13930_vm11, %v5687_v56, %v6689_v18  ;;  %v3114_v39 = vsel %vm3091_vm5, %v3049_v2, %v10728_v20  ;;  %v9287_v20 = vld [vmem:[#allocation2 + $0x110] sm:$0xff]  ;;  %259 = vst.msk [vmem:[#allocation2 + $0x2a9] sm:$0xff] %vm33_vm0, %v194_v31  ;;  %vm13931_vm11 = vcmask 58368  }
 0x23a   :  { %v2240_v3 = vpop.permute.xlu0 %2239  ;;  %v3179_v50 = vsel %vm3156_vm6, %v3114_v39, %v10774_v25  ;;  %v2920_v27 = vsel %vm33_vm0, %v9287_v20, %v10694_v29  ;;  %v368_v56 = vld [vmem:[#allocation2 + $0x1b1] sm:$0xff]  ;;  %v369_v39 = vld [vmem:[#allocation2 + $0x1b9] sm:$0xff] }
 0x23b   :  { %2505 = vrot.lane.b32.xlu1 %v749_v19, %s9334_s26  ;;  %v6691_v41 = vsel %vm6679_vm14, %v5694_v8, %v6690_v22  ;;  %v3244_v30 = vsel %vm3221_vm7, %v3179_v50, %v10802_v6  ;;  %v2985_v6 = vsel %vm13924_vm2, %v2920_v27, %v10704_v24  ;;  %v10903_v8 = vld [vmem:[#allocation2 + $0x18a] sm:$0xff]  ;;  %v432_v2 = vld [vmem:[#allocation2 + $0x1b2] sm:$0xff] }
 0x23c   :  { %2251 = vrot.lane.b32.xlu0 %v686_v42, %s9333_s19  ;;  %v6692_v45 = vsel %vm6681_vm15, %v5701_v4, %v6691_v41  ;;  %v3309_v12 = vsel %vm3286_vm8, %v3244_v30, %v2494_v44  ;;  %v3050_v29 = vsel %vm13923_vm4, %v2985_v6, %v10730_v48  ;;  %v296_v44 = vld [vmem:[#allocation2 + $0x120] sm:$0xff]  ;;  %v10908_v22 = vld [vmem:[#allocation2 + $0x271] sm:$0xff] }
 0x23d   :  { %v10835_v21 = vpop.permute.xlu1 %1729  ;;  %v6693_v26 = vsel %vm13927_vm1, %v5708_v52, %v6692_v45  ;;  %v3115_v11 = vsel %vm3091_vm5, %v3050_v29, %v10764_v28  ;;  %v193_v28 = vld [vmem:[%s13911_s0 + $0x190] sm:$0xff]  ;;  %v2921_v18 = vsel %vm33_vm0, %v296_v44, %v10766_v40 }
 0x23e   :  { %v10837_v54 = vpop.permute.xlu0 %1475  ;;  %v6694_v49 = vsel %vm13926_vm3, %v5715_v13, %v6693_v26  ;;  %v9024_v62 = vpop.f32.mrb[8].mxu0  ;;  %v3180_v60 = vsel %vm3156_vm6, %v3115_v11, %v10804_v33  ;;  %258 = vst.msk [vmem:[#allocation2 + $0x2a1] sm:$0xff] %vm33_vm0, %v193_v28  ;;  %v2986_v41 = vsel %vm13924_vm2, %v2921_v18, %v10791_v34  ;;  %v297_v13 = vld [vmem:[#allocation2 + $0x128] sm:$0xff] }
 0x23f   :  { %1261 = vrot.lane.b32.xlu1 %v636_v23, %s9328_s29  ;;  %v6695_v57 = vsel %vm13925_vm13, %v5722_v35, %v6694_v49  ;;  %v3731_v9 = vpop.f32.mrb[9].mxu0  ;;  %v701_v23 = vld [vmem:[#allocation2 + $0x270] sm:$0xff]  ;;  %v3245_v24 = vsel %vm3221_vm7, %v3180_v60, %v2240_v3  ;;  %v3737_v3 = vadd.f32 %v9024_v62, %v10494_v17  ;;  %v3051_v40 = vsel %vm13923_vm4, %v2986_v41, %v10812_v37 }
 0x240   :  { %1007 = vrot.lane.b32.xlu0 %v573_v61, %s9329_s30  ;;  %6812 = vst.msk [vmem:[#allocation3 + $0x21] sm:$0xff] %vm13924_vm2, %v6695_v57  ;;  %v637_v61 = vld [vmem:[#allocation2 + $0x262] sm:$0xff]  ;;  %v3116_v35 = vsel %vm3091_vm5, %v3051_v40, %v10835_v21  ;;  %v2922_v57 = vsel %vm33_vm0, %v297_v13, %v10793_v36 }
 0x241   :  { %v2750_v25 = vpop.permute.xlu1 %2749  ;;  %v4019_v16 = vmax.f32 %v3737_v3, 0.0 }
 0x242   :  { %v2496_v43 = vpop.permute.xlu0 %2495  ;;  %v3374_v7 = vsel %vm3351_vm9, %v3309_v12, %v2750_v25 }
 0x243   :  { %1741 = vrot.lane.b32.xlu1 %v749_v19, %s9331_s11  ;;  %9043 = vmatprep.mubr.msk.f32.mxu0 %vm3428_vm10, %v3374_v7  ;;  %v3310_v48 = vsel %vm3286_vm8, %v3245_v24, %v2496_v43  ;;  %v4291_v26 = vcombine.high %v4019_v16, %v4019_v16  ;;  %v4298_v21 = vrot.slane %v4019_v16, %v10521_v63  ;;  %v687_v24 = vld [vmem:[#allocation2 + $0x198] sm:$0xff] }
 0x244   :  { %1487 = vrot.lane.b32.xlu0 %v686_v42, %s9330_s10  ;;  %v3732_v42 = vadd.f32 %v10494_v17, %v3731_v9  ;;  %v10962_v16 = vld [vmem:[#allocation2 + $0x272] sm:$0xff] }
 0x245   :  { %v10862_v15 = vpop.permute.xlu1 %1731  ;;  %v4305_v43 = vrot.slane %v4291_v26, %v10521_v63 }
 0x246   :  { %v10864_v55 = vpop.permute.xlu0 %965  ;;  %v4018_v52 = vmax.f32 %v3732_v42, 0.0 }
 0x247   :  { %2281 = vrot.lane.b32.xlu1 %v701_v23, %s9333_s19 }
 0x248   :  { %2027 = vrot.lane.b32.xlu0 %v637_v61, %s9332_s14  ;;  %v4274_v50 = vcombine.high %v4018_v52, %v4018_v52  ;;  %v4281_v20 = vrot.slane %v4018_v52, %v10521_v63 }
 0x249   :  { %v2752_v5 = vpop.permute.xlu1 %2751 }
 0x24a   :  { %v1986_v46 = vpop.permute.xlu0 %1985  ;;  %v3375_v38 = vsel %vm3351_vm9, %v3310_v48, %v2752_v5  ;;  %v4288_v29 = vrot.slane %v4274_v50, %v10521_v63  ;;  %v4289_v48 = vcombine.high %v4281_v20, %v4281_v20 }
 0x24b   :  { %2761 = vrot.lane.b32.xlu1 %v813_v10, %s9335_s12  ;;  %9044 = vmatmul.mubr.msk.f32.gmra.mrb[22].mxu0 %vm3428_vm10, %v3375_v38  ;;  %v3181_v34 = vsel %vm3156_vm6, %v3116_v35, %v1986_v46 }
 0x24c   :  { %2507 = vrot.lane.b32.xlu0 %v750_v51, %s9334_s26 }
 0x24d   :  { %v10882_v33 = vpop.permute.xlu1 %1221 }
 0x24e   :  { %v10884_v59 = vpop.permute.xlu0 %967 }
 0x24f   :  { %1263 = vrot.lane.b32.xlu1 %v637_v61, %s9328_s29 }
 0x250   :  { %977 = vrot.lane.b32.xlu0 %v368_v56, %s9329_s30 }
 0x251   :  { %v2242_v53 = vpop.permute.xlu1 %2241 }
 0x252   :  { %v10888_v19 = vpop.permute.xlu0 %1987  ;;  %v3246_v37 = vsel %vm3221_vm7, %v3181_v34, %v2242_v53 }
 0x253   :  { %1743 = vrot.lane.b32.xlu1 %v750_v51, %s9331_s11  ;;  %v4307_v51 = vcombine.high %v4305_v43, %v4305_v43 }
 0x254   :  { %1517 = vrot.lane.b32.xlu0 %v701_v23, %s9330_s10  ;;  %v2987_v23 = vsel %vm13924_vm2, %v2922_v57, %v10814_v14 }
 0x255   :  { %v10892_v58 = vpop.permute.xlu1 %1477 }
 0x256   :  { %v10894_v32 = vpop.permute.xlu0 %1223 }
 0x257   :  { %2283 = vrot.lane.b32.xlu1 %v702_v47, %s9333_s19 }
 0x258   :  { %1997 = vrot.lane.b32.xlu0 %v813_v10, %s9332_s14  ;;  %v4306_v10 = vcombine.high %v4298_v21, %v4298_v21 }
 0x259   :  { %v2498_v4 = vpop.permute.xlu1 %2497 }
 0x25a   :  { %v10910_v0 = vpop.permute.xlu0 %2243  ;;  %v3311_v27 = vsel %vm3286_vm8, %v3246_v37, %v2498_v4 }
 0x25b   :  { %2763 = vrot.lane.b32.xlu1 %v10903_v8, %s9335_s12 }
 0x25c   :  { %2537 = vrot.lane.b32.xlu0 %v10908_v22, %s9334_s26 }
 0x25d   :  { %v10920_v45 = vpop.permute.xlu1 %1733 }
 0x25e   :  { %v10924_v49 = vpop.permute.xlu0 %1479  ;;  %v9027_v62 = vpop.f32.mrb[10].mxu0 }
 0x25f   :  { %1233 = vrot.lane.b32.xlu1 %v432_v2, %s9328_s29  ;;  %v3747_v30 = vadd.f32 %v9027_v62, %v10494_v17  ;;  %v3741_v9 = vpop.f32.mrb[11].mxu0 }
 0x260   :  { %979 = vrot.lane.b32.xlu0 %v369_v39, %s9329_s30  ;;  %v3742_v12 = vadd.f32 %v10494_v17, %v3741_v9  ;;  %v3052_v17 = vsel %vm13923_vm4, %v2987_v23, %v10837_v54  ;;  %v4290_v54 = vcombine.high %v4288_v29, %v4288_v29  ;;  %v10964_v39 = vld [vmem:[#allocation2 + $0x279] sm:$0xff]  ;;  %vm13932_vm4 = vmmov %vm13931_vm11 }
 0x261   :  { %v2754_v25 = vpop.permute.xlu1 %2753  ;;  %v4021_v7 = vmax.f32 %v3747_v30, 0.0  ;;  %vm13933_vm2 = vmmov %vm13932_vm4 }
 0x262   :  { %v3376_v36 = vsel %vm3351_vm9, %v3311_v27, %v2754_v25  ;;  %v10939_v6 = vpop.permute.xlu0 %2499  ;;  %v4020_v61 = vmax.f32 %v3742_v12, 0.0  ;;  %vm13934_vm13 = vmmov %vm13933_vm2  ;;  %v433_v12 = vld [vmem:[#allocation2 + $0x1ba] sm:$0xff] }
 0x263   :  { %1773 = vrot.lane.b32.xlu1 %v10908_v22, %s9331_s11  ;;  %9046 = vmatprep.mubr.msk.f32.mxu0 %vm3428_vm10, %v3376_v36  ;;  %v4325_v11 = vcombine.high %v4021_v7, %v4021_v7  ;;  %v4332_v60 = vrot.slane %v4021_v7, %v10521_v63  ;;  %vm13936_vm3 = vmmov %vm13933_vm2  ;;  %v179_v25 = vld [vmem:[%s13911_s0 + $0x120] sm:$0xff] }
 0x264   :  { %1519 = vrot.lane.b32.xlu0 %v702_v47, %s9330_s10  ;;  %v4308_v14 = vcombine.high %v4020_v61, %v4020_v61  ;;  %v4315_v5 = vrot.slane %v4020_v61, %v10521_v63  ;;  %vm13937_vm1 = vmmov %vm13933_vm2  ;;  %244 = vst.msk [vmem:[#allocation2 + $0x1f9] sm:$0xff] %vm33_vm0, %v179_v25 }
 0x265   :  { %v10952_v46 = vpop.permute.xlu1 %1735  ;;  %v4339_v38 = vrot.slane %v4325_v11, %v10521_v63  ;;  %v4340_v28 = vcombine.high %v4332_v60, %v4332_v60  ;;  %v5502_v56 = vmax.f32 %v4298_v21, %v4332_v60 }
 0x266   :  { %v10955_v53 = vpop.permute.xlu0 %969  ;;  %v4322_v44 = vrot.slane %v4308_v14, %v10521_v63  ;;  %v4323_v3 = vcombine.high %v4315_v5, %v4315_v5  ;;  %v5498_v47 = vmax.f32 %v4281_v20, %v4315_v5 }
 0x267   :  { %2253 = vrot.lane.b32.xlu1 %v687_v24, %s9333_s19  ;;  %v4341_v42 = vcombine.high %v4339_v38, %v4339_v38  ;;  %v5503_v31 = vmax.f32 %v4306_v10, %v4340_v28  ;;  %v5504_v18 = vmax.f32 %v4305_v43, %v4339_v38  ;;  %v5751_v4 = vsel %vm13931_vm11, %v5502_v56, -inf  ;;  %vm13935_vm11 = vmmov %vm13933_vm2 }
 0x268   :  { %1999 = vrot.lane.b32.xlu0 %v10903_v8, %s9332_s14  ;;  %v5752_v52 = vrot.slane %v5751_v4, 4  ;;  %v4324_v41 = vcombine.high %v4322_v44, %v4322_v44  ;;  %v5499_v2 = vmax.f32 %v4289_v48, %v4323_v3  ;;  %v5500_v13 = vmax.f32 %v4288_v29, %v4322_v44 }
 0x269   :  { %v2756_v40 = vpop.permute.xlu1 %2755  ;;  %v5505_v35 = vmax.f32 %v4307_v51, %v4341_v42  ;;  %v5758_v26 = vsel %vm13932_vm4, %v5503_v31, -inf  ;;  %v5765_v50 = vsel %vm13933_vm2, %v5504_v18, -inf  ;;  %v5723_v34 = vsel %vm13934_vm13, %v5498_v47, -inf  ;;  %vm13938_vm2 = vmmov %vm13937_vm1 }
 0x26a   :  { %v10969_v62 = vpop.permute.xlu0 %1989  ;;  %v5753_v57 = vmax.f32 %v5751_v4, %v5752_v52  ;;  %v5759_v8 = vrot.slane %v5758_v26, 4  ;;  %v5766_v37 = vrot.slane %v5765_v50, 4  ;;  %v5501_v30 = vmax.f32 %v4290_v54, %v4324_v41 }
 0x26b   :  { %2793 = vrot.lane.b32.xlu1 %v10962_v16, %s9335_s12  ;;  %v5772_v9 = vsel %vm13935_vm11, %v5505_v35, -inf  ;;  %v5724_v21 = vrot.slane %v5723_v34, 4  ;;  %v5730_v20 = vsel %vm13936_vm3, %v5499_v2, -inf  ;;  %v5737_v27 = vsel %vm13937_vm1, %v5500_v13, -inf }
 0x26c   :  { %2539 = vrot.lane.b32.xlu0 %v10964_v39, %s9334_s26  ;;  %v3117_v43 = vsel %vm3091_vm5, %v3052_v17, %v10862_v15  ;;  %v5760_v7 = vmax.f32 %v5758_v26, %v5759_v8  ;;  %v5767_v36 = vmax.f32 %v5765_v50, %v5766_v37  ;;  %v5773_v23 = vrot.slane %v5772_v9, 4  ;;  %v688_v26 = vld [vmem:[#allocation2 + $0x1a0] sm:$0xff] }
 0x26d   :  { %v10983_v29 = vpop.permute.xlu1 %1225  ;;  %v5725_v61 = vmax.f32 %v5723_v34, %v5724_v21  ;;  %v5731_v11 = vrot.slane %v5730_v20, 4  ;;  %v5738_v60 = vrot.slane %v5737_v27, 4  ;;  %v5744_v24 = vsel %vm13938_vm2, %v5501_v30, -inf }
 0x26e   :  { %v10987_v10 = vpop.permute.xlu0 %971  ;;  %v3182_v48 = vsel %vm3156_vm6, %v3117_v43, %v10888_v19  ;;  %v5754_v14 = vrot.slane %v5753_v57, 2  ;;  %v5761_v5 = vrot.slane %v5760_v7, 2  ;;  %v5774_v15 = vmax.f32 %v5772_v9, %v5773_v23  ;;  %v496_v19 = vld [vmem:[#allocation2 + $0x1c8] sm:$0xff]  ;;  %v751_v23 = vld [vmem:[#allocation2 + $0x199] sm:$0xff] }
 0x26f   :  { %1235 = vrot.lane.b32.xlu1 %v433_v12, %s9328_s29  ;;  %v5726_v17 = vrot.slane %v5725_v61, 2  ;;  %v5732_v51 = vmax.f32 %v5730_v20, %v5731_v11  ;;  %v5739_v38 = vmax.f32 %v5737_v27, %v5738_v60  ;;  %v5745_v28 = vrot.slane %v5744_v24, 4 }
 0x270   :  { %1009 = vrot.lane.b32.xlu0 %v10908_v22, %s9329_s30  ;;  %v3247_v56 = vsel %vm3221_vm7, %v3182_v48, %v10910_v0  ;;  %v5768_v54 = vrot.slane %v5767_v36, 2  ;;  %v5775_v44 = vrot.slane %v5774_v15, 2  ;;  %v5755_v52 = vmax.f32 %v5753_v57, %v5754_v14 }
 0x271   :  { %v10996_v3 = vpop.permute.xlu1 %2245  ;;  %v5727_v47 = vmax.f32 %v5725_v61, %v5726_v17  ;;  %v5733_v42 = vrot.slane %v5732_v51, 2  ;;  %v5740_v31 = vrot.slane %v5739_v38, 2  ;;  %v5746_v18 = vmax.f32 %v5744_v24, %v5745_v28  ;;  %v180_v17 = vld [vmem:[%s13911_s0 + $0x128] sm:$0xff] }
 0x272   :  { %v10998_v4 = vpop.permute.xlu0 %1991  ;;  %v5762_v41 = vmax.f32 %v5760_v7, %v5761_v5  ;;  %v3312_v2 = vsel %vm3286_vm8, %v3247_v56, %v10939_v6  ;;  %v5769_v50 = vmax.f32 %v5767_v36, %v5768_v54  ;;  %v5776_v57 = vmax.f32 %v5774_v15, %v5775_v44  ;;  %245 = vst.msk [vmem:[#allocation2 + $0x201] sm:$0xff] %vm33_vm0, %v180_v17  ;;  %v11115_v17 = vld [vmem:[#allocation2 + $0x289] sm:$0xff] }
 0x273   :  { %1775 = vrot.lane.b32.xlu1 %v10964_v39, %s9331_s11  ;;  %v5728_v22 = vrot.slane %v5727_v47, 1  ;;  %v5734_v0 = vmax.f32 %v5732_v51, %v5733_v42  ;;  %v5741_v13 = vmax.f32 %v5739_v38, %v5740_v31  ;;  %v5747_v35 = vrot.slane %v5746_v18, 2 }
 0x274   :  { %1489 = vrot.lane.b32.xlu0 %v496_v19, %s9330_s10  ;;  %v3377_v34 = vsel %vm3351_vm9, %v3312_v2, %v2756_v40  ;;  %v5756_v21 = vrot.slane %v5755_v52, 1  ;;  %v5763_v20 = vrot.slane %v5762_v41, 1  ;;  %v830_v40 = vld [vmem:[#allocation2 + $0x27a] sm:$0xff]  ;;  %v5770_v7 = vrot.slane %v5769_v50, 1  ;;  %v497_v2 = vld [vmem:[#allocation2 + $0x1d0] sm:$0xff] }
 0x275   :  { %v11006_v8 = vpop.permute.xlu1 %1227  ;;  %v5735_v37 = vrot.slane %v5734_v0, 1  ;;  %v5742_v30 = vrot.slane %v5741_v13, 1  ;;  %v5748_v9 = vmax.f32 %v5746_v18, %v5747_v35  ;;  %9047 = vmatmul.mubr.msk.f32.gmra.mrb[24].mxu0 %vm3428_vm10, %v3377_v34  ;;  %v5729_v27 = vmax.f32 %v5727_v47, %v5728_v22  ;;  %v298_v19 = vld [vmem:[#allocation2 + $0x138] sm:$0xff] }
 0x276   :  { %v11009_v6 = vpop.permute.xlu0 %1001  ;;  %v5777_v61 = vrot.slane %v5776_v57, 1  ;;  %v5757_v48 = vmax.f32 %v5755_v52, %v5756_v21  ;;  %vm13939_vm4 = vcmask 1042434   ;;  %v5764_v5 = vmax.f32 %v5762_v41, %v5763_v20  ;;  %v560_v52 = vld [vmem:[#allocation2 + $0x1c9] sm:$0xff]  ;;  %v815_v34 = vld [vmem:[#allocation2 + $0x19a] sm:$0xff] }
 0x277   :  { %2255 = vrot.lane.b32.xlu1 %v688_v26, %s9333_s19  ;;  %v5736_v12 = vmax.f32 %v5734_v0, %v5735_v37  ;;  %v5743_v25 = vmax.f32 %v5741_v13, %v5742_v30  ;;  %v5749_v43 = vrot.slane %v5748_v9, 1  ;;  %v5771_v51 = vmax.f32 %v5769_v50, %v5770_v7  ;;  %v752_v37 = vld [vmem:[#allocation2 + $0x1a1] sm:$0xff] }
 0x278   :  { %2029 = vrot.lane.b32.xlu0 %v10962_v16, %s9332_s14  ;;  %v5778_v56 = vmax.f32 %v5776_v57, %v5777_v61  ;;  %vm13940_vm13 = vcmask 1045509   ;;  %vm13941_vm1 = vcmask 1046534   ;;  %vm13942_vm3 = vcmask 1047559  }
 0x279   :  { %v11014_v36 = vpop.permute.xlu1 %2247  ;;  %v5750_v11 = vmax.f32 %v5748_v9, %v5749_v43  ;;  %v6696_v60 = vsel %vm6675_vm12, %v5736_v12, %v5729_v27  ;;  %vm13943_vm11 = vcmask 64512   ;;  %v2923_v22 = vsel %vm33_vm0, %v298_v19, %v10864_v55  ;;  %v299_v9 = vld [vmem:[#allocation2 + $0x140] sm:$0xff]  ;;  %v561_v27 = vld [vmem:[#allocation2 + $0x1d1] sm:$0xff] }
 0x27a   :  { %v11017_v24 = vpop.permute.xlu0 %1481  ;;  %v6697_v14 = vsel %vm13939_vm4, %v5743_v25, %v6696_v60  ;;  %vm13944_vm2 = vmmov %vm13943_vm11  ;;  %vm13945_vm4 = vcmask 97280   ;;  %v2924_v21 = vsel %vm33_vm0, %v299_v9, %v10884_v59 }
 0x27b   :  { %2795 = vrot.lane.b32.xlu1 %v830_v40, %s9335_s12  ;;  %v6698_v15 = vsel %vm6679_vm14, %v5750_v11, %v6697_v14  ;;  %v624_v11 = vld [vmem:[#allocation2 + $0x1ca] sm:$0xff] }
 0x27c   :  { %2509 = vrot.lane.b32.xlu0 %v751_v23, %s9334_s26  ;;  %v6699_v38 = vsel %vm6681_vm15, %v5757_v48, %v6698_v15  ;;  %v704_v23 = vld [vmem:[#allocation2 + $0x290] sm:$0xff] }
 0x27d   :  { %v11027_v28 = vpop.permute.xlu1 %1003  ;;  %v6700_v54 = vsel %vm13940_vm13, %v5764_v5, %v6699_v38  ;;  %vm13946_vm13 = vmmov %vm13944_vm2  ;;  %v816_v5 = vld [vmem:[#allocation2 + $0x1a2] sm:$0xff] }
 0x27e   :  { %v2502_v44 = vpop.permute.xlu0 %2501  ;;  %v6701_v47 = vsel %vm13941_vm1, %v5771_v51, %v6700_v54  ;;  %v9030_v42 = vpop.f32.mrb[12].mxu0  ;;  %v2989_v12 = vsel %vm13946_vm13, %v2924_v21, %v10894_v32  ;;  %vm13947_vm1 = vmmov %vm13945_vm4  ;;  %v625_v21 = vld [vmem:[#allocation2 + $0x1d2] sm:$0xff] }
 0x27f   :  { %1265 = vrot.lane.b32.xlu1 %v10962_v16, %s9328_s29  ;;  %v6702_v31 = vsel %vm13942_vm3, %v5778_v56, %v6701_v47  ;;  %v3751_v18 = vpop.f32.mrb[13].mxu0  ;;  %v703_v16 = vld [vmem:[#allocation2 + $0x288] sm:$0xff]  ;;  %v3054_v43 = vsel %vm13947_vm1, %v2989_v12, %v10924_v49  ;;  %v11100_v49 = vld [vmem:[%s13913_s2] ss:$0 sm:$0xff]  ;;  %vm13948_vm3 = vcmask 58368  }
 0x280   :  { %1011 = vrot.lane.b32.xlu0 %v10964_v39, %s9329_s30  ;;  %6813 = vst.msk [vmem:[#allocation3 + $0x31] sm:$0xff] %vm13943_vm11, %v6702_v31  ;;  %v2988_v39 = vsel %vm13944_vm2, %v2923_v22, %v10882_v33  ;;  %v3119_v59 = vsel %vm3091_vm5, %v3054_v43, %v10952_v46  ;;  %v3757_v46 = vadd.f32 %v11100_v49, %v9030_v42  ;;  %vm13949_vm11 = vmmov %vm13948_vm3 }
 0x281   :  { %v11038_v41 = vpop.permute.xlu1 %1483  ;;  %v3053_v35 = vsel %vm13945_vm4, %v2988_v39, %v10892_v58  ;;  %vm13950_vm2 = vmmov %vm13948_vm3 }
 0x282   :  { %v11042_v0 = vpop.permute.xlu0 %1257  ;;  %v3118_v50 = vsel %vm3091_vm5, %v3053_v35, %v10920_v45  ;;  %v4023_v51 = vmax.f32 %v3757_v46, 0.0  ;;  %vm13951_vm4 = vmmov %vm13950_vm2 }
 0x283   :  { %1745 = vrot.lane.b32.xlu1 %v560_v52, %s9331_s11  ;;  %v3183_v55 = vsel %vm3156_vm6, %v3118_v50, %v10969_v62  ;;  %v195_v62 = vld [vmem:[%s13911_s0 + $0x1a0] sm:$0xff]  ;;  %vm13952_vm13 = vmmov %vm13950_vm2 }
 0x284   :  { %1491 = vrot.lane.b32.xlu0 %v497_v2, %s9330_s10  ;;  %v3248_v33 = vsel %vm3221_vm7, %v3183_v55, %v10996_v3  ;;  %260 = vst.msk [vmem:[#allocation2 + $0x2b9] sm:$0xff] %vm33_vm0, %v195_v62  ;;  %vm13953_vm1 = vmmov %vm13950_vm2 }
 0x285   :  { %v2504_v13 = vpop.permute.xlu1 %2503  ;;  %v3313_v58 = vsel %vm3286_vm8, %v3248_v33, %v2502_v44  ;;  %v4359_v44 = vcombine.high %v4023_v51, %v4023_v51 }
 0x286   :  { %v11050_v26 = vpop.permute.xlu0 %1737 }
 0x287   :  { %2285 = vrot.lane.b32.xlu1 %v703_v16, %s9333_s19  ;;  %v4373_v39 = vrot.slane %v4359_v44, %v10521_v63 }
 0x288   :  { %2031 = vrot.lane.b32.xlu0 %v830_v40, %s9332_s14 }
 0x289   :  { %v11060_v57 = vpop.permute.xlu1 %973 }
 0x28a   :  { %v2758_v30 = vpop.permute.xlu0 %2757 }
 0x28b   :  { %v3378_v45 = vsel %vm3351_vm9, %v3313_v58, %v2758_v30  ;;  %2765 = vrot.lane.b32.xlu1 %v815_v34, %s9335_s12 }
 0x28c   :  { %2511 = vrot.lane.b32.xlu0 %v752_v37, %s9334_s26  ;;  %9049 = vmatprep.mubr.msk.f32.mxu0 %vm3428_vm10, %v3378_v45  ;;  %v11142_v37 = vld [vmem:[#allocation2 + $0x1e0] sm:$0xff] }
 0x28d   :  { %v11070_v3 = vpop.permute.xlu1 %1513 }
 0x28e   :  { %v11075_v20 = vpop.permute.xlu0 %1259 }
 0x28f   :  { %1267 = vrot.lane.b32.xlu1 %v830_v40, %s9328_s29  ;;  %v3184_v40 = vsel %vm3156_vm6, %v3119_v59, %v10998_v4  ;;  %v3752_v4 = vadd.f32 %v11100_v49, %v3751_v18 }
 0x290   :  { %981 = vrot.lane.b32.xlu0 %v560_v52, %s9329_s30  ;;  %v3249_v32 = vsel %vm3221_vm7, %v3184_v40, %v11014_v36  ;;  %v196_v36 = vld [vmem:[%s13911_s0 + $0x1a8] sm:$0xff]  ;;  %v4366_v52 = vrot.slane %v4023_v51, %v10521_v63 }
 0x291   :  { %v11081_v25 = vpop.permute.xlu1 %1993  ;;  %v3314_v60 = vsel %vm3286_vm8, %v3249_v32, %v2504_v13  ;;  %261 = vst.msk [vmem:[#allocation2 + $0x2c1] sm:$0xff] %vm33_vm0, %v196_v36  ;;  %v4022_v56 = vmax.f32 %v3752_v4, 0.0  ;;  %v11155_v36 = vld [vmem:[#allocation2 + $0x28a] sm:$0xff] }
 0x292   :  { %v11085_v7 = vpop.permute.xlu0 %1739  ;;  %v4374_v58 = vcombine.high %v4366_v52, %v4366_v52 }
 0x293   :  { %1747 = vrot.lane.b32.xlu1 %v561_v27, %s9331_s11  ;;  %v4342_v47 = vcombine.high %v4022_v56, %v4022_v56  ;;  %v4349_v2 = vrot.slane %v4022_v56, %v10521_v63 }
 0x294   :  { %1521 = vrot.lane.b32.xlu0 %v703_v16, %s9330_s10 }
 0x295   :  { %v11095_v61 = vpop.permute.xlu1 %975  ;;  %v4356_v50 = vrot.slane %v4342_v47, %v10521_v63  ;;  %v4357_v30 = vcombine.high %v4349_v2, %v4349_v2 }
 0x296   :  { %v2760_v48 = vpop.permute.xlu0 %2759 }
 0x297   :  { %v3379_v14 = vsel %vm3351_vm9, %v3314_v60, %v2760_v48  ;;  %2287 = vrot.lane.b32.xlu1 %v704_v23, %s9333_s19  ;;  %v4358_v32 = vcombine.high %v4356_v50, %v4356_v50 }
 0x298   :  { %2001 = vrot.lane.b32.xlu0 %v624_v11, %s9332_s14  ;;  %9050 = vmatmul.mubr.msk.f32.gmra.mrb[26].mxu0 %vm3428_vm10, %v3379_v14 }
 0x299   :  { %v11113_v15 = vpop.permute.xlu1 %1515 }
 0x29a   :  { %v11117_v38 = vpop.permute.xlu0 %1229 }
 0x29b   :  { %2767 = vrot.lane.b32.xlu1 %v816_v5, %s9335_s12 }
 0x29c   :  { %2541 = vrot.lane.b32.xlu0 %v11115_v17, %s9334_s26 }
 0x29d   :  { %v11122_v54 = vpop.permute.xlu1 %1995 }
 0x29e   :  { %v11124_v19 = vpop.permute.xlu0 %1769  ;;  %v9033_v42 = vpop.f32.mrb[14].mxu0 }
 0x29f   :  { %1237 = vrot.lane.b32.xlu1 %v624_v11, %s9328_s29  ;;  %v3767_v31 = vadd.f32 %v11100_v49, %v9033_v42  ;;  %v3761_v18 = vpop.f32.mrb[15].mxu0  ;;  %v11159_v42 = vld [vmem:[#allocation2 + $0x291] sm:$0xff] }
 0x2a0   :  { %983 = vrot.lane.b32.xlu0 %v561_v27, %s9329_s30  ;;  %v3762_v22 = vadd.f32 %v11100_v49, %v3761_v18  ;;  %v4375_v27 = vcombine.high %v4373_v39, %v4373_v39 }
 0x2a1   :  { %v11132_v16 = vpop.permute.xlu1 %1005  ;;  %v4025_v13 = vmax.f32 %v3767_v31, 0.0 }
 0x2a2   :  { %v11135_v35 = vpop.permute.xlu0 %2249  ;;  %v4024_v55 = vmax.f32 %v3762_v22, 0.0 }
 0x2a3   :  { %1777 = vrot.lane.b32.xlu1 %v11115_v17, %s9331_s11  ;;  %v4393_v34 = vcombine.high %v4025_v13, %v4025_v13  ;;  %v4400_v33 = vrot.slane %v4025_v13, %v10521_v63 }
 0x2a4   :  { %1523 = vrot.lane.b32.xlu0 %v704_v23, %s9330_s10  ;;  %v4376_v9 = vcombine.high %v4024_v55, %v4024_v55  ;;  %v4383_v45 = vrot.slane %v4024_v55, %v10521_v63 }
 0x2a5   :  { %v11145_v62 = vpop.permute.xlu1 %1485  ;;  %v4407_v12 = vrot.slane %v4393_v34, %v10521_v63  ;;  %v4408_v43 = vcombine.high %v4400_v33, %v4400_v33  ;;  %v5510_v59 = vmax.f32 %v4366_v52, %v4400_v33 }
 0x2a6   :  { %v11148_v40 = vpop.permute.xlu0 %1231  ;;  %v4390_v23 = vrot.slane %v4376_v9, %v10521_v63  ;;  %v4391_v11 = vcombine.high %v4383_v45, %v4383_v45  ;;  %v5506_v46 = vmax.f32 %v4349_v2, %v4383_v45  ;;  %v181_v9 = vld [vmem:[%s13911_s0 + $0x130] sm:$0xff] }
 0x2a7   :  { %2257 = vrot.lane.b32.xlu1 %v11142_v37, %s9333_s19  ;;  %v4409_v60 = vcombine.high %v4407_v12, %v4407_v12  ;;  %v5511_v48 = vmax.f32 %v4374_v58, %v4408_v43  ;;  %v5512_v4 = vmax.f32 %v4373_v39, %v4407_v12  ;;  %v5807_v14 = vsel %vm13948_vm3, %v5510_v59, -inf  ;;  %vm13954_vm3 = vmmov %vm13953_vm1  ;;  %246 = vst.msk [vmem:[#allocation2 + $0x211] sm:$0xff] %vm33_vm0, %v181_v9 }
 0x2a8   :  { %2003 = vrot.lane.b32.xlu0 %v625_v21, %s9332_s14  ;;  %v5808_v5 = vrot.slane %v5807_v14, 4  ;;  %v4392_v51 = vcombine.high %v4390_v23, %v4390_v23  ;;  %v5507_v56 = vmax.f32 %v4357_v30, %v4391_v11  ;;  %v5508_v44 = vmax.f32 %v4356_v50, %v4390_v23 }
 0x2a9   :  { %v11157_v47 = vpop.permute.xlu1 %2025  ;;  %v5513_v31 = vmax.f32 %v4375_v27, %v4409_v60  ;;  %v5814_v18 = vsel %vm13949_vm11, %v5511_v48, -inf  ;;  %v5821_v52 = vsel %vm13950_vm2, %v5512_v4, -inf  ;;  %v5779_v2 = vsel %vm13951_vm4, %v5506_v46, -inf  ;;  %vm13955_vm11 = vmmov %vm13953_vm1 }
 0x2aa   :  { %v11164_v22 = vpop.permute.xlu0 %1771  ;;  %v5809_v39 = vmax.f32 %v5807_v14, %v5808_v5  ;;  %v5815_v13 = vrot.slane %v5814_v18, 4  ;;  %v5822_v55 = vrot.slane %v5821_v52, 4  ;;  %v5509_v34 = vmax.f32 %v4358_v32, %v4392_v51  ;;  %v300_v14 = vld [vmem:[#allocation2 + $0x150] sm:$0xff] }
 0x2ab   :  { %2797 = vrot.lane.b32.xlu1 %v11155_v36, %s9335_s12  ;;  %v5828_v50 = vsel %vm13952_vm13, %v5513_v31, -inf  ;;  %v5780_v33 = vrot.slane %v5779_v2, 4  ;;  %v5786_v58 = vsel %vm13953_vm1, %v5507_v56, -inf  ;;  %v5793_v30 = vsel %vm13954_vm3, %v5508_v44, -inf }
 0x2ac   :  { %2543 = vrot.lane.b32.xlu0 %v11159_v42, %s9334_s26  ;;  %v5816_v45 = vmax.f32 %v5814_v18, %v5815_v13  ;;  %v5823_v27 = vmax.f32 %v5821_v52, %v5822_v55  ;;  %v5829_v12 = vrot.slane %v5828_v50, 4  ;;  %v5787_v32 = vrot.slane %v5786_v58, 4 }
 0x2ad   :  { %v11176_v43 = vpop.permute.xlu1 %2505  ;;  %v5781_v59 = vmax.f32 %v5779_v2, %v5780_v33  ;;  %v5794_v23 = vrot.slane %v5793_v30, 4  ;;  %v5800_v11 = vsel %vm13955_vm11, %v5509_v34, -inf  ;;  %v5810_v60 = vrot.slane %v5809_v39, 2 }
 0x2ae   :  { %v11180_v46 = vpop.permute.xlu0 %2251  ;;  %v5817_v48 = vrot.slane %v5816_v45, 2  ;;  %v5830_v4 = vmax.f32 %v5828_v50, %v5829_v12  ;;  %v5788_v51 = vmax.f32 %v5786_v58, %v5787_v32  ;;  %v5801_v44 = vrot.slane %v5800_v11, 4 }
 0x2af   :  { %1239 = vrot.lane.b32.xlu1 %v625_v21, %s9328_s29  ;;  %v5782_v5 = vrot.slane %v5781_v59, 2  ;;  %v5795_v56 = vmax.f32 %v5793_v30, %v5794_v23  ;;  %v5824_v31 = vrot.slane %v5823_v27, 2  ;;  %v2925_v21 = vsel %vm33_vm0, %v300_v14, %v10955_v53 }
 0x2b0   :  { %1013 = vrot.lane.b32.xlu0 %v11115_v17, %s9329_s30  ;;  %v5831_v18 = vrot.slane %v5830_v4, 2  ;;  %v5789_v13 = vrot.slane %v5788_v51, 2  ;;  %v5802_v34 = vmax.f32 %v5800_v11, %v5801_v44  ;;  %v5811_v50 = vmax.f32 %v5809_v39, %v5810_v60 }
 0x2b1   :  { %v11185_v52 = vpop.permute.xlu1 %1261  ;;  %v5783_v2 = vmax.f32 %v5781_v59, %v5782_v5  ;;  %v5796_v55 = vrot.slane %v5795_v56, 2  ;;  %v5818_v58 = vmax.f32 %v5816_v45, %v5817_v48  ;;  %v690_v59 = vld [vmem:[#allocation2 + $0x1e8] sm:$0xff]  ;;  %v5825_v32 = vmax.f32 %v5823_v27, %v5824_v31  ;;  %v11204_v27 = vld [vmem:[#allocation2 + $0x292] sm:$0xff] }
 0x2b2   :  { %v11187_v33 = vpop.permute.xlu0 %1007  ;;  %v5790_v17 = vmax.f32 %v5788_v51, %v5789_v13  ;;  %v5803_v12 = vrot.slane %v5802_v34, 2  ;;  %v5832_v11 = vmax.f32 %v5830_v4, %v5831_v18  ;;  %vm13956_vm2 = vcmask 64512  }
 0x2b3   :  { %1779 = vrot.lane.b32.xlu1 %v11159_v42, %s9331_s11  ;;  %v5784_v30 = vrot.slane %v5783_v2, 1  ;;  %v5797_v9 = vmax.f32 %v5795_v56, %v5796_v55  ;;  %v2990_v45 = vsel %vm13956_vm2, %v2925_v21, %v10983_v29  ;;  %v5812_v60 = vrot.slane %v5811_v50, 1  ;;  %v753_v29 = vld [vmem:[#allocation2 + $0x1e1] sm:$0xff] }
 0x2b4   :  { %1493 = vrot.lane.b32.xlu0 %v11142_v37, %s9330_s10  ;;  %v5791_v5 = vrot.slane %v5790_v17, 1  ;;  %v5804_v53 = vmax.f32 %v5802_v34, %v5803_v12  ;;  %v5819_v48 = vrot.slane %v5818_v58, 1  ;;  %vm13957_vm4 = vcmask 97280  }
 0x2b5   :  { %v11195_v23 = vpop.permute.xlu1 %1741  ;;  %v5798_v44 = vrot.slane %v5797_v9, 1  ;;  %v5785_v14 = vmax.f32 %v5783_v2, %v5784_v30  ;;  %v3055_v4 = vsel %vm13957_vm4, %v2990_v45, %v11017_v24  ;;  %v5826_v31 = vrot.slane %v5825_v32, 1  ;;  %vm13962_vm4 = vmmov %vm13956_vm2 }
 0x2b6   :  { %v11197_v39 = vpop.permute.xlu0 %1487  ;;  %v5792_v51 = vmax.f32 %v5790_v17, %v5791_v5  ;;  %v5805_v56 = vrot.slane %v5804_v53, 1  ;;  %v3120_v13 = vsel %vm3091_vm5, %v3055_v4, %v11050_v26  ;;  %v5833_v55 = vrot.slane %v5832_v11, 1  ;;  %v182_v5 = vld [vmem:[%s13911_s0 + $0x138] sm:$0xff]  ;;  %v817_v4 = vld [vmem:[#allocation2 + $0x1e2] sm:$0xff] }
 0x2b7   :  { %2259 = vrot.lane.b32.xlu1 %v690_v59, %s9333_s19  ;;  %v5799_v37 = vmax.f32 %v5797_v9, %v5798_v44  ;;  %v3185_v30 = vsel %vm3156_vm6, %v3120_v13, %v11081_v25  ;;  %v5813_v17 = vmax.f32 %v5811_v50, %v5812_v60  ;;  %vm13958_vm13 = vcmask 1042434   ;;  %247 = vst.msk [vmem:[#allocation2 + $0x219] sm:$0xff] %vm33_vm0, %v182_v5 }
 0x2b8   :  { %2033 = vrot.lane.b32.xlu0 %v11155_v36, %s9332_s14  ;;  %v5806_v2 = vmax.f32 %v5804_v53, %v5805_v56  ;;  %v6703_v34 = vsel %vm6675_vm12, %v5792_v51, %v5785_v14  ;;  %v5820_v24 = vmax.f32 %v5818_v58, %v5819_v48  ;;  %v3250_v26 = vsel %vm3221_vm7, %v3185_v30, %v11135_v35  ;;  %v705_v51 = vld [vmem:[#allocation2 + $0x2a0] sm:$0xff] }
 0x2b9   :  { %v11208_v18 = vpop.permute.xlu1 %2281  ;;  %v6704_v9 = vsel %vm13958_vm13, %v5799_v37, %v6703_v34  ;;  %v5827_v44 = vmax.f32 %v5825_v32, %v5826_v31  ;;  %v3315_v50 = vsel %vm3286_vm8, %v3250_v26, %v11176_v43  ;;  %v5834_v58 = vmax.f32 %v5832_v11, %v5833_v55  ;;  %v301_v11 = vld [vmem:[#allocation2 + $0x158] sm:$0xff]  ;;  %v706_v26 = vld [vmem:[#allocation2 + $0x2a8] sm:$0xff] }
 0x2ba   :  { %v11213_v21 = vpop.permute.xlu0 %2027  ;;  %v6705_v12 = vsel %vm6679_vm14, %v5806_v2, %v6704_v9  ;;  %vm13959_vm1 = vcmask 1045509   ;;  %vm13960_vm3 = vcmask 1046534   ;;  %vm13961_vm11 = vcmask 1047559  }
 0x2bb   :  { %2799 = vrot.lane.b32.xlu1 %v11204_v27, %s9335_s12  ;;  %v6706_v25 = vsel %vm6681_vm15, %v5813_v17, %v6705_v12  ;;  %vm13963_vm13 = vcmask 97280   ;;  %v316_v12 = vld [vmem:[#allocation2 + $0x240] sm:$0xff] }
 0x2bc   :  { %2513 = vrot.lane.b32.xlu0 %v753_v29, %s9334_s26  ;;  %v6707_v45 = vsel %vm13959_vm1, %v5820_v24, %v6706_v25  ;;  %vm13964_vm1 = vmmov %vm13956_vm2 }
 0x2bd   :  { %v2762_v53 = vpop.permute.xlu1 %2761  ;;  %v6708_v48 = vsel %vm13960_vm3, %v5827_v44, %v6707_v45  ;;  %vm13965_vm3 = vmmov %vm13963_vm13 }
 0x2be   :  { %v3380_v35 = vsel %vm3351_vm9, %v3315_v50, %v2762_v53  ;;  %v2508_v60 = vpop.permute.xlu0 %2507  ;;  %v6709_v32 = vsel %vm13961_vm11, %v5834_v58, %v6708_v48  ;;  %v198_v50 = vld [vmem:[%s13911_s0 + $0x1b8] sm:$0xff]  ;;  %v11303_v58 = vld [vmem:[#allocation2 + $0x1ea] sm:$0xff]  ;;  %vm13968_vm11 = vmmov %vm13964_vm1 }
 0x2bf   :  { %1269 = vrot.lane.b32.xlu1 %v11155_v36, %s9328_s29  ;;  %9052 = vmatprep.mubr.msk.f32.mxu0 %vm3428_vm10, %v3380_v35  ;;  %6814 = vst.msk [vmem:[#allocation3 + $0x41] sm:$0xff] %vm13956_vm2, %v6709_v32  ;;  %v2926_v36 = vsel %vm33_vm0, %v301_v11, %v10987_v10  ;;  %v754_v10 = vld [vmem:[#allocation2 + $0x1e9] sm:$0xff]  ;;  %vm13969_vm2 = vcmask 58368  }
 0x2c0   :  { %1015 = vrot.lane.b32.xlu0 %v11159_v42, %s9329_s30  ;;  %v2991_v42 = vsel %vm13962_vm4, %v2926_v36, %v11006_v8  ;;  %263 = vst.msk [vmem:[#allocation2 + $0x2d9] sm:$0xff] %vm33_vm0, %v198_v50  ;;  %vm13970_vm4 = vmmov %vm13969_vm2 }
 0x2c1   :  { %v11241_v43 = vpop.permute.xlu1 %1263 }
 0x2c2   :  { %v11243_v14 = vpop.permute.xlu0 %977 }
 0x2c3   :  { %1749 = vrot.lane.b32.xlu1 %v753_v29, %s9331_s11 }
 0x2c4   :  { %1495 = vrot.lane.b32.xlu0 %v690_v59, %s9330_s10  ;;  %v3056_v59 = vsel %vm13963_vm13, %v2991_v42, %v11038_v41  ;;  %v197_v41 = vld [vmem:[%s13911_s0 + $0x1b0] sm:$0xff]  ;;  %vm13971_vm13 = vmmov %vm13969_vm2 }
 0x2c5   :  { %v11249_v37 = vpop.permute.xlu1 %1743  ;;  %v3121_v55 = vsel %vm3091_vm5, %v3056_v59, %v11085_v7  ;;  %262 = vst.msk [vmem:[#allocation2 + $0x2d1] sm:$0xff] %vm33_vm0, %v197_v41 }
 0x2c6   :  { %v11251_v56 = vpop.permute.xlu0 %1517  ;;  %v3186_v8 = vsel %vm3156_vm6, %v3121_v55, %v11122_v54 }
 0x2c7   :  { %2289 = vrot.lane.b32.xlu1 %v705_v51, %s9333_s19  ;;  %v9036_v31 = vpop.f32.mrb[16].mxu0  ;;  %v3251_v30 = vsel %vm3221_vm7, %v3186_v8, %v11180_v46 }
 0x2c8   :  { %2035 = vrot.lane.b32.xlu0 %v11204_v27, %s9332_s14  ;;  %v3771_v2 = vpop.f32.mrb[17].mxu0  ;;  %v3316_v17 = vsel %vm3286_vm8, %v3251_v30, %v2508_v60  ;;  %v3777_v5 = vadd.f32 %v11100_v49, %v9036_v31  ;;  %v11310_v60 = vld [vmem:[#allocation2 + $0x2a1] sm:$0xff] }
 0x2c9   :  { %v11260_v13 = vpop.permute.xlu1 %2283 }
 0x2ca   :  { %v11264_v34 = vpop.permute.xlu0 %1997  ;;  %v4027_v35 = vmax.f32 %v3777_v5, 0.0 }
 0x2cb   :  { %2769 = vrot.lane.b32.xlu1 %v817_v4, %s9335_s12 }
 0x2cc   :  { %2515 = vrot.lane.b32.xlu0 %v754_v10, %s9334_s26 }
 0x2cd   :  { %v2764_v7 = vpop.permute.xlu1 %2763 }
 0x2ce   :  { %v3381_v9 = vsel %vm3351_vm9, %v3316_v17, %v2764_v7  ;;  %v2538_v24 = vpop.permute.xlu0 %2537 }
 0x2cf   :  { %1271 = vrot.lane.b32.xlu1 %v11204_v27, %s9328_s29  ;;  %9053 = vmatmul.mubr.msk.f32.gmra.mrb[28].mxu0 %vm3428_vm10, %v3381_v9  ;;  %v3772_v27 = vadd.f32 %v11100_v49, %v3771_v2 }
 0x2d0   :  { %985 = vrot.lane.b32.xlu0 %v753_v29, %s9329_s30  ;;  %v2941_v29 = vsel %vm33_vm0, %v316_v12, %v11009_v6 }
 0x2d1   :  { %v11282_v54 = vpop.permute.xlu1 %1233  ;;  %v3006_v53 = vsel %vm13964_vm1, %v2941_v29, %v11042_v0  ;;  %v4026_v32 = vmax.f32 %v3772_v27, 0.0  ;;  %vm13972_vm1 = vmmov %vm13969_vm2 }
 0x2d2   :  { %v11284_v46 = vpop.permute.xlu0 %979  ;;  %v3071_v45 = vsel %vm13965_vm3, %v3006_v53, %v11070_v3  ;;  %vm13973_vm3 = vmmov %vm13972_vm1 }
 0x2d3   :  { %1751 = vrot.lane.b32.xlu1 %v754_v10, %s9331_s11  ;;  %v3136_v48 = vsel %vm3091_vm5, %v3071_v45, %v11124_v19  ;;  %v4410_v19 = vcombine.high %v4026_v32, %v4026_v32  ;;  %v4417_v30 = vrot.slane %v4026_v32, %v10521_v63 }
 0x2d4   :  { %1525 = vrot.lane.b32.xlu0 %v705_v51, %s9330_s10  ;;  %v3201_v0 = vsel %vm3156_vm6, %v3136_v48, %v11157_v47  ;;  %v4427_v51 = vcombine.high %v4027_v35, %v4027_v35  ;;  %v317_v47 = vld [vmem:[#allocation2 + $0x248] sm:$0xff] }
 0x2d5   :  { %v11289_v44 = vpop.permute.xlu1 %1773  ;;  %v3266_v3 = vsel %vm3221_vm7, %v3201_v0, %v11208_v18  ;;  %v4434_v18 = vrot.slane %v4027_v35, %v10521_v63  ;;  %v4425_v53 = vcombine.high %v4417_v30, %v4417_v30 }
 0x2d6   :  { %v11292_v25 = vpop.permute.xlu0 %1519  ;;  %v3331_v36 = vsel %vm3286_vm8, %v3266_v3, %v2538_v24  ;;  %v4441_v17 = vrot.slane %v4427_v51, %v10521_v63  ;;  %v2942_v24 = vsel %vm33_vm0, %v317_v47, %v11027_v28  ;;  %v11350_v28 = vld [vmem:[#allocation2 + $0x1f8] sm:$0xff] }
 0x2d7   :  { %2291 = vrot.lane.b32.xlu1 %v706_v26, %s9333_s19  ;;  %v3007_v27 = vsel %vm13968_vm11, %v2942_v24, %v11075_v20  ;;  %v4442_v50 = vcombine.high %v4434_v18, %v4434_v18  ;;  %vm13974_vm11 = vmmov %vm13972_vm1 }
 0x2d8   :  { %2005 = vrot.lane.b32.xlu0 %v817_v4, %s9332_s14  ;;  %v4443_v48 = vcombine.high %v4441_v17, %v4441_v17 }
 0x2d9   :  { %v11308_v6 = vpop.permute.xlu1 %2253 }
 0x2da   :  { %v11314_v11 = vpop.permute.xlu0 %1999 }
 0x2db   :  { %2771 = vrot.lane.b32.xlu1 %v11303_v58, %s9335_s12 }
 0x2dc   :  { %2545 = vrot.lane.b32.xlu0 %v11310_v60, %s9334_s26 }
 0x2dd   :  { %v2794_v42 = vpop.permute.xlu1 %2793 }
 0x2de   :  { %v11325_v59 = vpop.permute.xlu0 %2539  ;;  %v9039_v31 = vpop.f32.mrb[18].mxu0  ;;  %v3396_v55 = vsel %vm3351_vm9, %v3331_v36, %v2794_v42 }
 0x2df   :  { %v3787_v2 = vadd.f32 %v11100_v49, %v9039_v31  ;;  %1241 = vrot.lane.b32.xlu1 %v817_v4, %s9328_s29  ;;  %v3781_v8 = vpop.f32.mrb[19].mxu0  ;;  %9076 = vmatprep.mubr.msk.f32.mxu1 %vm3428_vm10, %v3396_v55  ;;  %v4424_v4 = vrot.slane %v4410_v19, %v10521_v63 }
 0x2e0   :  { %987 = vrot.lane.b32.xlu0 %v754_v10, %s9329_s30  ;;  %v3782_v41 = vadd.f32 %v11100_v49, %v3781_v8  ;;  %v183_v8 = vld [vmem:[%s13911_s0 + $0x140] sm:$0xff] }
 0x2e1   :  { %v4029_v7 = vmax.f32 %v3787_v2, 0.0  ;;  %v11336_v9 = vpop.permute.xlu1 %1235  ;;  %v4426_v51 = vcombine.high %v4424_v4, %v4424_v4  ;;  %248 = vst.msk [vmem:[#allocation2 + $0x229] sm:$0xff] %vm33_vm0, %v183_v8 }
 0x2e2   :  { %13966 = vst [vmem:[#allocation7_spill] sm:$0xff] %v11336_v9  ;;  %v4028_v12 = vmax.f32 %v3782_v41, 0.0  ;;  %v11341_v5 = vpop.permute.xlu0 %1009 }
 0x2e3   :  { %13967 = vst [vmem:[#allocation8_spill] sm:$0xff] %v11341_v5  ;;  %v4461_v29 = vcombine.high %v4029_v7, %v4029_v7  ;;  %v4468_v10 = vrot.slane %v4029_v7, %v10521_v63  ;;  %1781 = vrot.lane.b32.xlu1 %v11310_v60, %s9331_s11 }
 0x2e4   :  { %v4444_v45 = vcombine.high %v4028_v12, %v4028_v12  ;;  %v4451_v35 = vrot.slane %v4028_v12, %v10521_v63  ;;  %1527 = vrot.lane.b32.xlu0 %v706_v26, %s9330_s10 }
 0x2e5   :  { %v4475_v32 = vrot.slane %v4461_v29, %v10521_v63  ;;  %v4476_v0 = vcombine.high %v4468_v10, %v4468_v10  ;;  %v5518_v20 = vmax.f32 %v4434_v18, %v4468_v10  ;;  %v11353_v3 = vpop.permute.xlu1 %1775 }
 0x2e6   :  { %v4458_v36 = vrot.slane %v4444_v45, %v10521_v63  ;;  %v4459_v42 = vcombine.high %v4451_v35, %v4451_v35  ;;  %v5514_v19 = vmax.f32 %v4417_v30, %v4451_v35  ;;  %v11356_v31 = vpop.permute.xlu0 %1489  ;;  %v11366_v30 = vld [vmem:[#allocation2 + $0x2a2] sm:$0xff] }
 0x2e7   :  { %v4477_v55 = vcombine.high %v4475_v32, %v4475_v32  ;;  %v5519_v47 = vmax.f32 %v4442_v50, %v4476_v0  ;;  %v5520_v2 = vmax.f32 %v4441_v17, %v4475_v32  ;;  %v5863_v26 = vsel %vm13969_vm2, %v5518_v20, -inf  ;;  %2261 = vrot.lane.b32.xlu1 %v11350_v28, %s9333_s19  ;;  %v11374_v45 = vld [vmem:[#allocation2 + $0x2a9] sm:$0xff]  ;;  %vm13975_vm2 = vmmov %vm13972_vm1 }
 0x2e8   :  { %v5864_v18 = vrot.slane %v5863_v26, 4  ;;  %v4460_v41 = vcombine.high %v4458_v36, %v4458_v36  ;;  %v5515_v7 = vmax.f32 %v4425_v53, %v4459_v42  ;;  %v5516_v24 = vmax.f32 %v4424_v4, %v4458_v36  ;;  %2007 = vrot.lane.b32.xlu0 %v11303_v58, %s9332_s14 }
 0x2e9   :  { %v5521_v17 = vmax.f32 %v4443_v48, %v4477_v55  ;;  %v5870_v12 = vsel %vm13970_vm4, %v5519_v47, -inf  ;;  %v5877_v29 = vsel %vm13971_vm13, %v5520_v2, -inf  ;;  %v5835_v10 = vsel %vm13972_vm1, %v5514_v19, -inf  ;;  %v11372_v50 = vpop.permute.xlu1 %2255  ;;  %vm13977_vm13 = vmmov %vm13972_vm1 }
 0x2ea   :  { %v5865_v53 = vmax.f32 %v5863_v26, %v5864_v18  ;;  %v5871_v4 = vrot.slane %v5870_v12, 4  ;;  %v5878_v35 = vrot.slane %v5877_v29, 4  ;;  %v5517_v32 = vmax.f32 %v4426_v51, %v4460_v41  ;;  %v11376_v0 = vpop.permute.xlu0 %2029 }
 0x2eb   :  { %v5884_v20 = vsel %vm13973_vm3, %v5521_v17, -inf  ;;  %v5836_v36 = vrot.slane %v5835_v10, 4  ;;  %v5842_v48 = vsel %vm13974_vm11, %v5515_v7, -inf  ;;  %v5849_v42 = vsel %vm13975_vm2, %v5516_v24, -inf  ;;  %2801 = vrot.lane.b32.xlu1 %v11366_v30, %s9335_s12 }
 0x2ec   :  { %vm13976_vm4 = vcmask 97280   ;;  %v5872_v55 = vmax.f32 %v5870_v12, %v5871_v4  ;;  %v5879_v47 = vmax.f32 %v5877_v29, %v5878_v35  ;;  %v5885_v2 = vrot.slane %v5884_v20, 4  ;;  %2547 = vrot.lane.b32.xlu0 %v11374_v45, %s9334_s26 }
 0x2ed   :  { %v3072_v19 = vsel %vm13976_vm4, %v3007_v27, %v11113_v15  ;;  %v5837_v51 = vmax.f32 %v5835_v10, %v5836_v36  ;;  %v5843_v26 = vrot.slane %v5842_v48, 4  ;;  %v5850_v8 = vrot.slane %v5849_v42, 4  ;;  %v2796_v41 = vpop.permute.xlu1 %2795  ;;  %vm13979_vm3 = vmmov %vm13976_vm4 }
 0x2ee   :  { %v5856_v18 = vsel %vm13977_vm13, %v5517_v32, -inf  ;;  %v3137_v7 = vsel %vm3091_vm5, %v3072_v19, %v11164_v22  ;;  %v5866_v24 = vrot.slane %v5865_v53, 2  ;;  %v5873_v17 = vrot.slane %v5872_v55, 2  ;;  %v11390_v5 = vpop.permute.xlu0 %2509 }
 0x2ef   :  { %v5886_v1 = vmax.f32 %v5884_v20, %v5885_v2  ;;  %v5838_v15 = vrot.slane %v5837_v51, 2  ;;  %v5844_v27 = vmax.f32 %v5842_v48, %v5843_v26  ;;  %v5851_v12 = vmax.f32 %v5849_v42, %v5850_v8  ;;  %1243 = vrot.lane.b32.xlu1 %v11303_v58, %s9328_s29  ;;  %v302_v26 = vld [vmem:[#allocation2 + $0x168] sm:$0xff] }
 0x2f0   :  { %v5857_v29 = vrot.slane %v5856_v18, 4  ;;  %v3202_v10 = vsel %vm3156_vm6, %v3137_v7, %v11213_v21  ;;  %v5880_v4 = vrot.slane %v5879_v47, 2  ;;  %1017 = vrot.lane.b32.xlu0 %v11310_v60, %s9329_s30  ;;  %v5867_v42 = vmax.f32 %v5865_v53, %v5866_v24 }
 0x2f1   :  { %v5887_v35 = vrot.slane %v5886_v1, 2  ;;  %v5839_v22 = vmax.f32 %v5837_v51, %v5838_v15  ;;  %v5845_v32 = vrot.slane %v5844_v27, 2  ;;  %v5852_v20 = vrot.slane %v5851_v12, 2  ;;  %v11398_v19 = vpop.permute.xlu1 %1265 }
 0x2f2   :  { %v5858_v36 = vmax.f32 %v5856_v18, %v5857_v29  ;;  %v3267_v48 = vsel %vm3221_vm7, %v3202_v10, %v11260_v13  ;;  %v5874_v2 = vmax.f32 %v5872_v55, %v5873_v17  ;;  %v11402_v58 = vpop.permute.xlu0 %1011  ;;  %v5881_v51 = vmax.f32 %v5879_v47, %v5880_v4  ;;  %v692_v13 = vld [vmem:[#allocation2 + $0x200] sm:$0xff] }
 0x2f3   :  { %v5840_v21 = vrot.slane %v5839_v22, 1  ;;  %v5846_v8 = vmax.f32 %v5844_v27, %v5845_v32  ;;  %v5853_v7 = vmax.f32 %v5851_v12, %v5852_v20  ;;  %1783 = vrot.lane.b32.xlu1 %v11374_v45, %s9331_s11  ;;  %v3332_v60 = vsel %vm3286_vm8, %v3267_v48, %v11325_v59 }
 0x2f4   :  { %v5859_v9 = vrot.slane %v5858_v36, 2  ;;  %1497 = vrot.lane.b32.xlu0 %v11350_v28, %s9330_s10  ;;  %v5888_v53 = vmax.f32 %v5886_v1, %v5887_v35  ;;  %v2927_v15 = vsel %vm33_vm0, %v302_v26, %v11060_v57  ;;  %v5868_v27 = vrot.slane %v5867_v42, 1  ;;  %v11423_v57 = vld [vmem:[#allocation2 + $0x2aa] sm:$0xff] }
 0x2f5   :  { %v5847_v55 = vrot.slane %v5846_v8, 1  ;;  %v5854_v18 = vrot.slane %v5853_v7, 1  ;;  %v11410_v17 = vpop.permute.xlu1 %1745  ;;  %v5875_v12 = vrot.slane %v5874_v2, 1  ;;  %v3397_v29 = vsel %vm3351_vm9, %v3332_v60, %v2796_v41 }
 0x2f6   :  { %v5860_v24 = vmax.f32 %v5858_v36, %v5859_v9  ;;  %v11415_v10 = vpop.permute.xlu0 %1491  ;;  %v5841_v59 = vmax.f32 %v5839_v22, %v5840_v21  ;;  %9077 = vmatmul.mubr.msk.f32.vlgmr.msra.gmra.mrb[0].mxu1 %vm3428_vm10, %v3397_v29  ;;  %vm13978_vm1 = vcmask 64512   ;;  %v5882_v9 = vrot.slane %v5881_v51, 1  ;;  %v755_v36 = vld [vmem:[#allocation2 + $0x1f9] sm:$0xff] }
 0x2f7   :  { %v5848_v47 = vmax.f32 %v5846_v8, %v5847_v55  ;;  %v5855_v4 = vmax.f32 %v5853_v7, %v5854_v18  ;;  %2263 = vrot.lane.b32.xlu1 %v692_v13, %s9333_s19  ;;  %v2992_v1 = vsel %vm13978_vm1, %v2927_v15, %v11117_v38  ;;  %v5889_v35 = vrot.slane %v5888_v53, 1  ;;  %v707_v29 = vld [vmem:[#allocation2 + $0x2b8] sm:$0xff] }
 0x2f8   :  { %v5861_v28 = vrot.slane %v5860_v24, 1  ;;  %2037 = vrot.lane.b32.xlu0 %v11366_v30, %s9332_s14  ;;  %v3057_v41 = vsel %vm13979_vm3, %v2992_v1, %v11145_v62  ;;  %v5869_v38 = vmax.f32 %v5867_v42, %v5868_v27  ;;  %vm13980_vm11 = vcmask 1042434   ;;  %v184_v42 = vld [vmem:[%s13911_s0 + $0x148] sm:$0xff]  ;;  %vm13984_vm3 = vmmov %vm13978_vm1 }
 0x2f9   :  { %v6710_v32 = vsel %vm6675_vm12, %v5848_v47, %v5841_v59  ;;  %v11428_v20 = vpop.permute.xlu1 %2285  ;;  %v3122_v48 = vsel %vm3091_vm5, %v3057_v41, %v11195_v23  ;;  %v5876_v7 = vmax.f32 %v5874_v2, %v5875_v12  ;;  %v5883_v55 = vmax.f32 %v5881_v51, %v5882_v9  ;;  %249 = vst.msk [vmem:[#allocation2 + $0x231] sm:$0xff] %vm33_vm0, %v184_v42  ;;  %v303_v12 = vld [vmem:[#allocation2 + $0x170] sm:$0xff]  ;;  %v756_v9 = vld [vmem:[#allocation2 + $0x201] sm:$0xff] }
 0x2fa   :  { %v5862_v22 = vmax.f32 %v5860_v24, %v5861_v28  ;;  %v6711_v26 = vsel %vm13980_vm11, %v5855_v4, %v6710_v32  ;;  %v11433_v21 = vpop.permute.xlu0 %2031  ;;  %v3187_v8 = vsel %vm3156_vm6, %v3122_v48, %v11264_v34  ;;  %v5890_v18 = vmax.f32 %v5888_v53, %v5889_v35  ;;  %v819_v4 = vld [vmem:[#allocation2 + $0x1fa] sm:$0xff]  ;;  %v11522_v42 = vld [vmem:[#allocation2 + $0x202] sm:$0xff] }
 0x2fb   :  { %2803 = vrot.lane.b32.xlu1 %v11423_v57, %s9335_s12  ;;  %v3252_v60 = vsel %vm3221_vm7, %v3187_v8, %v11308_v6  ;;  %vm13981_vm2 = vcmask 1045509   ;;  %vm13982_vm4 = vcmask 1046534   ;;  %vm13983_vm13 = vcmask 1047559   ;;  %v708_v8 = vld [vmem:[#allocation2 + $0x2c0] sm:$0xff] }
 0x2fc   :  { %v6712_v62 = vsel %vm6679_vm14, %v5862_v22, %v6711_v26  ;;  %2517 = vrot.lane.b32.xlu0 %v755_v36, %s9334_s26  ;;  %v3317_v2 = vsel %vm3286_vm8, %v3252_v60, %v11390_v5  ;;  %v2928_v47 = vsel %vm33_vm0, %v303_v12, %v11095_v61  ;;  %vm13985_vm11 = vcmask 97280   ;;  %v318_v26 = vld [vmem:[#allocation2 + $0x258] sm:$0xff] }
 0x2fd   :  { %v6713_v23 = vsel %vm6681_vm15, %v5869_v38, %v6712_v62  ;;  %v2766_v24 = vpop.permute.xlu1 %2765 }
 0x2fe   :  { %v6714_v34 = vsel %vm13981_vm2, %v5876_v7, %v6713_v23  ;;  %v3382_v51 = vsel %vm3351_vm9, %v3317_v2, %v2766_v24  ;;  %v2512_v15 = vpop.permute.xlu0 %2511  ;;  %vm13986_vm2 = vmmov %vm13978_vm1  ;;  %v11529_v2 = vld [vmem:[#allocation2 + $0x2b9] sm:$0xff] }
 0x2ff   :  { %v6715_v6 = vsel %vm13982_vm4, %v5883_v55, %v6714_v34  ;;  %1273 = vrot.lane.b32.xlu1 %v11366_v30, %s9328_s29  ;;  %9055 = vmatprep.mubr.msk.f32.mxu0 %vm3428_vm10, %v3382_v51  ;;  %v200_v55 = vld [vmem:[%s13911_s0 + $0x1c8] sm:$0xff]  ;;  %vm13987_vm4 = vmmov %vm13985_vm11 }
 0x300   :  { %v6716_v27 = vsel %vm13983_vm13, %v5890_v18, %v6715_v6  ;;  %1019 = vrot.lane.b32.xlu0 %v11374_v45, %s9329_s30  ;;  %v2993_v45 = vsel %vm13984_vm3, %v2928_v47, %v11148_v40  ;;  %265 = vst.msk [vmem:[#allocation2 + $0x2f1] sm:$0xff] %vm33_vm0, %v200_v55  ;;  %vm13988_vm13 = vmmov %vm13978_vm1 }
 0x301   :  { %6815 = vst.msk [vmem:[#allocation3 + $0x51] sm:$0xff] %vm13978_vm1, %v6716_v27  ;;  %v11460_v5 = vpop.permute.xlu1 %1267  ;;  %vm13989_vm1 = vcmask 58368  }
 0x302   :  { %v11462_v53 = vpop.permute.xlu0 %981  ;;  %vm13990_vm3 = vmmov %vm13989_vm1 }
 0x303   :  { %1753 = vrot.lane.b32.xlu1 %v755_v36, %s9331_s11 }
 0x304   :  { %1499 = vrot.lane.b32.xlu0 %v692_v13, %s9330_s10  ;;  %v3058_v13 = vsel %vm13985_vm11, %v2993_v45, %v11197_v39  ;;  %v199_v39 = vld [vmem:[%s13911_s0 + $0x1c0] sm:$0xff]  ;;  %vm13991_vm11 = vmmov %vm13989_vm1 }
 0x305   :  { %v11466_v59 = vpop.permute.xlu1 %1747  ;;  %v3123_v41 = vsel %vm3091_vm5, %v3058_v13, %v11249_v37  ;;  %264 = vst.msk [vmem:[#allocation2 + $0x2e9] sm:$0xff] %vm33_vm0, %v199_v39 }
 0x306   :  { %v11468_v30 = vpop.permute.xlu0 %1521  ;;  %v3188_v40 = vsel %vm3156_vm6, %v3123_v41, %v11314_v11 }
 0x307   :  { %2293 = vrot.lane.b32.xlu1 %v707_v29, %s9333_s19  ;;  %v9042_v28 = vpop.f32.mrb[20].mxu0  ;;  %v3253_v22 = vsel %vm3221_vm7, %v3188_v40, %v11372_v50 }
 0x308   :  { %2039 = vrot.lane.b32.xlu0 %v11423_v57, %s9332_s14  ;;  %v3791_v61 = vpop.f32.mrb[21].mxu0  ;;  %v3318_v32 = vsel %vm3286_vm8, %v3253_v22, %v2512_v15  ;;  %v3797_v7 = vadd.f32 %v11100_v49, %v9042_v28 }
 0x309   :  { %v11479_v1 = vpop.permute.xlu1 %2287 }
 0x30a   :  { %v11483_v35 = vpop.permute.xlu0 %2001  ;;  %v4031_v34 = vmax.f32 %v3797_v7, 0.0 }
 0x30b   :  { %2773 = vrot.lane.b32.xlu1 %v819_v4, %s9335_s12 }
 0x30c   :  { %2519 = vrot.lane.b32.xlu0 %v756_v9, %s9334_s26  ;;  %v4495_v15 = vcombine.high %v4031_v34, %v4031_v34 }
 0x30d   :  { %v2768_v37 = vpop.permute.xlu1 %2767 }
 0x30e   :  { %v3383_v48 = vsel %vm3351_vm9, %v3318_v32, %v2768_v37  ;;  %v2542_v38 = vpop.permute.xlu0 %2541  ;;  %v4509_v40 = vrot.slane %v4495_v15, %v10521_v63 }
 0x30f   :  { %1275 = vrot.lane.b32.xlu1 %v11423_v57, %s9328_s29  ;;  %9056 = vmatmul.mubr.msk.f32.gmra.mrb[30].mxu0 %vm3428_vm10, %v3383_v48  ;;  %v3792_v57 = vadd.f32 %v11100_v49, %v3791_v61 }
 0x310   :  { %989 = vrot.lane.b32.xlu0 %v755_v36, %s9329_s30  ;;  %v2943_v36 = vsel %vm33_vm0, %v318_v26, %v11132_v16  ;;  %v4511_v55 = vcombine.high %v4509_v40, %v4509_v40 }
 0x311   :  { %v11501_v11 = vpop.permute.xlu1 %1237  ;;  %v3008_v23 = vsel %vm13986_vm2, %v2943_v36, %v11185_v52  ;;  %v4030_v6 = vmax.f32 %v3792_v57, 0.0  ;;  %vm13992_vm2 = vmmov %vm13989_vm1 }
 0x312   :  { %v11503_v50 = vpop.permute.xlu0 %983  ;;  %v3073_v18 = vsel %vm13987_vm4, %v3008_v23, %v11251_v56  ;;  %vm13993_vm4 = vmmov %vm13989_vm1 }
 0x313   :  { %1755 = vrot.lane.b32.xlu1 %v756_v9, %s9331_s11  ;;  %v3138_v24 = vsel %vm3091_vm5, %v3073_v18, %v11289_v44  ;;  %v4478_v44 = vcombine.high %v4030_v6, %v4030_v6  ;;  %v4485_v41 = vrot.slane %v4030_v6, %v10521_v63 }
 0x314   :  { %1529 = vrot.lane.b32.xlu0 %v707_v29, %s9330_s10  ;;  %v3203_v52 = vsel %vm3156_vm6, %v3138_v24, %v11376_v0  ;;  %v319_v0 = vld [vmem:[#allocation2 + $0x260] sm:$0xff] }
 0x315   :  { %v11508_v62 = vpop.permute.xlu1 %1777  ;;  %v3268_v56 = vsel %vm3221_vm7, %v3203_v52, %v11428_v20  ;;  %v4502_v20 = vrot.slane %v4031_v34, %v10521_v63  ;;  %v2944_v32 = vsel %vm33_vm0, %v319_v0, %v11187_v33  ;;  %v4493_v7 = vcombine.high %v4485_v41, %v4485_v41  ;;  %v11569_v33 = vld [vmem:[#allocation2 + $0x210] sm:$0xff] }
 0x316   :  { %v11511_v60 = vpop.permute.xlu0 %1523  ;;  %v3333_v27 = vsel %vm3286_vm8, %v3268_v56, %v2542_v38  ;;  %v3009_v38 = vsel %vm13988_vm13, %v2944_v32, %v11241_v43  ;;  %v11589_v32 = vld [vmem:[#allocation2 + $0x2c1] sm:$0xff]  ;;  %vm13994_vm13 = vmmov %vm13989_vm1 }
 0x317   :  { %2295 = vrot.lane.b32.xlu1 %v708_v8, %s9333_s19 }
 0x318   :  { %2009 = vrot.lane.b32.xlu0 %v819_v4, %s9332_s14 }
 0x319   :  { %v11527_v16 = vpop.permute.xlu1 %2257 }
 0x31a   :  { %v11533_v51 = vpop.permute.xlu0 %2003 }
 0x31b   :  { %2775 = vrot.lane.b32.xlu1 %v11522_v42, %s9335_s12 }
 0x31c   :  { %2549 = vrot.lane.b32.xlu0 %v11529_v2, %s9334_s26 }
 0x31d   :  { %v2798_v12 = vpop.permute.xlu1 %2797 }
 0x31e   :  { %v3398_v29 = vsel %vm3351_vm9, %v3333_v27, %v2798_v12  ;;  %v11545_v47 = vpop.permute.xlu0 %2543  ;;  %v9045_v45 = vpop.f32.mrb[22].mxu0 }
 0x31f   :  { %v3807_v13 = vadd.f32 %v11100_v49, %v9045_v45  ;;  %1245 = vrot.lane.b32.xlu1 %v819_v4, %s9328_s29  ;;  %v3801_v28 = vpop.f32.mrb[23].mxu0  ;;  %9079 = vmatprep.mubr.msk.f32.mxu1 %vm3428_vm10, %v3398_v29  ;;  %v4492_v4 = vrot.slane %v4478_v44, %v10521_v63 }
 0x320   :  { %991 = vrot.lane.b32.xlu0 %v756_v9, %s9329_s30  ;;  %v3802_v61 = vadd.f32 %v11100_v49, %v3801_v28  ;;  %v4510_v49 = vcombine.high %v4502_v20, %v4502_v20  ;;  %v11582_v28 = vld [vmem:[#allocation2 + $0x2ba] sm:$0xff] }
 0x321   :  { %v4033_v22 = vmax.f32 %v3807_v13, 0.0  ;;  %v11555_v39 = vpop.permute.xlu1 %1239  ;;  %v4494_v24 = vcombine.high %v4492_v4, %v4492_v4 }
 0x322   :  { %v4032_v37 = vmax.f32 %v3802_v61, 0.0  ;;  %v11560_v48 = vpop.permute.xlu0 %1013 }
 0x323   :  { %v4529_v26 = vcombine.high %v4033_v22, %v4033_v22  ;;  %v4536_v9 = vrot.slane %v4033_v22, %v10521_v63  ;;  %1785 = vrot.lane.b32.xlu1 %v11529_v2, %s9331_s11 }
 0x324   :  { %v4512_v57 = vcombine.high %v4032_v37, %v4032_v37  ;;  %v4519_v36 = vrot.slane %v4032_v37, %v10521_v63  ;;  %1531 = vrot.lane.b32.xlu0 %v708_v8, %s9330_s10 }
 0x325   :  { %v4543_v23 = vrot.slane %v4529_v26, %v10521_v63  ;;  %v4544_v18 = vcombine.high %v4536_v9, %v4536_v9  ;;  %v5526_v43 = vmax.f32 %v4502_v20, %v4536_v9  ;;  %v11572_v34 = vpop.permute.xlu1 %1779 }
 0x326   :  { %v4526_v6 = vrot.slane %v4512_v57, %v10521_v63  ;;  %v4527_v52 = vcombine.high %v4519_v36, %v4519_v36  ;;  %v5522_v56 = vmax.f32 %v4485_v41, %v4519_v36  ;;  %v11575_v15 = vpop.permute.xlu0 %1493 }
 0x327   :  { %v4545_v27 = vcombine.high %v4543_v23, %v4543_v23  ;;  %v5527_v12 = vmax.f32 %v4510_v49, %v4544_v18  ;;  %v5528_v44 = vmax.f32 %v4509_v40, %v4543_v23  ;;  %v5919_v8 = vsel %vm13989_vm1, %v5526_v43, -inf  ;;  %2265 = vrot.lane.b32.xlu1 %v11569_v33, %s9333_s19 }
 0x328   :  { %v5920_v29 = vrot.slane %v5919_v8, 4  ;;  %v4528_v45 = vcombine.high %v4526_v6, %v4526_v6  ;;  %v5523_v0 = vmax.f32 %v4493_v7, %v4527_v52  ;;  %v5524_v13 = vmax.f32 %v4492_v4, %v4526_v6  ;;  %2011 = vrot.lane.b32.xlu0 %v11522_v42, %s9332_s14 }
 0x329   :  { %v5529_v20 = vmax.f32 %v4511_v55, %v4545_v27  ;;  %v5926_v41 = vsel %vm13990_vm3, %v5527_v12, -inf  ;;  %v5933_v61 = vsel %vm13991_vm11, %v5528_v44, -inf  ;;  %v5891_v40 = vsel %vm13992_vm2, %v5522_v56, -inf  ;;  %v11587_v22 = vpop.permute.xlu1 %2259  ;;  %vm13996_vm11 = vmmov %vm13989_vm1 }
 0x32a   :  { %v5921_v37 = vmax.f32 %v5919_v8, %v5920_v29  ;;  %v5927_v26 = vrot.slane %v5926_v41, 4  ;;  %v5934_v9 = vrot.slane %v5933_v61, 4  ;;  %v5525_v4 = vmax.f32 %v4494_v24, %v4528_v45  ;;  %v11591_v49 = vpop.permute.xlu0 %2033 }
 0x32b   :  { %v5940_v7 = vsel %vm13993_vm4, %v5529_v20, -inf  ;;  %v5892_v57 = vrot.slane %v5891_v40, 4  ;;  %v5898_v36 = vsel %vm13994_vm13, %v5523_v0, -inf  ;;  %v5905_v55 = vsel %vm13989_vm1, %v5524_v13, -inf  ;;  %2805 = vrot.lane.b32.xlu1 %v11582_v28, %s9335_s12 }
 0x32c   :  { %vm13995_vm3 = vcmask 97280   ;;  %v5928_v18 = vmax.f32 %v5926_v41, %v5927_v26  ;;  %v5935_v43 = vmax.f32 %v5933_v61, %v5934_v9  ;;  %v5941_v6 = vrot.slane %v5940_v7, 4  ;;  %2551 = vrot.lane.b32.xlu0 %v11589_v32, %s9334_s26 }
 0x32d   :  { %v3074_v23 = vsel %vm13995_vm3, %v3009_v38, %v11292_v25  ;;  %v5893_v24 = vmax.f32 %v5891_v40, %v5892_v57  ;;  %v5899_v52 = vrot.slane %v5898_v36, 4  ;;  %v5906_v56 = vrot.slane %v5905_v55, 4  ;;  %v2800_v12 = vpop.permute.xlu1 %2799  ;;  %vm13998_vm4 = vmmov %vm13995_vm3 }
 0x32e   :  { %v5912_v27 = vsel %vm13996_vm11, %v5525_v4, -inf  ;;  %v3139_v44 = vsel %vm3091_vm5, %v3074_v23, %v11353_v3  ;;  %v5922_v8 = vrot.slane %v5921_v37, 2  ;;  %v5929_v29 = vrot.slane %v5928_v18, 2  ;;  %v11605_v0 = vpop.permute.xlu0 %2513  ;;  %v304_v23 = vld [vmem:[#allocation2 + $0x1b0] sm:$0xff] }
 0x32f   :  { %v5942_v45 = vmax.f32 %v5940_v7, %v5941_v6  ;;  %v5894_v25 = vrot.slane %v5893_v24, 2  ;;  %v5900_v38 = vmax.f32 %v5898_v36, %v5899_v52  ;;  %v5907_v13 = vmax.f32 %v5905_v55, %v5906_v56  ;;  %1247 = vrot.lane.b32.xlu1 %v11522_v42, %s9328_s29 }
 0x330   :  { %v5913_v20 = vrot.slane %v5912_v27, 4  ;;  %v3204_v41 = vsel %vm3156_vm6, %v3139_v44, %v11433_v21  ;;  %v5936_v61 = vrot.slane %v5935_v43, 2  ;;  %1021 = vrot.lane.b32.xlu0 %v11529_v2, %s9329_s30  ;;  %v5923_v36 = vmax.f32 %v5921_v37, %v5922_v8 }
 0x331   :  { %v5943_v40 = vrot.slane %v5942_v45, 2  ;;  %v5895_v3 = vmax.f32 %v5893_v24, %v5894_v25  ;;  %v5901_v26 = vrot.slane %v5900_v38, 2  ;;  %v5908_v9 = vrot.slane %v5907_v13, 2  ;;  %v11613_v7 = vpop.permute.xlu1 %1269 }
 0x332   :  { %v5914_v4 = vmax.f32 %v5912_v27, %v5913_v20  ;;  %v3269_v57 = vsel %vm3221_vm7, %v3204_v41, %v11479_v1  ;;  %v5930_v55 = vmax.f32 %v5928_v18, %v5929_v29  ;;  %v11617_v42 = vpop.permute.xlu0 %1015  ;;  %v5937_v24 = vmax.f32 %v5935_v43, %v5936_v61  ;;  %v694_v1 = vld [vmem:[#allocation2 + $0x218] sm:$0xff] }
 0x333   :  { %v5896_v21 = vrot.slane %v5895_v3, 1  ;;  %v5902_v6 = vmax.f32 %v5900_v38, %v5901_v26  ;;  %v5909_v52 = vmax.f32 %v5907_v13, %v5908_v9  ;;  %1787 = vrot.lane.b32.xlu1 %v11589_v32, %s9331_s11  ;;  %v3334_v2 = vsel %vm3286_vm8, %v3269_v57, %v11545_v47 }
 0x334   :  { %v5915_v56 = vrot.slane %v5914_v4, 2  ;;  %1501 = vrot.lane.b32.xlu0 %v11569_v33, %s9330_s10  ;;  %v5944_v37 = vmax.f32 %v5942_v45, %v5943_v40  ;;  %v2929_v29 = vsel %vm33_vm0, %v304_v23, %v11243_v14  ;;  %v5924_v25 = vrot.slane %v5923_v36, 1  ;;  %v836_v14 = vld [vmem:[#allocation2 + $0x2c2] sm:$0xff] }
 0x335   :  { %v5903_v18 = vrot.slane %v5902_v6, 1  ;;  %v5910_v27 = vrot.slane %v5909_v52, 1  ;;  %v11625_v8 = vpop.permute.xlu1 %1749  ;;  %v5931_v38 = vrot.slane %v5930_v55, 1  ;;  %v3399_v13 = vsel %vm3351_vm9, %v3334_v2, %v2800_v12 }
 0x336   :  { %v5916_v44 = vmax.f32 %v5914_v4, %v5915_v56  ;;  %v11630_v20 = vpop.permute.xlu0 %1495  ;;  %v5897_v47 = vmax.f32 %v5895_v3, %v5896_v21  ;;  %9080 = vmatmul.mubr.msk.f32.gmra.mrb[2].mxu1 %vm3428_vm10, %v3399_v13  ;;  %vm13997_vm2 = vcmask 64512   ;;  %v5938_v61 = vrot.slane %v5937_v24, 1  ;;  %v757_v4 = vld [vmem:[#allocation2 + $0x211] sm:$0xff] }
 0x337   :  { %v5904_v43 = vmax.f32 %v5902_v6, %v5903_v18  ;;  %v5911_v41 = vmax.f32 %v5909_v52, %v5910_v27  ;;  %2267 = vrot.lane.b32.xlu1 %v694_v1, %s9333_s19  ;;  %v2994_v45 = vsel %vm13997_vm2, %v2929_v29, %v11282_v54  ;;  %v5945_v40 = vrot.slane %v5944_v37, 1 }
 0x338   :  { %v5917_v33 = vrot.slane %v5916_v44, 1  ;;  %2041 = vrot.lane.b32.xlu0 %v11582_v28, %s9332_s14  ;;  %v3059_v12 = vsel %vm13998_vm4, %v2994_v45, %v11356_v31  ;;  %v5925_v23 = vmax.f32 %v5923_v36, %v5924_v25  ;;  %vm13999_vm13 = vcmask 1042434   ;;  %vm14004_vm4 = vmmov %vm13997_vm2  ;;  %v758_v45 = vld [vmem:[#allocation2 + $0x219] sm:$0xff] }
 0x339   :  { %v6717_v26 = vsel %vm6675_vm12, %v5904_v43, %v5897_v47  ;;  %v11641_v9 = vpop.permute.xlu1 %2289  ;;  %v3124_v57 = vsel %vm3091_vm5, %v3059_v12, %v11410_v17  ;;  %v5932_v52 = vmax.f32 %v5930_v55, %v5931_v38  ;;  %v5939_v2 = vmax.f32 %v5937_v24, %v5938_v61  ;;  %v305_v24 = vld [vmem:[#allocation2 + $0x1b8] sm:$0xff] }
 0x33a   :  { %v5918_v3 = vmax.f32 %v5916_v44, %v5917_v33  ;;  %v6718_v54 = vsel %vm13999_vm13, %v5911_v41, %v6717_v26  ;;  %v11646_v21 = vpop.permute.xlu0 %2035  ;;  %v3189_v6 = vsel %vm3156_vm6, %v3124_v57, %v11483_v35  ;;  %v5946_v17 = vmax.f32 %v5944_v37, %v5945_v40  ;;  %v709_v37 = vld [vmem:[#allocation2 + $0x2d0] sm:$0xff] }
 0x33b   :  { %2807 = vrot.lane.b32.xlu1 %v836_v14, %s9335_s12  ;;  %v3254_v56 = vsel %vm3221_vm7, %v3189_v6, %v11527_v16  ;;  %vm14000_vm1 = vcmask 1045509   ;;  %vm14001_vm3 = vcmask 1046534   ;;  %vm14002_vm11 = vcmask 1047559   ;;  %v821_v43 = vld [vmem:[#allocation2 + $0x212] sm:$0xff] }
 0x33c   :  { %v6719_v31 = vsel %vm6679_vm14, %v5918_v3, %v6718_v54  ;;  %2521 = vrot.lane.b32.xlu0 %v757_v4, %s9334_s26  ;;  %v3319_v27 = vsel %vm3286_vm8, %v3254_v56, %v11605_v0  ;;  %v2930_v13 = vsel %vm33_vm0, %v305_v24, %v11284_v46  ;;  %vm14005_vm13 = vcmask 97280   ;;  %v320_v54 = vld [vmem:[#allocation2 + $0x270] sm:$0xff]  ;;  %v710_v6 = vld [vmem:[#allocation2 + $0x2d8] sm:$0xff] }
 0x33d   :  { %v6720_v18 = vsel %vm6681_vm15, %v5925_v23, %v6719_v31  ;;  %v2770_v35 = vpop.permute.xlu1 %2769  ;;  %v14006_v56 = vld [vmem:[#allocation8_spill] sm:$0xff] }
 0x33e   :  { %v6721_v36 = vsel %vm14000_vm1, %v5932_v52, %v6720_v18  ;;  %v3384_v44 = vsel %vm3351_vm9, %v3319_v27, %v2770_v35  ;;  %v2516_v29 = vpop.permute.xlu0 %2515  ;;  %vm14007_vm1 = vmmov %vm13997_vm2  ;;  %v822_v18 = vld [vmem:[#allocation2 + $0x21a] sm:$0xff]  ;;  %v11731_v27 = vld [vmem:[#allocation2 + $0x2d1] sm:$0xff] }
 0x33f   :  { %v6722_v55 = vsel %vm14001_vm3, %v5939_v2, %v6721_v36  ;;  %1277 = vrot.lane.b32.xlu1 %v11582_v28, %s9328_s29  ;;  %9058 = vmatprep.mubr.msk.f32.mxu0 %vm3428_vm10, %v3384_v44  ;;  %vm14008_vm3 = vmmov %vm14005_vm13 }
 0x340   :  { %v6723_v25 = vsel %vm14002_vm11, %v5946_v17, %v6722_v55  ;;  %1023 = vrot.lane.b32.xlu0 %v11589_v32, %s9329_s30  ;;  %v14003_v32 = vld [vmem:[#allocation7_spill] sm:$0xff]  ;;  %vm14009_vm11 = vmmov %vm14007_vm1 }
 0x341   :  { %6816 = vst.msk [vmem:[#allocation3 + $0x61] sm:$0xff] %vm13997_vm2, %v6723_v25  ;;  %v11668_v16 = vpop.permute.xlu1 %1271  ;;  %v2995_v47 = vsel %vm14004_vm4, %v2930_v13, %v14003_v32  ;;  %v321_v32 = vld [vmem:[#allocation2 + $0x278] sm:$0xff]  ;;  %vm14010_vm2 = vmmov %vm14008_vm3  ;;  %vm14012_vm4 = vcmask 58368  }
 0x342   :  { %v11670_v0 = vpop.permute.xlu0 %985  ;;  %v3060_v41 = vsel %vm14005_vm13, %v2995_v47, %v11415_v10  ;;  %v201_v10 = vld [vmem:[%s13911_s0 + $0x1d0] sm:$0xff]  ;;  %v695_v47 = vld [vmem:[#allocation2 + $0x228] sm:$0xff]  ;;  %vm14013_vm13 = vmmov %vm14012_vm4 }
 0x343   :  { %1757 = vrot.lane.b32.xlu1 %v757_v4, %s9331_s11  ;;  %v3125_v61 = vsel %vm3091_vm5, %v3060_v41, %v11466_v59  ;;  %266 = vst.msk [vmem:[#allocation2 + $0x301] sm:$0xff] %vm33_vm0, %v201_v10 }
 0x344   :  { %1503 = vrot.lane.b32.xlu0 %v694_v1, %s9330_s10  ;;  %v3190_v40 = vsel %vm3156_vm6, %v3125_v61, %v11533_v51  ;;  %v2946_v61 = vsel %vm33_vm0, %v321_v32, %v11402_v58 }
 0x345   :  { %v11674_v38 = vpop.permute.xlu1 %1751  ;;  %v3255_v3 = vsel %vm3221_vm7, %v3190_v40, %v11587_v22  ;;  %v11773_v40 = vld [vmem:[#allocation2 + $0x2d2] sm:$0xff] }
 0x346   :  { %v11676_v28 = vpop.permute.xlu0 %1525  ;;  %v3320_v26 = vsel %vm3286_vm8, %v3255_v3, %v2516_v29 }
 0x347   :  { %2297 = vrot.lane.b32.xlu1 %v709_v37, %s9333_s19 }
 0x348   :  { %2043 = vrot.lane.b32.xlu0 %v836_v14, %s9332_s14  ;;  %v9048_v1 = vpop.f32.mrb[24].mxu0 }
 0x349   :  { %v11686_v33 = vpop.permute.xlu1 %2291  ;;  %v3811_v12 = vpop.f32.mrb[25].mxu0 }
 0x34a   :  { %v11690_v46 = vpop.permute.xlu0 %2005 }
 0x34b   :  { %2777 = vrot.lane.b32.xlu1 %v821_v43, %s9335_s12 }
 0x34c   :  { %2523 = vrot.lane.b32.xlu0 %v758_v45, %s9334_s26 }
 0x34d   :  { %v2772_v59 = vpop.permute.xlu1 %2771 }
 0x34e   :  { %v3385_v57 = vsel %vm3351_vm9, %v3320_v26, %v2772_v59  ;;  %v2546_v23 = vpop.permute.xlu0 %2545  ;;  %v11779_v26 = vld [vmem:[#allocation2 + $0x2d9] sm:$0xff] }
 0x34f   :  { %1279 = vrot.lane.b32.xlu1 %v836_v14, %s9328_s29  ;;  %9059 = vmatmul.mubr.msk.f32.gmra.mrb[32].mxu0 %vm3428_vm10, %v3385_v57  ;;  %v2945_v14 = vsel %vm33_vm0, %v320_v54, %v14006_v56  ;;  %v306_v56 = vld [vmem:[#allocation2 + $0x1c8] sm:$0xff] }
 0x350   :  { %993 = vrot.lane.b32.xlu0 %v757_v4, %s9329_s30  ;;  %v202_v4 = vld [vmem:[%s13911_s0 + $0x1d8] sm:$0xff]  ;;  %v3010_v2 = vsel %vm14007_vm1, %v2945_v14, %v11398_v19  ;;  %vm14014_vm1 = vmmov %vm14012_vm4 }
 0x351   :  { %v11707_v51 = vpop.permute.xlu1 %1241  ;;  %267 = vst.msk [vmem:[#allocation2 + $0x309] sm:$0xff] %vm33_vm0, %v202_v4  ;;  %v3075_v17 = vsel %vm14008_vm3, %v3010_v2, %v11468_v30  ;;  %vm14015_vm3 = vmmov %vm14014_vm1 }
 0x352   :  { %v11709_v22 = vpop.permute.xlu0 %987  ;;  %v3140_v35 = vsel %vm3091_vm5, %v3075_v17, %v11508_v62 }
 0x353   :  { %1759 = vrot.lane.b32.xlu1 %v758_v45, %s9331_s11  ;;  %v3205_v19 = vsel %vm3156_vm6, %v3140_v35, %v11591_v49  ;;  %v11754_v49 = vld [vmem:[%s13913_s2] ss:$0 sm:$0xff] }
 0x354   :  { %1533 = vrot.lane.b32.xlu0 %v709_v37, %s9330_s10  ;;  %v3270_v44 = vsel %vm3221_vm7, %v3205_v19, %v11641_v9  ;;  %v3817_v9 = vadd.f32 %v11754_v49, %v9048_v1  ;;  %v3812_v13 = vadd.f32 %v11754_v49, %v3811_v12  ;;  %v3011_v12 = vsel %vm14009_vm11, %v2946_v61, %v11460_v5  ;;  %vm14016_vm11 = vmmov %vm14014_vm1 }
 0x355   :  { %v11713_v52 = vpop.permute.xlu1 %1781  ;;  %v3335_v30 = vsel %vm3286_vm8, %v3270_v44, %v2546_v23  ;;  %v3076_v3 = vsel %vm14010_vm2, %v3011_v12, %v11511_v60  ;;  %vm14017_vm2 = vmmov %vm14014_vm1 }
 0x356   :  { %v11715_v31 = vpop.permute.xlu0 %1527  ;;  %v4035_v41 = vmax.f32 %v3817_v9, 0.0  ;;  %v4034_v1 = vmax.f32 %v3812_v13, 0.0  ;;  %v3141_v58 = vsel %vm3091_vm5, %v3076_v3, %v11572_v34 }
 0x357   :  { %2299 = vrot.lane.b32.xlu1 %v710_v6, %s9333_s19  ;;  %v3206_v5 = vsel %vm3156_vm6, %v3141_v58, %v11646_v21 }
 0x358   :  { %2013 = vrot.lane.b32.xlu0 %v821_v43, %s9332_s14  ;;  %v4563_v59 = vcombine.high %v4035_v41, %v4035_v41  ;;  %v4546_v23 = vcombine.high %v4034_v1, %v4034_v1  ;;  %v3271_v60 = vsel %vm3221_vm7, %v3206_v5, %v11686_v33  ;;  %v4570_v14 = vrot.slane %v4035_v41, %v10521_v63 }
 0x359   :  { %v11729_v36 = vpop.permute.xlu1 %2261  ;;  %v4553_v4 = vrot.slane %v4034_v1, %v10521_v63 }
 0x35a   :  { %v11735_v55 = vpop.permute.xlu0 %2007  ;;  %v4577_v35 = vrot.slane %v4563_v59, %v10521_v63  ;;  %v4578_v13 = vcombine.high %v4570_v14, %v4570_v14 }
 0x35b   :  { %2779 = vrot.lane.b32.xlu1 %v822_v18, %s9335_s12  ;;  %v4561_v32 = vcombine.high %v4553_v4, %v4553_v4 }
 0x35c   :  { %2553 = vrot.lane.b32.xlu0 %v11731_v27, %s9334_s26  ;;  %v4579_v12 = vcombine.high %v4577_v35, %v4577_v35 }
 0x35d   :  { %v2802_v29 = vpop.permute.xlu1 %2801 }
 0x35e   :  { %v3400_v25 = vsel %vm3351_vm9, %v3335_v30, %v2802_v29  ;;  %v2548_v24 = vpop.permute.xlu0 %2547  ;;  %v4560_v30 = vrot.slane %v4546_v23, %v10521_v63 }
 0x35f   :  { %1249 = vrot.lane.b32.xlu1 %v821_v43, %s9328_s29  ;;  %9082 = vmatprep.mubr.msk.f32.mxu1 %vm3428_vm10, %v3400_v25  ;;  %v3336_v21 = vsel %vm3286_vm8, %v3271_v60, %v2548_v24  ;;  %v2931_v25 = vsel %vm33_vm0, %v306_v56, %v11462_v53  ;;  %v11821_v56 = vld [vmem:[#allocation2 + $0x230] sm:$0xff] }
 0x360   :  { %995 = vrot.lane.b32.xlu0 %v758_v45, %s9329_s30  ;;  %v4562_v53 = vcombine.high %v4560_v30, %v4560_v30 }
 0x361   :  { %v11749_v62 = vpop.permute.xlu1 %1243 }
 0x362   :  { %v11757_v37 = vpop.permute.xlu0 %1017 }
 0x363   :  { %1789 = vrot.lane.b32.xlu1 %v11731_v27, %s9331_s11 }
 0x364   :  { %1535 = vrot.lane.b32.xlu0 %v710_v6, %s9330_s10 }
 0x365   :  { %v11763_v43 = vpop.permute.xlu1 %1783 }
 0x366   :  { %v11765_v45 = vpop.permute.xlu0 %1497 }
 0x367   :  { %2269 = vrot.lane.b32.xlu1 %v695_v47, %s9333_s19 }
 0x368   :  { %2015 = vrot.lane.b32.xlu0 %v822_v18, %s9332_s14 }
 0x369   :  { %v11777_v10 = vpop.permute.xlu1 %2263 }
 0x36a   :  { %v11783_v57 = vpop.permute.xlu0 %2037 }
 0x36b   :  { %v9051_v54 = vpop.f32.mrb[26].mxu0  ;;  %2809 = vrot.lane.b32.xlu1 %v11773_v40, %s9335_s12 }
 0x36c   :  { %v3827_v6 = vadd.f32 %v11754_v49, %v9051_v54  ;;  %2555 = vrot.lane.b32.xlu0 %v11779_v26, %s9334_s26  ;;  %v3821_v34 = vpop.f32.mrb[27].mxu0 }
 0x36d   :  { %v3822_v2 = vadd.f32 %v11754_v49, %v3821_v34  ;;  %v2804_v17 = vpop.permute.xlu1 %2803 }
 0x36e   :  { %v4037_v19 = vmax.f32 %v3827_v6, 0.0  ;;  %v3401_v33 = vsel %vm3351_vm9, %v3336_v21, %v2804_v17  ;;  %v11800_v44 = vpop.permute.xlu0 %2517 }
 0x36f   :  { %v4036_v29 = vmax.f32 %v3822_v2, 0.0  ;;  %1251 = vrot.lane.b32.xlu1 %v822_v18, %s9328_s29  ;;  %9083 = vmatmul.mubr.msk.f32.gmra.mrb[4].mxu1 %vm3428_vm10, %v3401_v33 }
 0x370   :  { %v4597_v24 = vcombine.high %v4037_v19, %v4037_v19  ;;  %v4604_v9 = vrot.slane %v4037_v19, %v10521_v63  ;;  %1025 = vrot.lane.b32.xlu0 %v11731_v27, %s9329_s30 }
 0x371   :  { %v4580_v41 = vcombine.high %v4036_v29, %v4036_v29  ;;  %v4587_v61 = vrot.slane %v4036_v29, %v10521_v63  ;;  %v11811_v1 = vpop.permute.xlu1 %1273 }
 0x372   :  { %v4611_v18 = vrot.slane %v4597_v24, %v10521_v63  ;;  %v4612_v3 = vcombine.high %v4604_v9, %v4604_v9  ;;  %v5534_v58 = vmax.f32 %v4570_v14, %v4604_v9  ;;  %v11814_v59 = vpop.permute.xlu0 %1019 }
 0x373   :  { %14011 = vst [vmem:[#allocation7_spill] sm:$0xff] %v11814_v59  ;;  %v4594_v5 = vrot.slane %v4580_v41, %v10521_v63  ;;  %v4595_v23 = vcombine.high %v4587_v61, %v4587_v61  ;;  %v5530_v54 = vmax.f32 %v4553_v4, %v4587_v61  ;;  %1791 = vrot.lane.b32.xlu1 %v11779_v26, %s9331_s11 }
 0x374   :  { %v4613_v27 = vcombine.high %v4611_v18, %v4611_v18  ;;  %v5535_v60 = vmax.f32 %v4578_v13, %v4612_v3  ;;  %v5536_v6 = vmax.f32 %v4577_v35, %v4611_v18  ;;  %v5975_v34 = vsel %vm14012_vm4, %v5534_v58, -inf  ;;  %1505 = vrot.lane.b32.xlu0 %v695_v47, %s9330_s10  ;;  %vm14018_vm4 = vmmov %vm14014_vm1  ;;  %v11837_v18 = vld [vmem:[#allocation2 + $0x2da] sm:$0xff] }
 0x375   :  { %v5976_v14 = vrot.slane %v5975_v34, 4  ;;  %v4596_v21 = vcombine.high %v4594_v5, %v4594_v5  ;;  %v5531_v2 = vmax.f32 %v4561_v32, %v4595_v23  ;;  %v5532_v17 = vmax.f32 %v4560_v30, %v4594_v5  ;;  %v11823_v19 = vpop.permute.xlu1 %1753 }
 0x376   :  { %v5537_v33 = vmax.f32 %v4579_v12, %v4613_v27  ;;  %v5982_v4 = vsel %vm14013_vm13, %v5535_v60, -inf  ;;  %v5989_v29 = vsel %vm14014_vm1, %v5536_v6, -inf  ;;  %v5947_v24 = vsel %vm14015_vm3, %v5530_v54, -inf  ;;  %v11828_v35 = vpop.permute.xlu0 %1499  ;;  %v11843_v54 = vld [vmem:[#allocation2 + $0x229] sm:$0xff] }
 0x377   :  { %v5977_v9 = vmax.f32 %v5975_v34, %v5976_v14  ;;  %v5983_v13 = vrot.slane %v5982_v4, 4  ;;  %v5990_v47 = vrot.slane %v5989_v29, 4  ;;  %v5533_v41 = vmax.f32 %v4562_v53, %v4596_v21  ;;  %2271 = vrot.lane.b32.xlu1 %v11821_v56, %s9333_s19 }
 0x378   :  { %v5996_v30 = vsel %vm14016_vm11, %v5537_v33, -inf  ;;  %v5948_v32 = vrot.slane %v5947_v24, 4  ;;  %v5954_v61 = vsel %vm14017_vm2, %v5531_v2, -inf  ;;  %v5961_v12 = vsel %vm14018_vm4, %v5532_v17, -inf  ;;  %2045 = vrot.lane.b32.xlu0 %v11773_v40, %s9332_s14 }
 0x379   :  { %vm14019_vm13 = vcmask 64512   ;;  %v5984_v58 = vmax.f32 %v5982_v4, %v5983_v13  ;;  %v5991_v53 = vmax.f32 %v5989_v29, %v5990_v47  ;;  %v5997_v5 = vrot.slane %v5996_v30, 4  ;;  %v11841_v23 = vpop.permute.xlu1 %2293 }
 0x37a   :  { %v2996_v3 = vsel %vm14019_vm13, %v2931_v25, %v11501_v11  ;;  %v5949_v27 = vmax.f32 %v5947_v24, %v5948_v32  ;;  %v5955_v60 = vrot.slane %v5954_v61, 4  ;;  %v5962_v6 = vrot.slane %v5961_v12, 4  ;;  %v11846_v14 = vpop.permute.xlu0 %2039  ;;  %vm14022_vm2 = vmmov %vm14019_vm13 }
 0x37b   :  { %v5968_v34 = vsel %vm14014_vm1, %v5533_v41, -inf  ;;  %vm14020_vm3 = vcmask 97280   ;;  %v5978_v2 = vrot.slane %v5977_v9, 2  ;;  %v5985_v17 = vrot.slane %v5984_v58, 2  ;;  %2811 = vrot.lane.b32.xlu1 %v11837_v18, %s9335_s12 }
 0x37c   :  { %v3061_v21 = vsel %vm14020_vm3, %v2996_v3, %v11575_v15  ;;  %v5998_v11 = vmax.f32 %v5996_v30, %v5997_v5  ;;  %v5950_v25 = vrot.slane %v5949_v27, 2  ;;  %v5956_v33 = vmax.f32 %v5954_v61, %v5955_v60  ;;  %2525 = vrot.lane.b32.xlu0 %v11843_v54, %s9334_s26  ;;  %vm14023_vm4 = vmmov %vm14020_vm3 }
 0x37d   :  { %v5963_v4 = vmax.f32 %v5961_v12, %v5962_v6  ;;  %v5969_v29 = vrot.slane %v5968_v34, 4  ;;  %v3126_v24 = vsel %vm3091_vm5, %v3061_v21, %v11625_v8  ;;  %v5992_v13 = vrot.slane %v5991_v53, 2  ;;  %v2774_v41 = vpop.permute.xlu1 %2773 }
 0x37e   :  { %v5999_v47 = vrot.slane %v5998_v11, 2  ;;  %v5951_v15 = vmax.f32 %v5949_v27, %v5950_v25  ;;  %v5957_v32 = vrot.slane %v5956_v33, 2  ;;  %v11856_v5 = vpop.permute.xlu0 %2519  ;;  %v3191_v61 = vsel %vm3156_vm6, %v3126_v24, %v11690_v46  ;;  %v203_v27 = vld [vmem:[%s13911_s0 + $0x1e0] sm:$0xff] }
 0x37f   :  { %v5964_v3 = vrot.slane %v5963_v4, 2  ;;  %v5970_v30 = vmax.f32 %v5968_v34, %v5969_v29  ;;  %v5979_v12 = vmax.f32 %v5977_v9, %v5978_v2  ;;  %v5986_v60 = vmax.f32 %v5984_v58, %v5985_v17  ;;  %1281 = vrot.lane.b32.xlu1 %v11773_v40, %s9328_s29  ;;  %268 = vst.msk [vmem:[#allocation2 + $0x319] sm:$0xff] %vm33_vm0, %v203_v27  ;;  %v823_v27 = vld [vmem:[#allocation2 + $0x22a] sm:$0xff] }
 0x380   :  { %v5952_v6 = vrot.slane %v5951_v15, 1  ;;  %v5958_v59 = vmax.f32 %v5956_v33, %v5957_v32  ;;  %1027 = vrot.lane.b32.xlu0 %v11779_v26, %s9329_s30  ;;  %v3256_v34 = vsel %vm3221_vm7, %v3191_v61, %v11729_v36  ;;  %v5993_v46 = vmax.f32 %v5991_v53, %v5992_v13  ;;  %v307_v36 = vld [vmem:[#allocation2 + $0x1d0] sm:$0xff] }
 0x381   :  { %v5965_v8 = vmax.f32 %v5963_v4, %v5964_v3  ;;  %v5971_v21 = vrot.slane %v5970_v30, 2  ;;  %v11869_v9 = vpop.permute.xlu1 %1275  ;;  %v6000_v40 = vmax.f32 %v5998_v11, %v5999_v47  ;;  %v5980_v33 = vrot.slane %v5979_v12, 1  ;;  %v711_v47 = vld [vmem:[#allocation2 + $0x2e8] sm:$0xff] }
 0x382   :  { %v5959_v58 = vrot.slane %v5958_v59, 1  ;;  %v11872_v25 = vpop.permute.xlu0 %989  ;;  %v5987_v26 = vrot.slane %v5986_v60, 1  ;;  %v5953_v4 = vmax.f32 %v5951_v15, %v5952_v6  ;;  %v3321_v29 = vsel %vm3286_vm8, %v3256_v34, %v11800_v44  ;;  %v204_v34 = vld [vmem:[%s13911_s0 + $0x1e8] sm:$0xff] }
 0x383   :  { %v5966_v2 = vrot.slane %v5965_v8, 1  ;;  %v5972_v17 = vmax.f32 %v5970_v30, %v5971_v21  ;;  %1761 = vrot.lane.b32.xlu1 %v11843_v54, %s9331_s11  ;;  %v3386_v11 = vsel %vm3351_vm9, %v3321_v29, %v2774_v41  ;;  %v5994_v32 = vrot.slane %v5993_v46, 1  ;;  %269 = vst.msk [vmem:[#allocation2 + $0x321] sm:$0xff] %vm33_vm0, %v204_v34  ;;  %v697_v34 = vld [vmem:[#allocation2 + $0x240] sm:$0xff] }
 0x384   :  { %v5960_v53 = vmax.f32 %v5958_v59, %v5959_v58  ;;  %1507 = vrot.lane.b32.xlu0 %v11821_v56, %s9330_s10  ;;  %9061 = vmatprep.mubr.msk.f32.mxu0 %vm3428_vm10, %v3386_v11  ;;  %v6001_v3 = vrot.slane %v6000_v40, 1  ;;  %v2932_v59 = vsel %vm33_vm0, %v307_v36, %v11503_v50  ;;  %v5981_v6 = vmax.f32 %v5979_v12, %v5980_v33 }
 0x385   :  { %v5967_v24 = vmax.f32 %v5965_v8, %v5966_v2  ;;  %v5973_v13 = vrot.slane %v5972_v17, 1  ;;  %v11882_v15 = vpop.permute.xlu1 %1755  ;;  %vm14021_vm11 = vcmask 1042434   ;;  %v2997_v56 = vsel %vm14022_vm2, %v2932_v59, %v11555_v39  ;;  %v760_v39 = vld [vmem:[#allocation2 + $0x231] sm:$0xff] }
 0x386   :  { %v6724_v30 = vsel %vm6675_vm12, %v5960_v53, %v5953_v4  ;;  %v11885_v61 = vpop.permute.xlu0 %1529  ;;  %v5988_v8 = vmax.f32 %v5986_v60, %v5987_v26  ;;  %v3062_v50 = vsel %vm14023_vm4, %v2997_v56, %v11630_v20  ;;  %v5995_v12 = vmax.f32 %v5993_v46, %v5994_v32  ;;  %v824_v32 = vld [vmem:[#allocation2 + $0x232] sm:$0xff] }
 0x387   :  { %v5974_v44 = vmax.f32 %v5972_v17, %v5973_v13  ;;  %v6725_v41 = vsel %vm14021_vm11, %v5967_v24, %v6724_v30  ;;  %2301 = vrot.lane.b32.xlu1 %v711_v47, %s9333_s19  ;;  %v3127_v60 = vsel %vm3091_vm5, %v3062_v50, %v11674_v38  ;;  %v6002_v17 = vmax.f32 %v6000_v40, %v6001_v3  ;;  %vm14027_vm11 = vmmov %vm14022_vm2  ;;  %v322_v24 = vld [vmem:[#allocation2 + $0x288] sm:$0xff] }
 0x388   :  { %2047 = vrot.lane.b32.xlu0 %v11837_v18, %s9332_s14  ;;  %vm14024_vm13 = vcmask 1045509   ;;  %v3192_v4 = vsel %vm3156_vm6, %v3127_v60, %v11735_v55  ;;  %vm14025_vm1 = vcmask 1046534   ;;  %vm14026_vm3 = vcmask 1047559   ;;  %v839_v60 = vld [vmem:[#allocation2 + $0x2ea] sm:$0xff] }
 0x389   :  { %v6726_v21 = vsel %vm6679_vm14, %v5974_v44, %v6725_v41  ;;  %v11902_v2 = vpop.permute.xlu1 %2295  ;;  %v3257_v46 = vsel %vm3221_vm7, %v3192_v4, %v11777_v10  ;;  %v775_v44 = vld [vmem:[#allocation2 + $0x2e9] sm:$0xff]  ;;  %v776_v4 = vld [vmem:[#allocation2 + $0x2f1] sm:$0xff] }
 0x38a   :  { %v6727_v58 = vsel %vm6681_vm15, %v5981_v6, %v6726_v21  ;;  %v11908_v26 = vpop.permute.xlu0 %2009  ;;  %v3322_v38 = vsel %vm3286_vm8, %v3257_v46, %v11856_v5  ;;  %v712_v5 = vld [vmem:[#allocation2 + $0x2f0] sm:$0xff] }
 0x38b   :  { %v6728_v33 = vsel %vm14024_vm13, %v5988_v8, %v6727_v58  ;;  %2781 = vrot.lane.b32.xlu1 %v823_v27, %s9335_s12  ;;  %v323_v21 = vld [vmem:[#allocation2 + $0x290] sm:$0xff]  ;;  %vm14028_vm13 = vmmov %vm14022_vm2 }
 0x38c   :  { %v6729_v20 = vsel %vm14025_vm1, %v5995_v12, %v6728_v33  ;;  %2527 = vrot.lane.b32.xlu0 %v760_v39, %s9334_s26  ;;  %v2948_v58 = vsel %vm33_vm0, %v323_v21, %v11617_v42  ;;  %vm14029_vm1 = vmmov %vm14023_vm4 }
 0x38d   :  { %v6730_v29 = vsel %vm14026_vm3, %v6002_v17, %v6729_v20  ;;  %v2776_v40 = vpop.permute.xlu1 %2775  ;;  %vm14030_vm3 = vmmov %vm14022_vm2 }
 0x38e   :  { %6817 = vst.msk [vmem:[#allocation3 + $0x71] sm:$0xff] %vm14027_vm11, %v6730_v29  ;;  %v3387_v36 = vsel %vm3351_vm9, %v3322_v38, %v2776_v40  ;;  %v2550_v55 = vpop.permute.xlu0 %2549  ;;  %vm14031_vm11 = vmmov %vm14029_vm1 }
 0x38f   :  { %1283 = vrot.lane.b32.xlu1 %v11837_v18, %s9328_s29  ;;  %9062 = vmatmul.mubr.msk.f32.gmra.mrb[34].mxu0 %vm3428_vm10, %v3387_v36  ;;  %v2947_v18 = vsel %vm33_vm0, %v322_v24, %v11560_v48  ;;  %v308_v36 = vld [vmem:[#allocation2 + $0x1e0] sm:$0xff] }
 0x390   :  { %997 = vrot.lane.b32.xlu0 %v11843_v54, %s9329_s30  ;;  %v3012_v54 = vsel %vm14022_vm2, %v2947_v18, %v11613_v7  ;;  %v2933_v18 = vsel %vm33_vm0, %v308_v36, %v11670_v0 }
 0x391   :  { %v11927_v10 = vpop.permute.xlu1 %1245  ;;  %v3077_v3 = vsel %vm14023_vm4, %v3012_v54, %v11676_v28  ;;  %v2998_v54 = vsel %vm14030_vm3, %v2933_v18, %v11707_v51  ;;  %vm14032_vm4 = vmmov %vm14029_vm1 }
 0x392   :  { %v11929_v53 = vpop.permute.xlu0 %991  ;;  %v3142_v30 = vsel %vm3091_vm5, %v3077_v3, %v11713_v52  ;;  %v3063_v3 = vsel %vm14031_vm11, %v2998_v54, %v11765_v45  ;;  %vm14037_vm3 = vmmov %vm14022_vm2  ;;  %vm14038_vm11 = vcmask 58368  }
 0x393   :  { %1763 = vrot.lane.b32.xlu1 %v760_v39, %s9331_s11  ;;  %v3207_v48 = vsel %vm3156_vm6, %v3142_v30, %v11783_v57  ;;  %v761_v30 = vld [vmem:[#allocation2 + $0x241] sm:$0xff] }
 0x394   :  { %1537 = vrot.lane.b32.xlu0 %v711_v47, %s9330_s10  ;;  %v3272_v7 = vsel %vm3221_vm7, %v3207_v48, %v11841_v23  ;;  %v3128_v48 = vsel %vm3091_vm5, %v3063_v3, %v11823_v19 }
 0x395   :  { %v11933_v13 = vpop.permute.xlu1 %1785  ;;  %v3337_v28 = vsel %vm3286_vm8, %v3272_v7, %v2550_v55  ;;  %v698_v55 = vld [vmem:[#allocation2 + $0x248] sm:$0xff]  ;;  %v3193_v0 = vsel %vm3156_vm6, %v3128_v48, %v11908_v26 }
 0x396   :  { %v11935_v11 = vpop.permute.xlu0 %1531 }
 0x397   :  { %2303 = vrot.lane.b32.xlu1 %v712_v5, %s9333_s19 }
 0x398   :  { %2017 = vrot.lane.b32.xlu0 %v823_v27, %s9332_s14 }
 0x399   :  { %v11945_v47 = vpop.permute.xlu1 %2265 }
 0x39a   :  { %v11949_v59 = vpop.permute.xlu0 %2011  ;;  %v3258_v51 = vsel %vm3221_vm7, %v3193_v0, %v11945_v47  ;;  %v309_v47 = vld [vmem:[#allocation2 + $0x1e8] sm:$0xff] }
 0x39b   :  { %2783 = vrot.lane.b32.xlu1 %v824_v32, %s9335_s12  ;;  %v826_v0 = vld [vmem:[#allocation2 + $0x24a] sm:$0xff] }
 0x39c   :  { %2557 = vrot.lane.b32.xlu0 %v775_v44, %s9334_s26 }
 0x39d   :  { %v2806_v6 = vpop.permute.xlu1 %2805 }
 0x39e   :  { %v3402_v41 = vsel %vm3351_vm9, %v3337_v28, %v2806_v6  ;;  %v2552_v56 = vpop.permute.xlu0 %2551 }
 0x39f   :  { %1253 = vrot.lane.b32.xlu1 %v823_v27, %s9328_s29  ;;  %9085 = vmatprep.mubr.msk.f32.mxu1 %vm3428_vm10, %v3402_v41  ;;  %v205_v27 = vld [vmem:[%s13911_s0 + $0x1f0] sm:$0xff] }
 0x3a0   :  { %999 = vrot.lane.b32.xlu0 %v760_v39, %s9329_s30  ;;  %270 = vst.msk [vmem:[#allocation2 + $0x331] sm:$0xff] %vm33_vm0, %v205_v27  ;;  %v3013_v39 = vsel %vm14028_vm13, %v2948_v58, %v11668_v16  ;;  %v2934_v27 = vsel %vm33_vm0, %v309_v47, %v11709_v22  ;;  %vm14033_vm13 = vmmov %vm14022_vm2 }
 0x3a1   :  { %v11962_v52 = vpop.permute.xlu1 %1247  ;;  %v3078_v17 = vsel %vm14029_vm1, %v3013_v39, %v11715_v31  ;;  %v206_v31 = vld [vmem:[%s13911_s0 + $0x1f8] sm:$0xff]  ;;  %v2999_v58 = vsel %vm14022_vm2, %v2934_v27, %v11749_v62  ;;  %v825_v39 = vld [vmem:[#allocation2 + $0x242] sm:$0xff]  ;;  %vm14039_vm2 = vmmov %vm14038_vm11 }
 0x3a2   :  { %v11964_v57 = vpop.permute.xlu0 %1021  ;;  %v11966_v8 = vpop.f32.mrb[28].mxu0  ;;  %v3143_v20 = vsel %vm3091_vm5, %v3078_v17, %v11763_v43  ;;  %271 = vst.msk [vmem:[#allocation2 + $0x339] sm:$0xff] %vm33_vm0, %v206_v31 }
 0x3a3   :  { %1793 = vrot.lane.b32.xlu1 %v775_v44, %s9331_s11  ;;  %v11969_v23 = vpop.f32.mrb[29].mxu0  ;;  %v3208_v42 = vsel %vm3156_vm6, %v3143_v20, %v11846_v14 }
 0x3a4   :  { %1539 = vrot.lane.b32.xlu0 %v712_v5, %s9330_s10  ;;  %v3273_v16 = vsel %vm3221_vm7, %v3208_v42, %v11902_v2 }
 0x3a5   :  { %v11975_v50 = vpop.permute.xlu1 %1787  ;;  %v3338_v29 = vsel %vm3286_vm8, %v3273_v16, %v2552_v56  ;;  %v713_v56 = vld [vmem:[#allocation2 + $0x300] sm:$0xff] }
 0x3a6   :  { %v11978_v12 = vpop.permute.xlu0 %1501 }
 0x3a7   :  { %2273 = vrot.lane.b32.xlu1 %v697_v34, %s9333_s19 }
 0x3a8   :  { %2019 = vrot.lane.b32.xlu0 %v824_v32, %s9332_s14 }
 0x3a9   :  { %v11988_v33 = vpop.permute.xlu1 %2267 }
 0x3aa   :  { %v11992_v46 = vpop.permute.xlu0 %2041 }
 0x3ab   :  { %2813 = vrot.lane.b32.xlu1 %v839_v60, %s9335_s12 }
 0x3ac   :  { %2559 = vrot.lane.b32.xlu0 %v776_v4, %s9334_s26 }
 0x3ad   :  { %v2808_v38 = vpop.permute.xlu1 %2807 }
 0x3ae   :  { %v3403_v43 = vsel %vm3351_vm9, %v3338_v29, %v2808_v38  ;;  %v2522_v40 = vpop.permute.xlu0 %2521 }
 0x3af   :  { %1255 = vrot.lane.b32.xlu1 %v824_v32, %s9328_s29  ;;  %9086 = vmatmul.mubr.msk.f32.gmra.mrb[6].mxu1 %vm3428_vm10, %v3403_v43  ;;  %v840_v32 = vld [vmem:[#allocation2 + $0x2f2] sm:$0xff]  ;;  %v3323_v45 = vsel %vm3286_vm8, %v3258_v51, %v2522_v40  ;;  %v777_v40 = vld [vmem:[#allocation2 + $0x301] sm:$0xff] }
 0x3b0   :  { %1029 = vrot.lane.b32.xlu0 %v775_v44, %s9329_s30 }
 0x3b1   :  { %v12009_v14 = vpop.permute.xlu1 %1277 }
 0x3b2   :  { %v12011_v2 = vpop.permute.xlu0 %1023 }
 0x3b3   :  { %1795 = vrot.lane.b32.xlu1 %v776_v4, %s9331_s11 }
 0x3b4   :  { %1509 = vrot.lane.b32.xlu0 %v697_v34, %s9330_s10 }
 0x3b5   :  { %v12015_v24 = vpop.permute.xlu1 %1757 }
 0x3b6   :  { %v12017_v5 = vpop.permute.xlu0 %1503 }
 0x3b7   :  { %2275 = vrot.lane.b32.xlu1 %v698_v55, %s9333_s19 }
 0x3b8   :  { %2049 = vrot.lane.b32.xlu0 %v839_v60, %s9332_s14 }
 0x3b9   :  { %v12027_v44 = vpop.permute.xlu1 %2297 }
 0x3ba   :  { %v12031_v7 = vpop.permute.xlu0 %2043 }
 0x3bb   :  { %2815 = vrot.lane.b32.xlu1 %v840_v32, %s9335_s12 }
 0x3bc   :  { %2529 = vrot.lane.b32.xlu0 %v761_v30, %s9334_s26 }
 0x3bd   :  { %v2778_v28 = vpop.permute.xlu1 %2777 }
 0x3be   :  { %v3388_v6 = vsel %vm3351_vm9, %v3323_v45, %v2778_v28  ;;  %v2524_v41 = vpop.permute.xlu0 %2523 }
 0x3bf   :  { %1285 = vrot.lane.b32.xlu1 %v839_v60, %s9328_s29  ;;  %9064 = vmatprep.mubr.msk.f32.mxu0 %vm3428_vm10, %v3388_v6  ;;  %v3064_v60 = vsel %vm14032_vm4, %v2999_v58, %v11828_v35  ;;  %vm14040_vm4 = vmmov %vm14039_vm2 }
 0x3c0   :  { %1031 = vrot.lane.b32.xlu0 %v776_v4, %s9329_s30  ;;  %v762_v4 = vld [vmem:[#allocation2 + $0x249] sm:$0xff]  ;;  %v3129_v20 = vsel %vm3091_vm5, %v3064_v60, %v11882_v15 }
 0x3c1   :  { %v12044_v19 = vpop.permute.xlu1 %1279  ;;  %v3194_v16 = vsel %vm3156_vm6, %v3129_v20, %v11949_v59  ;;  %v325_v60 = vld [vmem:[#allocation2 + $0x2a8] sm:$0xff] }
 0x3c2   :  { %v12046_v26 = vpop.permute.xlu0 %993  ;;  %v3259_v35 = vsel %vm3221_vm7, %v3194_v16, %v11988_v33  ;;  %v324_v33 = vld [vmem:[#allocation2 + $0x2a0] sm:$0xff]  ;;  %v310_v16 = vld [vmem:[#allocation2 + $0x1f8] sm:$0xff] }
 0x3c3   :  { %1765 = vrot.lane.b32.xlu1 %v761_v30, %s9331_s11  ;;  %v3324_v31 = vsel %vm3286_vm8, %v3259_v35, %v2524_v41  ;;  %v2949_v54 = vsel %vm33_vm0, %v324_v33, %v11757_v37  ;;  %v3837_v30 = vadd.f32 %v11754_v49, %v11966_v8  ;;  %v3832_v37 = vadd.f32 %v11754_v49, %v11969_v23 }
 0x3c4   :  { %1511 = vrot.lane.b32.xlu0 %v698_v55, %s9330_s10  ;;  %v714_v55 = vld [vmem:[#allocation2 + $0x308] sm:$0xff] }
 0x3c5   :  { %v12050_v21 = vpop.permute.xlu1 %1759  ;;  %v4039_v8 = vmax.f32 %v3837_v30, 0.0 }
 0x3c6   :  { %v12052_v34 = vpop.permute.xlu0 %1533 }
 0x3c7   :  { %2305 = vrot.lane.b32.xlu1 %v713_v56, %s9333_s19  ;;  %v4638_v35 = vrot.slane %v4039_v8, %v10521_v63 }
 0x3c8   :  { %2051 = vrot.lane.b32.xlu0 %v840_v32, %s9332_s14 }
 0x3c9   :  { %v12062_v17 = vpop.permute.xlu1 %2299  ;;  %v12066_v42 = vpop.f32.mrb[0].mxu1 }
 0x3ca   :  { %v12068_v22 = vpop.permute.xlu0 %2013  ;;  %v12072_v62 = vpop.f32.mrb[1].mxu1 }
 0x3cb   :  { %2785 = vrot.lane.b32.xlu1 %v825_v39, %s9335_s12 }
 0x3cc   :  { %2531 = vrot.lane.b32.xlu0 %v762_v4, %s9334_s26 }
 0x3cd   :  { %v2780_v29 = vpop.permute.xlu1 %2779 }
 0x3ce   :  { %v3389_v15 = vsel %vm3351_vm9, %v3324_v31, %v2780_v29  ;;  %v2554_v38 = vpop.permute.xlu0 %2553 }
 0x3cf   :  { %1541 = vrot.lane.b32.xlu1 %v713_v56, %s9330_s10  ;;  %9065 = vmatmul.mubr.msk.f32.gmra.mrb[36].mxu0 %vm3428_vm10, %v3389_v15  ;;  %v699_v56 = vld [vmem:[#allocation2 + $0x258] sm:$0xff] }
 0x3d0   :  { %1287 = vrot.lane.b32.xlu0 %v840_v32, %s9328_s29  ;;  %v3014_v32 = vsel %vm14033_vm13, %v2949_v54, %v11811_v1  ;;  %v14036_v54 = vld [vmem:[#allocation7_spill] sm:$0xff]  ;;  %vm14041_vm13 = vmmov %vm14039_vm2 }
 0x3d1   :  { %v12083_v59 = vpop.permute.xlu1 %1249  ;;  %v3079_v3 = vsel %vm14029_vm1, %v3014_v32, %v11885_v61  ;;  %v2950_v32 = vsel %vm33_vm0, %v325_v60, %v14036_v54  ;;  %vm14042_vm1 = vmmov %vm14039_vm2 }
 0x3d2   :  { %v12085_v43 = vpop.permute.xlu0 %995  ;;  %v3144_v51 = vsel %vm3091_vm5, %v3079_v3, %v11933_v13  ;;  %v4038_v13 = vmax.f32 %v3832_v37, 0.0  ;;  %v12151_v37 = vsel %vm33_vm0, %v310_v16, %v11872_v25 }
 0x3d3   :  { %2021 = vrot.lane.b32.xlu1 %v825_v39, %s9332_s14  ;;  %v3209_v1 = vsel %vm3156_vm6, %v3144_v51, %v11992_v46  ;;  %v12124_v46 = vld [vmem:[#allocation2 + $0x309] sm:$0xff]  ;;  %v3015_v51 = vsel %vm14037_vm3, %v2950_v32, %v11869_v9  ;;  %vm14043_vm3 = vmmov %vm14042_vm1 }
 0x3d4   :  { %1767 = vrot.lane.b32.xlu0 %v762_v4, %s9331_s11  ;;  %v3274_v61 = vsel %vm3221_vm7, %v3209_v1, %v12027_v44  ;;  %v4631_v44 = vcombine.high %v4039_v8, %v4039_v8  ;;  %v4614_v27 = vcombine.high %v4038_v13, %v4038_v13  ;;  %v4621_v31 = vrot.slane %v4038_v13, %v10521_v63 }
 0x3d5   :  { %v12089_v36 = vpop.permute.xlu1 %1789  ;;  %v3339_v28 = vsel %vm3286_vm8, %v3274_v61, %v2554_v38  ;;  %v4646_v8 = vcombine.high %v4638_v35, %v4638_v35 }
 0x3d6   :  { %v12091_v18 = vpop.permute.xlu0 %1535  ;;  %v4645_v15 = vrot.slane %v4631_v44, %v10521_v63  ;;  %v4628_v3 = vrot.slane %v4614_v27, %v10521_v63 }
 0x3d7   :  { %2561 = vrot.lane.b32.xlu1 %v777_v40, %s9334_s26 }
 0x3d8   :  { %2307 = vrot.lane.b32.xlu0 %v714_v55, %s9333_s19  ;;  %v4630_v27 = vcombine.high %v4628_v3, %v4628_v3 }
 0x3d9   :  { %v12103_v48 = vpop.permute.xlu1 %2269 }
 0x3da   :  { %v12109_v45 = vpop.permute.xlu0 %2015 }
 0x3db   :  { %1543 = vrot.lane.b32.xlu1 %v714_v55, %s9330_s10  ;;  %v12140_v55 = vld [vmem:[#allocation2 + $0x302] sm:$0xff] }
 0x3dc   :  { %2787 = vrot.lane.b32.xlu0 %v826_v0, %s9335_s12 }
 0x3dd   :  { %v2810_v6 = vpop.permute.xlu1 %2809 }
 0x3de   :  { %v3404_v41 = vsel %vm3351_vm9, %v3339_v28, %v2810_v6  ;;  %v12119_v23 = vpop.permute.xlu0 %2555  ;;  %v4629_v28 = vcombine.high %v4621_v31, %v4621_v31 }
 0x3df   :  { %2023 = vrot.lane.b32.xlu1 %v826_v0, %s9332_s14  ;;  %9088 = vmatprep.mubr.msk.f32.mxu1 %vm3428_vm10, %v3404_v41  ;;  %v4647_v41 = vcombine.high %v4645_v15, %v4645_v15 }
 0x3e0   :  { %1797 = vrot.lane.b32.xlu0 %v777_v40, %s9331_s11 }
 0x3e1   :  { %v12126_v47 = vpop.permute.xlu1 %1251 }
 0x3e2   :  { %14034 = vst [vmem:[#allocation8_spill] sm:$0xff] %v12126_v47  ;;  %v12128_v58 = vpop.permute.xlu0 %1025  ;;  %v9057_v39 = vpop.f32.mrb[30].mxu0 }
 0x3e3   :  { %14035 = vst [vmem:[#allocation9_spill] sm:$0xff] %v12128_v58  ;;  %v3847_v4 = vadd.f32 %v11754_v49, %v9057_v39  ;;  %2563 = vrot.lane.b32.xlu1 %v12124_v46, %s9334_s26  ;;  %v3841_v20 = vpop.f32.mrb[31].mxu0 }
 0x3e4   :  { %2277 = vrot.lane.b32.xlu0 %v699_v56, %s9333_s19  ;;  %v3842_v29 = vadd.f32 %v11754_v49, %v3841_v20 }
 0x3e5   :  { %v4041_v38 = vmax.f32 %v3847_v4, 0.0  ;;  %v12138_v33 = vpop.permute.xlu1 %1791 }
 0x3e6   :  { %v4040_v30 = vmax.f32 %v3842_v29, 0.0  ;;  %v12145_v0 = vpop.permute.xlu0 %1505 }
 0x3e7   :  { %v4665_v1 = vcombine.high %v4041_v38, %v4041_v38  ;;  %v4672_v61 = vrot.slane %v4041_v38, %v10521_v63  ;;  %1033 = vrot.lane.b32.xlu1 %v777_v40, %s9329_s30 }
 0x3e8   :  { %v4648_v6 = vcombine.high %v4040_v30, %v4040_v30  ;;  %v4655_v13 = vrot.slane %v4040_v30, %v10521_v63  ;;  %2817 = vrot.lane.b32.xlu0 %v12140_v55, %s9335_s12 }
 0x3e9   :  { %v4679_v9 = vrot.slane %v4665_v1, %v10521_v63  ;;  %v4680_v44 = vcombine.high %v4672_v61, %v4672_v61  ;;  %v5542_v56 = vmax.f32 %v4638_v35, %v4672_v61  ;;  %v12159_v25 = vpop.permute.xlu1 %2271  ;;  %v763_v1 = vld [vmem:[#allocation2 + $0x259] sm:$0xff] }
 0x3ea   :  { %v4662_v39 = vrot.slane %v4648_v6, %v10521_v63  ;;  %v4663_v60 = vcombine.high %v4655_v13, %v4655_v13  ;;  %v5538_v40 = vmax.f32 %v4621_v31, %v4655_v13  ;;  %v12162_v4 = vpop.permute.xlu0 %2045  ;;  %v700_v13 = vld [vmem:[#allocation2 + $0x260] sm:$0xff] }
 0x3eb   :  { %v4681_v20 = vcombine.high %v4679_v9, %v4679_v9  ;;  %v5543_v16 = vmax.f32 %v4646_v8, %v4680_v44  ;;  %v5544_v29 = vmax.f32 %v4645_v15, %v4679_v9  ;;  %v6031_v38 = vsel %vm14038_vm11, %v5542_v56, -inf  ;;  %2053 = vrot.lane.b32.xlu1 %v12140_v55, %s9332_s14  ;;  %vm14044_vm11 = vmmov %vm14042_vm1 }
 0x3ec   :  { %v6032_v54 = vrot.slane %v6031_v38, 4  ;;  %v4664_v32 = vcombine.high %v4662_v39, %v4662_v39  ;;  %v5539_v35 = vmax.f32 %v4629_v28, %v4663_v60  ;;  %v5540_v30 = vmax.f32 %v4628_v3, %v4662_v39  ;;  %1799 = vrot.lane.b32.xlu0 %v12124_v46, %s9331_s11 }
 0x3ed   :  { %v5545_v61 = vmax.f32 %v4647_v41, %v4681_v20  ;;  %v6038_v31 = vsel %vm14039_vm2, %v5543_v16, -inf  ;;  %v6045_v6 = vsel %vm14040_vm4, %v5544_v29, -inf  ;;  %v6003_v15 = vsel %vm14041_vm13, %v5538_v40, -inf  ;;  %v12172_v8 = vpop.permute.xlu1 %2811  ;;  %vm14046_vm4 = vmmov %vm14042_vm1 }
 0x3ee   :  { %v6033_v9 = vmax.f32 %v6031_v38, %v6032_v54  ;;  %v6039_v44 = vrot.slane %v6038_v31, 4  ;;  %v6046_v56 = vrot.slane %v6045_v6, 4  ;;  %v5541_v58 = vmax.f32 %v4630_v27, %v4664_v32  ;;  %v12174_v28 = vpop.permute.xlu0 %2525 }
 0x3ef   :  { %v6052_v3 = vsel %vm14042_vm1, %v5545_v61, -inf  ;;  %v6004_v39 = vrot.slane %v6003_v15, 4  ;;  %v6010_v41 = vsel %vm14043_vm3, %v5539_v35, -inf  ;;  %v6017_v60 = vsel %vm14044_vm11, %v5540_v30, -inf  ;;  %2533 = vrot.lane.b32.xlu1 %v763_v1, %s9334_s26  ;;  %v12186_v35 = vld [vmem:[#allocation2 + $0x30a] sm:$0xff] }
 0x3f0   :  { %vm14045_vm2 = vcmask 97280   ;;  %v6040_v20 = vmax.f32 %v6038_v31, %v6039_v44  ;;  %v6047_v16 = vmax.f32 %v6045_v6, %v6046_v56  ;;  %v6053_v29 = vrot.slane %v6052_v3, 4  ;;  %2279 = vrot.lane.b32.xlu0 %v700_v13, %s9333_s19 }
 0x3f1   :  { %v3080_v40 = vsel %vm14045_vm2, %v3015_v51, %v11935_v11  ;;  %v6005_v27 = vmax.f32 %v6003_v15, %v6004_v39  ;;  %v6011_v38 = vrot.slane %v6010_v41, 4  ;;  %v6018_v54 = vrot.slane %v6017_v60, 4  ;;  %v12184_v61 = vpop.permute.xlu1 %1281  ;;  %vm14049_vm1 = vmmov %vm14045_vm2 }
 0x3f2   :  { %v6024_v32 = vsel %vm14046_vm4, %v5541_v58, -inf  ;;  %v3145_v30 = vsel %vm3091_vm5, %v3080_v40, %v11975_v50  ;;  %v6034_v1 = vrot.slane %v6033_v9, 2  ;;  %v6041_v47 = vrot.slane %v6040_v20, 2  ;;  %v12190_v51 = vpop.permute.xlu0 %1027 }
 0x3f3   :  { %v6054_v11 = vmax.f32 %v6052_v3, %v6053_v29  ;;  %14047 = vst [vmem:[#allocation7_spill] sm:$0xff] %v12190_v51  ;;  %v6006_v31 = vrot.slane %v6005_v27, 2  ;;  %v6012_v6 = vmax.f32 %v6010_v41, %v6011_v38  ;;  %v6019_v13 = vmax.f32 %v6017_v60, %v6018_v54  ;;  %1035 = vrot.lane.b32.xlu1 %v12124_v46, %s9329_s30 }
 0x3f4   :  { %v6025_v15 = vrot.slane %v6024_v32, 4  ;;  %vm14048_vm13 = vcmask 64512   ;;  %v3210_v44 = vsel %vm3156_vm6, %v3145_v30, %v12031_v7  ;;  %v6048_v50 = vrot.slane %v6047_v16, 2  ;;  %2819 = vrot.lane.b32.xlu0 %v12186_v35, %s9335_s12 }
 0x3f5   :  { %v3000_v58 = vsel %vm14048_vm13, %v12151_v37, %v11927_v10  ;;  %v6055_v56 = vrot.slane %v6054_v11, 2  ;;  %v6007_v3 = vmax.f32 %v6005_v27, %v6006_v31  ;;  %v6013_v39 = vrot.slane %v6012_v6, 2  ;;  %v12201_v40 = vpop.permute.xlu1 %1761 }
 0x3f6   :  { %v6020_v41 = vrot.slane %v6019_v13, 2  ;;  %v6026_v60 = vmax.f32 %v6024_v32, %v6025_v15  ;;  %v3065_v46 = vsel %vm14049_vm1, %v3000_v58, %v11978_v12  ;;  %v3275_v10 = vsel %vm3221_vm7, %v3210_v44, %v12062_v17  ;;  %v12207_v7 = vpop.permute.xlu0 %1507  ;;  %v764_v17 = vld [vmem:[#allocation2 + $0x261] sm:$0xff]  ;;  %vm14054_vm1 = vmmov %vm14048_vm13 }
 0x3f7   :  { %v6035_v37 = vmax.f32 %v6033_v9, %v6034_v1  ;;  %v6042_v29 = vmax.f32 %v6040_v20, %v6041_v47  ;;  %v6008_v38 = vrot.slane %v6007_v3, 1  ;;  %v6014_v54 = vmax.f32 %v6012_v6, %v6013_v39  ;;  %2055 = vrot.lane.b32.xlu1 %v12186_v35, %s9332_s14  ;;  %v715_v6 = vld [vmem:[#allocation2 + $0x318] sm:$0xff] }
 0x3f8   :  { %v6021_v30 = vmax.f32 %v6019_v13, %v6020_v41  ;;  %v6027_v51 = vrot.slane %v6026_v60, 2  ;;  %v3130_v27 = vsel %vm3091_vm5, %v3065_v46, %v12015_v24  ;;  %v3340_v12 = vsel %vm3286_vm8, %v3275_v10, %v12119_v23  ;;  %1289 = vrot.lane.b32.xlu0 %v12140_v55, %s9328_s29  ;;  %v827_v41 = vld [vmem:[#allocation2 + $0x25a] sm:$0xff] }
 0x3f9   :  { %v6049_v32 = vmax.f32 %v6047_v16, %v6048_v50  ;;  %v6056_v47 = vmax.f32 %v6054_v11, %v6055_v56  ;;  %v6015_v9 = vrot.slane %v6014_v54, 1  ;;  %v12217_v31 = vpop.permute.xlu1 %2301  ;;  %v3195_v13 = vsel %vm3156_vm6, %v3130_v27, %v12068_v22 }
 0x3fa   :  { %v6022_v20 = vrot.slane %v6021_v30, 1  ;;  %v6028_v1 = vmax.f32 %v6026_v60, %v6027_v51  ;;  %v6036_v15 = vrot.slane %v6035_v37, 1  ;;  %v6043_v24 = vrot.slane %v6042_v29, 1  ;;  %v12223_v16 = vpop.permute.xlu0 %2047 }
 0x3fb   :  { %v3405_v23 = vsel %vm3351_vm9, %v3340_v12, %v12172_v8  ;;  %v6009_v58 = vmax.f32 %v6007_v3, %v6008_v38  ;;  %v6016_v55 = vmax.f32 %v6014_v54, %v6015_v9  ;;  %2535 = vrot.lane.b32.xlu1 %v764_v17, %s9334_s26  ;;  %v3260_v51 = vsel %vm3221_vm7, %v3195_v13, %v12103_v48 }
 0x3fc   :  { %v6023_v44 = vmax.f32 %v6021_v30, %v6022_v20  ;;  %v6029_v11 = vrot.slane %v6028_v1, 1  ;;  %9089 = vmatmul.mubr.msk.f32.gmra.mrb[8].mxu1 %vm3428_vm10, %v3405_v23  ;;  %v6050_v50 = vrot.slane %v6049_v32, 1  ;;  %2309 = vrot.lane.b32.xlu0 %v715_v6, %s9333_s19  ;;  %v6057_v22 = vrot.slane %v6056_v47, 1 }
 0x3fd   :  { %v6731_v8 = vsel %vm6675_vm12, %v6016_v55, %v6009_v58  ;;  %v3325_v3 = vsel %vm3286_vm8, %v3260_v51, %v12174_v28  ;;  %v2782_v39 = vpop.permute.xlu1 %2781  ;;  %v6037_v60 = vmax.f32 %v6035_v37, %v6036_v15  ;;  %vm14050_vm3 = vcmask 1042434   ;;  %v716_v28 = vld [vmem:[#allocation2 + $0x320] sm:$0xff] }
 0x3fe   :  { %v6030_v56 = vmax.f32 %v6028_v1, %v6029_v11  ;;  %v6732_v46 = vsel %vm14050_vm3, %v6023_v44, %v6731_v8  ;;  %v3390_v10 = vsel %vm3351_vm9, %v3325_v3, %v2782_v39  ;;  %v2528_v38 = vpop.permute.xlu0 %2527  ;;  %v6044_v54 = vmax.f32 %v6042_v29, %v6043_v24  ;;  %v311_v1 = vld [vmem:[#allocation2 + $0x200] sm:$0xff] }
 0x3ff   :  { %1291 = vrot.lane.b32.xlu1 %v12186_v35, %s9328_s29  ;;  %9067 = vmatprep.mubr.msk.f32.mxu0 %vm3428_vm10, %v3390_v10  ;;  %v6051_v30 = vmax.f32 %v6049_v32, %v6050_v50  ;;  %v3917_v37 = vadd.f32 %v11754_v49, %v12066_v42  ;;  %v6058_v12 = vmax.f32 %v6056_v47, %v6057_v22  ;;  %vm14051_vm11 = vcmask 1045509   ;;  %v828_v42 = vld [vmem:[#allocation2 + $0x262] sm:$0xff]  ;;  %v12257_v15 = vld [vmem:[#allocation2 + $0x319] sm:$0xff] }
 0x400   :  { %v6733_v48 = vsel %vm6679_vm14, %v6030_v56, %v6732_v46  ;;  %2789 = vrot.lane.b32.xlu0 %v827_v41, %s9335_s12  ;;  %v3912_v9 = vadd.f32 %v11754_v49, %v12072_v62  ;;  %vm14052_vm2 = vcmask 1046534   ;;  %vm14053_vm4 = vcmask 1047559   ;;  %v326_v56 = vld [vmem:[#allocation2 + $0x2b8] sm:$0xff] }
 0x401   :  { %v6734_v27 = vsel %vm6681_vm15, %v6037_v60, %v6733_v48  ;;  %v12244_v29 = vpop.permute.xlu1 %1283  ;;  %v4055_v47 = vmax.f32 %v3917_v37, 0.0  ;;  %v2936_v24 = vsel %vm33_vm0, %v311_v1, %v11929_v53  ;;  %vm14055_vm3 = vcmask 97280   ;;  %v12292_v39 = vld [vmem:[#allocation2 + $0x31a] sm:$0xff] }
 0x402   :  { %v6735_v17 = vsel %vm14051_vm11, %v6044_v54, %v6734_v27  ;;  %v12249_v20 = vpop.permute.xlu0 %997  ;;  %v4054_v49 = vmax.f32 %v3912_v9, 0.0  ;;  %v3001_v23 = vsel %vm14054_vm1, %v2936_v24, %v11962_v52  ;;  %v12281_v52 = vld [vmem:[%s13913_s2] ss:$0 sm:$0xff]  ;;  %v12296_v54 = vld [vmem:[#allocation2 + $0x321] sm:$0xff]  ;;  %vm14056_vm11 = vcmask 58368  }
 0x403   :  { %v6736_v35 = vsel %vm14052_vm2, %v6051_v30, %v6735_v17  ;;  %2311 = vrot.lane.b32.xlu1 %v716_v28, %s9333_s19  ;;  %v4903_v58 = vcombine.high %v4055_v47, %v4055_v47  ;;  %vm14057_vm2 = vmmov %vm14056_vm11 }
 0x404   :  { %v6737_v32 = vsel %vm14053_vm4, %v6058_v12, %v6736_v35  ;;  %1545 = vrot.lane.b32.xlu0 %v715_v6, %s9330_s10  ;;  %v3066_v6 = vsel %vm14055_vm3, %v3001_v23, %v12017_v5  ;;  %v4886_v44 = vcombine.high %v4054_v49, %v4054_v49  ;;  %v4893_v8 = vrot.slane %v4054_v49, %v10521_v63  ;;  %vm14058_vm4 = vmmov %vm14057_vm2 }
 0x405   :  { %6818 = vst.msk [vmem:[#allocation3 + $0x81] sm:$0xff] %vm14048_vm13, %v6737_v32  ;;  %v12255_v13 = vpop.permute.xlu1 %1763  ;;  %v3131_v11 = vsel %vm3091_vm5, %v3066_v6, %v12050_v21  ;;  %v4910_v21 = vrot.slane %v4055_v47, %v10521_v63  ;;  %v4917_v41 = vrot.slane %v4903_v58, %v10521_v63  ;;  %vm14059_vm13 = vmmov %vm14057_vm2 }
 0x406   :  { %v12259_v62 = vpop.permute.xlu0 %1537  ;;  %v3196_v50 = vsel %vm3156_vm6, %v3131_v11, %v12109_v45  ;;  %v4900_v48 = vrot.slane %v4886_v44, %v10521_v63  ;;  %v4901_v17 = vcombine.high %v4893_v8, %v4893_v8  ;;  %vm14060_vm1 = vmmov %vm14057_vm2 }
 0x407   :  { %2791 = vrot.lane.b32.xlu1 %v828_v42, %s9335_s12  ;;  %v3261_v3 = vsel %vm3221_vm7, %v3196_v50, %v12159_v25  ;;  %v4919_v32 = vcombine.high %v4917_v41, %v4917_v41  ;;  %vm14061_vm3 = vmmov %vm14060_vm1 }
 0x408   :  { %2565 = vrot.lane.b32.xlu0 %v12257_v15, %s9334_s26  ;;  %v3326_v60 = vsel %vm3286_vm8, %v3261_v3, %v2528_v38  ;;  %v4918_v38 = vcombine.high %v4910_v21, %v4910_v21  ;;  %v4902_v49 = vcombine.high %v4900_v48, %v4900_v48  ;;  %v12322_v3 = vld [vmem:[#allocation2 + $0x322] sm:$0xff] }
 0x409   :  { %v12270_v55 = vpop.permute.xlu1 %2303  ;;  %v9081_v51 = vpop.f32.mrb[2].mxu1 }
 0x40a   :  { %v12274_v53 = vpop.permute.xlu0 %2017  ;;  %v3927_v5 = vadd.f32 %v12281_v52, %v9081_v51  ;;  %v3921_v22 = vpop.f32.mrb[3].mxu1 }
 0x40b   :  { %1801 = vrot.lane.b32.xlu1 %v12257_v15, %s9331_s11  ;;  %v3922_v45 = vadd.f32 %v12281_v52, %v3921_v22 }
 0x40c   :  { %1547 = vrot.lane.b32.xlu0 %v716_v28, %s9330_s10  ;;  %v4057_v46 = vmax.f32 %v3927_v5, 0.0  ;;  %v2951_v28 = vsel %vm33_vm0, %v326_v56, %v11964_v57 }
 0x40d   :  { %v2784_v10 = vpop.permute.xlu1 %2783  ;;  %v4056_v30 = vmax.f32 %v3922_v45, 0.0 }
 0x40e   :  { %v3391_v27 = vsel %vm3351_vm9, %v3326_v60, %v2784_v10  ;;  %v12300_v25 = vpop.permute.xlu0 %2557  ;;  %v4937_v37 = vcombine.high %v4057_v46, %v4057_v46  ;;  %v4944_v12 = vrot.slane %v4057_v46, %v10521_v63 }
 0x40f   :  { %2821 = vrot.lane.b32.xlu1 %v12292_v39, %s9335_s12  ;;  %9068 = vmatmul.mubr.msk.f32.gmra.mrb[38].mxu0 %vm3428_vm10, %v3391_v27  ;;  %v4920_v9 = vcombine.high %v4056_v30, %v4056_v30  ;;  %v4927_v35 = vrot.slane %v4056_v30, %v10521_v63 }
 0x410   :  { %2567 = vrot.lane.b32.xlu0 %v12296_v54, %s9334_s26  ;;  %v4951_v1 = vrot.slane %v4937_v37, %v10521_v63  ;;  %v4952_v57 = vcombine.high %v4944_v12, %v4944_v12  ;;  %v5574_v42 = vmax.f32 %v4910_v21, %v4944_v12 }
 0x411   :  { %v12312_v47 = vpop.permute.xlu1 %1253  ;;  %v4934_v24 = vrot.slane %v4920_v9, %v10521_v63  ;;  %v4935_v23 = vcombine.high %v4927_v35, %v4927_v35  ;;  %v5570_v6 = vmax.f32 %v4893_v8, %v4927_v35 }
 0x412   :  { %v12315_v58 = vpop.permute.xlu0 %999  ;;  %v4953_v44 = vcombine.high %v4951_v1, %v4951_v1  ;;  %v5575_v11 = vmax.f32 %v4918_v38, %v4952_v57  ;;  %v5576_v51 = vmax.f32 %v4917_v41, %v4951_v1  ;;  %v6255_v50 = vsel %vm14056_vm11, %v5574_v42, -inf  ;;  %vm14062_vm11 = vmmov %vm14060_vm1 }
 0x413   :  { %1803 = vrot.lane.b32.xlu1 %v12296_v54, %s9331_s11  ;;  %v6256_v5 = vrot.slane %v6255_v50, 4  ;;  %v4936_v22 = vcombine.high %v4934_v24, %v4934_v24  ;;  %v5571_v56 = vmax.f32 %v4901_v17, %v4935_v23  ;;  %v5572_v21 = vmax.f32 %v4900_v48, %v4934_v24 }
 0x414   :  { %1037 = vrot.lane.b32.xlu0 %v12257_v15, %s9329_s30  ;;  %v5577_v8 = vmax.f32 %v4919_v32, %v4953_v44  ;;  %v6262_v45 = vsel %vm14057_vm2, %v5575_v11, -inf  ;;  %v6269_v60 = vsel %vm14058_vm4, %v5576_v51, -inf  ;;  %v6227_v41 = vsel %vm14059_vm13, %v5570_v6, -inf  ;;  %vm14064_vm4 = vmmov %vm14060_vm1 }
 0x415   :  { %v12327_v46 = vpop.permute.xlu1 %1793  ;;  %v6257_v10 = vmax.f32 %v6255_v50, %v6256_v5  ;;  %v6263_v30 = vrot.slane %v6262_v45, 4  ;;  %v6270_v27 = vrot.slane %v6269_v60, 4  ;;  %v5573_v37 = vmax.f32 %v4902_v49, %v4936_v22 }
 0x416   :  { %v12329_v12 = vpop.permute.xlu0 %1539  ;;  %v6276_v48 = vsel %vm14060_vm1, %v5577_v8, -inf  ;;  %v6228_v15 = vrot.slane %v6227_v41, 4  ;;  %v6234_v38 = vsel %vm14061_vm3, %v5571_v56, -inf  ;;  %v6241_v17 = vsel %vm14062_vm11, %v5572_v21, -inf }
 0x417   :  { %2823 = vrot.lane.b32.xlu1 %v12322_v3, %s9335_s12  ;;  %vm14063_vm2 = vcmask 64512   ;;  %v6264_v35 = vmax.f32 %v6262_v45, %v6263_v30  ;;  %v6271_v32 = vmax.f32 %v6269_v60, %v6270_v27  ;;  %v6277_v1 = vrot.slane %v6276_v48, 4 }
 0x418   :  { %v3016_v9 = vsel %vm14063_vm2, %v2951_v28, %v12009_v14  ;;  %2057 = vrot.lane.b32.xlu0 %v12292_v39, %s9332_s14  ;;  %v6229_v57 = vmax.f32 %v6227_v41, %v6228_v15  ;;  %v6235_v42 = vrot.slane %v6234_v38, 4  ;;  %v6242_v49 = vrot.slane %v6241_v17, 4  ;;  %vm14067_vm3 = vmmov %vm14063_vm2 }
 0x419   :  { %v6248_v24 = vsel %vm14064_vm4, %v5573_v37, -inf  ;;  %v12341_v23 = vpop.permute.xlu1 %2273  ;;  %vm14065_vm13 = vcmask 97280   ;;  %v6258_v44 = vrot.slane %v6257_v10, 2  ;;  %v6265_v11 = vrot.slane %v6264_v35, 2 }
 0x41a   :  { %v3081_v6 = vsel %vm14065_vm13, %v3016_v9, %v12052_v34  ;;  %v6278_v51 = vmax.f32 %v6276_v48, %v6277_v1  ;;  %v12345_v14 = vpop.permute.xlu0 %2019  ;;  %v6230_v28 = vrot.slane %v6229_v57, 2  ;;  %v6236_v50 = vmax.f32 %v6234_v38, %v6235_v42  ;;  %v717_v34 = vld [vmem:[#allocation2 + $0x330] sm:$0xff]  ;;  %vm14068_vm11 = vmmov %vm14065_vm13 }
 0x41b   :  { %v6243_v5 = vmax.f32 %v6241_v17, %v6242_v49  ;;  %v6249_v22 = vrot.slane %v6248_v24, 4  ;;  %1293 = vrot.lane.b32.xlu1 %v12292_v39, %s9328_s29  ;;  %v3146_v56 = vsel %vm3091_vm5, %v3081_v6, %v12089_v36  ;;  %v6272_v21 = vrot.slane %v6271_v32, 2 }
 0x41c   :  { %v6279_v8 = vrot.slane %v6278_v51, 2  ;;  %1039 = vrot.lane.b32.xlu0 %v12296_v54, %s9329_s30  ;;  %v6231_v45 = vmax.f32 %v6229_v57, %v6230_v28  ;;  %v6237_v60 = vrot.slane %v6236_v50, 2  ;;  %v3211_v37 = vsel %vm3156_vm6, %v3146_v56, %v12162_v4  ;;  %s9337_s30 = smov 40  }
 0x41d   :  { %v6244_v41 = vrot.slane %v6243_v5, 2  ;;  %v6250_v30 = vmax.f32 %v6248_v24, %v6249_v22  ;;  %v2814_v27 = vpop.permute.xlu1 %2813  ;;  %v6259_v48 = vmax.f32 %v6257_v10, %v6258_v44  ;;  %v6266_v15 = vmax.f32 %v6264_v35, %v6265_v11 }
 0x41e   :  { %v2560_v39 = vpop.permute.xlu0 %2559  ;;  %v6232_v38 = vrot.slane %v6231_v45, 1  ;;  %v6238_v17 = vmax.f32 %v6236_v50, %v6237_v60  ;;  %v3276_v54 = vsel %vm3221_vm7, %v3211_v37, %v12217_v31  ;;  %v6273_v1 = vmax.f32 %v6271_v32, %v6272_v21 }
 0x41f   :  { %v6245_v36 = vmax.f32 %v6243_v5, %v6244_v41  ;;  %v6251_v9 = vrot.slane %v6250_v30, 2  ;;  %2313 = vrot.lane.b32.xlu1 %v717_v34, %s9333_s19  ;;  %v6280_v57 = vmax.f32 %v6278_v51, %v6279_v8  ;;  %v6260_v35 = vrot.slane %v6259_v48, 1  ;;  %v327_v5 = vld [vmem:[#allocation2 + $0x2c0] sm:$0xff]  ;;  %v718_v41 = vld [vmem:[#allocation2 + $0x338] sm:$0xff] }
 0x420   :  { %2059 = vrot.lane.b32.xlu0 %v12322_v3, %s9332_s14  ;;  %v6239_v42 = vrot.slane %v6238_v17, 1  ;;  %v6267_v24 = vrot.slane %v6266_v15, 1  ;;  %v3341_v6 = vsel %vm3286_vm8, %v3276_v54, %v12300_v25  ;;  %v6233_v31 = vmax.f32 %v6231_v45, %v6232_v38  ;;  %v781_v25 = vld [vmem:[#allocation2 + $0x331] sm:$0xff] }
 0x421   :  { %v6246_v49 = vrot.slane %v6245_v36, 1  ;;  %v6252_v4 = vmax.f32 %v6250_v30, %v6251_v9  ;;  %v12360_v10 = vpop.permute.xlu1 %1255  ;;  %v6274_v22 = vrot.slane %v6273_v1, 1  ;;  %v3406_v56 = vsel %vm3351_vm9, %v3341_v6, %v2814_v27 }
 0x422   :  { %v12364_v44 = vpop.permute.xlu0 %1029  ;;  %v12366_v11 = vpop.f32.mrb[32].mxu0  ;;  %v6240_v32 = vmax.f32 %v6238_v17, %v6239_v42  ;;  %v6281_v21 = vrot.slane %v6280_v57, 1  ;;  %9091 = vmatprep.mubr.msk.f32.mxu1 %vm3428_vm10, %v3406_v56  ;;  %vm14066_vm1 = vcmask 1042434   ;;  %v2952_v27 = vsel %vm33_vm0, %v327_v5, %v12011_v2  ;;  %v720_v56 = vld [vmem:[#allocation2 + $0x350] sm:$0xff] }
 0x423   :  { %v6247_v28 = vmax.f32 %v6245_v36, %v6246_v49  ;;  %v6253_v50 = vrot.slane %v6252_v4, 1  ;;  %1549 = vrot.lane.b32.xlu1 %v717_v34, %s9330_s10  ;;  %v12369_v51 = vpop.f32.mrb[33].mxu0  ;;  %v6261_v34 = vmax.f32 %v6259_v48, %v6260_v35  ;;  %v6268_v38 = vmax.f32 %v6266_v15, %v6267_v24  ;;  %v782_v24 = vld [vmem:[#allocation2 + $0x339] sm:$0xff] }
 0x424   :  { %1295 = vrot.lane.b32.xlu0 %v12322_v3, %s9328_s29  ;;  %v6759_v60 = vsel %vm6675_vm12, %v6240_v32, %v6233_v31  ;;  %v3017_v17 = vsel %vm14067_vm3, %v2952_v27, %v12044_v19  ;;  %v6275_v36 = vmax.f32 %v6273_v1, %v6274_v22  ;;  %v6282_v54 = vmax.f32 %v6280_v57, %v6281_v21  ;;  %v845_v57 = vld [vmem:[#allocation2 + $0x332] sm:$0xff]  ;;  %v783_v27 = vld [vmem:[#allocation2 + $0x349] sm:$0xff] }
 0x425   :  { %v6254_v8 = vmax.f32 %v6252_v4, %v6253_v50  ;;  %v12376_v45 = vpop.permute.xlu1 %1795  ;;  %v6760_v30 = vsel %vm14066_vm1, %v6247_v28, %v6759_v60  ;;  %v3082_v48 = vsel %vm14068_vm11, %v3017_v17, %v12091_v18  ;;  %vm14069_vm2 = vcmask 1045509   ;;  %vm14072_vm1 = vmmov %vm14067_vm3  ;;  %v9291_v50 = vld [vmem:[#allocation2 + $0x210] sm:$0xff] }
 0x426   :  { %v12379_v37 = vpop.permute.xlu0 %1509  ;;  %v3147_v15 = vsel %vm3091_vm5, %v3082_v48, %v12138_v33  ;;  %vm14070_vm4 = vcmask 1046534   ;;  %vm14071_vm13 = vcmask 1047559   ;;  %v2937_v5 = vsel %vm33_vm0, %v9291_v50, %v12046_v26  ;;  %vm14073_vm3 = vmmov %vm14072_vm1 }
 0x427   :  { %v6761_v3 = vsel %vm6679_vm14, %v6254_v8, %v6760_v30  ;;  %2569 = vrot.lane.b32.xlu1 %v781_v25, %s9334_s26  ;;  %v3212_v19 = vsel %vm3156_vm6, %v3147_v15, %v12223_v16  ;;  %v3002_v22 = vsel %vm14073_vm3, %v2937_v5, %v12083_v59  ;;  %v719_v8 = vld [vmem:[#allocation2 + $0x348] sm:$0xff]  ;;  %v6844_v15 = vld [vmem:[#allocation3 + $0x11] sm:$0xff] }
 0x428   :  { %v6762_v9 = vsel %vm6681_vm15, %v6261_v34, %v6761_v3  ;;  %2315 = vrot.lane.b32.xlu0 %v718_v41, %s9333_s19  ;;  %v3277_v18 = vsel %vm3221_vm7, %v3212_v19, %v12270_v55  ;;  %v655_v55 = vld [vmem:[#allocation2 + $0x33a] sm:$0xff]  ;;  %v784_v34 = vld [vmem:[#allocation2 + $0x351] sm:$0xff] }
 0x429   :  { %v6763_v42 = vsel %vm14069_vm2, %v6268_v38, %v6762_v9  ;;  %v12392_v2 = vpop.permute.xlu1 %2275  ;;  %v3342_v33 = vsel %vm3286_vm8, %v3277_v18, %v2560_v39  ;;  %vm14075_vm2 = vmmov %vm14072_vm1 }
 0x42a   :  { %v6764_v49 = vsel %vm14070_vm4, %v6275_v36, %v6763_v42  ;;  %v12397_v4 = vpop.permute.xlu0 %2049  ;;  %vm14076_vm4 = vmmov %vm14068_vm11 }
 0x42b   :  { %v6765_v1 = vsel %vm14071_vm13, %v6282_v54, %v6764_v49  ;;  %1805 = vrot.lane.b32.xlu1 %v781_v25, %s9331_s11  ;;  %v3067_v25 = vsel %vm14068_vm11, %v3002_v22, %v12145_v0  ;;  %v6843_v54 = vld [vmem:[#allocation3 + $0x1] sm:$0xff]  ;;  %v9292_v49 = vld [vmem:[#allocation2 + $0x218] sm:$0xff]  ;;  %vm14078_vm13 = vmmov %vm14072_vm1 }
 0x42c   :  { %6822 = vst.msk [vmem:[#allocation3 + $0xe1] sm:$0xff] %vm14072_vm1, %v6765_v1  ;;  %1551 = vrot.lane.b32.xlu0 %v718_v41, %s9330_s10  ;;  %v3132_v60 = vsel %vm3091_vm5, %v3067_v25, %v12201_v40  ;;  %v2938_v19 = vsel %vm33_vm0, %v9292_v49, %v12085_v43  ;;  %v14074_v1 = vld [vmem:[#allocation8_spill] sm:$0xff]  ;;  %v6876_v22 = vld [vmem:[#allocation3 + $0x20] sm:$0xff]  ;;  %vm14079_vm1 = vmmov %vm14076_vm4 }
 0x42d   :  { %v2816_v35 = vpop.permute.xlu1 %2815  ;;  %v3197_v26 = vsel %vm3156_vm6, %v3132_v60, %v12274_v53  ;;  %v848_v53 = vld [vmem:[#allocation2 + $0x352] sm:$0xff]  ;;  %v3003_v18 = vsel %vm14075_vm2, %v2938_v19, %v14074_v1  ;;  %v12527_v49 = vld [vmem:[#allocation3 + $0x22] sm:$0xff]  ;;  %vm14081_vm3 = vmmov %vm14075_vm2 }
 0x42e   :  { %v3407_v6 = vsel %vm3351_vm9, %v3342_v33, %v2816_v35  ;;  %v2530_v31 = vpop.permute.xlu0 %2529  ;;  %v3262_v59 = vsel %vm3221_vm7, %v3197_v26, %v12341_v23  ;;  %v847_v23 = vld [vmem:[#allocation2 + $0x34a] sm:$0xff]  ;;  %v6859_v33 = vld [vmem:[#allocation3 + $0x2] sm:$0xff]  ;;  %v3068_v35 = vsel %vm14076_vm4, %v3003_v18, %v12207_v7  ;;  %v14077_v60 = vld [vmem:[#allocation9_spill] sm:$0xff] }
 0x42f   :  { %2825 = vrot.lane.b32.xlu1 %v845_v57, %s9335_s12  ;;  %9092 = vmatmul.mubr.msk.f32.gmra.mrb[10].mxu1 %vm3428_vm10, %v3407_v6  ;;  %v3327_v0 = vsel %vm3286_vm8, %v3262_v59, %v2530_v31  ;;  %v6860_v6 = vld [vmem:[#allocation3 + $0x12] sm:$0xff]  ;;  %v3133_v31 = vsel %vm3091_vm5, %v3068_v35, %v12255_v13  ;;  %vm14082_vm11 = vmmov %vm14079_vm1 }
 0x430   :  { %2571 = vrot.lane.b32.xlu0 %v782_v24, %s9334_s26  ;;  %v3198_v43 = vsel %vm3156_vm6, %v3133_v31, %v12345_v14  ;;  %v6875_v25 = vld [vmem:[#allocation3 + $0x10] sm:$0xff]  ;;  %v7619_v18 = vld [vmem:[%s13914_s3 + $0x18] sm:$0xff]  ;;  %vm14083_vm4 = vmmov %vm14075_vm2 }
 0x431   :  { %v12412_v16 = vpop.permute.xlu1 %1285  ;;  %v12530_v1 = vld [vmem:[#allocation3 + $0x31] sm:$0xff] }
 0x432   :  { %v12414_v32 = vpop.permute.xlu0 %1031 }
 0x433   :  { %2061 = vrot.lane.b32.xlu1 %v845_v57, %s9332_s14 }
 0x434   :  { %1807 = vrot.lane.b32.xlu0 %v782_v24, %s9331_s11 }
 0x435   :  { %v12418_v39 = vpop.permute.xlu1 %1765 }
 0x436   :  { %v12420_v28 = vpop.permute.xlu0 %1511 }
 0x437   :  { %2063 = vrot.lane.b32.xlu1 %v655_v55, %s9332_s14 }
 0x438   :  { %2827 = vrot.lane.b32.xlu0 %v655_v55, %s9335_s12  ;;  %v3263_v55 = vsel %vm3221_vm7, %v3198_v43, %v12392_v2  ;;  %v12490_v2 = vld [vmem:[#allocation3 + $0x21] sm:$0xff] }
 0x439   :  { %v12430_v21 = vpop.permute.xlu1 %2305 }
 0x43a   :  { %v12434_v41 = vpop.permute.xlu0 %2051 }
 0x43b   :  { %2319 = vrot.lane.b32.xlu1 %v720_v56, %s9333_s19 }
 0x43c   :  { %2317 = vrot.lane.b32.xlu0 %v719_v8, %s9333_s19  ;;  %v9293_v8 = vld [vmem:[#allocation2 + $0x2d0] sm:$0xff] }
 0x43d   :  { %v2786_v30 = vpop.permute.xlu1 %2785  ;;  %v2953_v26 = vsel %vm33_vm0, %v9293_v8, %v14077_v60 }
 0x43e   :  { %v3392_v38 = vsel %vm3351_vm9, %v3327_v0, %v2786_v30  ;;  %v2532_v40 = vpop.permute.xlu0 %2531  ;;  %v3018_v59 = vsel %vm14078_vm13, %v2953_v26, %v12184_v61  ;;  %v3857_v30 = vadd.f32 %v12281_v52, %v12366_v11  ;;  %v7617_v11 = vld [vmem:[%s13914_s3 + $0x8] sm:$0xff]  ;;  %vm14084_vm13 = vmmov %vm14079_vm1 }
 0x43f   :  { %2575 = vrot.lane.b32.xlu1 %v784_v34, %s9334_s26  ;;  %9070 = vmatprep.mubr.msk.f32.mxu0 %vm3428_vm10, %v3392_v38  ;;  %v3328_v7 = vsel %vm3286_vm8, %v3263_v55, %v2532_v40  ;;  %v3083_v0 = vsel %vm14079_vm1, %v3018_v59, %v12259_v62  ;;  %v7616_v62 = vld [vmem:[%s13914_s3] sm:$0xff]  ;;  %v330_v59 = vld [vmem:[#allocation2 + $0x2e8] sm:$0xff]  ;;  %vm14085_vm1 = vmmov %vm14075_vm2 }
 0x440   :  { %2573 = vrot.lane.b32.xlu0 %v783_v27, %s9334_s26  ;;  %v3852_v27 = vadd.f32 %v12281_v52, %v12369_v51  ;;  %v3148_v40 = vsel %vm3091_vm5, %v3083_v0, %v12327_v46 }
 0x441   :  { %v12447_v3 = vpop.permute.xlu1 %1541  ;;  %v3213_v61 = vsel %vm3156_vm6, %v3148_v40, %v12397_v4 }
 0x442   :  { %v12449_v17 = vpop.permute.xlu0 %1287  ;;  %v12451_v36 = vpop.f32.mrb[4].mxu1  ;;  %v3278_v46 = vsel %vm3221_vm7, %v3213_v61, %v12430_v21  ;;  %v7618_v21 = vld [vmem:[%s13914_s3 + $0x10] sm:$0xff] }
 0x443   :  { %2831 = vrot.lane.b32.xlu1 %v848_v53, %s9335_s12  ;;  %v12454_v9 = vpop.f32.mrb[5].mxu1  ;;  %v9167_v53 = vpack.c.bf16 %v7617_v11, %v7616_v62 }
 0x444   :  { %2829 = vrot.lane.b32.xlu0 %v847_v23, %s9335_s12  ;;  %v4043_v23 = vmax.f32 %v3857_v30, 0.0 }
 0x445   :  { %v12457_v48 = vpop.permute.xlu1 %2021  ;;  %9168 = vmatprep.subr.bf16.mxu1 %v9167_v53 }
 0x446   :  { %v12459_v42 = vpop.permute.xlu0 %1767  ;;  %9170 = vmatpush3.bf16.msra.mxu1 %v9167_v53  ;;  %v4699_v31 = vcombine.high %v4043_v23, %v4043_v23  ;;  %v4706_v0 = vrot.slane %v4043_v23, %v10521_v63 }
 0x447   :  { %6990 = vrot.lane.b32.xlu1 %v6844_v15, %s9328_s29 }
 0x448   :  { %6988 = vrot.lane.b32.xlu0 %v6843_v54, %s9328_s29  ;;  %v4042_v54 = vmax.f32 %v3852_v27, 0.0 }
 0x449   :  { %v2562_v57 = vpop.permute.xlu1 %2561 }
 0x44a   :  { %v12469_v24 = vpop.permute.xlu0 %2307  ;;  %v3343_v4 = vsel %vm3286_vm8, %v3278_v46, %v2562_v57  ;;  %v9171_v57 = vpack.c.bf16 %v7619_v18, %v7618_v21  ;;  %v4682_v43 = vcombine.high %v4042_v54, %v4042_v54  ;;  %v12564_v30 = vrot.slane %v4042_v54, %v10521_v63  ;;  %v6877_v46 = vld [vmem:[#allocation3 + $0x30] sm:$0xff] }
 0x44b   :  { %7054 = vrot.lane.b32.xlu1 %v6860_v6, %s9331_s11  ;;  %v331_v18 = vld [vmem:[#allocation2 + $0x2f0] sm:$0xff] }
 0x44c   :  { %7052 = vrot.lane.b32.xlu0 %v6859_v33, %s9331_s11  ;;  %v329_v33 = vld [vmem:[#allocation2 + $0x2d8] sm:$0xff]  ;;  %9172 = vmatprep.subr.bf16.mxu1 %v9171_v57  ;;  %v4697_v21 = vcombine.high %v12564_v30, %v12564_v30 }
 0x44d   :  { %v12479_v50 = vpop.permute.xlu1 %1543  ;;  %9174 = vmatpush3.bf16.msra.mxu1 %v9171_v57 }
 0x44e   :  { %v2788_v5 = vpop.permute.xlu0 %2787 }
 0x44f   :  { %v3393_v56 = vsel %vm3351_vm9, %v3328_v7, %v2788_v5  ;;  %7118 = vrot.lane.b32.xlu1 %v6876_v22, %s9333_s19  ;;  %v315_v7 = vld [vmem:[#allocation2 + $0x230] sm:$0xff]  ;;  %v7620_v5 = vld [vmem:[%s13914_s3 + $0x20] sm:$0xff] }
 0x450   :  { %9071 = vmatmul.mubr.msk.f32.gmra.mrb[40].mxu0 %vm3428_vm10, %v3393_v56  ;;  %7116 = vrot.lane.b32.xlu0 %v6875_v25, %s9333_s19  ;;  %v7621_v56 = vld [vmem:[%s13914_s3 + $0x28] sm:$0xff]  ;;  %v2940_v40 = vsel %vm33_vm0, %v315_v7, %v12315_v58 }
 0x451   :  { %v12486_v13 = vpop.permute.xlu1 %2023  ;;  %v14080_v25 = vld [vmem:[#allocation7_spill] sm:$0xff]  ;;  %v9175_v60 = vpack.c.bf16 %v7621_v56, %v7620_v5  ;;  %v3005_v58 = vsel %vm14083_vm4, %v2940_v40, %v12360_v10 }
 0x452   :  { %v12488_v14 = vpop.permute.xlu0 %1797  ;;  %v2954_v8 = vsel %vm33_vm0, %v329_v33, %v14080_v25  ;;  %v12621_v25 = vsel %vm33_vm0, %v331_v18, %v12414_v32 }
 0x453   :  { %6992 = vrot.lane.b32.xlu1 %v12490_v2, %s9328_s29  ;;  %v3019_v26 = vsel %vm14081_vm3, %v2954_v8, %v12244_v29  ;;  %v12573_v29 = vrot.slane %v4699_v31, %v10521_v63  ;;  %9176 = vmatprep.subr.bf16.mxu1 %v9175_v60  ;;  %vm14086_vm3 = vmmov %vm14082_vm11 }
 0x454   :  { %7180 = vrot.lane.b32.xlu0 %v6844_v15, %s9335_s12  ;;  %v3084_v61 = vsel %vm14082_vm11, %v3019_v26, %v12329_v12  ;;  %9178 = vmatpush3.bf16.msra.mxu1 %v9175_v60  ;;  %v3070_v32 = vsel %vm14086_vm3, %v3005_v58, %v12420_v28  ;;  %vm14087_vm11 = vcmask 58368  }
 0x455   :  { %v12499_v34 = vpop.permute.xlu1 %2563  ;;  %v3149_v12 = vsel %vm3091_vm5, %v3084_v61, %v12376_v45  ;;  %v4714_v45 = vcombine.high %v4706_v0, %v4706_v0 }
 0x456   :  { %v12507_v38 = vpop.permute.xlu0 %2277 }
 0x457   :  { %7244 = vrot.lane.b32.xlu1 %v6860_v6, %s9337_s30  ;;  %v314_v6 = vld [vmem:[#allocation2 + $0x228] sm:$0xff] }
 0x458   :  { %7182 = vrot.lane.b32.xlu0 %v12490_v2, %s9335_s12 }
 0x459   :  { %v12524_v51 = vpop.permute.xlu1 %1033 }
 0x45a   :  { %v2818_v15 = vpop.permute.xlu0 %2817 }
 0x45b   :  { %v3408_v19 = vsel %vm3351_vm9, %v3343_v4, %v2818_v15  ;;  %7056 = vrot.lane.b32.xlu1 %v12527_v49, %s9331_s11  ;;  %v12587_v4 = vld [vmem:[#allocation3 + $0x32] sm:$0xff]  ;;  %v2955_v15 = vsel %vm33_vm0, %v330_v59, %v12364_v44 }
 0x45c   :  { %9094 = vmatprep.mubr.msk.f32.mxu1 %vm3428_vm10, %v3408_v19  ;;  %6994 = vrot.lane.b32.xlu0 %v12530_v1, %s9328_s29  ;;  %v12613_v7 = vsel %vm14085_vm1, %v2955_v15, %v12412_v16 }
 0x45d   :  { %v12543_v35 = vpop.permute.xlu1 %2053 }
 0x45e   :  { %v12545_v55 = vpop.permute.xlu0 %1799 }
 0x45f   :  { %7308 = vrot.lane.b32.xlu1 %v6876_v22, %s9338_s17  ;;  %v2939_v22 = vsel %vm33_vm0, %v314_v6, %v12249_v20  ;;  %v12576_v20 = vrot.slane %v4682_v43, %v10521_v63 }
 0x460   :  { %7246 = vrot.lane.b32.xlu0 %v12527_v49, %s9337_s30  ;;  %v3004_v53 = vsel %vm14075_vm2, %v2939_v22, %v12312_v47  ;;  %v3214_v47 = vsel %vm3156_vm6, %v3149_v12, %v12434_v41  ;;  %vm14088_vm2 = vmmov %vm14087_vm11 }
 0x461   :  { %v12566_v27 = vpop.permute.xlu1 %2533  ;;  %v3069_v19 = vsel %vm14084_vm13, %v3004_v53, %v12379_v37  ;;  %v3279_v57 = vsel %vm3221_vm7, %v3214_v47, %v12469_v24  ;;  %v4715_v37 = vcombine.high %v12573_v29, %v12573_v29  ;;  %v4698_v41 = vcombine.high %v12576_v20, %v12576_v20  ;;  %vm14089_vm4 = vmmov %vm14088_vm2 }
 0x462   :  { %v12578_v62 = vpop.permute.xlu0 %2279  ;;  %v9063_v11 = vpop.f32.mrb[34].mxu0  ;;  %v3344_v6 = vsel %vm3286_vm8, %v3279_v57, %v12499_v34  ;;  %v3134_v16 = vsel %vm3091_vm5, %v3069_v19, %v12418_v39  ;;  %vm14090_vm13 = vmmov %vm14088_vm2 }
 0x463   :  { %v3867_v23 = vadd.f32 %v12281_v52, %v9063_v11  ;;  %v3861_v54 = vpop.f32.mrb[35].mxu0  ;;  %7120 = vrot.lane.b32.xlu1 %v6877_v46, %s9333_s19  ;;  %vm14091_vm1 = vmmov %vm14088_vm2 }
 0x464   :  { %v3862_v10 = vadd.f32 %v12281_v52, %v3861_v54  ;;  %7058 = vrot.lane.b32.xlu0 %v12587_v4, %s9331_s11  ;;  %vm14092_vm3 = vmmov %vm14091_vm1 }
 0x465   :  { %v4045_v44 = vmax.f32 %v3867_v23, 0.0  ;;  %v12603_v33 = vpop.permute.xlu1 %1035  ;;  %v12639_v23 = vld [vmem:[#allocation3 + $0x40] sm:$0xff] }
 0x466   :  { %v4044_v31 = vmax.f32 %v3862_v10, 0.0  ;;  %v2820_v43 = vpop.permute.xlu0 %2819 }
 0x467   :  { %v4733_v24 = vcombine.high %v4045_v44, %v4045_v44  ;;  %v4740_v5 = vrot.slane %v4045_v44, %v10521_v63  ;;  %v3409_v56 = vsel %vm3351_vm9, %v3344_v6, %v2820_v43  ;;  %7372 = vrot.lane.b32.xlu1 %v12490_v2, %s9339_s23 }
 0x468   :  { %v4716_v34 = vcombine.high %v4044_v31, %v4044_v31  ;;  %v4723_v8 = vrot.slane %v4044_v31, %v10521_v63  ;;  %9095 = vmatmul.mubr.msk.f32.gmra.mrb[12].mxu1 %vm3428_vm10, %v3409_v56  ;;  %7310 = vrot.lane.b32.xlu0 %v6877_v46, %s9338_s17  ;;  %v3937_v31 = vadd.f32 %v12281_v52, %v12451_v36 }
 0x469   :  { %v4747_v60 = vrot.slane %v4733_v24, %v10521_v63  ;;  %v4748_v26 = vcombine.high %v4740_v5, %v4740_v5  ;;  %v5550_v22 = vmax.f32 %v4706_v0, %v4740_v5  ;;  %v12629_v59 = vpop.permute.xlu1 %2055 }
 0x46a   :  { %v4730_v2 = vrot.slane %v4716_v34, %v10521_v63  ;;  %v4731_v40 = vcombine.high %v4723_v8, %v4723_v8  ;;  %v5546_v61 = vmax.f32 %v12564_v30, %v4723_v8  ;;  %v12635_v11 = vpop.permute.xlu0 %1289 }
 0x46b   :  { %v4749_v46 = vcombine.high %v4747_v60, %v4747_v60  ;;  %v5551_v53 = vmax.f32 %v4714_v45, %v4748_v26  ;;  %v5552_v39 = vmax.f32 %v12573_v29, %v4747_v60  ;;  %v6087_v12 = vsel %vm14087_vm11, %v5550_v22, -inf  ;;  %7184 = vrot.lane.b32.xlu1 %v12530_v1, %s9335_s12  ;;  %vm14093_vm11 = vmmov %vm14091_vm1 }
 0x46c   :  { %v6088_v0 = vrot.slane %v6087_v12, 4  ;;  %v4732_v28 = vcombine.high %v4730_v2, %v4730_v2  ;;  %v5547_v58 = vmax.f32 %v4697_v21, %v4731_v40  ;;  %v5548_v54 = vmax.f32 %v12576_v20, %v4730_v2  ;;  %7122 = vrot.lane.b32.xlu0 %v12639_v23, %s9333_s19  ;;  %v12667_v40 = vld [vmem:[#allocation3 + $0x41] sm:$0xff] }
 0x46d   :  { %v5553_v30 = vmax.f32 %v4715_v37, %v4749_v46  ;;  %v6094_v15 = vsel %vm14088_vm2, %v5551_v53, -inf  ;;  %v6101_v29 = vsel %vm14089_vm4, %v5552_v39, -inf  ;;  %v6059_v19 = vsel %vm14090_vm13, %v5546_v61, -inf  ;;  %v12649_v47 = vpop.permute.xlu1 %2535  ;;  %vm14094_vm2 = vmmov %vm14091_vm1 }
 0x46e   :  { %v6089_v10 = vmax.f32 %v6087_v12, %v6088_v0  ;;  %v6095_v45 = vrot.slane %v6094_v15, 4  ;;  %v6102_v18 = vrot.slane %v6101_v29, 4  ;;  %v5549_v57 = vmax.f32 %v4698_v41, %v4732_v28  ;;  %v12651_v44 = vpop.permute.xlu0 %2309 }
 0x46f   :  { %v6108_v20 = vsel %vm14091_vm1, %v5553_v30, -inf  ;;  %v6060_v21 = vrot.slane %v6059_v19, 4  ;;  %v6066_v6 = vsel %vm14092_vm3, %v5547_v58, -inf  ;;  %v6073_v37 = vsel %vm14093_vm11, %v5548_v54, -inf  ;;  %7436 = vrot.lane.b32.xlu1 %v12527_v49, %s9340_s24 }
 0x470   :  { %v6096_v43 = vmax.f32 %v6094_v15, %v6095_v45  ;;  %v6103_v24 = vmax.f32 %v6101_v29, %v6102_v18  ;;  %v6109_v5 = vrot.slane %v6108_v20, 4  ;;  %7374 = vrot.lane.b32.xlu0 %v12530_v1, %s9339_s23  ;;  %v6067_v56 = vrot.slane %v6066_v6, 4 }
 0x471   :  { %v6061_v41 = vmax.f32 %v6059_v19, %v6060_v21  ;;  %v6074_v34 = vrot.slane %v6073_v37, 4  ;;  %v6080_v8 = vsel %vm14094_vm2, %v5549_v57, -inf  ;;  %v12663_v60 = vpop.permute.xlu1 %1291  ;;  %v3932_v26 = vadd.f32 %v12281_v52, %v12454_v9 }
 0x472   :  { %v6090_v49 = vrot.slane %v6089_v10, 2  ;;  %v6097_v22 = vrot.slane %v6096_v43, 2  ;;  %v6110_v2 = vmax.f32 %v6108_v20, %v6109_v5  ;;  %v2790_v36 = vpop.permute.xlu0 %2789  ;;  %v6068_v46 = vmax.f32 %v6066_v6, %v6067_v56 }
 0x473   :  { %v6062_v61 = vrot.slane %v6061_v41, 2  ;;  %v6075_v53 = vmax.f32 %v6073_v37, %v6074_v34  ;;  %v6081_v1 = vrot.slane %v6080_v8, 4  ;;  %7186 = vrot.lane.b32.xlu1 %v12667_v40, %s9335_s12  ;;  %v3199_v39 = vsel %vm3156_vm6, %v3134_v16, %v12457_v48 }
 0x474   :  { %v3135_v12 = vsel %vm3091_vm5, %v3070_v32, %v12459_v42  ;;  %v6104_v9 = vrot.slane %v6103_v24, 2  ;;  %v6111_v0 = vrot.slane %v6110_v2, 2  ;;  %6996 = vrot.lane.b32.xlu0 %v12667_v40, %s9328_s29  ;;  %v6069_v58 = vrot.slane %v6068_v46, 2 }
 0x475   :  { %v6063_v28 = vmax.f32 %v6061_v41, %v6062_v61  ;;  %v6076_v54 = vrot.slane %v6075_v53, 2  ;;  %v6082_v30 = vmax.f32 %v6080_v8, %v6081_v1  ;;  %v12677_v15 = vpop.permute.xlu1 %2311  ;;  %v3200_v29 = vsel %vm3156_vm6, %v3135_v12, %v12486_v13  ;;  %v12713_v1 = vld [vmem:[#allocation3 + $0x51] sm:$0xff] }
 0x476   :  { %v3264_v48 = vsel %vm3221_vm7, %v3199_v39, %v12507_v38  ;;  %v6091_v16 = vmax.f32 %v6089_v10, %v6090_v49  ;;  %v6098_v19 = vmax.f32 %v6096_v43, %v6097_v22  ;;  %v12683_v42 = vpop.permute.xlu0 %1545  ;;  %v6070_v45 = vmax.f32 %v6068_v46, %v6069_v58 }
 0x477   :  { %v6064_v32 = vrot.slane %v6063_v28, 1  ;;  %v6077_v18 = vmax.f32 %v6075_v53, %v6076_v54  ;;  %v6083_v57 = vrot.slane %v6082_v30, 2  ;;  %7438 = vrot.lane.b32.xlu1 %v12587_v4, %s9340_s24  ;;  %v12687_v20 = vmax.f32 %v3937_v31, 0.0  ;;  %v7624_v54 = vld [vmem:[%s13914_s3 + $0x40] sm:$0xff] }
 0x478   :  { %v3329_v21 = vsel %vm3286_vm8, %v3264_v48, %v12566_v27  ;;  %v3265_v13 = vsel %vm3221_vm7, %v3200_v29, %v12578_v62  ;;  %v6105_v38 = vmax.f32 %v6103_v24, %v6104_v9  ;;  %7248 = vrot.lane.b32.xlu0 %v12587_v4, %s9337_s30  ;;  %v6112_v10 = vmax.f32 %v6110_v2, %v6111_v0  ;;  %v12697_v27 = vld [vmem:[#allocation3 + $0x42] sm:$0xff]  ;;  %v7622_v62 = vld [vmem:[%s13914_s3 + $0x30] sm:$0xff]  ;;  %v7623_v4 = vld [vmem:[%s13914_s3 + $0x38] sm:$0xff] }
 0x479   :  { %v6071_v6 = vrot.slane %v6070_v45, 1  ;;  %v6078_v37 = vrot.slane %v6077_v18, 1  ;;  %v6084_v43 = vmax.f32 %v6082_v30, %v6083_v57  ;;  %v2792_v5 = vpop.permute.xlu1 %2791  ;;  %v6092_v41 = vrot.slane %v6091_v16, 1 }
 0x47a   :  { %v6099_v56 = vrot.slane %v6098_v19, 1  ;;  %v6065_v34 = vmax.f32 %v6063_v28, %v6064_v32  ;;  %v3330_v31 = vsel %vm3286_vm8, %v3265_v13, %v12649_v47  ;;  %v2566_v8 = vpop.permute.xlu0 %2565  ;;  %v3394_v2 = vsel %vm3351_vm9, %v3329_v21, %v2790_v36 }
 0x47b   :  { %v6072_v24 = vmax.f32 %v6070_v45, %v6071_v6  ;;  %v6079_v49 = vmax.f32 %v6077_v18, %v6078_v37  ;;  %v6085_v22 = vrot.slane %v6084_v43, 1  ;;  %7060 = vrot.lane.b32.xlu1 %v12697_v27, %s9331_s11  ;;  %vm14095_vm4 = vcmask 97280   ;;  %9073 = vmatprep.mubr.msk.f32.mxu0 %vm3428_vm10, %v3394_v2  ;;  %v6879_v6 = vld [vmem:[#allocation3 + $0x50] sm:$0xff] }
 0x47c   :  { %v3085_v47 = vsel %vm14095_vm4, %v12613_v7, %v12447_v3  ;;  %v4058_v61 = vmax.f32 %v3932_v26, 0.0  ;;  %v6106_v46 = vrot.slane %v6105_v38, 1  ;;  %v3395_v53 = vsel %vm3351_vm9, %v3330_v31, %v2792_v5  ;;  %6998 = vrot.lane.b32.xlu0 %v12713_v1, %s9328_s29  ;;  %v12759_v31 = vld [vmem:[#allocation3 + $0x52] sm:$0xff] }
 0x47d   :  { %v6113_v39 = vrot.slane %v6112_v10, 1  ;;  %v6086_v12 = vmax.f32 %v6084_v43, %v6085_v22  ;;  %v6738_v9 = vsel %vm6675_vm12, %v6072_v24, %v6065_v34  ;;  %9074 = vmatmul.mubr.msk.f32.gmra.mrb[42].mxu0 %vm3428_vm10, %v3395_v53  ;;  %v12719_v36 = vpop.permute.xlu1 %1801  ;;  %v9179_v3 = vpack.c.bf16 %v7623_v4, %v7622_v62 }
 0x47e   :  { %v4971_v7 = vcombine.high %v12687_v20, %v12687_v20  ;;  %v3150_v26 = vsel %vm3091_vm5, %v3085_v47, %v12488_v14  ;;  %v6093_v0 = vmax.f32 %v6091_v16, %v6092_v41  ;;  %vm14096_vm13 = vcmask 1042434   ;;  %v12726_v58 = vpop.permute.xlu0 %1547 }
 0x47f   :  { %v6739_v28 = vsel %vm14096_vm13, %v6079_v49, %v6738_v9  ;;  %v3215_v30 = vsel %vm3156_vm6, %v3150_v26, %v12543_v35  ;;  %v6100_v29 = vmax.f32 %v6098_v19, %v6099_v56  ;;  %7312 = vrot.lane.b32.xlu1 %v12639_v23, %s9338_s17  ;;  %9180 = vmatprep.subr.bf16.mxu1 %v9179_v3  ;;  %vm14097_vm1 = vcmask 1045509  }
 0x480   :  { %v6740_v48 = vsel %vm6679_vm14, %v6086_v12, %v6739_v28  ;;  %v4954_v14 = vcombine.high %v4058_v61, %v4058_v61  ;;  %v6107_v16 = vmax.f32 %v6105_v38, %v6106_v46  ;;  %v3280_v45 = vsel %vm3221_vm7, %v3215_v30, %v12651_v44  ;;  %9182 = vmatpush3.bf16.msra.mxu1 %v9179_v3 }
 0x481   :  { %v6741_v32 = vsel %vm6681_vm15, %v6093_v0, %v6740_v48  ;;  %v6114_v18 = vmax.f32 %v6112_v10, %v6113_v39  ;;  %v3345_v35 = vsel %vm3286_vm8, %v3280_v45, %v2566_v8  ;;  %7250 = vrot.lane.b32.xlu0 %v12697_v27, %s9337_s30  ;;  %v2822_v19 = vpop.permute.xlu1 %2821  ;;  %9122 = vmatprep.subr.mxu1 %v7624_v54  ;;  %vm14098_vm3 = vcmask 1046534   ;;  %v12790_v45 = vld [vmem:[#allocation3 + $0x60] sm:$0xff] }
 0x482   :  { %v6742_v57 = vsel %vm14097_vm1, %v6100_v29, %v6741_v32  ;;  %v4978_v23 = vrot.slane %v12687_v20, %v10521_v63  ;;  %v4961_v21 = vrot.slane %v4058_v61, %v10521_v63  ;;  %v3410_v44 = vsel %vm3351_vm9, %v3345_v35, %v2822_v19  ;;  %v2568_v38 = vpop.permute.xlu0 %2567  ;;  %v9087_v10 = vpop.f32.mrb[6].mxu1 }
 0x483   :  { %v6743_v13 = vsel %vm14098_vm3, %v6107_v16, %v6742_v57  ;;  %v4985_v37 = vrot.slane %v4971_v7, %v10521_v63  ;;  %vm14099_vm11 = vcmask 1047559   ;;  %v3947_v5 = vadd.f32 %v12281_v52, %v9087_v10  ;;  %v3941_v41 = vpop.f32.mrb[7].mxu1  ;;  %9097 = vmatprep.mubr.msk.f32.mxu1 %vm3428_vm10, %v3410_v44  ;;  %7124 = vrot.lane.b32.xlu1 %v6879_v6, %s9333_s19 }
 0x484   :  { %v6744_v43 = vsel %vm14099_vm11, %v6114_v18, %v6743_v13  ;;  %vm14100_vm2 = vcmask 64512   ;;  %v4968_v56 = vrot.slane %v4954_v14, %v10521_v63  ;;  %v3942_v34 = vadd.f32 %v12281_v52, %v3941_v41  ;;  %9123 = vmatpush3.msra.mxu1 %v7624_v54 }
 0x485   :  { %v3021_v20 = vsel %vm14100_vm2, %v12621_v25, %v12449_v17  ;;  %vm14101_vm4 = vmmov %vm14100_vm2  ;;  %vm14102_vm13 = vcmask 97280   ;;  %v4061_v62 = vmax.f32 %v3947_v5, 0.0  ;;  %7062 = vrot.lane.b32.xlu0 %v12759_v31, %s9331_s11  ;;  %v12765_v4 = vpop.permute.xlu1 %1803  ;;  %v4986_v24 = vcombine.high %v4978_v23, %v4978_v23 }
 0x486   :  { %6819 = vst.msk [vmem:[#allocation3 + $0xb1] sm:$0xff] %vm14101_vm4, %v6744_v43  ;;  %v3086_v8 = vsel %vm14102_vm13, %v3021_v20, %v12479_v50  ;;  %v4969_v17 = vcombine.high %v4961_v21, %v4961_v21  ;;  %v4060_v49 = vmax.f32 %v3942_v34, 0.0  ;;  %v12769_v22 = vpop.permute.xlu0 %1037  ;;  %v4987_v52 = vcombine.high %v4985_v37, %v4985_v37 }
 0x487   :  { %v3151_v25 = vsel %vm3091_vm5, %v3086_v8, %v12545_v55  ;;  %v5005_v47 = vcombine.high %v4061_v62, %v4061_v62  ;;  %v5012_v50 = vrot.slane %v4061_v62, %v10521_v63  ;;  %7376 = vrot.lane.b32.xlu1 %v12667_v40, %s9339_s23  ;;  %v4970_v61 = vcombine.high %v4968_v56, %v4968_v56 }
 0x488   :  { %v3216_v2 = vsel %vm3156_vm6, %v3151_v25, %v12629_v59  ;;  %v4988_v53 = vcombine.high %v4060_v49, %v4060_v49  ;;  %v4995_v55 = vrot.slane %v4060_v49, %v10521_v63  ;;  %vm14103_vm1 = vcmask 58368  }
 0x489   :  { %v3281_v46 = vsel %vm3221_vm7, %v3216_v2, %v12677_v15  ;;  %v5019_v12 = vrot.slane %v5005_v47, %v10521_v63  ;;  %v5020_v9 = vcombine.high %v5012_v50, %v5012_v50  ;;  %v5582_v3 = vmax.f32 %v4978_v23, %v5012_v50  ;;  %7314 = vrot.lane.b32.xlu0 %v6879_v6, %s9338_s17  ;;  %v2824_v59 = vpop.permute.xlu1 %2823  ;;  %vm14104_vm3 = vmmov %vm14103_vm1  ;;  %v12813_v47 = vld [vmem:[#allocation3 + $0x61] sm:$0xff] }
 0x48a   :  { %v3346_v39 = vsel %vm3286_vm8, %v3281_v46, %v2568_v38  ;;  %v5002_v7 = vrot.slane %v4988_v53, %v10521_v63  ;;  %v5003_v26 = vcombine.high %v4995_v55, %v4995_v55  ;;  %v5578_v40 = vmax.f32 %v4961_v21, %v4995_v55  ;;  %v12784_v28 = vpop.permute.xlu0 %2057  ;;  %vm14105_vm11 = vmmov %vm14103_vm1 }
 0x48b   :  { %v3411_v0 = vsel %vm3351_vm9, %v3346_v39, %v2824_v59  ;;  %v5021_v15 = vcombine.high %v5019_v12, %v5019_v12  ;;  %v5583_v54 = vmax.f32 %v4986_v24, %v5020_v9  ;;  %v5584_v30 = vmax.f32 %v4985_v37, %v5019_v12  ;;  %7188 = vrot.lane.b32.xlu1 %v12713_v1, %s9335_s12  ;;  %vm14106_vm2 = vmmov %vm14103_vm1 }
 0x48c   :  { %v6311_v29 = vsel %vm14103_vm1, %v5582_v3, -inf  ;;  %9098 = vmatmul.mubr.msk.f32.gmra.mrb[14].mxu1 %vm3428_vm10, %v3411_v0  ;;  %v5004_v14 = vcombine.high %v5002_v7, %v5002_v7  ;;  %v5579_v16 = vmax.f32 %v4969_v17, %v5003_v26  ;;  %v5580_v32 = vmax.f32 %v4968_v56, %v5002_v7  ;;  %vm14107_vm4 = vmmov %vm14103_vm1 }
 0x48d   :  { %v6312_v48 = vrot.slane %v6311_v29, 4  ;;  %v5585_v18 = vmax.f32 %v4987_v52, %v5021_v15  ;;  %v6318_v57 = vsel %vm14104_vm3, %v5583_v54, -inf  ;;  %v6325_v35 = vsel %vm14105_vm11, %v5584_v30, -inf  ;;  %7126 = vrot.lane.b32.xlu0 %v12790_v45, %s9333_s19  ;;  %v12797_v23 = vpop.permute.xlu1 %1293  ;;  %vm14108_vm13 = vmmov %vm14103_vm1 }
 0x48e   :  { %v6283_v19 = vsel %vm14106_vm2, %v5578_v40, -inf  ;;  %v6319_v13 = vrot.slane %v6318_v57, 4  ;;  %v6326_v44 = vrot.slane %v6325_v35, 4  ;;  %v5581_v38 = vmax.f32 %v4970_v61, %v5004_v14  ;;  %v12799_v10 = vpop.permute.xlu0 %1039  ;;  %vm14109_vm3 = vmmov %vm14103_vm1  ;;  %v332_v40 = vld [vmem:[#allocation2 + $0x300] sm:$0xff] }
 0x48f   :  { %v6313_v21 = vmax.f32 %v6311_v29, %v6312_v48  ;;  %v6332_v6 = vsel %vm14107_vm4, %v5585_v18, -inf  ;;  %v6284_v37 = vrot.slane %v6283_v19, 4  ;;  %v6290_v43 = vsel %vm14108_vm13, %v5579_v16, -inf  ;;  %7440 = vrot.lane.b32.xlu1 %v12697_v27, %s9340_s24 }
 0x490   :  { %v6297_v5 = vsel %vm14103_vm1, %v5580_v32, -inf  ;;  %v6320_v41 = vmax.f32 %v6318_v57, %v6319_v13  ;;  %v6327_v20 = vmax.f32 %v6325_v35, %v6326_v44  ;;  %v6333_v56 = vrot.slane %v6332_v6, 4  ;;  %v12829_v13 = vld [vmem:[#allocation3 + $0x62] sm:$0xff] }
 0x491   :  { %v6285_v34 = vmax.f32 %v6283_v19, %v6284_v37  ;;  %v6291_v8 = vrot.slane %v6290_v43, 4  ;;  %v6298_v62 = vrot.slane %v6297_v5, 4  ;;  %v6304_v24 = vsel %vm14109_vm3, %v5581_v38, -inf  ;;  %7378 = vrot.lane.b32.xlu0 %v12713_v1, %s9339_s23  ;;  %v12809_v17 = vpop.permute.xlu1 %2313 }
 0x492   :  { %v6314_v25 = vrot.slane %v6313_v21, 2  ;;  %v6321_v49 = vrot.slane %v6320_v41, 2  ;;  %v6334_v52 = vmax.f32 %v6332_v6, %v6333_v56  ;;  %v12811_v2 = vpop.permute.xlu0 %2059  ;;  %v6305_v46 = vrot.slane %v6304_v24, 4 }
 0x493   :  { %v6286_v27 = vrot.slane %v6285_v34, 2  ;;  %v6292_v50 = vmax.f32 %v6290_v43, %v6291_v8  ;;  %v6299_v61 = vmax.f32 %v6297_v5, %v6298_v62  ;;  %7190 = vrot.lane.b32.xlu1 %v12813_v47, %s9335_s12  ;;  %v6328_v53 = vrot.slane %v6327_v20, 2  ;;  %v12835_v5 = vld [vmem:[#allocation3 + $0x71] sm:$0xff] }
 0x494   :  { %v6335_v55 = vrot.slane %v6334_v52, 2  ;;  %v6306_v9 = vmax.f32 %v6304_v24, %v6305_v46  ;;  %v6315_v59 = vmax.f32 %v6313_v21, %v6314_v25  ;;  %v6322_v7 = vmax.f32 %v6320_v41, %v6321_v49 }
 0x495   :  { %v6287_v39 = vmax.f32 %v6285_v34, %v6286_v27  ;;  %v6293_v1 = vrot.slane %v6292_v50, 2  ;;  %v6300_v12 = vrot.slane %v6299_v61, 2  ;;  %7000 = vrot.lane.b32.xlu0 %v12813_v47, %s9328_s29  ;;  %v12819_v3 = vpop.permute.xlu1 %1549  ;;  %v6329_v29 = vmax.f32 %v6327_v20, %v6328_v53 }
 0x496   :  { %v12821_v26 = vpop.permute.xlu0 %1295  ;;  %v6307_v30 = vrot.slane %v6306_v9, 2  ;;  %v6336_v48 = vmax.f32 %v6334_v52, %v6335_v55  ;;  %v2957_v57 = vsel %vm33_vm0, %v332_v40, %v12524_v51  ;;  %v6316_v35 = vrot.slane %v6315_v59, 1 }
 0x497   :  { %v6288_v0 = vrot.slane %v6287_v39, 1  ;;  %v6294_v15 = vmax.f32 %v6292_v50, %v6293_v1  ;;  %v6301_v54 = vmax.f32 %v6299_v61, %v6300_v12  ;;  %7442 = vrot.lane.b32.xlu1 %v12759_v31, %s9340_s24  ;;  %v6323_v19 = vrot.slane %v6322_v7, 1  ;;  %v12863_v12 = vld [vmem:[#allocation3 + $0x70] sm:$0xff] }
 0x498   :  { %v6308_v32 = vmax.f32 %v6306_v9, %v6307_v30  ;;  %vm14110_vm11 = vcmask 64512   ;;  %vm14111_vm2 = vcmask 97280   ;;  %v6337_v41 = vrot.slane %v6336_v48, 1 }
 0x499   :  { %v6295_v14 = vrot.slane %v6294_v15, 1  ;;  %v6302_v16 = vrot.slane %v6301_v54, 1  ;;  %7252 = vrot.lane.b32.xlu0 %v12759_v31, %s9337_s30  ;;  %v2570_v18 = vpop.permute.xlu1 %2569  ;;  %v6289_v44 = vmax.f32 %v6287_v39, %v6288_v0  ;;  %v3022_v43 = vsel %vm14110_vm11, %v2957_v57, %v12635_v11 }
 0x49a   :  { %v2316_v21 = vpop.permute.xlu0 %2315  ;;  %v6309_v37 = vrot.slane %v6308_v32, 1  ;;  %v6330_v31 = vrot.slane %v6329_v29, 1  ;;  %v3087_v51 = vsel %vm14111_vm2, %v3022_v43, %v12683_v42  ;;  %v6317_v62 = vmax.f32 %v6315_v59, %v6316_v35  ;;  %vm14116_vm2 = vmmov %vm14110_vm11 }
 0x49b   :  { %v6296_v38 = vmax.f32 %v6294_v15, %v6295_v14  ;;  %v6303_v6 = vmax.f32 %v6301_v54, %v6302_v16  ;;  %7064 = vrot.lane.b32.xlu1 %v12829_v13, %s9331_s11  ;;  %v3152_v8 = vsel %vm3091_vm5, %v3087_v51, %v12719_v36  ;;  %vm14112_vm4 = vcmask 1042434   ;;  %v333_v36 = vld [vmem:[#allocation2 + $0x308] sm:$0xff] }
 0x49c   :  { %v6310_v20 = vmax.f32 %v6308_v32, %v6309_v37  ;;  %v6324_v25 = vmax.f32 %v6322_v7, %v6323_v19  ;;  %v3217_v42 = vsel %vm3156_vm6, %v3152_v8, %v12784_v28  ;;  %v6331_v52 = vmax.f32 %v6329_v29, %v6330_v31  ;;  %v6866_v7 = vld [vmem:[#allocation3 + $0x72] sm:$0xff] }
 0x49d   :  { %v6766_v56 = vsel %vm6675_vm12, %v6296_v38, %v6289_v44  ;;  %7002 = vrot.lane.b32.xlu0 %v12835_v5, %s9328_s29  ;;  %v12842_v34 = vpop.permute.xlu1 %1805  ;;  %v3282_v50 = vsel %vm3221_vm7, %v3217_v42, %v12809_v17  ;;  %v6338_v61 = vmax.f32 %v6336_v48, %v6337_v41  ;;  %vm14113_vm13 = vcmask 1045509   ;;  %v334_v48 = vld [vmem:[#allocation2 + $0x318] sm:$0xff] }
 0x49e   :  { %v6767_v11 = vsel %vm14112_vm4, %v6303_v6, %v6766_v56  ;;  %v1552_v24 = vpop.permute.xlu0 %1551  ;;  %v3347_v53 = vsel %vm3286_vm8, %v3282_v50, %v2570_v18  ;;  %vm14114_vm1 = vcmask 1046534   ;;  %vm14115_vm3 = vcmask 1047559   ;;  %v6898_v6 = vld [vmem:[#allocation3 + $0x81] sm:$0xff]  ;;  %v12940_v50 = vld [vmem:[#allocation3 + $0xb2] sm:$0xff] }
 0x49f   :  { %v6768_v49 = vsel %vm6679_vm14, %v6310_v20, %v6767_v11  ;;  %7316 = vrot.lane.b32.xlu1 %v12790_v45, %s9338_s17  ;;  %v2958_v59 = vsel %vm33_vm0, %v333_v36, %v12603_v33  ;;  %vm14117_vm4 = vcmask 97280   ;;  %v335_v33 = vld [vmem:[#allocation2 + $0x320] sm:$0xff]  ;;  %v6852_v11 = vld [vmem:[#allocation3 + $0xb1] sm:$0xff] }
 0x4a0   :  { %v6769_v27 = vsel %vm6681_vm15, %v6317_v62, %v6768_v49  ;;  %v3023_v40 = vsel %vm14116_vm2, %v2958_v59, %v12663_v60  ;;  %v6914_v49 = vld [vmem:[#allocation3 + $0x82] sm:$0xff] }
 0x4a1   :  { %v6770_v46 = vsel %vm14113_vm13, %v6324_v25, %v6769_v27  ;;  %7254 = vrot.lane.b32.xlu0 %v12829_v13, %s9337_s30  ;;  %v2826_v55 = vpop.permute.xlu1 %2825  ;;  %v3088_v15 = vsel %vm14117_vm4, %v3023_v40, %v12726_v58  ;;  %vm14118_vm13 = vmmov %vm14116_vm2  ;;  %v12936_v27 = vld [vmem:[#allocation3 + $0xb0] sm:$0xff]  ;;  %v6827_v40 = vld [vmem:[#allocation3] sm:$0xff] }
 0x4a2   :  { %v6771_v28 = vsel %vm14114_vm1, %v6331_v52, %v6770_v46  ;;  %v3412_v45 = vsel %vm3351_vm9, %v3347_v53, %v2826_v55  ;;  %v2572_v39 = vpop.permute.xlu0 %2571  ;;  %v12861_v1 = vpop.f32.mrb[36].mxu0  ;;  %v3153_v30 = vsel %vm3091_vm5, %v3088_v15, %v12765_v4  ;;  %v2960_v4 = vsel %vm33_vm0, %v335_v33, %v12799_v10  ;;  %vm14119_vm1 = vmmov %vm14116_vm2  ;;  %v6931_v46 = vld [vmem:[#allocation3 + $0x90] sm:$0xff] }
 0x4a3   :  { %v6772_v17 = vsel %vm14115_vm3, %v6338_v61, %v6771_v28  ;;  %v12866_v9 = vpop.f32.mrb[37].mxu0  ;;  %9100 = vmatprep.mubr.msk.f32.mxu1 %vm3428_vm10, %v3412_v45  ;;  %7128 = vrot.lane.b32.xlu1 %v12863_v12, %s9333_s19  ;;  %v3218_v29 = vsel %vm3156_vm6, %v3153_v30, %v12811_v2  ;;  %v2959_v2 = vsel %vm33_vm0, %v334_v48, %v12769_v22  ;;  %vm14120_vm3 = vmmov %vm14117_vm4  ;;  %vm7599_vm2 = vcmask 523264  }
 0x4a4   :  { %6823 = vst.msk [vmem:[#allocation3 + $0xf1] sm:$0xff] %vm14110_vm11, %v6772_v17  ;;  %v3283_v60 = vsel %vm3221_vm7, %v3218_v29, %v2316_v21  ;;  %v3025_v57 = vsel %vm14118_vm13, %v2960_v4, %v12821_v26  ;;  %v3024_v10 = vsel %vm14119_vm1, %v2959_v2, %v12797_v23  ;;  %vm14121_vm0 = vmmov %vm14120_vm3  ;;  %v6851_v26 = vld [vmem:[#allocation3 + $0xa1] sm:$0xff]  ;;  %vm7582_vm11 = vcmask 457728  }
 0x4a5   :  { %7066 = vrot.lane.b32.xlu0 %v6866_v7, %s9331_s11  ;;  %v2062_v0 = vpop.permute.xlu1 %2061  ;;  %v3348_v58 = vsel %vm3286_vm8, %v3283_v60, %v2572_v39  ;;  %v3090_v19 = vsel %vm14120_vm3, %v3025_v57, %v1552_v24  ;;  %v3089_v21 = vsel %vm14121_vm0, %v3024_v10, %v12819_v3  ;;  %vm13929_vm4 = vcmask 588800   ;;  %vm14123_vm13 = vmmov %vm14119_vm1 }
 0x4a6   :  { %v1808_v54 = vpop.permute.xlu0 %1807  ;;  %v3154_v23 = vsel %vm3091_vm5, %v3089_v21, %v12842_v34  ;;  %v6867_v34 = vld [vmem:[#allocation3 + $0xa2] sm:$0xff] }
 0x4a7   :  { %7380 = vrot.lane.b32.xlu1 %v12813_v47, %s9339_s23  ;;  %v6882_v47 = vld [vmem:[#allocation3 + $0x80] sm:$0xff]  ;;  %v3155_v44 = vsel %vm3091_vm5, %v3090_v19, %v1808_v54 }
 0x4a8   :  { %v12965_v54 = vld [vmem:[%s13913_s2] ss:$0 sm:$0xff] }
 0x4a9   :  { %7318 = vrot.lane.b32.xlu0 %v12863_v12, %s9338_s17  ;;  %v2064_v14 = vpop.permute.xlu1 %2063  ;;  %v3877_v30 = vadd.f32 %v12965_v54, %v12861_v1  ;;  %v3872_v29 = vadd.f32 %v12965_v54, %v12866_v9 }
 0x4aa   :  { %v2828_v16 = vpop.permute.xlu0 %2827  ;;  %v3220_v37 = vsel %vm3156_vm6, %v3155_v44, %v2064_v14 }
 0x4ab   :  { %v3413_v32 = vsel %vm3351_vm9, %v3348_v58, %v2828_v16  ;;  %7192 = vrot.lane.b32.xlu1 %v12835_v5, %s9335_s12  ;;  %v4047_v58 = vmax.f32 %v3877_v30, 0.0  ;;  %v4046_v16 = vmax.f32 %v3872_v29, 0.0 }
 0x4ac   :  { %9101 = vmatmul.mubr.msk.f32.gmra.mrb[16].mxu1 %vm3428_vm10, %v3413_v32 }
 0x4ad   :  { %7130 = vrot.lane.b32.xlu0 %v6882_v47, %s9333_s19  ;;  %v2320_v18 = vpop.permute.xlu1 %2319  ;;  %v4774_v19 = vrot.slane %v4047_v58, %v10521_v63 }
 0x4ae   :  { %v2318_v35 = vpop.permute.xlu0 %2317  ;;  %v3285_v43 = vsel %vm3221_vm7, %v3220_v37, %v2320_v18  ;;  %v4750_v18 = vcombine.high %v4046_v16, %v4046_v16 }
 0x4af   :  { %7444 = vrot.lane.b32.xlu1 %v12829_v13, %s9340_s24  ;;  %v3219_v13 = vsel %vm3156_vm6, %v3154_v23, %v2062_v0  ;;  %vm14122_vm6 = vmmov %vm14119_vm1  ;;  %vm14124_vm1 = vcmask 58368  }
 0x4b0   :  { %v3284_v31 = vsel %vm3221_vm7, %v3219_v13, %v2318_v35  ;;  %vm14125_vm3 = vmmov %vm14124_vm1 }
 0x4b1   :  { %7382 = vrot.lane.b32.xlu0 %v12835_v5, %s9339_s23  ;;  %v2576_v22 = vpop.permute.xlu1 %2575  ;;  %vm14126_vm0 = vmmov %vm14124_vm1 }
 0x4b2   :  { %v2574_v38 = vpop.permute.xlu0 %2573  ;;  %v3350_v3 = vsel %vm3286_vm8, %v3285_v43, %v2576_v22  ;;  %v4757_v22 = vrot.slane %v4046_v16, %v10521_v63  ;;  %v4764_v43 = vrot.slane %v4750_v18, %v10521_v63 }
 0x4b3   :  { %7194 = vrot.lane.b32.xlu1 %v6898_v6, %s9335_s12  ;;  %v3349_v51 = vsel %vm3286_vm8, %v3284_v31, %v2574_v38  ;;  %vm7548_vm8 = vcmask 326656  }
 0x4b5   :  { %7004 = vrot.lane.b32.xlu0 %v6851_v26, %s9328_s29  ;;  %v2832_v5 = vpop.permute.xlu1 %2831 }
 0x4b6   :  { %v3415_v41 = vsel %vm3351_vm9, %v3350_v3, %v2832_v5  ;;  %v2830_v20 = vpop.permute.xlu0 %2829 }
 0x4b7   :  { %v3414_v56 = vsel %vm3351_vm9, %v3349_v51, %v2830_v20  ;;  %7446 = vrot.lane.b32.xlu1 %v6866_v7, %s9340_s24  ;;  %v4782_v20 = vcombine.high %v4774_v19, %v4774_v19 }
 0x4b8   :  { %9103 = vmatprep.mubr.msk.f32.mxu1 %vm3428_vm10, %v3414_v56  ;;  %v4765_v56 = vcombine.high %v4757_v22, %v4757_v22 }
 0x4b9   :  { %7256 = vrot.lane.b32.xlu0 %v6866_v7, %s9337_s30  ;;  %9104 = vmatmul.mubr.msk.f32.gmra.mrb[18].mxu1 %vm3428_vm10, %v3415_v41  ;;  %v12926_v8 = vpop.permute.xlu1 %6990  ;;  %vm7565_vm10 = vcmask 392192  }
 0x4ba   :  { %v6989_v62 = vpop.permute.xlu0 %6988 }
 0x4bb   :  { %7068 = vrot.lane.b32.xlu1 %v6867_v34, %s9331_s11  ;;  %v7484_v33 = vsel %vm14122_vm6, %v6827_v40, %v6989_v62  ;;  %vm14127_vm6 = vmmov %vm14126_vm0 }
 0x4bd   :  { %7006 = vrot.lane.b32.xlu0 %v6852_v11, %s9328_s29  ;;  %v12930_v24 = vpop.permute.xlu1 %7054 }
 0x4be   :  { %v7053_v25 = vpop.permute.xlu0 %7052 }
 0x4bf   :  { %7320 = vrot.lane.b32.xlu1 %v6882_v47, %s9338_s17  ;;  %v7500_v60 = vsel %vm3091_vm5, %v7484_v33, %v7053_v25  ;;  %v4767_v47 = vcombine.high %v4047_v58, %v4047_v58 }
 0x4c1   :  { %7258 = vrot.lane.b32.xlu0 %v6914_v49, %s9337_s30  ;;  %v12934_v42 = vpop.permute.xlu1 %7118  ;;  %v4781_v26 = vrot.slane %v4767_v47, %v10521_v63 }
 0x4c2   :  { %v7117_v52 = vpop.permute.xlu0 %7116 }
 0x4c3   :  { %7132 = vrot.lane.b32.xlu1 %v12936_v27, %s9333_s19  ;;  %v7516_v4 = vsel %vm3221_vm7, %v7500_v60, %v7117_v52  ;;  %v4766_v52 = vcombine.high %v4764_v43, %v4764_v43 }
 0x4c5   :  { %7070 = vrot.lane.b32.xlu0 %v12940_v50, %s9331_s11  ;;  %v12944_v36 = vpop.permute.xlu1 %6992 }
 0x4c6   :  { %v7181_v61 = vpop.permute.xlu0 %7180 }
 0x4c7   :  { %7384 = vrot.lane.b32.xlu1 %v6898_v6, %s9339_s23  ;;  %v7532_v2 = vsel %vm3351_vm9, %v7516_v4, %v7181_v61  ;;  %v9295_v6 = vld [vmem:[#allocation3 + $0x10] sm:$0xff] }
 0x4c8   :  { %v7485_v23 = vsel %vm14123_vm13, %v9295_v6, %v12926_v8  ;;  %vm14128_vm13 = vmmov %vm14126_vm0 }
 0x4c9   :  { %7322 = vrot.lane.b32.xlu0 %v6931_v46, %s9338_s17  ;;  %v7245_v53 = vpop.permute.xlu1 %7244  ;;  %v7501_v31 = vsel %vm3091_vm5, %v7485_v23, %v12930_v24 }
 0x4ca   :  { %v7183_v55 = vpop.permute.xlu0 %7182  ;;  %v7549_v9 = vsel %vm7548_vm8, %v7532_v2, %v7245_v53  ;;  %v7517_v5 = vsel %vm3221_vm7, %v7501_v31, %v12934_v42 }
 0x4cb   :  { %7196 = vrot.lane.b32.xlu1 %v6852_v11, %s9335_s12  ;;  %v7533_v34 = vsel %vm3351_vm9, %v7517_v5, %v7183_v55  ;;  %v4783_v11 = vcombine.high %v4781_v26, %v4781_v26 }
 0x4cd   :  { %v12949_v28 = vpop.permute.xlu1 %7056 }
 0x4ce   :  { %v12953_v39 = vpop.permute.xlu0 %6994 }
 0x4cf   :  { %v12951_v45 = vpop.f32.mrb[8].mxu1  ;;  %7448 = vrot.lane.b32.xlu1 %v6914_v49, %s9340_s24 }
 0x4d0   :  { %v12955_v17 = vpop.f32.mrb[9].mxu1 }
 0x4d1   :  { %v7309_v59 = vpop.permute.xlu1 %7308 }
 0x4d2   :  { %v7247_v7 = vpop.permute.xlu0 %7246  ;;  %v7566_v57 = vsel %vm7565_vm10, %v7549_v9, %v7309_v59 }
 0x4d3   :  { %v7550_v25 = vsel %vm7548_vm8, %v7533_v34, %v7247_v7 }
 0x4d5   :  { %v12958_v0 = vpop.permute.xlu1 %7120 }
 0x4d6   :  { %v12960_v15 = vpop.permute.xlu0 %7058 }
 0x4d9   :  { %v7373_v48 = vpop.permute.xlu1 %7372 }
 0x4da   :  { %v7311_v14 = vpop.permute.xlu0 %7310  ;;  %v7583_v35 = vsel %vm7582_vm11, %v7566_v57, %v7373_v48 }
 0x4db   :  { %v7567_v61 = vsel %vm7565_vm10, %v7550_v25, %v7311_v14 }
 0x4dd   :  { %v12974_v32 = vpop.permute.xlu1 %7184 }
 0x4de   :  { %v12977_v1 = vpop.permute.xlu0 %7122 }
 0x4e1   :  { %v7437_v10 = vpop.permute.xlu1 %7436 }
 0x4e2   :  { %v7375_v21 = vpop.permute.xlu0 %7374  ;;  %v7600_v44 = vsel %vm7599_vm2, %v7583_v35, %v7437_v10  ;;  %v9069_v38 = vpop.f32.mrb[38].mxu0 }
 0x4e3   :  { %v3887_v37 = vadd.f32 %v12965_v54, %v9069_v38  ;;  %v3881_v13 = vpop.f32.mrb[39].mxu0  ;;  %9124 = vmatprep.mubr.msk.f32.mxu1 %vm13929_vm4, %v7600_v44  ;;  %v7584_v53 = vsel %vm7582_vm11, %v7567_v61, %v7375_v21 }
 0x4e4   :  { %v3882_v3 = vadd.f32 %v12965_v54, %v3881_v13 }
 0x4e5   :  { %v4049_v51 = vmax.f32 %v3887_v37, 0.0  ;;  %v12996_v41 = vpop.permute.xlu1 %7186 }
 0x4e6   :  { %v4048_v8 = vmax.f32 %v3882_v3, 0.0  ;;  %v12999_v62 = vpop.permute.xlu0 %6996 }
 0x4e7   :  { %v4801_v49 = vcombine.high %v4049_v51, %v4049_v51  ;;  %v4808_v24 = vrot.slane %v4049_v51, %v10521_v63 }
 0x4e8   :  { %v4784_v42 = vcombine.high %v4048_v8, %v4048_v8  ;;  %v4791_v46 = vrot.slane %v4048_v8, %v10521_v63 }
 0x4e9   :  { %v4815_v59 = vrot.slane %v4801_v49, %v10521_v63  ;;  %v4816_v55 = vcombine.high %v4808_v24, %v4808_v24  ;;  %v5558_v40 = vmax.f32 %v4774_v19, %v4808_v24  ;;  %v7439_v30 = vpop.permute.xlu1 %7438 }
 0x4ea   :  { %v4798_v33 = vrot.slane %v4784_v42, %v10521_v63  ;;  %v4799_v29 = vcombine.high %v4791_v46, %v4791_v46  ;;  %v5554_v7 = vmax.f32 %v4757_v22, %v4791_v46  ;;  %v13008_v48 = vpop.permute.xlu0 %7248  ;;  %v7601_v60 = vsel %vm7599_vm2, %v7584_v53, %v7439_v30 }
 0x4eb   :  { %v4817_v58 = vcombine.high %v4815_v59, %v4815_v59  ;;  %v5559_v14 = vmax.f32 %v4782_v20, %v4816_v55  ;;  %v5560_v16 = vmax.f32 %v4781_v26, %v4815_v59  ;;  %v6143_v4 = vsel %vm14124_vm1, %v5558_v40, -inf  ;;  %9125 = vmatmul.mubr.msk.f32.vlgmr.msra.gmra.mrb[20].mxu1 %vm13929_vm4, %v7601_v60  ;;  %vm14129_vm1 = vmmov %vm14126_vm0 }
 0x4ec   :  { %v6144_v2 = vrot.slane %v6143_v4, 4  ;;  %v4800_v47 = vcombine.high %v4798_v33, %v4798_v33  ;;  %v5555_v9 = vmax.f32 %v4765_v56, %v4799_v29  ;;  %v5556_v18 = vmax.f32 %v4764_v43, %v4798_v33  ;;  %vm14130_vm4 = vmmov %vm14126_vm0 }
 0x4ed   :  { %v5561_v57 = vmax.f32 %v4783_v11, %v4817_v58  ;;  %v6150_v35 = vsel %vm14125_vm3, %v5559_v14, -inf  ;;  %v6157_v10 = vsel %vm14126_vm0, %v5560_v16, -inf  ;;  %v6115_v19 = vsel %vm14127_vm6, %v5554_v7, -inf  ;;  %v13016_v22 = vpop.permute.xlu1 %7060  ;;  %vm14131_vm3 = vmmov %vm14126_vm0 }
 0x4ee   :  { %v6145_v21 = vmax.f32 %v6143_v4, %v6144_v2  ;;  %v6151_v44 = vrot.slane %v6150_v35, 4  ;;  %v6158_v38 = vrot.slane %v6157_v10, 4  ;;  %v5557_v26 = vmax.f32 %v4766_v52, %v4800_v47  ;;  %v13021_v43 = vpop.permute.xlu0 %6998 }
 0x4ef   :  { %v6164_v6 = vsel %vm14128_vm13, %v5561_v57, -inf  ;;  %v6116_v23 = vrot.slane %v6115_v19, 4  ;;  %v6122_v37 = vsel %vm14129_vm1, %v5555_v9, -inf  ;;  %v6129_v13 = vsel %vm14130_vm4, %v5556_v18, -inf }
 0x4f0   :  { %v6152_v31 = vmax.f32 %v6150_v35, %v6151_v44  ;;  %v6159_v3 = vmax.f32 %v6157_v10, %v6158_v38  ;;  %v6165_v5 = vrot.slane %v6164_v6, 4  ;;  %v6123_v20 = vrot.slane %v6122_v37, 4 }
 0x4f1   :  { %v6117_v51 = vmax.f32 %v6115_v19, %v6116_v23  ;;  %v6130_v56 = vrot.slane %v6129_v13, 4  ;;  %v6136_v34 = vsel %vm14131_vm3, %v5557_v26, -inf  ;;  %v7313_v8 = vpop.permute.xlu1 %7312  ;;  %v6146_v11 = vrot.slane %v6145_v21, 2  ;;  %v9296_v26 = vld [vmem:[#allocation3 + $0x20] sm:$0xff] }
 0x4f2   :  { %v6153_v25 = vrot.slane %v6152_v31, 2  ;;  %v6166_v49 = vmax.f32 %v6164_v6, %v6165_v5  ;;  %v6124_v52 = vmax.f32 %v6122_v37, %v6123_v20  ;;  %v6137_v42 = vrot.slane %v6136_v34, 4 }
 0x4f3   :  { %v6118_v24 = vrot.slane %v6117_v51, 2  ;;  %v6131_v61 = vmax.f32 %v6129_v13, %v6130_v56  ;;  %v13024_v46 = vpop.permute.xlu0 %7250  ;;  %v6160_v53 = vrot.slane %v6159_v3, 2  ;;  %v3957_v7 = vadd.f32 %v12965_v54, %v12951_v45 }
 0x4f4   :  { %v6167_v59 = vrot.slane %v6166_v49, 2  ;;  %v6125_v40 = vrot.slane %v6124_v52, 2  ;;  %v6138_v33 = vmax.f32 %v6136_v34, %v6137_v42  ;;  %v6147_v60 = vmax.f32 %v6145_v21, %v6146_v11 }
 0x4f5   :  { %v6119_v55 = vmax.f32 %v6117_v51, %v6118_v24  ;;  %v6132_v30 = vrot.slane %v6131_v61, 2  ;;  %v13026_v29 = vpop.permute.xlu1 %7124  ;;  %v6154_v58 = vmax.f32 %v6152_v31, %v6153_v25  ;;  %v3952_v9 = vadd.f32 %v12965_v54, %v12955_v17 }
 0x4f6   :  { %v6126_v16 = vmax.f32 %v6124_v52, %v6125_v40  ;;  %v6139_v2 = vrot.slane %v6138_v33, 2  ;;  %v6161_v18 = vmax.f32 %v6159_v3, %v6160_v53  ;;  %v6168_v57 = vmax.f32 %v6166_v49, %v6167_v59 }
 0x4f7   :  { %v6120_v14 = vrot.slane %v6119_v55, 1  ;;  %v6133_v4 = vmax.f32 %v6131_v61, %v6132_v30  ;;  %v13030_v47 = vpop.permute.xlu0 %7062  ;;  %v4063_v38 = vmax.f32 %v3957_v7, 0.0  ;;  %vm14132_vm4 = vcmask 64512  }
 0x4f8   :  { %v6127_v35 = vrot.slane %v6126_v16, 1  ;;  %v6140_v19 = vmax.f32 %v6138_v33, %v6139_v2  ;;  %v7486_v45 = vsel %vm14132_vm4, %v9296_v26, %v12944_v36  ;;  %v6148_v21 = vrot.slane %v6147_v60, 1  ;;  %v9297_v2 = vld [vmem:[#allocation3 + $0x30] sm:$0xff]  ;;  %vm14136_vm1 = vmmov %vm14132_vm4 }
 0x4f9   :  { %v6134_v10 = vrot.slane %v6133_v4, 1  ;;  %v7377_v44 = vpop.permute.xlu1 %7376  ;;  %v6155_v6 = vrot.slane %v6154_v58, 1  ;;  %v6121_v23 = vmax.f32 %v6119_v55, %v6120_v14  ;;  %v4062_v51 = vmax.f32 %v3952_v9, 0.0 }
 0x4fa   :  { %v6128_v37 = vmax.f32 %v6126_v16, %v6127_v35  ;;  %v6141_v31 = vrot.slane %v6140_v19, 1  ;;  %v7502_v17 = vsel %vm3091_vm5, %v7486_v45, %v12949_v28  ;;  %v6162_v3 = vrot.slane %v6161_v18, 1 }
 0x4fb   :  { %v6135_v13 = vmax.f32 %v6133_v4, %v6134_v10  ;;  %v7315_v5 = vpop.permute.xlu0 %7314  ;;  %v7518_v20 = vsel %vm3221_vm7, %v7502_v17, %v12958_v0  ;;  %v6169_v56 = vrot.slane %v6168_v57, 1  ;;  %v6149_v49 = vmax.f32 %v6147_v60, %v6148_v21 }
 0x4fc   :  { %v6142_v34 = vmax.f32 %v6140_v19, %v6141_v31  ;;  %v6745_v11 = vsel %vm6675_vm12, %v6128_v37, %v6121_v23  ;;  %v7534_v25 = vsel %vm3351_vm9, %v7518_v20, %v12974_v32  ;;  %vm14133_vm0 = vcmask 1042434  }
 0x4fd   :  { %v13041_v36 = vpop.permute.xlu1 %7188  ;;  %v6746_v24 = vsel %vm14133_vm0, %v6135_v13, %v6745_v11  ;;  %v5039_v52 = vcombine.high %v4063_v38, %v4063_v38  ;;  %v6156_v61 = vmax.f32 %v6154_v58, %v6155_v6  ;;  %v7551_v42 = vsel %vm7548_vm8, %v7534_v25, %v13008_v48  ;;  %vm14139_vm0 = vmmov %vm14136_vm1 }
 0x4fe   :  { %v6747_v28 = vsel %vm6679_vm14, %v6142_v34, %v6746_v24  ;;  %v5022_v53 = vcombine.high %v4062_v51, %v4062_v51  ;;  %v6163_v59 = vmax.f32 %v6161_v18, %v6162_v3  ;;  %v7568_v40 = vsel %vm7565_vm10, %v7551_v42, %v7313_v8 }
 0x4ff   :  { %v13049_v0 = vpop.permute.xlu0 %7126  ;;  %v6748_v55 = vsel %vm6681_vm15, %v6149_v49, %v6747_v28  ;;  %v6170_v30 = vmax.f32 %v6168_v57, %v6169_v56  ;;  %vm14134_vm6 = vcmask 1045509   ;;  %v7585_v33 = vsel %vm7582_vm11, %v7568_v40, %v7377_v44 }
 0x500   :  { %v6749_v32 = vsel %vm14134_vm6, %v6156_v61, %v6748_v55  ;;  %v5046_v60 = vrot.slane %v4063_v38, %v10521_v63  ;;  %v5029_v58 = vrot.slane %v4062_v51, %v10521_v63  ;;  %vm14135_vm13 = vcmask 1046534  }
 0x501   :  { %v7441_v7 = vpop.permute.xlu1 %7440  ;;  %v6750_v48 = vsel %vm14135_vm13, %v6163_v59, %v6749_v32  ;;  %v5053_v4 = vrot.slane %v5039_v52, %v10521_v63  ;;  %v7487_v8 = vsel %vm14136_vm1, %v9297_v2, %v12953_v39  ;;  %vm14137_vm3 = vcmask 1047559  }
 0x502   :  { %v7602_v14 = vsel %vm7599_vm2, %v7585_v33, %v7441_v7  ;;  %v9093_v16 = vpop.f32.mrb[10].mxu1  ;;  %v6751_v9 = vsel %vm14137_vm3, %v6170_v30, %v6750_v48  ;;  %vm14138_vm4 = vcmask 588800   ;;  %v5036_v10 = vrot.slane %v5022_v53, %v10521_v63 }
 0x503   :  { %v7379_v18 = vpop.permute.xlu0 %7378  ;;  %v3967_v57 = vadd.f32 %v12965_v54, %v9093_v16  ;;  %v3961_v35 = vpop.f32.mrb[11].mxu1  ;;  %9127 = vmatprep.mubr.msk.f32.mxu1 %vm14138_vm4, %v7602_v14  ;;  %v7503_v19 = vsel %vm3091_vm5, %v7487_v8, %v12960_v15  ;;  %6820 = vst.msk [vmem:[#allocation3 + $0xc1] sm:$0xff] %vm14139_vm0, %v6751_v9  ;;  %v5054_v45 = vcombine.high %v5046_v60, %v5046_v60  ;;  %vm14140_vm6 = vcmask 58368   ;;  %vm14141_vm13 = vmmov %vm14138_vm4  ;;  %v6947_v16 = vld [vmem:[#allocation3 + $0x91] sm:$0xff] }
 0x504   :  { %v3962_v44 = vadd.f32 %v12965_v54, %v3961_v35  ;;  %v7519_v39 = vsel %vm3221_vm7, %v7503_v19, %v12977_v1  ;;  %v5037_v21 = vcombine.high %v5029_v58, %v5029_v58  ;;  %v5055_v37 = vcombine.high %v5053_v4, %v5053_v4  ;;  %vm14142_vm1 = vmmov %vm14140_vm6 }
 0x505   :  { %v4065_v38 = vmax.f32 %v3967_v57, 0.0  ;;  %v13072_v26 = vpop.permute.xlu1 %7190  ;;  %v7535_v6 = vsel %vm3351_vm9, %v7519_v39, %v12996_v41  ;;  %v5038_v17 = vcombine.high %v5036_v10, %v5036_v10  ;;  %vm14143_vm3 = vmmov %vm14142_vm1 }
 0x506   :  { %v4064_v23 = vmax.f32 %v3962_v44, 0.0  ;;  %v7552_v15 = vsel %vm7548_vm8, %v7535_v6, %v13024_v46  ;;  %vm14144_vm4 = vmmov %vm14142_vm1 }
 0x507   :  { %v5073_v13 = vcombine.high %v4065_v38, %v4065_v38  ;;  %v5080_v31 = vrot.slane %v4065_v38, %v10521_v63  ;;  %v13079_v51 = vpop.permute.xlu0 %7000  ;;  %v7569_v1 = vsel %vm7565_vm10, %v7552_v15, %v7315_v5  ;;  %vm14145_vm0 = vmmov %vm14142_vm1 }
 0x508   :  { %v5056_v3 = vcombine.high %v4064_v23, %v4064_v23  ;;  %v5063_v20 = vrot.slane %v4064_v23, %v10521_v63  ;;  %v7586_v56 = vsel %vm7582_vm11, %v7569_v1, %v7379_v18 }
 0x509   :  { %v5087_v41 = vrot.slane %v5073_v13, %v10521_v63  ;;  %v5088_v34 = vcombine.high %v5080_v31, %v5080_v31  ;;  %v5590_v11 = vmax.f32 %v5046_v60, %v5080_v31  ;;  %v7443_v25 = vpop.permute.xlu1 %7442 }
 0x50a   :  { %v5070_v46 = vrot.slane %v5056_v3, %v10521_v63  ;;  %v5071_v49 = vcombine.high %v5063_v20, %v5063_v20  ;;  %v5586_v24 = vmax.f32 %v5029_v58, %v5063_v20  ;;  %v7603_v52 = vsel %vm7599_vm2, %v7586_v56, %v7443_v25  ;;  %v6884_v59 = vld [vmem:[#allocation3 + $0xc0] sm:$0xff] }
 0x50b   :  { %v5089_v61 = vcombine.high %v5087_v41, %v5087_v41  ;;  %v5591_v28 = vmax.f32 %v5054_v45, %v5088_v34  ;;  %v5592_v42 = vmax.f32 %v5053_v4, %v5087_v41  ;;  %v6367_v5 = vsel %vm14140_vm6, %v5590_v11, -inf  ;;  %v13088_v53 = vpop.permute.xlu0 %7252  ;;  %v13090_v55 = vld [vmem:[#allocation3 + $0xc1] sm:$0xff]  ;;  %9128 = vmatmul.mubr.msk.f32.gmra.mrb[22].mxu1 %vm14141_vm13, %v7603_v52  ;;  %7134 = vrot.lane.b32.xlu0 %v6884_v59, %s9333_s19  ;;  %v6963_v4 = vld [vmem:[#allocation3 + $0x92] sm:$0xff]  ;;  %vm14146_vm6 = vmmov %vm14145_vm0 }
 0x50c   :  { %v6368_v40 = vrot.slane %v6367_v5, 4  ;;  %v5072_v30 = vcombine.high %v5070_v46, %v5070_v46  ;;  %v5587_v32 = vmax.f32 %v5037_v21, %v5071_v49  ;;  %v5588_v33 = vmax.f32 %v5036_v10, %v5070_v46  ;;  %7198 = vrot.lane.b32.xlu1 %v13090_v55, %s9335_s12  ;;  %vm14147_vm13 = vmmov %vm14145_vm0  ;;  %v13109_v34 = vld [vmem:[#allocation3 + $0xc2] sm:$0xff] }
 0x50d   :  { %v5593_v7 = vmax.f32 %v5055_v37, %v5089_v61  ;;  %v6374_v60 = vsel %vm14142_vm1, %v5591_v28, -inf  ;;  %v6381_v58 = vsel %vm14143_vm3, %v5592_v42, -inf  ;;  %v6339_v48 = vsel %vm14144_vm4, %v5586_v24, -inf  ;;  %v13099_v14 = vpop.permute.xlu1 %7064  ;;  %vm14148_vm1 = vmmov %vm14145_vm0 }
 0x50e   :  { %v6369_v2 = vmax.f32 %v6367_v5, %v6368_v40  ;;  %v6375_v8 = vrot.slane %v6374_v60, 4  ;;  %v6382_v9 = vrot.slane %v6381_v58, 4  ;;  %v5589_v18 = vmax.f32 %v5038_v17, %v5072_v30 }
 0x50f   :  { %v6388_v57 = vsel %vm14145_vm0, %v5593_v7, -inf  ;;  %v6340_v35 = vrot.slane %v6339_v48, 4  ;;  %v6346_v10 = vsel %vm14146_vm6, %v5587_v32, -inf  ;;  %v6353_v19 = vsel %vm14147_vm13, %v5588_v33, -inf  ;;  %v7003_v44 = vpop.permute.xlu0 %7002  ;;  %7386 = vrot.lane.b32.xlu0 %v6947_v16, %s9339_s23 }
 0x510   :  { %v6376_v39 = vmax.f32 %v6374_v60, %v6375_v8  ;;  %v6383_v38 = vmax.f32 %v6381_v58, %v6382_v9  ;;  %v6389_v45 = vrot.slane %v6388_v57, 4  ;;  %7450 = vrot.lane.b32.xlu1 %v6963_v4, %s9340_s24  ;;  %v6347_v6 = vrot.slane %v6346_v10, 4  ;;  %v9298_v8 = vld [vmem:[#allocation3 + $0x40] sm:$0xff] }
 0x511   :  { %v6341_v21 = vmax.f32 %v6339_v48, %v6340_v35  ;;  %v6354_v23 = vrot.slane %v6353_v19, 4  ;;  %v6360_v37 = vsel %vm14148_vm1, %v5589_v18, -inf  ;;  %v7317_v15 = vpop.permute.xlu1 %7316  ;;  %v6370_v13 = vrot.slane %v6369_v2, 2 }
 0x512   :  { %v6377_v31 = vrot.slane %v6376_v39, 2  ;;  %v6390_v17 = vmax.f32 %v6388_v57, %v6389_v45  ;;  %v6348_v3 = vmax.f32 %v6346_v10, %v6347_v6  ;;  %v6361_v56 = vrot.slane %v6360_v37, 4 }
 0x513   :  { %v6342_v1 = vrot.slane %v6341_v21, 2  ;;  %v6355_v20 = vmax.f32 %v6353_v19, %v6354_v23  ;;  %v13107_v41 = vpop.permute.xlu0 %7254  ;;  %v6384_v11 = vrot.slane %v6383_v38, 2  ;;  %7008 = vrot.lane.b32.xlu0 %v13090_v55, %s9328_s29  ;;  %v6371_v28 = vmax.f32 %v6369_v2, %v6370_v13 }
 0x514   :  { %v6391_v25 = vrot.slane %v6390_v17, 2  ;;  %7072 = vrot.lane.b32.xlu1 %v13109_v34, %s9331_s11  ;;  %v6349_v49 = vrot.slane %v6348_v3, 2  ;;  %v6362_v52 = vmax.f32 %v6360_v37, %v6361_v56  ;;  %v6378_v42 = vmax.f32 %v6376_v39, %v6377_v31 }
 0x515   :  { %v6343_v46 = vmax.f32 %v6341_v21, %v6342_v1  ;;  %v6356_v24 = vrot.slane %v6355_v20, 2  ;;  %v13115_v61 = vpop.permute.xlu1 %7128  ;;  %v6385_v7 = vmax.f32 %v6383_v38, %v6384_v11  ;;  %vm14149_vm3 = vcmask 64512  }
 0x516   :  { %v6350_v40 = vmax.f32 %v6348_v3, %v6349_v49  ;;  %v6363_v32 = vrot.slane %v6362_v52, 2  ;;  %v6392_v60 = vmax.f32 %v6390_v17, %v6391_v25  ;;  %v7488_v2 = vsel %vm14149_vm3, %v9298_v8, %v12999_v62  ;;  %vm14150_vm4 = vmmov %vm14149_vm3 }
 0x517   :  { %v6344_v5 = vrot.slane %v6343_v46, 1  ;;  %v6357_v30 = vmax.f32 %v6355_v20, %v6356_v24  ;;  %v7067_v33 = vpop.permute.xlu0 %7066  ;;  %7260 = vrot.lane.b32.xlu0 %v12940_v50, %s9337_s30  ;;  %v6372_v9 = vrot.slane %v6371_v28, 1  ;;  %v6379_v18 = vrot.slane %v6378_v42, 1  ;;  %vm14154_vm1 = vmmov %vm14149_vm3 }
 0x518   :  { %7324 = vrot.lane.b32.xlu1 %v6884_v59, %s9338_s17  ;;  %v6351_v58 = vrot.slane %v6350_v40, 1  ;;  %v6364_v16 = vmax.f32 %v6362_v52, %v6363_v32  ;;  %v7491_v50 = vsel %vm14150_vm4, %v12863_v12, %v7003_v44  ;;  %v7504_v59 = vsel %vm3091_vm5, %v7488_v2, %v13016_v22  ;;  %v9299_v52 = vld [vmem:[#allocation3 + $0x50] sm:$0xff] }
 0x519   :  { %v6358_v48 = vrot.slane %v6357_v30, 1  ;;  %v7381_v4 = vpop.permute.xlu1 %7380  ;;  %v6345_v57 = vmax.f32 %v6343_v46, %v6344_v5  ;;  %v6386_v38 = vrot.slane %v6385_v7, 1  ;;  %v7507_v45 = vsel %vm3091_vm5, %v7491_v50, %v7067_v33 }
 0x51a   :  { %v6352_v35 = vmax.f32 %v6350_v40, %v6351_v58  ;;  %v6365_v19 = vrot.slane %v6364_v16, 1  ;;  %v7520_v21 = vsel %vm3221_vm7, %v7504_v59, %v13026_v29  ;;  %v6393_v62 = vrot.slane %v6392_v60, 1  ;;  %v9300_v59 = vld [vmem:[#allocation3 + $0x60] sm:$0xff] }
 0x51b   :  { %v6359_v10 = vmax.f32 %v6357_v30, %v6358_v48  ;;  %v7319_v39 = vpop.permute.xlu0 %7318  ;;  %v7536_v13 = vsel %vm3351_vm9, %v7520_v21, %v13041_v36  ;;  %v6373_v31 = vmax.f32 %v6371_v28, %v6372_v9  ;;  %vm14151_vm0 = vcmask 1042434  }
 0x51c   :  { %v6366_v6 = vmax.f32 %v6364_v16, %v6365_v19  ;;  %v6773_v23 = vsel %vm6675_vm12, %v6352_v35, %v6345_v57  ;;  %v6380_v44 = vmax.f32 %v6378_v42, %v6379_v18  ;;  %v7553_v17 = vsel %vm7548_vm8, %v7536_v13, %v13088_v53 }
 0x51d   :  { %v7193_v37 = vpop.permute.xlu1 %7192  ;;  %v6774_v12 = vsel %vm14151_vm0, %v6359_v10, %v6773_v23  ;;  %v6387_v3 = vmax.f32 %v6385_v7, %v6386_v38  ;;  %v7570_v20 = vsel %vm7565_vm10, %v7553_v17, %v7317_v15  ;;  %v6394_v11 = vmax.f32 %v6392_v60, %v6393_v62  ;;  %vm14157_vm0 = vmmov %vm14154_vm1 }
 0x51e   :  { %v6775_v22 = vsel %vm6679_vm14, %v6366_v6, %v6774_v12  ;;  %vm14152_vm6 = vcmask 1045509   ;;  %v7587_v25 = vsel %vm7582_vm11, %v7570_v20, %v7381_v4  ;;  %vm14153_vm13 = vcmask 1046534  }
 0x51f   :  { %v7131_v1 = vpop.permute.xlu0 %7130  ;;  %v6776_v29 = vsel %vm6681_vm15, %v6373_v31, %v6775_v22  ;;  %v7489_v53 = vsel %vm14154_vm1, %v9299_v52, %v13021_v43  ;;  %vm14155_vm3 = vcmask 1047559   ;;  %vm14156_vm4 = vcmask 588800   ;;  %vm14160_vm1 = vmmov %vm14157_vm0 }
 0x520   :  { %v7523_v56 = vsel %vm3221_vm7, %v7507_v45, %v7131_v1  ;;  %v6777_v36 = vsel %vm14152_vm6, %v6380_v44, %v6776_v29  ;;  %v7505_v5 = vsel %vm3091_vm5, %v7489_v53, %v13030_v47  ;;  %v6835_v47 = vld [vmem:[#allocation3 + $0xa0] sm:$0xff]  ;;  %vm14158_vm6 = vmmov %vm14157_vm0 }
 0x521   :  { %v7445_v46 = vpop.permute.xlu1 %7444  ;;  %v6778_v49 = vsel %vm14153_vm13, %v6387_v3, %v6777_v36  ;;  %v7521_v30 = vsel %vm3221_vm7, %v7505_v5, %v13049_v0  ;;  %vm14159_vm13 = vmmov %vm14156_vm4 }
 0x522   :  { %v7604_v24 = vsel %vm7599_vm2, %v7587_v25, %v7445_v46  ;;  %v6779_v28 = vsel %vm14155_vm3, %v6394_v11, %v6778_v49  ;;  %v7537_v33 = vsel %vm3351_vm9, %v7521_v30, %v13072_v26  ;;  %vm14161_vm3 = vmmov %vm14157_vm0 }
 0x523   :  { %v7383_v42 = vpop.permute.xlu0 %7382  ;;  %v9072_v15 = vpop.f32.mrb[40].mxu0  ;;  %9130 = vmatprep.mubr.msk.f32.mxu1 %vm14156_vm4, %v7604_v24  ;;  %6824 = vst.msk [vmem:[#allocation3 + $0x101] sm:$0xff] %vm14157_vm0, %v6779_v28  ;;  %v7554_v7 = vsel %vm7548_vm8, %v7537_v33, %v13107_v41  ;;  %v7490_v38 = vsel %vm14161_vm3, %v9300_v59, %v13079_v51  ;;  %vm14162_vm0 = vcmask 58368  }
 0x524   :  { %v3891_v40 = vpop.f32.mrb[41].mxu0  ;;  %v7571_v58 = vsel %vm7565_vm10, %v7554_v7, %v7319_v39  ;;  %v7506_v21 = vsel %vm3091_vm5, %v7490_v38, %v13099_v14  ;;  %v3897_v14 = vadd.f32 %v12965_v54, %v9072_v15  ;;  %vm14166_vm3 = vmmov %vm14162_vm0 }
 0x525   :  { %v7195_v32 = vpop.permute.xlu1 %7194  ;;  %v7588_v48 = vsel %vm7582_vm11, %v7571_v58, %v7383_v42  ;;  %v7522_v6 = vsel %vm3221_vm7, %v7506_v21, %v13115_v61  ;;  %v3892_v61 = vadd.f32 %v12965_v54, %v3891_v40 }
 0x526   :  { %v13155_v43 = vsel %vm3351_vm9, %v7523_v56, %v7195_v32  ;;  %v4051_v17 = vmax.f32 %v3897_v14, 0.0 }
 0x527   :  { %v7005_v60 = vpop.permute.xlu0 %7004 }
 0x528   :  { %v7492_v0 = vsel %vm14158_vm6, %v6835_v47, %v7005_v60  ;;  %v4835_v1 = vcombine.high %v4051_v17, %v4051_v17  ;;  %v4842_v20 = vrot.slane %v4051_v17, %v10521_v63  ;;  %vm14163_vm6 = vmmov %vm14162_vm0 }
 0x529   :  { %v7447_v16 = vpop.permute.xlu1 %7446 }
 0x52a   :  { %v7605_v4 = vsel %vm7599_vm2, %v7588_v48, %v7447_v16  ;;  %v4849_v11 = vrot.slane %v4835_v1, %v10521_v63  ;;  %v4850_v42 = vcombine.high %v4842_v20, %v4842_v20 }
 0x52b   :  { %v7257_v8 = vpop.permute.xlu0 %7256  ;;  %9131 = vmatmul.mubr.msk.f32.gmra.mrb[24].mxu1 %vm14159_vm13, %v7605_v4  ;;  %vm14164_vm13 = vmmov %vm14162_vm0 }
 0x52c   :  { %v4851_v5 = vcombine.high %v4849_v11, %v4849_v11 }
 0x52d   :  { %v7069_v26 = vpop.permute.xlu1 %7068 }
 0x52e   :  { %v7508_v2 = vsel %vm3091_vm5, %v7492_v0, %v7069_v26 }
 0x52f   :  { %v7007_v9 = vpop.permute.xlu0 %7006 }
 0x530   :  { %v7493_v10 = vsel %vm14160_vm1, %v12936_v27, %v7007_v9  ;;  %v7538_v27 = vsel %vm3351_vm9, %v7522_v6, %v7193_v37  ;;  %v4050_v37 = vmax.f32 %v3892_v61, 0.0  ;;  %vm14165_vm1 = vmmov %vm14162_vm0 }
 0x531   :  { %v7321_v18 = vpop.permute.xlu1 %7320  ;;  %v7555_v31 = vsel %vm7548_vm8, %v7538_v27, %v7257_v8 }
 0x532   :  { %v7572_v12 = vsel %vm7565_vm10, %v7555_v31, %v7321_v18  ;;  %v4818_v3 = vcombine.high %v4050_v37, %v4050_v37  ;;  %v4825_v36 = vrot.slane %v4050_v37, %v10521_v63 }
 0x533   :  { %v13165_v41 = vpop.permute.xlu0 %7258 }
 0x534   :  { %v4832_v49 = vrot.slane %v4818_v3, %v10521_v63  ;;  %v4833_v40 = vcombine.high %v4825_v36, %v4825_v36 }
 0x535   :  { %v7133_v57 = vpop.permute.xlu1 %7132 }
 0x536   :  { %v7524_v35 = vsel %vm3221_vm7, %v7508_v2, %v7133_v57  ;;  %v4834_v33 = vcombine.high %v4832_v49, %v4832_v49 }
 0x537   :  { %v7071_v19 = vpop.permute.xlu0 %7070 }
 0x538   :  { %v13171_v50 = vsel %vm3091_vm5, %v7493_v10, %v7071_v19 }
 0x539   :  { %v7385_v39 = vpop.permute.xlu1 %7384 }
 0x53a   :  { %v7589_v51 = vsel %vm7582_vm11, %v7572_v12, %v7385_v39 }
 0x53b   :  { %v9096_v45 = vpop.f32.mrb[12].mxu1 }
 0x53c   :  { %v3971_v62 = vpop.f32.mrb[13].mxu1  ;;  %v3977_v29 = vadd.f32 %v12965_v54, %v9096_v45 }
 0x53d   :  { %v7197_v23 = vpop.permute.xlu1 %7196  ;;  %v3972_v24 = vadd.f32 %v12965_v54, %v3971_v62 }
 0x53e   :  { %v13181_v13 = vsel %vm3351_vm9, %v7524_v35, %v7197_v23  ;;  %v13198_v53 = vmax.f32 %v3977_v29, 0.0 }
 0x53f   :  { %v13201_v7 = vmax.f32 %v3972_v24, 0.0 }
 0x540   :  { %v5107_v47 = vcombine.high %v13198_v53, %v13198_v53  ;;  %v13209_v0 = vrot.slane %v13198_v53, %v10521_v63 }
 0x541   :  { %v7449_v44 = vpop.permute.xlu1 %7448 }
 0x542   :  { %v7606_v22 = vsel %vm7599_vm2, %v7589_v51, %v7449_v44 }
 0x543   :  { %9133 = vmatprep.mubr.msk.f32.mxu1 %vm14156_vm4, %v7606_v22  ;;  %vm14167_vm4 = vmmov %vm14162_vm0 }
 0x550   :  { %v9075_v56 = vpop.f32.mrb[42].mxu0 }
 0x551   :  { %v3907_v25 = vadd.f32 %v12965_v54, %v9075_v56  ;;  %v3901_v46 = vpop.f32.mrb[43].mxu0 }
 0x552   :  { %v3902_v52 = vadd.f32 %v12965_v54, %v3901_v46 }
 0x553   :  { %v4053_v28 = vmax.f32 %v3907_v25, 0.0 }
 0x554   :  { %v4052_v15 = vmax.f32 %v3902_v52, 0.0 }
 0x555   :  { %v4869_v30 = vcombine.high %v4053_v28, %v4053_v28  ;;  %v4876_v32 = vrot.slane %v4053_v28, %v10521_v63 }
 0x556   :  { %v4852_v60 = vcombine.high %v4052_v15, %v4052_v15  ;;  %v4859_v58 = vrot.slane %v4052_v15, %v10521_v63 }
 0x557   :  { %v4883_v48 = vrot.slane %v4869_v30, %v10521_v63  ;;  %v4884_v16 = vcombine.high %v4876_v32, %v4876_v32  ;;  %v5566_v4 = vmax.f32 %v4842_v20, %v4876_v32 }
 0x558   :  { %v4866_v8 = vrot.slane %v4852_v60, %v10521_v63  ;;  %v4867_v26 = vcombine.high %v4859_v58, %v4859_v58  ;;  %v5562_v2 = vmax.f32 %v4825_v36, %v4859_v58  ;;  %v5090_v36 = vcombine.high %v13201_v7, %v13201_v7 }
 0x559   :  { %v4885_v9 = vcombine.high %v4883_v48, %v4883_v48  ;;  %v5567_v18 = vmax.f32 %v4850_v42, %v4884_v16  ;;  %v5568_v57 = vmax.f32 %v4849_v11, %v4883_v48  ;;  %v6199_v35 = vsel %vm14162_vm0, %v5566_v4, -inf }
 0x55a   :  { %v6200_v10 = vrot.slane %v6199_v35, 4  ;;  %v4868_v19 = vcombine.high %v4866_v8, %v4866_v8  ;;  %v5563_v39 = vmax.f32 %v4833_v40, %v4867_v26  ;;  %v5564_v59 = vmax.f32 %v4832_v49, %v4866_v8 }
 0x55b   :  { %v5569_v38 = vmax.f32 %v4851_v5, %v4885_v9  ;;  %v6206_v45 = vsel %vm14163_vm6, %v5567_v18, -inf  ;;  %v6213_v21 = vsel %vm14164_vm13, %v5568_v57, -inf  ;;  %v6171_v62 = vsel %vm14165_vm1, %v5562_v2, -inf  ;;  %vm14168_vm6 = vmmov %vm14162_vm0 }
 0x55c   :  { %v6201_v6 = vmax.f32 %v6199_v35, %v6200_v10  ;;  %v6207_v23 = vrot.slane %v6206_v45, 4  ;;  %v6214_v27 = vrot.slane %v6213_v21, 4  ;;  %v5565_v31 = vmax.f32 %v4834_v33, %v4868_v19 }
 0x55d   :  { %v6220_v12 = vsel %vm14166_vm3, %v5569_v38, -inf  ;;  %v6172_v51 = vrot.slane %v6171_v62, 4  ;;  %v6178_v44 = vsel %vm14167_vm4, %v5563_v39, -inf  ;;  %v6185_v22 = vsel %vm14162_vm0, %v5564_v59, -inf  ;;  %vm14171_vm3 = vmmov %vm14162_vm0 }
 0x55e   :  { %v6202_v14 = vrot.slane %v6201_v6, 2  ;;  %v6208_v61 = vmax.f32 %v6206_v45, %v6207_v23  ;;  %v6215_v17 = vmax.f32 %v6213_v21, %v6214_v27  ;;  %v6221_v37 = vrot.slane %v6220_v12, 4 }
 0x55f   :  { %v9099_v1 = vpop.f32.mrb[14].mxu1  ;;  %v6173_v3 = vmax.f32 %v6171_v62, %v6172_v51  ;;  %v6179_v29 = vrot.slane %v6178_v44, 4  ;;  %v6186_v20 = vrot.slane %v6185_v22, 4  ;;  %v6192_v56 = vsel %vm14168_vm6, %v5565_v31, -inf }
 0x560   :  { %v3981_v11 = vpop.f32.mrb[15].mxu1  ;;  %v6209_v25 = vrot.slane %v6208_v61, 2  ;;  %v6216_v46 = vrot.slane %v6215_v17, 2  ;;  %v6222_v49 = vmax.f32 %v6220_v12, %v6221_v37  ;;  %v6193_v28 = vrot.slane %v6192_v56, 4 }
 0x561   :  { %v6174_v24 = vrot.slane %v6173_v3, 2  ;;  %v6180_v52 = vmax.f32 %v6178_v44, %v6179_v29  ;;  %v6187_v53 = vmax.f32 %v6185_v22, %v6186_v20  ;;  %v6203_v42 = vmax.f32 %v6201_v6, %v6202_v14 }
 0x562   :  { %v6210_v15 = vmax.f32 %v6208_v61, %v6209_v25  ;;  %v6217_v5 = vmax.f32 %v6215_v17, %v6216_v46  ;;  %v6223_v40 = vrot.slane %v6222_v49, 2  ;;  %v6194_v60 = vmax.f32 %v6192_v56, %v6193_v28 }
 0x563   :  { %v6175_v30 = vmax.f32 %v6173_v3, %v6174_v24  ;;  %v6181_v32 = vrot.slane %v6180_v52, 2  ;;  %v6188_v33 = vrot.slane %v6187_v53, 2  ;;  %v5121_v58 = vrot.slane %v5107_v47, %v10521_v63 }
 0x564   :  { %v5122_v48 = vcombine.high %v13209_v0, %v13209_v0  ;;  %v13227_v16 = vrot.slane %v13201_v7, %v10521_v63  ;;  %v6224_v4 = vmax.f32 %v6222_v49, %v6223_v40  ;;  %v6195_v9 = vrot.slane %v6194_v60, 2 }
 0x565   :  { %v6176_v8 = vrot.slane %v6175_v30, 1  ;;  %v6182_v26 = vmax.f32 %v6180_v52, %v6181_v32  ;;  %v6189_v2 = vmax.f32 %v6187_v53, %v6188_v33  ;;  %v13230_v18 = vrot.slane %v5090_v36, %v10521_v63 }
 0x566   :  { %v6204_v57 = vrot.slane %v6203_v42, 1  ;;  %v6211_v35 = vrot.slane %v6210_v15, 1  ;;  %v3987_v10 = vadd.f32 %v12965_v54, %v9099_v1  ;;  %v6218_v47 = vrot.slane %v6217_v5, 1 }
 0x567   :  { %v6183_v19 = vrot.slane %v6182_v26, 1  ;;  %v6190_v39 = vrot.slane %v6189_v2, 1  ;;  %v6196_v59 = vmax.f32 %v6194_v60, %v6195_v9  ;;  %v5123_v38 = vcombine.high %v5121_v58, %v5121_v58 }
 0x568   :  { %v6225_v45 = vrot.slane %v6224_v4, 1  ;;  %v4069_v7 = vmax.f32 %v3987_v10, 0.0  ;;  %v3982_v21 = vadd.f32 %v12965_v54, %v3981_v11  ;;  %v6177_v62 = vmax.f32 %v6175_v30, %v6176_v8 }
 0x569   :  { %v6184_v6 = vmax.f32 %v6182_v26, %v6183_v19  ;;  %v6191_v23 = vmax.f32 %v6189_v2, %v6190_v39  ;;  %v6197_v27 = vrot.slane %v6196_v59, 1  ;;  %v6205_v31 = vmax.f32 %v6203_v42, %v6204_v57 }
 0x56a   :  { %v5141_v12 = vcombine.high %v4069_v7, %v4069_v7  ;;  %v5148_v51 = vrot.slane %v4069_v7, %v10521_v63  ;;  %v4068_v44 = vmax.f32 %v3982_v21, 0.0  ;;  %v6212_v22 = vmax.f32 %v6210_v15, %v6211_v35 }
 0x56b   :  { %v6219_v14 = vmax.f32 %v6217_v5, %v6218_v47  ;;  %v6198_v61 = vmax.f32 %v6196_v59, %v6197_v27  ;;  %v6752_v17 = vsel %vm6675_vm12, %v6184_v6, %v6177_v62  ;;  %vm14169_vm13 = vcmask 1042434  }
 0x56c   :  { %v6753_v37 = vsel %vm14169_vm13, %v6191_v23, %v6752_v17  ;;  %v5155_v1 = vrot.slane %v5141_v12, %v10521_v63  ;;  %v5156_v3 = vcombine.high %v5148_v51, %v5148_v51  ;;  %v5598_v54 = vmax.f32 %v13209_v0, %v5148_v51  ;;  %vm14174_vm13 = vmmov %vm14162_vm0  ;;  %v7323_v51 = vpop.permute.xlu0 %7322 }
 0x56d   :  { %v6226_v29 = vmax.f32 %v6224_v4, %v6225_v45  ;;  %v6754_v20 = vsel %vm6679_vm14, %v6198_v61, %v6753_v37  ;;  %v5124_v56 = vcombine.high %v4068_v44, %v4068_v44  ;;  %v5131_v11 = vrot.slane %v4068_v44, %v10521_v63 }
 0x56e   :  { %v6755_v36 = vsel %vm6681_vm15, %v6205_v31, %v6754_v20  ;;  %v5157_v25 = vcombine.high %v5155_v1, %v5155_v1  ;;  %v5599_v46 = vmax.f32 %v5122_v48, %v5156_v3  ;;  %v5600_v49 = vmax.f32 %v5121_v58, %v5155_v1 }
 0x56f   :  { %vm14170_vm1 = vcmask 1045509   ;;  %v6423_v52 = vsel %vm14171_vm3, %v5598_v54, -inf  ;;  %v5138_v53 = vrot.slane %v5124_v56, %v10521_v63  ;;  %v5139_v28 = vcombine.high %v5131_v11, %v5131_v11  ;;  %vm14176_vm3 = vmmov %vm14162_vm0 }
 0x570   :  { %v6756_v24 = vsel %vm14170_vm1, %v6212_v22, %v6755_v36  ;;  %v5105_v0 = vcombine.high %v13227_v16, %v13227_v16  ;;  %vm14172_vm4 = vcmask 1046534   ;;  %v5601_v15 = vmax.f32 %v5123_v38, %v5157_v25 }
 0x571   :  { %v6757_v42 = vsel %vm14172_vm4, %v6219_v14, %v6756_v24  ;;  %v6430_v5 = vsel %vm14162_vm0, %v5599_v46, -inf  ;;  %vm14173_vm6 = vcmask 1047559   ;;  %v6424_v30 = vrot.slane %v6423_v52, 4  ;;  %vm14177_vm4 = vmmov %vm14162_vm0 }
 0x572   :  { %v6758_v40 = vsel %vm14173_vm6, %v6226_v29, %v6757_v42  ;;  %v6437_v32 = vsel %vm14174_vm13, %v5600_v49, -inf  ;;  %v5140_v33 = vcombine.high %v5138_v53, %v5138_v53  ;;  %v5106_v60 = vcombine.high %v13230_v18, %v13230_v18  ;;  %vm14178_vm6 = vmmov %vm14162_vm0 }
 0x573   :  { %vm14175_vm1 = vcmask 64512   ;;  %v6431_v58 = vrot.slane %v6430_v5, 4  ;;  %v6444_v48 = vsel %vm14176_vm3, %v5601_v15, -inf  ;;  %v5594_v4 = vmax.f32 %v13227_v16, %v5131_v11  ;;  %vm14179_vm13 = vmmov %vm14162_vm0 }
 0x574   :  { %6821 = vst.msk [vmem:[#allocation3 + $0xd1] sm:$0xff] %vm14175_vm1, %v6758_v40  ;;  %v6438_v8 = vrot.slane %v6437_v32, 4  ;;  %v6445_v26 = vrot.slane %v6444_v48, 4  ;;  %v5595_v2 = vmax.f32 %v5105_v0, %v5139_v28  ;;  %v5596_v9 = vmax.f32 %v13230_v18, %v5138_v53 }
 0x575   :  { %v5597_v57 = vmax.f32 %v5106_v60, %v5140_v33  ;;  %v6395_v35 = vsel %vm14177_vm4, %v5594_v4, -inf  ;;  %v6425_v10 = vmax.f32 %v6423_v52, %v6424_v30  ;;  %v6432_v39 = vmax.f32 %v6430_v5, %v6431_v58 }
 0x576   :  { %v6396_v47 = vrot.slane %v6395_v35, 4  ;;  %v6402_v19 = vsel %vm14162_vm0, %v5595_v2, -inf  ;;  %v6409_v38 = vsel %vm14178_vm6, %v5596_v9, -inf  ;;  %v6439_v45 = vmax.f32 %v6437_v32, %v6438_v8 }
 0x577   :  { %v6403_v59 = vrot.slane %v6402_v19, 4  ;;  %v6446_v7 = vmax.f32 %v6444_v48, %v6445_v26  ;;  %v6410_v16 = vrot.slane %v6409_v38, 4  ;;  %v6416_v6 = vsel %vm14179_vm13, %v5597_v57, -inf }
 0x578   :  { %v6397_v21 = vmax.f32 %v6395_v35, %v6396_v47  ;;  %v6426_v23 = vrot.slane %v6425_v10, 2  ;;  %v6433_v44 = vrot.slane %v6432_v39, 2  ;;  %v6417_v14 = vrot.slane %v6416_v6, 4 }
 0x579   :  { %v6404_v62 = vmax.f32 %v6402_v19, %v6403_v59  ;;  %v6411_v27 = vmax.f32 %v6409_v38, %v6410_v16  ;;  %v6440_v61 = vrot.slane %v6439_v45, 2  ;;  %v6447_v17 = vrot.slane %v6446_v7, 2 }
 0x57a   :  { %v6398_v18 = vrot.slane %v6397_v21, 2  ;;  %v6418_v54 = vmax.f32 %v6416_v6, %v6417_v14  ;;  %v6427_v29 = vmax.f32 %v6425_v10, %v6426_v23  ;;  %v6434_v11 = vmax.f32 %v6432_v39, %v6433_v44 }
 0x57b   :  { %v13261_v31 = vld [vmem:[#allocation3 + $0xd1] sm:$0xff]  ;;  %v6405_v22 = vrot.slane %v6404_v62, 2  ;;  %v6412_v1 = vrot.slane %v6411_v27, 2  ;;  %v6441_v24 = vmax.f32 %v6439_v45, %v6440_v61  ;;  %v6448_v52 = vmax.f32 %v6446_v7, %v6447_v17 }
 0x57c   :  { %v13263_v12 = vld [vmem:[#allocation3 + $0xd0] sm:$0xff]  ;;  %7010 = vrot.lane.b32.xlu0 %v13261_v31, %s9328_s29  ;;  %v6399_v37 = vmax.f32 %v6397_v21, %v6398_v18  ;;  %v6419_v25 = vrot.slane %v6418_v54, 2  ;;  %v6428_v32 = vrot.slane %v6427_v29, 1  ;;  %v6435_v48 = vrot.slane %v6434_v11, 1  ;;  %v13304_v18 = vld [vmem:[#allocation3 + $0xe0] sm:$0xff] }
 0x57d   :  { %7136 = vrot.lane.b32.xlu1 %v13263_v12, %s9333_s19  ;;  %v6406_v3 = vmax.f32 %v6404_v62, %v6405_v22  ;;  %v6413_v56 = vmax.f32 %v6411_v27, %v6412_v1  ;;  %v7135_v46 = vpop.permute.xlu0 %7134  ;;  %v13281_v60 = vld [vmem:[#allocation3 + $0xd2] sm:$0xff]  ;;  %v6442_v2 = vrot.slane %v6441_v24, 1  ;;  %vm14180_vm1 = vcmask 1042434   ;;  %v13306_v27 = vld [vmem:[#allocation3 + $0xe1] sm:$0xff] }
 0x57e   :  { %v6400_v20 = vrot.slane %v6399_v37, 1  ;;  %v7199_v49 = vpop.permute.xlu1 %7198  ;;  %v7525_v28 = vsel %vm3221_vm7, %v13171_v50, %v7135_v46  ;;  %v6420_v5 = vmax.f32 %v6418_v54, %v6419_v25  ;;  %v6449_v35 = vrot.slane %v6448_v52, 1  ;;  %v13323_v25 = vld [vmem:[#allocation3 + $0xe2] sm:$0xff] }
 0x57f   :  { %v6407_v36 = vrot.slane %v6406_v3, 1  ;;  %v6414_v53 = vrot.slane %v6413_v56, 1  ;;  %v9102_v0 = vpop.f32.mrb[16].mxu1  ;;  %v13276_v40 = vsel %vm3351_vm9, %v7525_v28, %v7199_v49  ;;  %v6429_v39 = vmax.f32 %v6427_v29, %v6428_v32 }
 0x580   :  { %7262 = vrot.lane.b32.xlu0 %v13109_v34, %s9337_s30  ;;  %v6401_v42 = vmax.f32 %v6399_v37, %v6400_v20  ;;  %v3991_v30 = vpop.f32.mrb[17].mxu1  ;;  %v6421_v50 = vrot.slane %v6420_v5, 1  ;;  %vm14181_vm3 = vcmask 588800   ;;  %v6436_v59 = vmax.f32 %v6434_v11, %v6435_v48 }
 0x581   :  { %7388 = vrot.lane.b32.xlu1 %v13090_v55, %s9339_s23  ;;  %v6408_v15 = vmax.f32 %v6406_v3, %v6407_v36  ;;  %v7556_v55 = vsel %vm7548_vm8, %v13155_v43, %v13165_v41  ;;  %v6415_v33 = vmax.f32 %v6413_v56, %v6414_v53  ;;  %v7387_v8 = vpop.permute.xlu0 %7386  ;;  %v9301_v41 = vld [vmem:[%s13913_s2] ss:$0 sm:$0xff]  ;;  %v6443_v45 = vmax.f32 %v6441_v24, %v6442_v2 }
 0x582   :  { %v7573_v58 = vsel %vm7565_vm10, %v7556_v55, %v7323_v51  ;;  %v7451_v26 = vpop.permute.xlu1 %7450  ;;  %v3997_v9 = vadd.f32 %v9301_v41, %v9102_v0  ;;  %v6422_v10 = vmax.f32 %v6420_v5, %v6421_v50  ;;  %v3992_v47 = vadd.f32 %v9301_v41, %v3991_v30 }
 0x583   :  { %v6780_v4 = vsel %vm6675_vm12, %v6408_v15, %v6401_v42  ;;  %v7590_v57 = vsel %vm7582_vm11, %v7573_v58, %v7387_v8  ;;  %v6450_v16 = vmax.f32 %v6448_v52, %v6449_v35  ;;  %vm14182_vm4 = vcmask 1045509  }
 0x584   :  { %7074 = vrot.lane.b32.xlu0 %v13281_v60, %s9331_s11  ;;  %v6781_v43 = vsel %vm14180_vm1, %v6415_v33, %v6780_v4  ;;  %v7607_v19 = vsel %vm7599_vm2, %v7590_v57, %v7451_v26  ;;  %v4071_v21 = vmax.f32 %v3997_v9, 0.0  ;;  %v4070_v6 = vmax.f32 %v3992_v47, 0.0 }
 0x585   :  { %7200 = vrot.lane.b32.xlu1 %v13261_v31, %s9335_s12  ;;  %9134 = vmatmul.mubr.msk.f32.gmra.mrb[26].mxu1 %vm14181_vm3, %v7607_v19  ;;  %v6782_v38 = vsel %vm6679_vm14, %v6422_v10, %v6781_v43  ;;  %vm14183_vm0 = vcmask 1046534   ;;  %vm14184_vm6 = vcmask 1047559   ;;  %vm14185_vm13 = vcmask 64512  }
 0x586   :  { %v6783_v7 = vsel %vm6681_vm15, %v6429_v39, %v6782_v38  ;;  %v5158_v44 = vcombine.high %v4070_v6, %v4070_v6  ;;  %v5182_v14 = vrot.slane %v4071_v21, %v10521_v63  ;;  %v5165_v37 = vrot.slane %v4070_v6, %v10521_v63  ;;  %v13343_v39 = vld [vmem:[#allocation3 + $0xf1] sm:$0xff] }
 0x587   :  { %v6784_v62 = vsel %vm14182_vm4, %v6436_v59, %v6783_v7  ;;  %vm14186_vm1 = vcmask 58368   ;;  %v13345_v59 = vld [vmem:[#allocation3 + $0xf0] sm:$0xff] }
 0x588   :  { %7326 = vrot.lane.b32.xlu0 %v13263_v12, %s9338_s17  ;;  %v6785_v23 = vsel %vm14183_vm0, %v6443_v45, %v6784_v62  ;;  %v5172_v29 = vrot.slane %v5158_v44, %v10521_v63  ;;  %v5190_v56 = vcombine.high %v5182_v14, %v5182_v14  ;;  %v5173_v46 = vcombine.high %v5165_v37, %v5165_v37  ;;  %vm14187_vm3 = vmmov %vm14186_vm1 }
 0x589   :  { %7452 = vrot.lane.b32.xlu1 %v13109_v34, %s9340_s24  ;;  %v6786_v51 = vsel %vm14184_vm6, %v6450_v16, %v6785_v23  ;;  %v5175_v34 = vcombine.high %v4071_v21, %v4071_v21  ;;  %vm14188_vm4 = vmmov %vm14186_vm1 }
 0x58a   :  { %6825 = vst.msk [vmem:[#allocation3 + $0x111] sm:$0xff] %vm14185_vm13, %v6786_v51  ;;  %v5174_v0 = vcombine.high %v5172_v29, %v5172_v29  ;;  %vm14189_vm0 = vmmov %vm14186_vm1 }
 0x58b   :  { %v5189_v3 = vrot.slane %v5175_v34, %v10521_v63  ;;  %vm14190_vm6 = vmmov %vm14189_vm0 }
 0x58c   :  { %7138 = vrot.lane.b32.xlu0 %v13304_v18, %s9333_s19  ;;  %v9105_v22 = vpop.f32.mrb[18].mxu1  ;;  %vm14191_vm13 = vmmov %vm14189_vm0 }
 0x58d   :  { %7202 = vrot.lane.b32.xlu1 %v13306_v27, %s9335_s12  ;;  %v4007_v61 = vadd.f32 %v9301_v41, %v9105_v22  ;;  %v4001_v17 = vpop.f32.mrb[19].mxu1  ;;  %v5191_v24 = vcombine.high %v5189_v3, %v5189_v3 }
 0x58e   :  { %v4002_v1 = vadd.f32 %v9301_v41, %v4001_v17 }
 0x58f   :  { %v4073_v54 = vmax.f32 %v4007_v61, 0.0 }
 0x590   :  { %7390 = vrot.lane.b32.xlu0 %v13261_v31, %s9339_s23  ;;  %v4072_v20 = vmax.f32 %v4002_v1, 0.0 }
 0x591   :  { %7454 = vrot.lane.b32.xlu1 %v13281_v60, %s9340_s24  ;;  %v5209_v11 = vcombine.high %v4073_v54, %v4073_v54  ;;  %v5216_v36 = vrot.slane %v4073_v54, %v10521_v63 }
 0x592   :  { %v5192_v49 = vcombine.high %v4072_v20, %v4072_v20  ;;  %v5199_v31 = vrot.slane %v4072_v20, %v10521_v63 }
 0x593   :  { %v5223_v52 = vrot.slane %v5209_v11, %v10521_v63  ;;  %v5224_v53 = vcombine.high %v5216_v36, %v5216_v36  ;;  %v5606_v28 = vmax.f32 %v5182_v14, %v5216_v36 }
 0x594   :  { %7012 = vrot.lane.b32.xlu0 %v13306_v27, %s9328_s29  ;;  %v5206_v42 = vrot.slane %v5192_v49, %v10521_v63  ;;  %v5207_v15 = vcombine.high %v5199_v31, %v5199_v31  ;;  %v5602_v5 = vmax.f32 %v5165_v37, %v5199_v31  ;;  %v6872_v31 = vld [vmem:[#allocation3 + $0xf2] sm:$0xff] }
 0x595   :  { %7076 = vrot.lane.b32.xlu1 %v13323_v25, %s9331_s11  ;;  %v5225_v30 = vcombine.high %v5223_v52, %v5223_v52  ;;  %v5607_v55 = vmax.f32 %v5190_v56, %v5224_v53  ;;  %v5608_v32 = vmax.f32 %v5189_v3, %v5223_v52  ;;  %v6479_v33 = vsel %vm14186_vm1, %v5606_v28, -inf  ;;  %vm14192_vm1 = vmmov %vm14189_vm0 }
 0x596   :  { %v6480_v58 = vrot.slane %v6479_v33, 4  ;;  %v5208_v48 = vcombine.high %v5206_v42, %v5206_v42  ;;  %v5603_v50 = vmax.f32 %v5173_v46, %v5207_v15  ;;  %v5604_v4 = vmax.f32 %v5172_v29, %v5206_v42 }
 0x597   :  { %v5609_v8 = vmax.f32 %v5191_v24, %v5225_v30  ;;  %v6486_v26 = vsel %vm14187_vm3, %v5607_v55, -inf  ;;  %v6493_v2 = vsel %vm14188_vm4, %v5608_v32, -inf  ;;  %v6451_v43 = vsel %vm14189_vm0, %v5602_v5, -inf  ;;  %vm14193_vm3 = vmmov %vm14189_vm0 }
 0x598   :  { %7264 = vrot.lane.b32.xlu0 %v13281_v60, %s9337_s30  ;;  %v6481_v41 = vmax.f32 %v6479_v33, %v6480_v58  ;;  %v6487_v9 = vrot.slane %v6486_v26, 4  ;;  %v6494_v57 = vrot.slane %v6493_v2, 4  ;;  %v5605_v35 = vmax.f32 %v5174_v0, %v5208_v48 }
 0x599   :  { %7328 = vrot.lane.b32.xlu1 %v13304_v18, %s9338_s17  ;;  %v6500_v10 = vsel %vm14190_vm6, %v5609_v8, -inf  ;;  %v6452_v47 = vrot.slane %v6451_v43, 4  ;;  %v6458_v19 = vsel %vm14191_vm13, %v5603_v50, -inf  ;;  %v6465_v60 = vsel %vm14192_vm1, %v5604_v4, -inf }
 0x59a   :  { %v6488_v38 = vmax.f32 %v6486_v26, %v6487_v9  ;;  %v6495_v45 = vmax.f32 %v6493_v2, %v6494_v57  ;;  %v6501_v7 = vrot.slane %v6500_v10, 4  ;;  %v6459_v16 = vrot.slane %v6458_v19, 4  ;;  %v13366_v2 = vld [vmem:[#allocation3 + $0x100] sm:$0xff] }
 0x59b   :  { %v6453_v21 = vmax.f32 %v6451_v43, %v6452_v47  ;;  %v6466_v62 = vrot.slane %v6465_v60, 4  ;;  %v6472_v6 = vsel %vm14193_vm3, %v5605_v35, -inf  ;;  %v6482_v23 = vrot.slane %v6481_v41, 2  ;;  %v6904_v43 = vld [vmem:[#allocation3 + $0x101] sm:$0xff] }
 0x59c   :  { %7014 = vrot.lane.b32.xlu0 %v13343_v39, %s9328_s29  ;;  %v6489_v51 = vrot.slane %v6488_v38, 2  ;;  %v6502_v34 = vmax.f32 %v6500_v10, %v6501_v7  ;;  %v6460_v22 = vmax.f32 %v6458_v19, %v6459_v16  ;;  %v6473_v61 = vrot.slane %v6472_v6, 4  ;;  %v6873_v47 = vld [vmem:[#allocation3 + $0x102] sm:$0xff]  ;;  %v6858_v19 = vld [vmem:[#allocation3 + $0x111] sm:$0xff] }
 0x59d   :  { %7140 = vrot.lane.b32.xlu1 %v13345_v59, %s9333_s19  ;;  %v6454_v44 = vrot.slane %v6453_v21, 2  ;;  %v6467_v14 = vmax.f32 %v6465_v60, %v6466_v62  ;;  %v6496_v17 = vrot.slane %v6495_v45, 2  ;;  %v6483_v20 = vmax.f32 %v6481_v41, %v6482_v23  ;;  %v13384_v60 = vld [vmem:[#allocation3 + $0x110] sm:$0xff] }
 0x59e   :  { %v6503_v37 = vrot.slane %v6502_v34, 2  ;;  %v6461_v3 = vrot.slane %v6460_v22, 2  ;;  %v6474_v29 = vmax.f32 %v6472_v6, %v6473_v61  ;;  %v6490_v56 = vmax.f32 %v6488_v38, %v6489_v51  ;;  %v6874_v16 = vld [vmem:[#allocation3 + $0x112] sm:$0xff] }
 0x59f   :  { %v6455_v1 = vmax.f32 %v6453_v21, %v6454_v44  ;;  %v6468_v54 = vrot.slane %v6467_v14, 2  ;;  %v6497_v24 = vmax.f32 %v6495_v45, %v6496_v17  ;;  %v6484_v0 = vrot.slane %v6483_v20, 1 }
 0x5a0   :  { %7266 = vrot.lane.b32.xlu0 %v13323_v25, %s9337_s30  ;;  %v6462_v36 = vmax.f32 %v6460_v22, %v6461_v3  ;;  %v6475_v49 = vrot.slane %v6474_v29, 2  ;;  %v6504_v52 = vmax.f32 %v6502_v34, %v6503_v37  ;;  %v6491_v42 = vrot.slane %v6490_v56, 1 }
 0x5a1   :  { %7392 = vrot.lane.b32.xlu1 %v13306_v27, %s9339_s23  ;;  %v6456_v11 = vrot.slane %v6455_v1, 1  ;;  %v6469_v46 = vmax.f32 %v6467_v14, %v6468_v54  ;;  %v6498_v32 = vrot.slane %v6497_v24, 1  ;;  %v6485_v50 = vmax.f32 %v6483_v20, %v6484_v0  ;;  %v13444_v0 = vpop.permute.xlu0 %7008 }
 0x5a2   :  { %v6463_v53 = vrot.slane %v6462_v36, 1  ;;  %v6476_v28 = vmax.f32 %v6474_v29, %v6475_v49  ;;  %v6505_v33 = vrot.slane %v6504_v52, 1  ;;  %vm14194_vm4 = vcmask 1042434   ;;  %v6955_v49 = vld [vmem:[#allocation3 + $0x131] sm:$0xff] }
 0x5a3   :  { %v6470_v27 = vrot.slane %v6469_v46, 1  ;;  %v6457_v15 = vmax.f32 %v6455_v1, %v6456_v11  ;;  %v6492_v8 = vmax.f32 %v6490_v56, %v6491_v42  ;;  %v6499_v41 = vmax.f32 %v6497_v24, %v6498_v32  ;;  %v13446_v42 = vpop.permute.xlu1 %7072 }
 0x5a4   :  { %7078 = vrot.lane.b32.xlu0 %v6872_v31, %s9331_s11  ;;  %v6464_v5 = vmax.f32 %v6462_v36, %v6463_v53  ;;  %v6477_v55 = vrot.slane %v6476_v28, 1  ;;  %vm14195_vm0 = vcmask 1045509   ;;  %vm14196_vm6 = vcmask 1046534   ;;  %v6939_v36 = vld [vmem:[#allocation3 + $0x130] sm:$0xff] }
 0x5a5   :  { %7204 = vrot.lane.b32.xlu1 %v13343_v39, %s9335_s12  ;;  %v6471_v30 = vmax.f32 %v6469_v46, %v6470_v27  ;;  %vm14197_vm13 = vcmask 1047559   ;;  %vm14198_vm1 = vcmask 64512  }
 0x5a6   :  { %v6478_v58 = vmax.f32 %v6476_v28, %v6477_v55  ;;  %v6787_v48 = vsel %vm6675_vm12, %v6464_v5, %v6457_v15  ;;  %vm14201_vm3 = vmmov %vm14198_vm1 }
 0x5a7   :  { %v6788_v4 = vsel %vm14194_vm4, %v6471_v30, %v6787_v48  ;;  %vm14202_vm4 = vmmov %vm14198_vm1 }
 0x5a8   :  { %7330 = vrot.lane.b32.xlu0 %v13345_v59, %s9338_s17  ;;  %v6789_v26 = vsel %vm6679_vm14, %v6478_v58, %v6788_v4  ;;  %vm14199_vm14 = vcmask 588800  }
 0x5a9   :  { %7456 = vrot.lane.b32.xlu1 %v13323_v25, %s9340_s24  ;;  %v6790_v9 = vsel %vm6681_vm15, %v6485_v50, %v6789_v26  ;;  %v6506_v25 = vmax.f32 %v6504_v52, %v6505_v33  ;;  %v7261_v26 = vpop.permute.xlu0 %7260  ;;  %vm14200_vm15 = vmmov %vm14199_vm14 }
 0x5aa   :  { %v6791_v57 = vsel %vm14195_vm0, %v6492_v8, %v6790_v9  ;;  %vm14203_vm0 = vmmov %vm14199_vm14 }
 0x5ab   :  { %v6792_v35 = vsel %vm14196_vm6, %v6499_v41, %v6791_v57  ;;  %vm14204_vm6 = vmmov %vm14203_vm0 }
 0x5ac   :  { %7142 = vrot.lane.b32.xlu0 %v13366_v2, %s9333_s19  ;;  %v6793_v10 = vsel %vm14197_vm13, %v6506_v25, %v6792_v35  ;;  %vm14205_vm13 = vmmov %vm14198_vm1 }
 0x5ad   :  { %7206 = vrot.lane.b32.xlu1 %v6904_v43, %s9335_s12  ;;  %6826 = vst.msk [vmem:[#allocation3 + $0x121] sm:$0xff] %vm14198_vm1, %v6793_v10  ;;  %vm14206_vm1 = vmmov %vm14203_vm0 }
 0x5b0   :  { %7394 = vrot.lane.b32.xlu0 %v13343_v39, %s9339_s23  ;;  %v13392_v39 = vld [vmem:[%s13915_s4] ss:$0 sm:$0xff] }
 0x5b1   :  { %7458 = vrot.lane.b32.xlu1 %v6872_v31, %s9340_s24 }
 0x5b4   :  { %7016 = vrot.lane.b32.xlu0 %v6904_v43, %s9328_s29  ;;  %v6890_v20 = vld [vmem:[#allocation3 + $0x120] sm:$0xff] }
 0x5b5   :  { %7080 = vrot.lane.b32.xlu1 %v6873_v47, %s9331_s11  ;;  %v6922_v11 = vld [vmem:[#allocation3 + $0x122] sm:$0xff] }
 0x5b6   :  { %v6906_v46 = vld [vmem:[#allocation3 + $0x121] sm:$0xff] }
 0x5b8   :  { %7268 = vrot.lane.b32.xlu0 %v6872_v31, %s9337_s30  ;;  %v6971_v31 = vld [vmem:[#allocation3 + $0x132] sm:$0xff] }
 0x5b9   :  { %7332 = vrot.lane.b32.xlu1 %v13366_v2, %s9338_s17 }
 0x5bc   :  { %7018 = vrot.lane.b32.xlu0 %v6858_v19, %s9328_s29 }
 0x5bd   :  { %7144 = vrot.lane.b32.xlu1 %v13384_v60, %s9333_s19 }
 0x5be   :  { %v9126_v38 = vpop.f32.mrb[20].mxu1 }
 0x5bf   :  { %v7753_v45 = vadd.f32 %v9126_v38, %v13392_v39  ;;  %v7747_v7 = vpop.f32.mrb[21].mxu1  ;;  %v7557_v38 = vsel %vm7548_vm8, %v13181_v13, %v7261_v26 }
 0x5c0   :  { %7270 = vrot.lane.b32.xlu0 %v6873_v47, %s9337_s30  ;;  %v7748_v21 = vadd.f32 %v13392_v39, %v7747_v7 }
 0x5c1   :  { %7396 = vrot.lane.b32.xlu1 %v6904_v43, %s9339_s23  ;;  %v7827_v62 = vmax.f32 %v7753_v45, 0.0  ;;  %v7325_v43 = vpop.permute.xlu1 %7324 }
 0x5c2   :  { %v7826_v6 = vmax.f32 %v7748_v21, 0.0  ;;  %v7574_v21 = vsel %vm7565_vm10, %v7557_v38, %v7325_v43 }
 0x5c3   :  { %v7875_v23 = vcombine.high %v7827_v62, %v7827_v62  ;;  %v13401_v51 = vrot.slane %v7827_v62, %v10521_v63 }
 0x5c4   :  { %7082 = vrot.lane.b32.xlu0 %v6874_v16, %s9331_s11  ;;  %v7858_v34 = vcombine.high %v7826_v6, %v7826_v6  ;;  %v13404_v44 = vrot.slane %v7826_v6, %v10521_v63 }
 0x5c5   :  { %7208 = vrot.lane.b32.xlu1 %v6858_v19, %s9335_s12  ;;  %v13407_v22 = vrot.slane %v7875_v23, %v10521_v63  ;;  %v7890_v14 = vcombine.high %v13401_v51, %v13401_v51 }
 0x5c6   :  { %v13412_v61 = vrot.slane %v7858_v34, %v10521_v63  ;;  %v7873_v17 = vcombine.high %v13404_v44, %v13404_v44  ;;  %v8194_v37 = vmax.f32 %v13404_v44, %v13401_v51 }
 0x5c7   :  { %v7891_v1 = vcombine.high %v13407_v22, %v13407_v22 }
 0x5c8   :  { %7334 = vrot.lane.b32.xlu0 %v13384_v60, %s9338_s17  ;;  %v7874_v3 = vcombine.high %v13412_v61, %v13412_v61  ;;  %v13425_v54 = vmax.f32 %v7873_v17, %v7890_v14  ;;  %v8196_v29 = vmax.f32 %v13412_v61, %v13407_v22 }
 0x5c9   :  { %7460 = vrot.lane.b32.xlu1 %v6873_v47, %s9340_s24 }
 0x5ca   :  { %v13429_v56 = vmax.f32 %v7874_v3, %v7891_v1 }
 0x5cc   :  { %7146 = vrot.lane.b32.xlu0 %v6890_v20, %s9333_s19 }
 0x5cd   :  { %7272 = vrot.lane.b32.xlu1 %v6874_v16, %s9337_s30 }
 0x5d0   :  { %7398 = vrot.lane.b32.xlu0 %v6858_v19, %s9339_s23 }
 0x5d1   :  { %7274 = vrot.lane.b32.xlu1 %v6922_v11, %s9337_s30 }
 0x5d4   :  { %7210 = vrot.lane.b32.xlu0 %v6906_v46, %s9335_s12 }
 0x5d5   :  { %7338 = vrot.lane.b32.xlu1 %v6939_v36, %s9338_s17 }
 0x5d8   :  { %7462 = vrot.lane.b32.xlu0 %v6874_v16, %s9340_s24 }
 0x5d9   :  { %7402 = vrot.lane.b32.xlu1 %v6955_v49, %s9339_s23 }
 0x5dc   :  { %7336 = vrot.lane.b32.xlu0 %v6890_v20, %s9338_s17 }
 0x5dd   :  { %7466 = vrot.lane.b32.xlu1 %v6971_v31, %s9340_s24 }
 0x5de   :  { %v9129_v24 = vpop.f32.mrb[22].mxu1 }
 0x5df   :  { %v7763_v52 = vadd.f32 %v9129_v24, %v13392_v39  ;;  %v7757_v53 = vpop.f32.mrb[23].mxu1 }
 0x5e0   :  { %7400 = vrot.lane.b32.xlu0 %v6906_v46, %s9339_s23  ;;  %v7758_v27 = vadd.f32 %v13392_v39, %v7757_v53 }
 0x5e1   :  { %v7829_v28 = vmax.f32 %v7763_v52, 0.0 }
 0x5e2   :  { %v7828_v15 = vmax.f32 %v7758_v27, 0.0 }
 0x5e3   :  { %v7909_v5 = vcombine.high %v7829_v28, %v7829_v28  ;;  %v13450_v30 = vrot.slane %v7829_v28, %v10521_v63 }
 0x5e4   :  { %7464 = vrot.lane.b32.xlu0 %v6922_v11, %s9340_s24  ;;  %v7892_v55 = vcombine.high %v7828_v15, %v7828_v15  ;;  %v13453_v32 = vrot.slane %v7828_v15, %v10521_v63 }
 0x5e5   :  { %v13456_v33 = vrot.slane %v7909_v5, %v10521_v63  ;;  %v7924_v58 = vcombine.high %v13450_v30, %v13450_v30 }
 0x5e6   :  { %v13461_v48 = vrot.slane %v7892_v55, %v10521_v63  ;;  %v7907_v50 = vcombine.high %v13453_v32, %v13453_v32  ;;  %v8198_v4 = vmax.f32 %v13453_v32, %v13450_v30 }
 0x5e7   :  { %v7925_v8 = vcombine.high %v13456_v33, %v13456_v33 }
 0x5e8   :  { %v7908_v41 = vcombine.high %v13461_v48, %v13461_v48  ;;  %v13471_v9 = vmax.f32 %v7907_v50, %v7924_v58  ;;  %v8200_v25 = vmax.f32 %v13461_v48, %v13456_v33 }
 0x5ea   :  { %v13475_v57 = vmax.f32 %v7908_v41, %v7925_v8 }
 0x5ee   :  { %v13477_v35 = vpop.permute.xlu0 %7010 }
 0x5ef   :  { %v7137_v10 = vpop.permute.xlu1 %7136 }
 0x5f2   :  { %v7263_v47 = vpop.permute.xlu0 %7262 }
 0x5f3   :  { %v7389_v19 = vpop.permute.xlu1 %7388  ;;  %v7558_v1 = vsel %vm7548_vm8, %v13276_v40, %v7263_v47 }
 0x5f4   :  { %v7591_v16 = vsel %vm7582_vm11, %v7574_v21, %v7389_v19 }
 0x5f6   :  { %v7075_v45 = vpop.permute.xlu0 %7074 }
 0x5f7   :  { %v7201_v7 = vpop.permute.xlu1 %7200 }
 0x5fa   :  { %v7327_v62 = vpop.permute.xlu0 %7326 }
 0x5fb   :  { %v7453_v6 = vpop.permute.xlu1 %7452  ;;  %v7575_v20 = vsel %vm7565_vm10, %v7558_v1, %v7327_v62 }
 0x5fc   :  { %v7608_v23 = vsel %vm7599_vm2, %v7591_v16, %v7453_v6 }
 0x5fd   :  { %9136 = vmatprep.mubr.msk.f32.mxu1 %vm14199_vm14, %v7608_v23  ;;  %v9302_v23 = vld [vmem:[#allocation3 + $0xc0] sm:$0xff]  ;;  %vm14207_vm14 = vmmov %vm14201_vm3 }
 0x5fe   :  { %v7139_v34 = vpop.permute.xlu0 %7138  ;;  %v9132_v17 = vpop.f32.mrb[24].mxu1 }
 0x5ff   :  { %v7203_v14 = vpop.permute.xlu1 %7202  ;;  %v7773_v13 = vadd.f32 %v9132_v17, %v13392_v39  ;;  %v7767_v3 = vpop.f32.mrb[25].mxu1  ;;  %v7494_v17 = vsel %vm14201_vm3, %v9302_v23, %v13444_v0  ;;  %v7495_v0 = vsel %vm14202_vm4, %v13263_v12, %v13477_v35 }
 0x600   :  { %v7768_v46 = vadd.f32 %v13392_v39, %v7767_v3  ;;  %v7510_v3 = vsel %vm3091_vm5, %v7494_v17, %v13446_v42 }
 0x601   :  { %v7831_v31 = vmax.f32 %v7773_v13, 0.0 }
 0x602   :  { %v7391_v11 = vpop.permute.xlu0 %7390  ;;  %v7830_v52 = vmax.f32 %v7768_v46, 0.0 }
 0x603   :  { %v7455_v36 = vpop.permute.xlu1 %7454  ;;  %v7592_v49 = vsel %vm7582_vm11, %v7575_v20, %v7391_v11  ;;  %v7943_v53 = vcombine.high %v7831_v31, %v7831_v31  ;;  %v13493_v27 = vrot.slane %v7831_v31, %v10521_v63  ;;  %v7526_v20 = vsel %vm3221_vm7, %v7510_v3, %v7137_v10 }
 0x604   :  { %v7609_v24 = vsel %vm7599_vm2, %v7592_v49, %v7455_v36  ;;  %v7926_v40 = vcombine.high %v7830_v52, %v7830_v52  ;;  %v13497_v28 = vrot.slane %v7830_v52, %v10521_v63  ;;  %v7542_v11 = vsel %vm3351_vm9, %v7526_v20, %v7201_v7 }
 0x605   :  { %9137 = vmatmul.mubr.msk.f32.gmra.mrb[28].mxu1 %vm14200_vm15, %v7609_v24  ;;  %v13500_v55 = vrot.slane %v7943_v53, %v10521_v63  ;;  %v7958_v58 = vcombine.high %v13493_v27, %v13493_v27  ;;  %v7511_v10 = vsel %vm3091_vm5, %v7495_v0, %v7075_v45  ;;  %vm14208_vm15 = vmmov %vm14201_vm3 }
 0x606   :  { %v7013_v15 = vpop.permute.xlu0 %7012  ;;  %v13505_v50 = vrot.slane %v7926_v40, %v10521_v63  ;;  %v7941_v8 = vcombine.high %v13497_v28, %v13497_v28  ;;  %v8202_v26 = vmax.f32 %v13497_v28, %v13493_v27  ;;  %v7527_v7 = vsel %vm3221_vm7, %v7511_v10, %v7139_v34  ;;  %vm14209_vm3 = vmmov %vm14203_vm0 }
 0x607   :  { %v7077_v5 = vpop.permute.xlu1 %7076  ;;  %v7959_v43 = vcombine.high %v13500_v55, %v13500_v55 }
 0x608   :  { %v7942_v41 = vcombine.high %v13505_v50, %v13505_v50  ;;  %v13515_v47 = vmax.f32 %v7941_v8, %v7958_v58  ;;  %v8204_v19 = vmax.f32 %v13505_v50, %v13500_v55  ;;  %v7543_v8 = vsel %vm3351_vm9, %v7527_v7, %v7203_v14 }
 0x609   :  { %v7496_v14 = vsel %vm14205_vm13, %v13304_v18, %v7013_v15 }
 0x60a   :  { %v7265_v38 = vpop.permute.xlu0 %7264  ;;  %v13519_v16 = vmax.f32 %v7942_v41, %v7959_v43 }
 0x60b   :  { %v7329_v21 = vpop.permute.xlu1 %7328  ;;  %v7559_v36 = vsel %vm7548_vm8, %v7542_v11, %v7265_v38  ;;  %v7512_v11 = vsel %vm3091_vm5, %v7496_v14, %v7077_v5 }
 0x60c   :  { %v7576_v31 = vsel %vm7565_vm10, %v7559_v36, %v7329_v21 }
 0x60e   :  { %v7015_v62 = vpop.permute.xlu0 %7014 }
 0x60f   :  { %v7141_v6 = vpop.permute.xlu1 %7140 }
 0x610   :  { %v7528_v36 = vsel %vm3221_vm7, %v7512_v11, %v7141_v6  ;;  %v7497_v6 = vsel %vm14207_vm14, %v13345_v59, %v7015_v62 }
 0x612   :  { %v7267_v1 = vpop.permute.xlu0 %7266 }
 0x613   :  { %v7393_v13 = vpop.permute.xlu1 %7392  ;;  %v7560_v43 = vsel %vm7548_vm8, %v7543_v8, %v7267_v1 }
 0x614   :  { %v7593_v24 = vsel %vm7582_vm11, %v7576_v31, %v7393_v13 }
 0x616   :  { %v7079_v46 = vpop.permute.xlu0 %7078 }
 0x617   :  { %v7205_v49 = vpop.permute.xlu1 %7204  ;;  %v7513_v8 = vsel %vm3091_vm5, %v7497_v6, %v7079_v46 }
 0x618   :  { %v7544_v31 = vsel %vm3351_vm9, %v7528_v36, %v7205_v49 }
 0x61a   :  { %v7331_v52 = vpop.permute.xlu0 %7330 }
 0x61b   :  { %v7457_v53 = vpop.permute.xlu1 %7456  ;;  %v7577_v41 = vsel %vm7565_vm10, %v7560_v43, %v7331_v52 }
 0x61c   :  { %v7610_v42 = vsel %vm7599_vm2, %v7593_v24, %v7457_v53 }
 0x61d   :  { %9139 = vmatprep.mubr.msk.f32.mxu1 %vm14203_vm0, %v7610_v42 }
 0x61e   :  { %v7143_v40 = vpop.permute.xlu0 %7142 }
 0x61f   :  { %v7207_v58 = vpop.permute.xlu1 %7206 }
 0x622   :  { %v7395_v38 = vpop.permute.xlu0 %7394 }
 0x623   :  { %v7459_v21 = vpop.permute.xlu1 %7458  ;;  %v7594_v12 = vsel %vm7582_vm11, %v7577_v41, %v7395_v38  ;;  %v7529_v41 = vsel %vm3221_vm7, %v7513_v8, %v7143_v40 }
 0x624   :  { %v7611_v35 = vsel %vm7599_vm2, %v7594_v12, %v7459_v21  ;;  %v7545_v21 = vsel %vm3351_vm9, %v7529_v41, %v7207_v58 }
 0x625   :  { %9140 = vmatmul.mubr.msk.f32.gmra.mrb[30].mxu1 %vm14204_vm6, %v7611_v35 }
 0x626   :  { %v7017_v45 = vpop.permute.xlu0 %7016 }
 0x627   :  { %v7081_v23 = vpop.permute.xlu1 %7080  ;;  %v7498_v58 = vsel %vm14202_vm4, %v13366_v2, %v7017_v45 }
 0x628   :  { %v7514_v36 = vsel %vm3091_vm5, %v7498_v58, %v7081_v23  ;;  %v8576_v58 = vld [vmem:[%s13916_s5 + $0x80] sm:$0xff] }
 0x62a   :  { %v7269_v17 = vpop.permute.xlu0 %7268 }
 0x62b   :  { %v7333_v34 = vpop.permute.xlu1 %7332  ;;  %v7561_v24 = vsel %vm7548_vm8, %v7544_v31, %v7269_v17 }
 0x62c   :  { %v7578_v0 = vsel %vm7565_vm10, %v7561_v24, %v7333_v34 }
 0x62e   :  { %v7019_v13 = vpop.permute.xlu0 %7018 }
 0x62f   :  { %v7145_v3 = vpop.permute.xlu1 %7144  ;;  %v7499_v59 = vsel %vm14208_vm15, %v13384_v60, %v7019_v13 }
 0x630   :  { %v7530_v60 = vsel %vm3221_vm7, %v7514_v36, %v7145_v3  ;;  %v8561_v36 = vld [vmem:[%s13916_s5 + $0x8] sm:$0xff] }
 0x632   :  { %v7271_v1 = vpop.permute.xlu0 %7270 }
 0x633   :  { %v7397_v20 = vpop.permute.xlu1 %7396  ;;  %v7562_v12 = vsel %vm7548_vm8, %v7545_v21, %v7271_v1 }
 0x634   :  { %v7595_v42 = vsel %vm7582_vm11, %v7578_v0, %v7397_v20 }
 0x636   :  { %v7083_v52 = vpop.permute.xlu0 %7082 }
 0x637   :  { %v7209_v53 = vpop.permute.xlu1 %7208  ;;  %v7515_v46 = vsel %vm3091_vm5, %v7499_v59, %v7083_v52 }
 0x638   :  { %v7546_v24 = vsel %vm3351_vm9, %v7530_v60, %v7209_v53  ;;  %v8579_v60 = vld [vmem:[%s13916_s5 + $0x98] sm:$0xff] }
 0x63a   :  { %v7335_v10 = vpop.permute.xlu0 %7334 }
 0x63b   :  { %v7461_v7 = vpop.permute.xlu1 %7460  ;;  %v7579_v35 = vsel %vm7565_vm10, %v7562_v12, %v7335_v10 }
 0x63c   :  { %v7612_v18 = vsel %vm7599_vm2, %v7595_v42, %v7461_v7 }
 0x63d   :  { %9142 = vmatprep.mubr.msk.f32.mxu1 %vm14206_vm1, %v7612_v18 }
 0x63e   :  { %v7147_v15 = vpop.permute.xlu0 %7146 }
 0x63f   :  { %v7273_v5 = vpop.permute.xlu1 %7272  ;;  %v7531_v40 = vsel %vm3221_vm7, %v7515_v46, %v7147_v15  ;;  %vm14210_vm7 = vmmov %vm14203_vm0 }
 0x640   :  { %v7563_v52 = vsel %vm7548_vm8, %v7546_v24, %v7273_v5 }
 0x642   :  { %v7399_v49 = vpop.permute.xlu0 %7398 }
 0x643   :  { %v7275_v43 = vpop.permute.xlu1 %7274  ;;  %v7596_v34 = vsel %vm7582_vm11, %v7579_v35, %v7399_v49 }
 0x646   :  { %v7211_v38 = vpop.permute.xlu0 %7210 }
 0x647   :  { %v7339_v17 = vpop.permute.xlu1 %7338  ;;  %v7547_v1 = vsel %vm3351_vm9, %v7531_v40, %v7211_v38 }
 0x648   :  { %v7564_v31 = vsel %vm7548_vm8, %v7547_v1, %v7275_v43  ;;  %v8577_v1 = vld [vmem:[%s13916_s5 + $0x88] sm:$0xff]  ;;  %vm8226_vm8 = vcmask 123904  }
 0x649   :  { %v7581_v0 = vsel %vm7565_vm10, %v7564_v31, %v7339_v17  ;;  %v8578_v31 = vld [vmem:[%s13916_s5 + $0x90] sm:$0xff]  ;;  %v8248_v51 = vsel %vm8226_vm8, %v13429_v56, -inf }
 0x64a   :  { %v7463_v14 = vpop.permute.xlu0 %7462  ;;  %v9187_v24 = vpack.c.bf16 %v8579_v60, %v8578_v31 }
 0x64b   :  { %v7613_v62 = vsel %vm7599_vm2, %v7596_v34, %v7463_v14  ;;  %v7403_v11 = vpop.permute.xlu1 %7402 }
 0x64c   :  { %9143 = vmatmul.mubr.msk.f32.gmra.mrb[32].mxu1 %vm14209_vm3, %v7613_v62  ;;  %v7598_v7 = vsel %vm7582_vm11, %v7581_v0, %v7403_v11  ;;  %v9183_v11 = vpack.c.bf16 %v8577_v1, %v8576_v58  ;;  %v8563_v0 = vld [vmem:[%s13916_s5 + $0x18] sm:$0xff] }
 0x64e   :  { %v7337_v20 = vpop.permute.xlu0 %7336  ;;  %9184 = vmatprep.subr.bf16.mxu1 %v9183_v11 }
 0x64f   :  { %v7580_v42 = vsel %vm7565_vm10, %v7563_v52, %v7337_v20  ;;  %v7467_v2 = vpop.permute.xlu1 %7466  ;;  %v8560_v20 = vld [vmem:[%s13916_s5] sm:$0xff]  ;;  %v8562_v52 = vld [vmem:[%s13916_s5 + $0x10] sm:$0xff] }
 0x650   :  { %v7615_v18 = vsel %vm7599_vm2, %v7598_v7, %v7467_v2  ;;  %v8581_v2 = vld [vmem:[%s13916_s5 + $0xa8] sm:$0xff]  ;;  %v8564_v7 = vld [vmem:[%s13916_s5 + $0x20] sm:$0xff] }
 0x652   :  { %v7401_v13 = vpop.permute.xlu0 %7400 }
 0x653   :  { %v7597_v45 = vsel %vm7582_vm11, %v7580_v42, %v7401_v13  ;;  %v9185_v13 = vpack.c.bf16 %v8561_v36, %v8560_v20  ;;  %v8580_v42 = vld [vmem:[%s13916_s5 + $0xa0] sm:$0xff]  ;;  %vm9345_vm11 = vmmov 0  }
 0x655   :  { %9186 = vmatpush3.bf16.msra.mxu1 %v9185_v13 }
 0x656   :  { %v7465_v10 = vpop.permute.xlu0 %7464  ;;  %9188 = vmatprep.subr.bf16.mxu1 %v9187_v24 }
 0x657   :  { %v7614_v23 = vsel %vm7599_vm2, %v7597_v45, %v7465_v10  ;;  %v9189_v45 = vpack.c.bf16 %v8563_v0, %v8562_v52  ;;  %v9191_v10 = vpack.c.bf16 %v8581_v2, %v8580_v42 }
 0x658   :  { %9145 = vmatprep.mubr.msk.f32.mxu1 %vm14210_vm7, %v7614_v23  ;;  %v9135_v3 = vpop.f32.mrb[26].mxu1  ;;  %v8565_v23 = vld [vmem:[%s13916_s5 + $0x28] sm:$0xff] }
 0x659   :  { %9146 = vmatmul.mubr.msk.f32.gmra.mrb[34].mxu1 %vm14203_vm0, %v7615_v18  ;;  %v7783_v53 = vadd.f32 %v9135_v3, %v13392_v39  ;;  %v7777_v15 = vpop.f32.mrb[27].mxu1  ;;  %v8227_v18 = vsel %vm8226_vm8, %v8194_v37, -inf  ;;  %v9193_v3 = vpack.c.bf16 %v8565_v23, %v8564_v7 }
 0x65a   :  { %v7778_v5 = vadd.f32 %v13392_v39, %v7777_v15  ;;  %9190 = vmatpush3.bf16.msra.mxu1 %v9189_v45  ;;  %v8241_v15 = vsel %vm8226_vm8, %v8196_v29, -inf }
 0x65b   :  { %v7833_v6 = vmax.f32 %v7783_v53, 0.0  ;;  %v8234_v53 = vsel %vm8226_vm8, %v13425_v54, -inf  ;;  %9192 = vmatprep.subr.bf16.mxu1 %v9191_v10 }
 0x65c   :  { %v7832_v49 = vmax.f32 %v7778_v5, 0.0  ;;  %v8228_v5 = vrot.slane %v8227_v18, 4 }
 0x65d   :  { %v7977_v8 = vcombine.high %v7833_v6, %v7833_v6  ;;  %v13586_v43 = vrot.slane %v7833_v6, %v10521_v63 }
 0x65e   :  { %v7960_v41 = vcombine.high %v7832_v49, %v7832_v49  ;;  %v13589_v38 = vrot.slane %v7832_v49, %v10521_v63  ;;  %v8235_v49 = vrot.slane %v8234_v53, 4  ;;  %9194 = vmatpush3.bf16.msra.mxu1 %v9193_v3  ;;  %v8229_v54 = vmax.f32 %v8227_v18, %v8228_v5 }
 0x65f   :  { %v13592_v21 = vrot.slane %v7977_v8, %v10521_v63  ;;  %v7992_v12 = vcombine.high %v13586_v43, %v13586_v43  ;;  %v8242_v8 = vrot.slane %v8241_v15, 4 }
 0x660   :  { %v13597_v35 = vrot.slane %v7960_v41, %v10521_v63  ;;  %v7975_v17 = vcombine.high %v13589_v38, %v13589_v38  ;;  %v8206_v34 = vmax.f32 %v13589_v38, %v13586_v43  ;;  %v8236_v61 = vmax.f32 %v8234_v53, %v8235_v49 }
 0x661   :  { %v7993_v14 = vcombine.high %v13592_v21, %v13592_v21  ;;  %v8243_v29 = vmax.f32 %v8241_v15, %v8242_v8  ;;  %v8230_v20 = vrot.slane %v8229_v54, 2 }
 0x662   :  { %v7976_v59 = vcombine.high %v13597_v35, %v13597_v35  ;;  %v13607_v62 = vmax.f32 %v7975_v17, %v7992_v12  ;;  %v8208_v46 = vmax.f32 %v13597_v35, %v13592_v21  ;;  %v8249_v17 = vrot.slane %v8248_v51, 4 }
 0x663   :  { %v8237_v24 = vrot.slane %v8236_v61, 2  ;;  %v8244_v52 = vrot.slane %v8243_v29, 2  ;;  %v8231_v7 = vmax.f32 %v8229_v54, %v8230_v20 }
 0x664   :  { %v13611_v40 = vmax.f32 %v7976_v59, %v7993_v14  ;;  %v8250_v36 = vmax.f32 %v8248_v51, %v8249_v17  ;;  %v8325_v43 = vsel %vm8226_vm8, %v8208_v46, -inf }
 0x665   :  { %v8238_v8 = vmax.f32 %v8236_v61, %v8237_v24  ;;  %v8245_v51 = vmax.f32 %v8243_v29, %v8244_v52 }
 0x666   :  { %v8251_v18 = vrot.slane %v8250_v36, 2  ;;  %v8332_v46 = vsel %vm8226_vm8, %v13611_v40, -inf }
 0x667   :  { %v8239_v20 = vrot.slane %v8238_v8, 1 }
 0x668   :  { %v8252_v54 = vmax.f32 %v8250_v36, %v8251_v18 }
 0x66a   :  { %v8253_v29 = vrot.slane %v8252_v54, 1 }
 0x6d8   :  { %v9138_v6 = vpop.f32.mrb[28].mxu1 }
 0x6d9   :  { %v7793_v44 = vadd.f32 %v9138_v6, %v13392_v39  ;;  %v7787_v37 = vpop.f32.mrb[29].mxu1 }
 0x6da   :  { %v7788_v41 = vadd.f32 %v13392_v39, %v7787_v37 }
 0x6db   :  { %v7835_v12 = vmax.f32 %v7793_v44, 0.0 }
 0x6dc   :  { %v7834_v22 = vmax.f32 %v7788_v41, 0.0 }
 0x6dd   :  { %v8011_v14 = vcombine.high %v7835_v12, %v7835_v12  ;;  %v8018_v59 = vrot.slane %v7835_v12, %v10521_v63 }
 0x6de   :  { %v7994_v58 = vcombine.high %v7834_v22, %v7834_v22  ;;  %v8001_v1 = vrot.slane %v7834_v22, %v10521_v63  ;;  %v8232_v22 = vrot.slane %v8231_v7, 1 }
 0x6df   :  { %v8025_v56 = vrot.slane %v8011_v14, %v10521_v63  ;;  %v8026_v11 = vcombine.high %v8018_v59, %v8018_v59 }
 0x6e0   :  { %v8008_v31 = vrot.slane %v7994_v58, %v10521_v63  ;;  %v8009_v60 = vcombine.high %v8001_v1, %v8001_v1  ;;  %v8210_v13 = vmax.f32 %v8001_v1, %v8018_v59  ;;  %v8233_v61 = vmax.f32 %v8231_v7, %v8232_v22 }
 0x6e1   :  { %v8027_v0 = vcombine.high %v8025_v56, %v8025_v56  ;;  %v8254_v7 = vmax.f32 %v8252_v54, %v8253_v29 }
 0x6e2   :  { %v8010_v42 = vcombine.high %v8008_v31, %v8008_v31  ;;  %v8211_v2 = vmax.f32 %v8009_v60, %v8026_v11  ;;  %v8212_v45 = vmax.f32 %v8008_v31, %v8025_v56  ;;  %v8339_v10 = vsel %vm8226_vm8, %v8210_v13, -inf }
 0x6e3   :  { %v8340_v23 = vrot.slane %v8339_v10, 4  ;;  %v8246_v56 = vrot.slane %v8245_v51, 1 }
 0x6e4   :  { %v8213_v3 = vmax.f32 %v8010_v42, %v8027_v0  ;;  %v8346_v53 = vsel %vm8226_vm8, %v8211_v2, -inf  ;;  %v8353_v15 = vsel %vm8226_vm8, %v8212_v45, -inf  ;;  %v8240_v2 = vmax.f32 %v8238_v8, %v8239_v20 }
 0x6e5   :  { %v8341_v5 = vmax.f32 %v8339_v10, %v8340_v23  ;;  %v8347_v6 = vrot.slane %v8346_v53, 4  ;;  %v8354_v49 = vrot.slane %v8353_v15, 4  ;;  %v8247_v45 = vmax.f32 %v8245_v51, %v8246_v56 }
 0x6e6   :  { %v8360_v44 = vsel %vm8226_vm8, %v8213_v3, -inf  ;;  %v8269_v8 = vsel %vm8226_vm8, %v8200_v25, -inf }
 0x6e7   :  { %v8342_v37 = vrot.slane %v8341_v5, 2  ;;  %v8348_v41 = vmax.f32 %v8346_v53, %v8347_v6  ;;  %v8355_v12 = vmax.f32 %v8353_v15, %v8354_v49  ;;  %v8361_v17 = vrot.slane %v8360_v44, 4 }
 0x6e8   :  { %v8255_v6 = vsel %vm8226_vm8, %v8198_v4, -inf  ;;  %v8262_v49 = vsel %vm8226_vm8, %v13471_v9, -inf }
 0x6e9   :  { %v8343_v14 = vmax.f32 %v8341_v5, %v8342_v37  ;;  %v8349_v59 = vrot.slane %v8348_v41, 2  ;;  %v8356_v58 = vrot.slane %v8355_v12, 2  ;;  %v8362_v1 = vmax.f32 %v8360_v44, %v8361_v17 }
 0x6ea   :  { %v8256_v51 = vrot.slane %v8255_v6, 4  ;;  %v8263_v37 = vrot.slane %v8262_v49, 4 }
 0x6eb   :  { %v8344_v11 = vrot.slane %v8343_v14, 1  ;;  %v8350_v31 = vmax.f32 %v8348_v41, %v8349_v59  ;;  %v8357_v60 = vmax.f32 %v8355_v12, %v8356_v58  ;;  %v8363_v13 = vrot.slane %v8362_v1, 2 }
 0x6ec   :  { %v8270_v41 = vrot.slane %v8269_v8, 4  ;;  %v8276_v12 = vsel %vm8226_vm8, %v13475_v57, -inf  ;;  %v8257_v4 = vmax.f32 %v8255_v6, %v8256_v51 }
 0x6ed   :  { %v8345_v24 = vmax.f32 %v8343_v14, %v8344_v11  ;;  %v8351_v52 = vrot.slane %v8350_v31, 1  ;;  %v8358_v0 = vrot.slane %v8357_v60, 1  ;;  %v8364_v42 = vmax.f32 %v8362_v1, %v8363_v13 }
 0x6ee   :  { %v8277_v9 = vrot.slane %v8276_v12, 4  ;;  %v8264_v14 = vmax.f32 %v8262_v49, %v8263_v37  ;;  %v8271_v33 = vmax.f32 %v8269_v8, %v8270_v41  ;;  %v8258_v1 = vrot.slane %v8257_v4, 2 }
 0x6ef   :  { %v8352_v10 = vmax.f32 %v8350_v31, %v8351_v52  ;;  %v8359_v36 = vmax.f32 %v8357_v60, %v8358_v0  ;;  %v8365_v23 = vrot.slane %v8364_v42, 1  ;;  %v13672_v18 = vsel %vm6675_vm12, %v8345_v24, %v8233_v61 }
 0x6f0   :  { %v8278_v56 = vmax.f32 %v8276_v12, %v8277_v9  ;;  %v8265_v13 = vrot.slane %v8264_v14, 2  ;;  %v8272_v61 = vrot.slane %v8271_v33, 2 }
 0x6f1   :  { %v13675_v3 = vsel %vm6675_vm12, %v8352_v10, %v8240_v2  ;;  %v13678_v53 = vsel %vm6675_vm12, %v8359_v36, %v8247_v45  ;;  %v8366_v15 = vmax.f32 %v8364_v42, %v8365_v23  ;;  %v8259_v2 = vmax.f32 %v8257_v4, %v8258_v1 }
 0x6f2   :  { %v8279_v10 = vrot.slane %v8278_v56, 2  ;;  %v8266_v8 = vmax.f32 %v8264_v14, %v8265_v13  ;;  %v8273_v51 = vmax.f32 %v8271_v33, %v8272_v61  ;;  %v8283_v14 = vsel %vm8226_vm8, %v8202_v26, -inf }
 0x6f3   :  { %v13681_v5 = vsel %vm6675_vm12, %v8366_v15, %v8254_v7  ;;  %v8284_v13 = vrot.slane %v8283_v14, 4 }
 0x6f8   :  { %v9141_v44 = vpop.f32.mrb[30].mxu1 }
 0x6f9   :  { %v7803_v17 = vadd.f32 %v9141_v44, %v13392_v39  ;;  %v7797_v30 = vpop.f32.mrb[31].mxu1 }
 0x6fa   :  { %v7798_v32 = vadd.f32 %v13392_v39, %v7797_v30  ;;  %v8260_v30 = vrot.slane %v8259_v2, 1 }
 0x6fb   :  { %v7837_v22 = vmax.f32 %v7803_v17, 0.0 }
 0x6fc   :  { %v7836_v54 = vmax.f32 %v7798_v32, 0.0  ;;  %v8280_v32 = vmax.f32 %v8278_v56, %v8279_v10  ;;  %v8285_v10 = vmax.f32 %v8283_v14, %v8284_v13 }
 0x6fd   :  { %v8045_v48 = vcombine.high %v7837_v22, %v7837_v22  ;;  %v8052_v25 = vrot.slane %v7837_v22, %v10521_v63 }
 0x6fe   :  { %v8028_v59 = vcombine.high %v7836_v54, %v7836_v54  ;;  %v8035_v58 = vrot.slane %v7836_v54, %v10521_v63 }
 0x6ff   :  { %v8059_v57 = vrot.slane %v8045_v48, %v10521_v63  ;;  %v8060_v20 = vcombine.high %v8052_v25, %v8052_v25  ;;  %v8267_v48 = vrot.slane %v8266_v8, 1 }
 0x700   :  { %v8042_v11 = vrot.slane %v8028_v59, %v10521_v63  ;;  %v8043_v31 = vcombine.high %v8035_v58, %v8035_v58  ;;  %v8214_v60 = vmax.f32 %v8035_v58, %v8052_v25  ;;  %v8274_v25 = vrot.slane %v8273_v51, 1 }
 0x701   :  { %v8061_v29 = vcombine.high %v8059_v57, %v8059_v57  ;;  %v8268_v61 = vmax.f32 %v8266_v8, %v8267_v48 }
 0x702   :  { %v8044_v24 = vcombine.high %v8042_v11, %v8042_v11  ;;  %v8215_v52 = vmax.f32 %v8043_v31, %v8060_v20  ;;  %v8216_v0 = vmax.f32 %v8042_v11, %v8059_v57  ;;  %v8367_v42 = vsel %vm8226_vm8, %v8214_v60, -inf }
 0x703   :  { %v8368_v45 = vrot.slane %v8367_v42, 4  ;;  %v8261_v57 = vmax.f32 %v8259_v2, %v8260_v30  ;;  %v8281_v20 = vrot.slane %v8280_v32, 1 }
 0x704   :  { %v8217_v36 = vmax.f32 %v8044_v24, %v8061_v29  ;;  %v8374_v23 = vsel %vm8226_vm8, %v8215_v52, -inf  ;;  %v8381_v7 = vsel %vm8226_vm8, %v8216_v0, -inf  ;;  %v8275_v29 = vmax.f32 %v8273_v51, %v8274_v25 }
 0x705   :  { %v8369_v15 = vmax.f32 %v8367_v42, %v8368_v45  ;;  %v8375_v6 = vrot.slane %v8374_v23, 4  ;;  %v8382_v49 = vrot.slane %v8381_v7, 4  ;;  %v8282_v42 = vmax.f32 %v8280_v32, %v8281_v20 }
 0x706   :  { %v8388_v44 = vsel %vm8226_vm8, %v8217_v36, -inf  ;;  %v8290_v45 = vsel %vm8226_vm8, %v13515_v47, -inf  ;;  %v8297_v36 = vsel %vm8226_vm8, %v8204_v19, -inf  ;;  %v8311_v47 = vsel %vm8226_vm8, %v8206_v34, -inf }
 0x707   :  { %v8370_v37 = vrot.slane %v8369_v15, 2  ;;  %v8376_v41 = vmax.f32 %v8374_v23, %v8375_v6  ;;  %v8383_v12 = vmax.f32 %v8381_v7, %v8382_v49  ;;  %v8389_v17 = vrot.slane %v8388_v44, 4 }
 0x708   :  { %v8291_v7 = vrot.slane %v8290_v45, 4  ;;  %v8298_v6 = vrot.slane %v8297_v36, 4  ;;  %v8286_v49 = vrot.slane %v8285_v10, 2  ;;  %v8312_v19 = vrot.slane %v8311_v47, 4 }
 0x709   :  { %v8371_v4 = vmax.f32 %v8369_v15, %v8370_v37  ;;  %v8377_v22 = vrot.slane %v8376_v41, 2  ;;  %v8384_v9 = vrot.slane %v8383_v12, 2  ;;  %v8390_v54 = vmax.f32 %v8388_v44, %v8389_v17 }
 0x70a   :  { %v8304_v15 = vsel %vm8226_vm8, %v13519_v16, -inf  ;;  %v8292_v51 = vmax.f32 %v8290_v45, %v8291_v7  ;;  %v8299_v44 = vmax.f32 %v8297_v36, %v8298_v6  ;;  %v8287_v55 = vmax.f32 %v8285_v10, %v8286_v49 }
 0x70b   :  { %v8372_v33 = vrot.slane %v8371_v4, 1  ;;  %v8378_v59 = vmax.f32 %v8376_v41, %v8377_v22  ;;  %v8385_v58 = vmax.f32 %v8383_v12, %v8384_v9  ;;  %v8391_v1 = vrot.slane %v8390_v54, 2 }
 0x70c   :  { %v8305_v8 = vrot.slane %v8304_v15, 4  ;;  %v8293_v37 = vrot.slane %v8292_v51, 2  ;;  %v8300_v41 = vrot.slane %v8299_v44, 2  ;;  %v8288_v12 = vrot.slane %v8287_v55, 1 }
 0x70d   :  { %v8373_v11 = vmax.f32 %v8371_v4, %v8372_v33  ;;  %v8379_v31 = vrot.slane %v8378_v59, 1  ;;  %v8386_v56 = vrot.slane %v8385_v58, 1  ;;  %v8392_v60 = vmax.f32 %v8390_v54, %v8391_v1 }
 0x70e   :  { %v8306_v50 = vmax.f32 %v8304_v15, %v8305_v8  ;;  %v8318_v17 = vsel %vm8226_vm8, %v13607_v62, -inf  ;;  %v8313_v32 = vmax.f32 %v8311_v47, %v8312_v19  ;;  %v8294_v4 = vmax.f32 %v8292_v51, %v8293_v37 }
 0x70f   :  { %v13710_v24 = vsel %vm6675_vm12, %v8373_v11, %v8261_v57  ;;  %v8380_v52 = vmax.f32 %v8378_v59, %v8379_v31  ;;  %v8387_v27 = vmax.f32 %v8385_v58, %v8386_v56  ;;  %v8393_v28 = vrot.slane %v8392_v60, 1 }
 0x710   :  { %v8307_v30 = vrot.slane %v8306_v50, 2  ;;  %v8301_v9 = vmax.f32 %v8299_v44, %v8300_v41  ;;  %v8319_v54 = vrot.slane %v8318_v17, 4  ;;  %v13741_v25 = vmax.f32 %v8287_v55, %v8288_v12 }
 0x711   :  { %v13713_v26 = vsel %vm6675_vm12, %v8380_v52, %v8268_v61  ;;  %v13716_v0 = vsel %vm6675_vm12, %v8387_v27, %v8275_v29  ;;  %v8394_v2 = vmax.f32 %v8392_v60, %v8393_v28  ;;  %v8326_v62 = vrot.slane %v8325_v43, 4 }
 0x712   :  { %v8308_v33 = vmax.f32 %v8306_v50, %v8307_v30  ;;  %v8314_v59 = vrot.slane %v8313_v32, 2  ;;  %v8295_v35 = vrot.slane %v8294_v4, 1  ;;  %v8302_v20 = vrot.slane %v8301_v9, 1 }
 0x713   :  { %v13725_v23 = vsel %vm6675_vm12, %v8394_v2, %v8282_v42  ;;  %v8320_v11 = vmax.f32 %v8318_v17, %v8319_v54  ;;  %v8327_v60 = vmax.f32 %v8325_v43, %v8326_v62  ;;  %v8333_v27 = vrot.slane %v8332_v46, 4 }
 0x714   :  { %v13749_v52 = vmax.f32 %v8313_v32, %v8314_v59  ;;  %v8309_v42 = vrot.slane %v8308_v33, 1  ;;  %v8296_v15 = vmax.f32 %v8294_v4, %v8295_v35  ;;  %v8303_v6 = vmax.f32 %v8301_v9, %v8302_v20 }
 0x715   :  { %v8321_v36 = vrot.slane %v8320_v11, 2  ;;  %v8328_v49 = vrot.slane %v8327_v60, 2  ;;  %v13757_v12 = vmax.f32 %v8332_v46, %v8333_v27 }
 0x716   :  { %v13754_v37 = vmax.f32 %v8308_v33, %v8309_v42  ;;  %v8316_v41 = vrot.slane %v13749_v52, 1 }
 0x717   :  { %v13761_v4 = vmax.f32 %v8320_v11, %v8321_v36  ;;  %v8335_v59 = vrot.slane %v13757_v12, 2 }
 0x71f   :  { %v9144_v16 = vpop.f32.mrb[32].mxu1 }
 0x720   :  { %v7813_v38 = vadd.f32 %v9144_v16, %v13392_v39  ;;  %v7807_v34 = vpop.f32.mrb[33].mxu1 }
 0x721   :  { %v7808_v22 = vadd.f32 %v13392_v39, %v7807_v34 }
 0x722   :  { %v7839_v48 = vmax.f32 %v7813_v38, 0.0 }
 0x723   :  { %v7838_v14 = vmax.f32 %v7808_v22, 0.0  ;;  %v13763_v22 = vmax.f32 %v8327_v60, %v8328_v49 }
 0x724   :  { %v8079_v58 = vcombine.high %v7839_v48, %v7839_v48  ;;  %v8086_v21 = vrot.slane %v7839_v48, %v10521_v63 }
 0x725   :  { %v8062_v1 = vcombine.high %v7838_v14, %v7838_v14  ;;  %v8069_v57 = vrot.slane %v7838_v14, %v10521_v63 }
 0x726   :  { %v8093_v31 = vrot.slane %v8079_v58, %v10521_v63  ;;  %v8094_v56 = vcombine.high %v8086_v21, %v8086_v21 }
 0x727   :  { %v8076_v13 = vrot.slane %v8062_v1, %v10521_v63  ;;  %v8077_v61 = vcombine.high %v8069_v57, %v8069_v57  ;;  %v8218_v29 = vmax.f32 %v8069_v57, %v8086_v21 }
 0x728   :  { %v8095_v28 = vcombine.high %v8093_v31, %v8093_v31 }
 0x729   :  { %v8078_v2 = vcombine.high %v8076_v13, %v8076_v13  ;;  %v8219_v40 = vmax.f32 %v8077_v61, %v8094_v56  ;;  %v8220_v45 = vmax.f32 %v8076_v13, %v8093_v31  ;;  %v8395_v10 = vsel %vm8226_vm8, %v8218_v29, -inf }
 0x72a   :  { %v8396_v7 = vrot.slane %v8395_v10, 4 }
 0x72b   :  { %v8221_v8 = vmax.f32 %v8078_v2, %v8095_v28  ;;  %v8402_v51 = vsel %vm8226_vm8, %v8219_v40, -inf  ;;  %v8409_v47 = vsel %vm8226_vm8, %v8220_v45, -inf }
 0x72c   :  { %v8397_v44 = vmax.f32 %v8395_v10, %v8396_v7  ;;  %v8403_v55 = vrot.slane %v8402_v51, 4  ;;  %v8410_v50 = vrot.slane %v8409_v47, 4  ;;  %v9147_v19 = vpop.f32.mrb[34].mxu1 }
 0x72d   :  { %v8416_v17 = vsel %vm8226_vm8, %v8221_v8, -inf  ;;  %v7823_v16 = vadd.f32 %v9147_v19, %v13392_v39  ;;  %v7817_v30 = vpop.f32.mrb[35].mxu1  ;;  %v8566_v19 = vld [vmem:[%s13916_s5 + $0x30] sm:$0xff] }
 0x72e   :  { %v8398_v32 = vrot.slane %v8397_v44, 2  ;;  %v8404_v43 = vmax.f32 %v8402_v51, %v8403_v55  ;;  %v8411_v38 = vmax.f32 %v8409_v47, %v8410_v50  ;;  %v8417_v34 = vrot.slane %v8416_v17, 4  ;;  %v8582_v47 = vld [vmem:[%s13916_s5 + $0xb0] sm:$0xff] }
 0x72f   :  { %v7841_v9 = vmax.f32 %v7823_v16, 0.0  ;;  %v7818_v54 = vadd.f32 %v13392_v39, %v7817_v30 }
 0x730   :  { %v8399_v48 = vmax.f32 %v8397_v44, %v8398_v32  ;;  %v8405_v62 = vrot.slane %v8404_v43, 2  ;;  %v8412_v14 = vrot.slane %v8411_v38, 2  ;;  %v8418_v33 = vmax.f32 %v8416_v17, %v8417_v34  ;;  %v8567_v17 = vld [vmem:[%s13916_s5 + $0x38] sm:$0xff]  ;;  %v8584_v32 = vld [vmem:[%s13916_s5 + $0xc0] sm:$0xff] }
 0x731   :  { %v8113_v58 = vcombine.high %v7841_v9, %v7841_v9  ;;  %v8120_v21 = vrot.slane %v7841_v9, %v10521_v63  ;;  %v7840_v35 = vmax.f32 %v7818_v54, 0.0  ;;  %v8585_v54 = vld [vmem:[%s13916_s5 + $0xc8] sm:$0xff] }
 0x732   :  { %v8400_v46 = vrot.slane %v8399_v48, 1  ;;  %v8406_v1 = vmax.f32 %v8404_v43, %v8405_v62  ;;  %v8413_v57 = vmax.f32 %v8411_v38, %v8412_v14  ;;  %v8419_v20 = vrot.slane %v8418_v33, 2 }
 0x733   :  { %v8127_v11 = vrot.slane %v8113_v58, %v10521_v63  ;;  %v8128_v31 = vcombine.high %v8120_v21, %v8120_v21  ;;  %v8096_v56 = vcombine.high %v7840_v35, %v7840_v35  ;;  %v8103_v39 = vrot.slane %v7840_v35, %v10521_v63 }
 0x734   :  { %v8401_v60 = vmax.f32 %v8399_v48, %v8400_v46  ;;  %v8407_v13 = vrot.slane %v8406_v1, 1  ;;  %v8414_v61 = vrot.slane %v8413_v57, 1  ;;  %v8420_v29 = vmax.f32 %v8418_v33, %v8419_v20  ;;  %v8568_v48 = vld [vmem:[%s13916_s5 + $0x40] sm:$0xff] }
 0x735   :  { %v8129_v27 = vcombine.high %v8127_v11, %v8127_v11  ;;  %v8110_v28 = vrot.slane %v8096_v56, %v10521_v63  ;;  %v8111_v42 = vcombine.high %v8103_v39, %v8103_v39  ;;  %v8222_v2 = vmax.f32 %v8103_v39, %v8120_v21 }
 0x736   :  { %v8408_v40 = vmax.f32 %v8406_v1, %v8407_v13  ;;  %v8415_v45 = vmax.f32 %v8413_v57, %v8414_v61  ;;  %v8421_v10 = vrot.slane %v8420_v29, 1  ;;  %v13773_v36 = vsel %vm6675_vm12, %v8401_v60, %v13741_v25  ;;  %v8583_v25 = vld [vmem:[%s13916_s5 + $0xb8] sm:$0xff]  ;;  %v8586_v1 = vld [vmem:[%s13916_s5 + $0xd0] sm:$0xff] }
 0x737   :  { %v8112_v7 = vcombine.high %v8110_v28, %v8110_v28  ;;  %v8223_v49 = vmax.f32 %v8111_v42, %v8128_v31  ;;  %v8224_v8 = vmax.f32 %v8110_v28, %v8127_v11  ;;  %v8423_v51 = vsel %vm8226_vm8, %v8222_v2, -inf  ;;  %v8587_v57 = vld [vmem:[%s13916_s5 + $0xd8] sm:$0xff]  ;;  %v8570_v61 = vld [vmem:[%s13916_s5 + $0x50] sm:$0xff] }
 0x738   :  { %v8424_v44 = vrot.slane %v8423_v51, 4  ;;  %v8503_v63 = vsel %vm6675_vm12, %v8408_v40, %v8296_v15  ;;  %v8509_v55 = vsel %vm6675_vm12, %v8415_v45, %v8303_v6  ;;  %v8422_v50 = vmax.f32 %v8420_v29, %v8421_v10  ;;  %v8571_v29 = vld [vmem:[%s13916_s5 + $0x58] sm:$0xff]  ;;  %v8588_v40 = vld [vmem:[%s13916_s5 + $0xe0] sm:$0xff]  ;;  %v8589_v45 = vld [vmem:[%s13916_s5 + $0xe8] sm:$0xff] }
 0x739   :  { %v8225_v16 = vmax.f32 %v8112_v7, %v8129_v27  ;;  %v8430_v30 = vsel %vm8226_vm8, %v8223_v49, -inf  ;;  %v8437_v15 = vsel %vm8226_vm8, %v8224_v8, -inf  ;;  %v9247_v6 = vpack.i.bf16 %v13675_v3, %v8503_v63  ;;  %v8569_v3 = vld [vmem:[%s13916_s5 + $0x48] sm:$0xff] }
 0x73a   :  { %v8425_v43 = vmax.f32 %v8423_v51, %v8424_v44  ;;  %v8431_v38 = vrot.slane %v8430_v30, 4  ;;  %v8438_v34 = vrot.slane %v8437_v15, 4  ;;  %v9252_v9 = vpack.i.bf16 %v13678_v53, %v8509_v55 }
 0x73b   :  { %v8444_v62 = vsel %vm8226_vm8, %v8225_v16, -inf  ;;  %9248 = vrot.lane.b32.xlu0 %v9247_v6, %s9331_s11  ;;  %v8515_v14 = vsel %vm6675_vm12, %v8422_v50, %v13754_v37  ;;  %v9195_v53 = vpack.c.bf16 %v8583_v25, %v8582_v47  ;;  %v9197_v33 = vpack.c.bf16 %v8567_v17, %v8566_v19  ;;  %v8572_v25 = vld [vmem:[%s13916_s5 + $0x60] sm:$0xff] }
 0x73c   :  { %v8426_v58 = vrot.slane %v8425_v43, 2  ;;  %v8432_v21 = vmax.f32 %v8430_v30, %v8431_v38  ;;  %v8439_v35 = vmax.f32 %v8437_v15, %v8438_v34  ;;  %v8445_v46 = vrot.slane %v8444_v62, 4  ;;  %9253 = vrot.lane.b32.xlu1 %v9252_v9, %s9335_s12 }
 0x73d   :  { %v8336_v20 = vmax.f32 %v13757_v12, %v8335_v59  ;;  %v9257_v37 = vpack.i.bf16 %v13681_v5, %v8515_v14  ;;  %9196 = vmatprep.subr.bf16.mxu1 %v9195_v53  ;;  %v9199_v11 = vpack.c.bf16 %v8585_v54, %v8584_v32  ;;  %v9201_v31 = vpack.c.bf16 %v8569_v3, %v8568_v48  ;;  %v8575_v48 = vld [vmem:[%s13916_s5 + $0x78] sm:$0xff] }
 0x73e   :  { %v8427_v56 = vmax.f32 %v8425_v43, %v8426_v58  ;;  %v8433_v39 = vrot.slane %v8432_v21, 2  ;;  %v8440_v60 = vrot.slane %v8439_v35, 2  ;;  %v8446_v13 = vmax.f32 %v8444_v62, %v8445_v46  ;;  %9198 = vmatpush3.bf16.msra.mxu1 %v9197_v33 }
 0x73f   :  { %v8323_v12 = vrot.slane %v13761_v4, 1  ;;  %v8330_v5 = vrot.slane %v13763_v22, 1  ;;  %9258 = vrot.lane.b32.xlu0 %v9257_v37, %s9338_s17  ;;  %9200 = vmatprep.subr.bf16.mxu1 %v9199_v11  ;;  %v9203_v59 = vpack.c.bf16 %v8587_v57, %v8586_v1  ;;  %v8317_v10 = vmax.f32 %v13749_v52, %v8316_v41  ;;  %v8573_v52 = vld [vmem:[%s13916_s5 + $0x68] sm:$0xff] }
 0x740   :  { %v8428_v27 = vrot.slane %v8427_v56, 1  ;;  %v8434_v28 = vmax.f32 %v8432_v21, %v8433_v39  ;;  %v8441_v42 = vmax.f32 %v8439_v35, %v8440_v60  ;;  %v8447_v2 = vrot.slane %v8446_v13, 2 }
 0x741   :  { %v8337_v7 = vrot.slane %v8336_v20, 1  ;;  %v9205_v49 = vpack.c.bf16 %v8571_v29, %v8570_v61  ;;  %v8324_v63 = vmax.f32 %v13761_v4, %v8323_v12  ;;  %v8331_v55 = vmax.f32 %v13763_v22, %v8330_v5  ;;  %v8590_v4 = vld [vmem:[%s13916_s5 + $0xf0] sm:$0xff]  ;;  %v8591_v22 = vld [vmem:[%s13916_s5 + $0xf8] sm:$0xff] }
 0x742   :  { %v8429_v8 = vmax.f32 %v8427_v56, %v8428_v27  ;;  %v8435_v51 = vrot.slane %v8434_v28, 1  ;;  %v8442_v47 = vrot.slane %v8441_v42, 1  ;;  %v8448_v44 = vmax.f32 %v8446_v13, %v8447_v2  ;;  %9202 = vmatpush3.bf16.msra.mxu1 %v9201_v31  ;;  %v8669_v2 = vld [vmem:[%s13918_s7] sm:$0xff] }
 0x743   :  { %9204 = vmatprep.subr.bf16.mxu1 %v9203_v59  ;;  %v9207_v50 = vpack.c.bf16 %v8589_v45, %v8588_v40  ;;  %v8338_v15 = vmax.f32 %v8336_v20, %v8337_v7  ;;  %v9209_v38 = vpack.c.bf16 %v8573_v52, %v8572_v25  ;;  %v9211_v54 = vpack.c.bf16 %v8591_v22, %v8590_v4  ;;  %v8670_v40 = vld [vmem:[%s13918_s7 + $0x8] sm:$0xff]  ;;  %v8864_v4 = vld [vmem:[%s13919_s8] ss:$0 sm:$0xff] }
 0x744   :  { %v8521_v41 = vsel %vm6675_vm12, %v8429_v8, %v8317_v10  ;;  %v8436_v19 = vmax.f32 %v8434_v28, %v8435_v51  ;;  %v8443_v17 = vmax.f32 %v8441_v42, %v8442_v47  ;;  %v8449_v16 = vrot.slane %v8448_v44, 1 }
 0x745   :  { %v9262_v30 = vpack.i.bf16 %v13710_v24, %v8521_v41  ;;  %v8574_v24 = vld [vmem:[%s13916_s5 + $0x70] sm:$0xff]  ;;  %v9216_v51 = vpack.c.bf16 %v8670_v40, %v8669_v2  ;;  %v14211_v25 = vmov 0.0   ;;  %v8863_v41 = vld [vmem:[%s13917_s6] ss:$0 sm:$0xff]  ;;  %s9346_s6 = smov [#allocation4]  }
 0x746   :  { %v8527_v6 = vsel %vm6675_vm12, %v8436_v19, %v8324_v63  ;;  %v8533_v32 = vsel %vm6675_vm12, %v8443_v17, %v8331_v55  ;;  %v8450_v43 = vmax.f32 %v8448_v44, %v8449_v16  ;;  %9206 = vmatpush3.bf16.msra.mxu1 %v9205_v49  ;;  %v8671_v63 = vld [vmem:[%s13918_s7 + $0x10] sm:$0xff]  ;;  %v8672_v55 = vld [vmem:[%s13918_s7 + $0x18] sm:$0xff]  ;;  %s8772_s7 = sshll.u32 %s9346_s6, 4  ;;  %s8773_s7 = int_to_ptr.vmem [resolvable:$true] %s8772_s7 }
 0x747   :  { %9263 = vrot.lane.b32.xlu1 %v9262_v30, %s9340_s24  ;;  %v9267_v34 = vpack.i.bf16 %v13713_v26, %v8527_v6  ;;  %v9272_v9 = vpack.i.bf16 %v13716_v0, %v8533_v32  ;;  %9208 = vmatprep.subr.bf16.mxu1 %v9207_v50  ;;  %v9213_v26 = vpack.c.bf16 %v8575_v48, %v8574_v24  ;;  %s9342_s24 = smov 96   ;;  %v9344_v0 = vmov 0.0|0.0   ;;  %s9303_s8 = scalar_lea.vmem %s8773_s7, 32 }
 0x748   :  { %v8539_v3 = vsel %vm6675_vm12, %v8450_v43, %v8338_v15  ;;  %vm8547_vm12 = vcmask 654336   ;;  %v9219_v50 = vpack.c.bf16 %v8672_v55, %v8671_v63  ;;  %p9304_p0 = scmp.ne.s32.totalorder %s8773_s7, %s9303_s8  ;;  %p9308_p1 = scmp.lt.s32.totalorder %s8773_s7, %s8773_s7 }
 0x749   :  { %9268 = vrot.lane.b32.xlu0 %v9267_v34, %s9341_s28  ;;  %v9277_v62 = vpack.i.bf16 %v13725_v23, %v8539_v3  ;;  %p9309_p2 = scmp.lt.s32.totalorder %s9303_s8, %s9303_s8 }
 0x74a   :  { %9210 = vmatpush3.bf16.msra.mxu1 %v9209_v38 }
 0x74b   :  { %9273 = vrot.lane.b32.xlu1 %v9272_v9, %s9342_s24  ;;  %9212 = vmatprep.subr.bf16.mxu1 %v9211_v54  ;;  %p9310_p3 = por %p9309_p2, %p9308_p1 }
 0x74d   :  { %9278 = vrot.lane.b32.xlu0 %v9277_v62, %s9343_s1  ;;  %p9311_p4 = pnand %p9310_p3, %p9304_p0 }
 0x74e   :  { %9214 = vmatpush3.bf16.msra.mxu1 %v9213_v26 }
 0x74f   :  { %9215 = vmatprep.subr.bf16.mxu1 %v9344_v0 }
 0x7ad   :  { %v9249_v14 = vpop.permute.xlu0 %9248 }
 0x7ae   :  { %v9251_v53 = vunpack.i.h.bf16 %v9249_v14  ;;  %v9250_v33 = vunpack.i.l.bf16 %v9249_v14  ;;  %v9254_v58 = vpop.permute.xlu1 %9253 }
 0x7af   :  { %v9256_v35 = vunpack.i.h.bf16 %v9254_v58  ;;  %v9255_v46 = vunpack.i.l.bf16 %v9254_v58 }
 0x7b0   :  { %v8543_v23 = vsel %vm3091_vm5, %v13672_v18, %v9251_v53  ;;  %v8553_v1 = vsel %vm3091_vm5, %v13773_v36, %v9250_v33  ;;  %vm8549_vm5 = vcmask 785408  }
 0x7b1   :  { %v9259_v21 = vpop.permute.xlu0 %9258  ;;  %v8544_v11 = vsel %vm3351_vm9, %v8543_v23, %v9256_v35  ;;  %v8554_v31 = vsel %vm3351_vm9, %v8553_v1, %v9255_v46 }
 0x7b2   :  { %v9261_v57 = vunpack.i.h.bf16 %v9259_v21  ;;  %v9260_v20 = vunpack.i.l.bf16 %v9259_v21 }
 0x7b4   :  { %v8545_v60 = vsel %vm7565_vm10, %v8544_v11, %v9261_v57  ;;  %v8555_v13 = vsel %vm7565_vm10, %v8554_v31, %v9260_v20  ;;  %vm8551_vm10 = vcmask 916480  }
 0x7b9   :  { %v9264_v37 = vpop.permute.xlu1 %9263 }
 0x7ba   :  { %v9266_v56 = vunpack.i.h.bf16 %v9264_v37  ;;  %v9265_v39 = vunpack.i.l.bf16 %v9264_v37 }
 0x7bb   :  { %v9269_v61 = vpop.permute.xlu0 %9268 }
 0x7bc   :  { %v8546_v18 = vsel %vm7599_vm2, %v8545_v60, %v9266_v56  ;;  %v8556_v29 = vsel %vm7599_vm2, %v8555_v13, %v9265_v39  ;;  %v9271_v36 = vunpack.i.h.bf16 %v9269_v61  ;;  %v9270_v12 = vunpack.i.l.bf16 %v9269_v61 }
 0x7bd   :  { %v9274_v5 = vpop.permute.xlu1 %9273  ;;  %vm8753_vm2 = vcmask 74752  }
 0x7be   :  { %v8548_v59 = vsel %vm8547_vm12, %v8546_v18, %v9271_v36  ;;  %v9276_v27 = vunpack.i.h.bf16 %v9274_v5  ;;  %v9275_v28 = vunpack.i.l.bf16 %v9274_v5  ;;  %v8557_v42 = vsel %vm8547_vm12, %v8556_v29, %v9270_v12 }
 0x7bf   :  { %v9279_v45 = vpop.permute.xlu0 %9278 }
 0x7c0   :  { %v8550_v10 = vsel %vm8549_vm5, %v8548_v59, %v9276_v27  ;;  %v9281_v7 = vunpack.i.h.bf16 %v9279_v45  ;;  %v9280_v49 = vunpack.i.l.bf16 %v9279_v45  ;;  %v8558_v8 = vsel %vm8549_vm5, %v8557_v42, %v9275_v28 }
 0x7c2   :  { %v8559_v47 = vsel %vm8551_vm10, %v8558_v8, %v9280_v49  ;;  %v8552_v44 = vsel %vm8551_vm10, %v8550_v10, %v9281_v7 }
 0x7c3   :  { %8663 = vmatprep.mubr.f32.mxu1 %v8559_v47 }
 0x7c4   :  { %8664 = vmatmul.mubr.f32.vlgmr.msra.gmra.mrb[36].mxu1 %v8552_v44 }
 0x7c5   :  { %9217 = vmatpush3.bf16.msra.mxu1 %v9216_v51  ;;  %9156 = vmatprep.mubr.msk.f32.mxu1 %vm9345_vm11, %v14211_v25 }
 0x7c6   :  { %9218 = vmatprep.subr.bf16.mxu1 %v9344_v0 }
 0x7c9   :  { %9220 = vmatpush3.bf16.msra.mxu1 %v9219_v50 }
 0x897   :  { %v8992_v52 = vpop.f32.mrb[36].mxu1 }
 0x898   :  { %v8993_v19 = vpop.f32.mrb[37].mxu1 }
 0x899   :  { %v8994_v17 = vadd.f32 %v8993_v19, %v8992_v52 }
 0x89b   :  { %v8666_v16 = vadd.f32 %v8994_v17, %v8863_v41 }
 0x89d   :  { %9157 = vmatmul.mubr.msk.f32.vlgmr.msra.gmra.mrb[38].mxu1 %vm3351_vm9, %v8666_v16 }
 0x970   :  { %v8749_v22 = vpop.f32.mrb[38].mxu1 }
 0x971   :  { %v8750_v30 = vadd.f32 %v8864_v4, %v8749_v22  ;;  %v9158_v15 = vpop.f32.mrb[39].mxu1 }
 0x973   :  { %v8754_v6 = vsel %vm8753_vm2, %v8750_v30, -inf }
 0x974   :  { %8755 = vmax.xlane.f32.xlu1 %v8754_v6 }
 0xa01   :  { %v8756_v32 = vpop.xlane.xlu1 %8755 }
 0xa02   :  { %v8757_v43 = vsub.f32 %v8750_v30, %v8756_v32 }
 0xa04   :  { %v8758_v38 = vmul.f32 1.442695, %v8757_v43 }
 0xa06   :  { %9282 = vpow2.f32 %v8758_v38 }
 0xa10   :  { %v9283_v34 = vpop.eup %9282 }
 0xa11   :  { %v8760_v9 = vsel %vm8753_vm2, %v9283_v34, 0.0 }
 0xa12   :  { %8761 = vadd.xlane.f32.xlu0 %v8760_v9 }
 0xa9f   :  { %v8762_v54 = vpop.xlane.xlu0 %8761 }
 0xaa0   :  { %9284 = vrcp.f32 %v8762_v54 }
 0xaaa   :  { %v9285_v24 = vpop.eup %9284 }
 0xaab   :  { %v8764_v48 = vmul.f32 %v9285_v24, %v9283_v34 }
 0xaad   :  { %8765 = vst.msk [vmem:[#allocation4] sm:$0x3] %vm8753_vm2, %v8764_v48 }
 0xaae   :  { %9314 = shalt.err (!%p9311_p4)
}
 0xaaf   :  { %s9315_s21 = scalar_lea.hbm %s13920_s9, 32 }
 0xab0   :  { %p9316_p5 = scmp.ne.s32.totalorder %s13920_s9, %s9315_s21  ;;  %p9319_p6 = scmp.lt.u32.totalorder %s9315_s21, %s13920_s9 }
 0xab2   :  { %p9321_p7 = pnand %p9319_p6, %p9316_p5 }
 0xab4   :  { %9324 = shalt.err (!%p9321_p7)
}
 0xab5   :  { %8775 = dma.vmem_to_hbm [thread:$0]  %s8773_s7, 32, %s13920_s9, [#allocation5]  }
 0xab6   :  { %9325 = dma.done.wait [#allocation5], 32  }
 0xab7   :  { %9326 = vsyncadd [#allocation5], 4294967264 }
 0xab8   :  { %8779 = vsyncpa [#allocation5], 1 }

</bundles_post_ra>
